<compile_context>
chip_gen: v5e
topology: v5e:2x2
jax: 0.10.0
libtpu: 0.0.40
codegen_flags: <defaults>
</compile_context>

<pallas_src>
import math
from functools import lru_cache, partial

import jax
import jax.numpy as jnp
from jax.experimental import pallas as pl
from jax.experimental.pallas import tpu as pltpu


def _round_up(v, m):
    return ((v + m - 1) // m) * m


@lru_cache(maxsize=None)
def _vmem_limit():
    """Generation-aware scoped-VMEM limit: ~3/4 of physical, capped at 100 MiB."""
    try:
        cap = int(pltpu.get_tpu_info().vmem_capacity_bytes)
    except Exception:
        cap = 64 * 1024 * 1024          # conservative fallback (safe on v7x)
    return max(32 * 1024 * 1024, min((cap * 3) // 4, 100 * 1024 * 1024))


def _cparams(semantics):
    return pltpu.CompilerParams(dimension_semantics=semantics,
                                vmem_limit_bytes=_vmem_limit())


def _pick_tile(dim, max_tile=512):
    """Largest tile <= max_tile that divides `dim` exactly, preferring
    128-multiples (MXU friendly); returns `dim` itself when it already fits."""
    if dim <= max_tile:
        return dim
    for t in range(max_tile - max_tile % 128, 127, -128):
        if dim % t == 0:
            return t
    for t in range(max_tile, 0, -1):
        if dim % t == 0:
            return t
    return dim


def _pick_tm(m):
    """Row tile: as big as useful for the HBM roofline, but split >= 2 ways
    when the whole M fits one tile, so both v7x TensorCores get work."""
    if m > 512:
        return 512
    if m > 256:
        return _round_up(pl.cdiv(m, 2), 8)
    return _round_up(m, 8)


# ---------------------------------------------------------------------------
# conv1: 1x1 conv as K-tiled matmul, folded-BN bias + ReLU epilogue
# ---------------------------------------------------------------------------
def _mm_bias_relu_kernel(x_ref, w_ref, b_ref, o_ref, acc_ref):
    k = pl.program_id(2)

    @pl.when(k == 0)
    def _init():
        acc_ref[...] = jnp.zeros_like(acc_ref)

    acc_ref[...] += jnp.dot(x_ref[...], w_ref[...],
                            preferred_element_type=jnp.float32)

    @pl.when(k == pl.num_programs(2) - 1)
    def _fin():
        o_ref[...] = jnp.maximum(acc_ref[...] + b_ref[...], 0.0).astype(o_ref.dtype)


def matmul_bias_relu(x, w, b, *, out_dtype=jnp.bfloat16):
    """relu(x @ w + b).  x:(M,K) bf16, w:(K,N) bf16 (BN scale folded), b:(1,N) f32."""
    M, K = x.shape
    K2, Nc = w.shape
    assert K == K2
    tm = _pick_tm(M)
    tn = _pick_tile(Nc)
    tk = _pick_tile(K)
    assert Nc % tn == 0 and K % tk == 0
    grid = (pl.cdiv(M, tm), Nc // tn, K // tk)
    return pl.pallas_call(
        _mm_bias_relu_kernel,
        out_shape=jax.ShapeDtypeStruct((M, Nc), out_dtype),
        grid=grid,
        in_specs=[pl.BlockSpec((tm, tk), lambda i, j, k: (i, k)),
                  pl.BlockSpec((tk, tn), lambda i, j, k: (k, j)),
                  pl.BlockSpec((1, tn), lambda i, j, k: (0, j))],
        out_specs=pl.BlockSpec((tm, tn), lambda i, j, k: (i, j)),
        scratch_shapes=[pltpu.VMEM((tm, tn), jnp.float32)],
        compiler_params=_cparams(("parallel", "parallel", "arbitrary")),
    )(x, w, b)


# ---------------------------------------------------------------------------
# conv3 + BN3 + identity residual + ReLU in one kernel
# ---------------------------------------------------------------------------
def _mm_res_bias_relu_kernel(x_ref, w_ref, r_ref, b_ref, o_ref):
    acc = jnp.dot(x_ref[...], w_ref[...], preferred_element_type=jnp.float32)
    acc = acc + r_ref[...].astype(jnp.float32) + b_ref[...]
    o_ref[...] = jnp.maximum(acc, 0.0).astype(o_ref.dtype)


def matmul_res_bias_relu(x, w, r, b, *, out_dtype=jnp.bfloat16):
    """relu(x @ w + r + b).  Identity-residual epilogue; K (= gw) is untiled."""
    M, K = x.shape
    Nc = w.shape[1]
    tm = _pick_tm(M)
    tn = _pick_tile(Nc)
    assert Nc % tn == 0
    grid = (pl.cdiv(M, tm), Nc // tn)
    return pl.pallas_call(
        _mm_res_bias_relu_kernel,
        out_shape=jax.ShapeDtypeStruct((M, Nc), out_dtype),
        grid=grid,
        in_specs=[pl.BlockSpec((tm, K), lambda i, j: (i, 0)),
                  pl.BlockSpec((K, tn), lambda i, j: (0, j)),
                  pl.BlockSpec((tm, tn), lambda i, j: (i, j)),
                  pl.BlockSpec((1, tn), lambda i, j: (0, j))],
        out_specs=pl.BlockSpec((tm, tn), lambda i, j: (i, j)),
        compiler_params=_cparams(("parallel", "parallel")),
    )(x, w, r, b)


# ---------------------------------------------------------------------------
# conv3 + BN3 fused with the downsample 1x1 conv + BNd residual + final ReLU
# ---------------------------------------------------------------------------
def _mm2_bias_relu_kernel(x1_ref, w1_ref, x2_ref, w2_ref, b_ref, o_ref):
    acc = jnp.dot(x1_ref[...], w1_ref[...], preferred_element_type=jnp.float32)
    acc = acc + jnp.dot(x2_ref[...], w2_ref[...], preferred_element_type=jnp.float32)
    o_ref[...] = jnp.maximum(acc + b_ref[...], 0.0).astype(o_ref.dtype)


def matmul2_bias_relu(x1, w1, x2, w2, b, *, out_dtype=jnp.bfloat16):
    """relu(x1 @ w1 + x2 @ w2 + b): conv3 and the downsample residual conv on
    the same output tile (both BN scales folded into the weights, one bias)."""
    M, K1 = x1.shape
    M2, K2 = x2.shape
    assert M == M2
    Nc = w1.shape[1]
    tm = _pick_tm(M)
    tn = _pick_tile(Nc)
    assert Nc % tn == 0
    grid = (pl.cdiv(M, tm), Nc // tn)
    return pl.pallas_call(
        _mm2_bias_relu_kernel,
        out_shape=jax.ShapeDtypeStruct((M, Nc), out_dtype),
        grid=grid,
        in_specs=[pl.BlockSpec((tm, K1), lambda i, j: (i, 0)),
                  pl.BlockSpec((K1, tn), lambda i, j: (0, j)),
                  pl.BlockSpec((tm, K2), lambda i, j: (i, 0)),
                  pl.BlockSpec((K2, tn), lambda i, j: (0, j)),
                  pl.BlockSpec((1, tn), lambda i, j: (0, j))],
        out_specs=pl.BlockSpec((tm, tn), lambda i, j: (i, j)),
        compiler_params=_cparams(("parallel", "parallel")),
    )(x1, w1, x2, w2, b)


# ---------------------------------------------------------------------------
# conv2: grouped 3x3 conv (pad 1, stride s) as a lane-dense block-diagonal
# matmul over a row-flattened padded plane; folded BN + ReLU epilogue.
# ---------------------------------------------------------------------------
def _gconv3x3_kernel(x_ref, w_ref, b_ref, o_ref, acc_ref, *, stride, Ho, Wo, Wq):
    # x_ref  : (1, s*s, L, gw)  row-flattened (phase-split) padded input plane
    # w_ref  : (9, gw, gw)      block-diagonal per-tap weights (BN scale folded)
    # b_ref  : (1, gw) f32
    # o_ref  : (1, Ho, Wo, gw)  bf16
    # acc_ref: (Ho*Wq, gw) f32  (rows with col >= Wo are garbage, never stored)
    R = Ho * Wq
    first = True
    for di in range(3):
        for dj in range(3):
            p = (di % stride) * stride + (dj % stride)      # phase plane
            off = (di // stride) * Wq + (dj // stride)       # pure sublane offset
            a = x_ref[0, p, off:off + R, :]                  # (R, gw) lane-dense
            contrib = jnp.dot(a, w_ref[di * 3 + dj],
                              preferred_element_type=jnp.float32)
            if first:
                acc_ref[...] = contrib                       # init with tap 0
                first = False
            else:
                acc_ref[...] += contrib
    y = jnp.maximum(acc_ref[...] + b_ref[...], 0.0)
    for i in range(Ho):                                      # drop garbage columns
        o_ref[0, i] = y[i * Wq:i * Wq + Wo, :].astype(o_ref.dtype)


def grouped_conv3x3_bn_relu(x, w_bd, bias, *, stride):
    """x: (N, H, W, gw) bf16 (channels lane-concatenated, group-major order);
    w_bd: (9, gw, gw) bf16 block-diagonal tap weights; bias: (1, gw) f32.
    Returns (N, Ho, Wo, gw) bf16 = relu(BN(grouped_conv3x3(x)))."""
    N, H, W, gw = x.shape
    assert w_bd.shape == (9, gw, gw)
    s = stride
    Ho = (H + 2 - 3) // s + 1
    Wo = (W + 2 - 3) // s + 1
    # spatial pad 1; round W up to the stride; add `s` extra zero rows so that
    # (largest tap offset + Ho*Wq) stays inside the flattened plane.
    Hs = _round_up(H + 2, s) + s
    Ws = _round_up(W + 2, s)
    xp = jnp.pad(x, ((0, 0), (1, Hs - H - 1), (1, Ws - W - 1), (0, 0)))
    Hq, Wq = Hs // s, Ws // s
    if s == 1:
        xph = xp.reshape(N, 1, Hq * Wq, gw)                  # free reshape
    else:
        # space-to-depth phases so every tap is a contiguous sublane offset
        xph = xp.reshape(N, Hq, s, Wq, s, gw).transpose(0, 2, 4, 1, 3, 5)
        xph = xph.reshape(N, s * s, Hq * Wq, gw)
    L = Hq * Wq

    return pl.pallas_call(
        partial(_gconv3x3_kernel, stride=s, Ho=Ho, Wo=Wo, Wq=Wq),
        out_shape=jax.ShapeDtypeStruct((N, Ho, Wo, gw), jnp.bfloat16),
        grid=(N,),
        in_specs=[
            pl.BlockSpec((1, s * s, L, gw), lambda n: (n, 0, 0, 0)),
            pl.BlockSpec((9, gw, gw), lambda n: (0, 0, 0)),   # VMEM-resident
            pl.BlockSpec((1, gw), lambda n: (0, 0)),          # VMEM-resident
        ],
        out_specs=pl.BlockSpec((1, Ho, Wo, gw), lambda n: (n, 0, 0, 0)),
        scratch_shapes=[pltpu.VMEM((Ho * Wq, gw), jnp.float32)],
        compiler_params=_cparams(("parallel",)),
    )(xph, w_bd, bias)


# ---------------------------------------------------------------------------
# Block forward (NHWC internally; NCHW at the public boundary)
# ---------------------------------------------------------------------------
def block_forward(x_nhwc, p):
    N, H, W, Cin = x_nhwc.shape
    s = p["stride"]
    gw = p["w1"].shape[1]
    c4 = p["w3"].shape[1]

    # conv1 (1x1) + BN1 + ReLU
    y = matmul_bias_relu(x_nhwc.reshape(N * H * W, Cin), p["w1"], p["b1"])
    y = y.reshape(N, H, W, gw)

    # conv2 (grouped 3x3, stride s, pad 1) + BN2 + ReLU -- one fused kernel
    y = grouped_conv3x3_bn_relu(y, p["w2bd"], p["b2"], stride=s)
    _, Ho, Wo, _ = y.shape
    y2 = y.reshape(N * Ho * Wo, gw)

    # conv3 (1x1) + BN3 + residual add + final ReLU, all in one kernel
    if p["wd"] is not None:
        # downsample residual: single strided slice of the already-materialized
        # NHWC input feeds the fused second matmul (no separate residual kernel)
        r = x_nhwc[:, ::s, ::s, :].reshape(N * Ho * Wo, Cin)
        out = matmul2_bias_relu(y2, p["w3"], r, p["wd"], p["b3d"])
    else:
        assert s == 1 and Cin == c4, (
            "identity residual requires stride == 1 and in_channels == 4*channels")
        out = matmul_res_bias_relu(y2, p["w3"],
                                   x_nhwc.reshape(N * H * W, Cin), p["b3"])
    return out.reshape(N, Ho, Wo, c4)


def block_apply(x_nchw, p):
    # NOTE: activations run in bf16 with f32 accumulation (deliberate precision
    # trade-off; verified against the f32 reference below).
    x = jnp.transpose(x_nchw, (0, 2, 3, 1)).astype(jnp.bfloat16)
    out = block_forward(x, p)                        # bf16 NHWC
    # cast to f32 only after the transpose: halves writeback/transpose traffic
    return jnp.transpose(out, (0, 3, 1, 2)).astype(jnp.float32)


# ---------------------------------------------------------------------------
# Parameter construction (PyTorch-layout raw weights) and kernel-side prep
# ---------------------------------------------------------------------------
def make_raw_block_params(key, cfg):
    D = int(math.floor(cfg["channels"] * (cfg["bottleneck_width"] / 64)))
    gw = cfg["cardinality"] * D
    c4 = cfg["channels"] * 4
    cin = cfg["in_channels"]
    ks = jax.random.split(key, 8)

    def conv_w(k, cout, cin_, kh, kw):
        fan = cin_ * kh * kw
        return jax.random.normal(k, (cout, cin_, kh, kw), jnp.float32) / math.sqrt(fan)

    def bn(k, c):
        k1, k2, k3, k4 = jax.random.split(k, 4)
        gamma = jax.random.uniform(k1, (c,), jnp.float32, 0.5, 1.5)
        beta = jax.random.normal(k2, (c,), jnp.float32) * 0.1
        mean = jax.random.normal(k3, (c,), jnp.float32) * 0.1
        var = jax.random.uniform(k4, (c,), jnp.float32, 0.5, 1.5)
        return (gamma, beta, mean, var)

    raw = {"stride": cfg["stride"], "groups": cfg["cardinality"]}
    raw["w1"] = conv_w(ks[0], gw, cin, 1, 1)
    raw["bn1"] = bn(ks[1], gw)
    raw["w2"] = conv_w(ks[2], gw, D, 3, 3)          # grouped: (Cout, Cin/g, 3, 3)
    raw["bn2"] = bn(ks[3], gw)
    raw["w3"] = conv_w(ks[4], c4, gw, 1, 1)
    raw["bn3"] = bn(ks[5], c4)
    if cfg["downsample"]:
        raw["wd"] = conv_w(ks[6], c4, cin, 1, 1)
        raw["bnd"] = bn(ks[7], c4)
    else:
        raw["wd"] = None
        raw["bnd"] = None
    return raw


def _fold_bn(bn, eps=1e-5):
    gamma, beta, mean, var = bn
    scale = gamma / jnp.sqrt(var + eps)
    return scale, beta - mean * scale


def prep_block_params(raw):
    """Fold eval-mode BN into the weights (scale) and a bias, build the
    block-diagonal per-tap conv2 weights, cast everything to bf16."""
    p = {"stride": raw["stride"], "groups": raw["groups"]}

    s1, b1 = _fold_bn(raw["bn1"])
    p["w1"] = (raw["w1"][:, :, 0, 0].T * s1[None, :]).astype(jnp.bfloat16)  # (Cin, gw)
    p["b1"] = b1.reshape(1, -1).astype(jnp.float32)

    G = raw["groups"]
    w2 = raw["w2"]                                   # (gw, D, 3, 3)
    gw, D = w2.shape[0], w2.shape[1]
    Dout = gw // G
    s2, b2 = _fold_bn(raw["bn2"])
    # (G, Dout, D, 3, 3) -> (kh, kw, G, D, Dout) -> (9, G, D, Dout)
    wt = jnp.transpose(w2.reshape(G, Dout, D, 3, 3), (3, 4, 0, 2, 1)).reshape(9, G, D, Dout)
    eye = jnp.eye(G, dtype=jnp.float32)
    wbd = jnp.einsum("tgdo,gh->tgdho", wt, eye).reshape(9, G * D, G * Dout)
    wbd = wbd * s2[None, None, :]                    # fold BN2 scale (per out chan)
    p["w2bd"] = wbd.astype(jnp.bfloat16)             # (9, gw, gw) block-diagonal
    p["b2"] = b2.reshape(1, -1).astype(jnp.float32)

    s3, b3 = _fold_bn(raw["bn3"])
    p["w3"] = (raw["w3"][:, :, 0, 0].T * s3[None, :]).astype(jnp.bfloat16)  # (gw, c4)
    p["b3"] = b3.reshape(1, -1).astype(jnp.float32)

    if raw["wd"] is not None:
        sd, bd = _fold_bn(raw["bnd"])
        p["wd"] = (raw["wd"][:, :, 0, 0].T * sd[None, :]).astype(jnp.bfloat16)  # (Cin, c4)
        p["b3d"] = (b3 + bd).reshape(1, -1).astype(jnp.float32)
    else:
        p["wd"] = None
    return p


# ---------------------------------------------------------------------------
# Pure-JAX f32 reference (PyTorch semantics) for the correctness check
# ---------------------------------------------------------------------------
def _conv_ref(x, w, stride, pad, groups):
    return jax.lax.conv_general_dilated(
        x, jnp.transpose(w, (2, 3, 1, 0)),
        window_strides=(stride, stride),
        padding=[(pad, pad), (pad, pad)],
        dimension_numbers=("NHWC", "HWIO", "NHWC"),
        feature_group_count=groups,
        precision=jax.lax.Precision.HIGHEST)


def _bn_ref(x, bn, eps=1e-5):
    gamma, beta, mean, var = bn
    return (x - mean) / jnp.sqrt(var + eps) * gamma + beta


def block_reference(x_nchw, raw):
    x = jnp.transpose(x_nchw, (0, 2, 3, 1)).astype(jnp.float32)
    y = _conv_ref(x, raw["w1"], 1, 0, 1)
    y = jnp.maximum(_bn_ref(y, raw["bn1"]), 0.0)
    y = _conv_ref(y, raw["w2"], raw["stride"], 1, raw["groups"])
    y = jnp.maximum(_bn_ref(y, raw["bn2"]), 0.0)
    y = _conv_ref(y, raw["w3"], 1, 0, 1)
    y = _bn_ref(y, raw["bn3"])
    if raw["wd"] is not None:
        r = _conv_ref(x, raw["wd"], raw["stride"], 0, 1)
        r = _bn_ref(r, raw["bnd"])
    else:
        r = x
    out = jnp.maximum(y + r, 0.0)
    return jnp.transpose(out, (0, 3, 1, 2))


# ---------------------------------------------------------------------------
if __name__ == "__main__":
    key = jax.random.PRNGKey(0)
    configs = [
        # identity-residual path, stride 1
        dict(in_channels=256, channels=64, cardinality=8, bottleneck_width=4,
             stride=1, downsample=False, N=2, H=16, W=16),
        # downsample path, stride 2
        dict(in_channels=64, channels=64, cardinality=8, bottleneck_width=4,
             stride=2, downsample=True, N=2, H=16, W=16),
    ]
    for idx, cfg in enumerate(configs):
        key, kx, kp = jax.random.split(key, 3)
        raw = make_raw_block_params(kp, cfg)
        params = prep_block_params(raw)
        x = jax.random.normal(
            kx, (cfg["N"], cfg["in_channels"], cfg["H"], cfg["W"]), jnp.float32)

        fwd = jax.jit(lambda inp, _p=params: block_apply(inp, _p))
        out = jax.block_until_ready(fwd(x))

        ref = block_reference(x, raw)
        assert out.shape == ref.shape, (out.shape, ref.shape)
        assert bool(jnp.all(jnp.isfinite(out)))
        err = float(jnp.max(jnp.abs(out - ref)) / (jnp.max(jnp.abs(ref)) + 1e-6))
        assert err < 0.08, f"config {idx}: relative error {err}"

    print("KERNEL_OK")
</pallas_src>

<mosaic_0001>
module attributes {stable_mosaic.version = 11 : i64} {
  func.func @_mm_bias_relu_kernel(%arg0: i32, %arg1: i32, %arg2: i32, %arg3: memref<256x256xbf16, #tpu.memory_space<vmem>>, %arg4: memref<256x32xbf16, #tpu.memory_space<vmem>>, %arg5: memref<1x32xf32, #tpu.memory_space<vmem>>, %arg6: memref<256x32xbf16, #tpu.memory_space<vmem>>, %arg7: memref<256x32xf32, #tpu.memory_space<vmem>>) attributes {dimension_semantics = [#tpu.dimension_semantics<parallel>, #tpu.dimension_semantics<parallel>, #tpu.dimension_semantics<arbitrary>], iteration_bounds = array<i64: 2, 1, 1>, scalar_prefetch = 0 : i64, scratch_operands = 1 : i64, tpu.core_type = #tpu.core_type<tc>, window_params = [{transform_indices = @transform_0, window_bounds = array<i64: 256, 256>}, {transform_indices = @transform_1, window_bounds = array<i64: 256, 32>}, {transform_indices = @transform_2, window_bounds = array<i64: 1, 32>}, {transform_indices = @transform_3, window_bounds = array<i64: 256, 32>}]} {
    %c0_i32 = arith.constant 0 : i32
    %0 = arith.cmpi eq, %arg2, %c0_i32 : i32
    %1 = arith.extui %0 : i1 to i32
    %c0_i32_0 = arith.constant 0 : i32
    %2 = arith.cmpi ne, %1, %c0_i32_0 : i32
    scf.if %2 {
      %cst_10 = arith.constant 0.000000e+00 : f32
      %12 = vector.broadcast %cst_10 : f32 to vector<256x32xf32>
      %c0_11 = arith.constant 0 : index
      %c0_12 = arith.constant 0 : index
      %13 = vector.load %arg7[%c0_11, %c0_12] : memref<256x32xf32, #tpu.memory_space<vmem>>, vector<256x32xf32>
      tpu.vector_store %arg7[%c0_11, %c0_12], %12 {strides = array<i32>} : memref<256x32xf32, #tpu.memory_space<vmem>>, vector<256x32xf32>,
    } else {
    }
    %c0 = arith.constant 0 : index
    %c0_1 = arith.constant 0 : index
    %3 = vector.load %arg7[%c0, %c0_1] : memref<256x32xf32, #tpu.memory_space<vmem>>, vector<256x32xf32>
    %c0_2 = arith.constant 0 : index
    %c0_3 = arith.constant 0 : index
    %4 = vector.load %arg3[%c0_2, %c0_3] : memref<256x256xbf16, #tpu.memory_space<vmem>>, vector<256x256xbf16>
    %c0_4 = arith.constant 0 : index
    %c0_5 = arith.constant 0 : index
    %5 = vector.load %arg4[%c0_4, %c0_5] : memref<256x32xbf16, #tpu.memory_space<vmem>>, vector<256x32xbf16>
    %cst = arith.constant dense<0.000000e+00> : vector<256x32xf32>
    %6 = tpu.matmul %4, %5, %cst {dimension_numbers = #tpu.dot_dimension_numbers<[1], [0], [0], [1], [0, 0, 1, 1], [], []>} : vector<256x256xbf16>, vector<256x32xbf16>, vector<256x32xf32> -> vector<256x32xf32>
    %7 = arith.addf %3, %6 : vector<256x32xf32>
    %c0_6 = arith.constant 0 : index
    %c0_7 = arith.constant 0 : index
    %8 = vector.load %arg7[%c0_6, %c0_7] : memref<256x32xf32, #tpu.memory_space<vmem>>, vector<256x32xf32>
    tpu.vector_store %arg7[%c0_6, %c0_7], %7 {strides = array<i32>} : memref<256x32xf32, #tpu.memory_space<vmem>>, vector<256x32xf32>,
    %c0_i32_8 = arith.constant 0 : i32
    %9 = arith.cmpi eq, %arg2, %c0_i32_8 : i32
    %10 = arith.extui %9 : i1 to i32
    %c0_i32_9 = arith.constant 0 : i32
    %11 = arith.cmpi ne, %10, %c0_i32_9 : i32
    scf.if %11 {
      %c0_10 = arith.constant 0 : index
      %c0_11 = arith.constant 0 : index
      %12 = vector.load %arg7[%c0_10, %c0_11] : memref<256x32xf32, #tpu.memory_space<vmem>>, vector<256x32xf32>
      %c0_12 = arith.constant 0 : index
      %c0_13 = arith.constant 0 : index
      %13 = vector.load %arg5[%c0_12, %c0_13] : memref<1x32xf32, #tpu.memory_space<vmem>>, vector<1x32xf32>
      %14 = vector.broadcast %13 : vector<1x32xf32> to vector<256x32xf32>
      %15 = arith.addf %12, %14 : vector<256x32xf32>
      %cst_14 = arith.constant 0.000000e+00 : f32
      %16 = vector.broadcast %cst_14 : f32 to vector<256x32xf32>
      %17 = arith.maximumf %15, %16 : vector<256x32xf32>
      %18 = arith.truncf %17 : vector<256x32xf32> to vector<256x32xbf16>
      %c0_15 = arith.constant 0 : index
      %c0_16 = arith.constant 0 : index
      %19 = vector.load %arg6[%c0_15, %c0_16] : memref<256x32xbf16, #tpu.memory_space<vmem>>, vector<256x32xbf16>
      tpu.vector_store %arg6[%c0_15, %c0_16], %18 {strides = array<i32>} : memref<256x32xbf16, #tpu.memory_space<vmem>>, vector<256x32xbf16>,
    } else {
    }
    return
  }
  func.func @transform_0(%arg0: i32, %arg1: i32, %arg2: i32) -> (i32, i32) {
    %c0_i32 = arith.constant 0 : i32
    return %arg0, %arg2 : i32, i32
  }
  func.func @transform_1(%arg0: i32, %arg1: i32, %arg2: i32) -> (i32, i32) {
    %c0_i32 = arith.constant 0 : i32
    return %arg2, %arg1 : i32, i32
  }
  func.func @transform_2(%arg0: i32, %arg1: i32, %arg2: i32) -> (i32, i32) {
    %c0_i32 = arith.constant 0 : i32
    %c0_i32_0 = arith.constant 0 : i32
    return %c0_i32, %arg1 : i32, i32
  }
  func.func @transform_3(%arg0: i32, %arg1: i32, %arg2: i32) -> (i32, i32) {
    %c0_i32 = arith.constant 0 : i32
    return %arg0, %arg1 : i32, i32
  }
}

module attributes {stable_mosaic.version = 11 : i64} {
  func.func @_mm_res_bias_relu_kernel(%arg0: i32, %arg1: i32, %arg2: memref<256x32xbf16, #tpu.memory_space<vmem>>, %arg3: memref<32x256xbf16, #tpu.memory_space<vmem>>, %arg4: memref<256x256xbf16, #tpu.memory_space<vmem>>, %arg5: memref<1x256xf32, #tpu.memory_space<vmem>>, %arg6: memref<256x256xbf16, #tpu.memory_space<vmem>>) attributes {dimension_semantics = [#tpu.dimension_semantics<parallel>, #tpu.dimension_semantics<parallel>], iteration_bounds = array<i64: 2, 1>, scalar_prefetch = 0 : i64, scratch_operands = 0 : i64, tpu.core_type = #tpu.core_type<tc>, window_params = [{transform_indices = @transform_0, window_bounds = array<i64: 256, 32>}, {transform_indices = @transform_1, window_bounds = array<i64: 32, 256>}, {transform_indices = @transform_2, window_bounds = array<i64: 256, 256>}, {transform_indices = @transform_3, window_bounds = array<i64: 1, 256>}, {transform_indices = @transform_4, window_bounds = array<i64: 256, 256>}]} {
    %c0 = arith.constant 0 : index
    %c0_0 = arith.constant 0 : index
    %0 = vector.load %arg2[%c0, %c0_0] : memref<256x32xbf16, #tpu.memory_space<vmem>>, vector<256x32xbf16>
    %c0_1 = arith.constant 0 : index
    %c0_2 = arith.constant 0 : index
    %1 = vector.load %arg3[%c0_1, %c0_2] : memref<32x256xbf16, #tpu.memory_space<vmem>>, vector<32x256xbf16>
    %cst = arith.constant dense<0.000000e+00> : vector<256x256xf32>
    %2 = tpu.matmul %0, %1, %cst {dimension_numbers = #tpu.dot_dimension_numbers<[1], [0], [0], [1], [0, 0, 1, 1], [], []>} : vector<256x32xbf16>, vector<32x256xbf16>, vector<256x256xf32> -> vector<256x256xf32>
    %c0_3 = arith.constant 0 : index
    %c0_4 = arith.constant 0 : index
    %3 = vector.load %arg4[%c0_3, %c0_4] : memref<256x256xbf16, #tpu.memory_space<vmem>>, vector<256x256xbf16>
    %4 = arith.extf %3 : vector<256x256xbf16> to vector<256x256xf32>
    %5 = arith.addf %2, %4 : vector<256x256xf32>
    %c0_5 = arith.constant 0 : index
    %c0_6 = arith.constant 0 : index
    %6 = vector.load %arg5[%c0_5, %c0_6] : memref<1x256xf32, #tpu.memory_space<vmem>>, vector<1x256xf32>
    %7 = vector.broadcast %6 : vector<1x256xf32> to vector<256x256xf32>
    %8 = arith.addf %5, %7 : vector<256x256xf32>
    %cst_7 = arith.constant 0.000000e+00 : f32
    %9 = vector.broadcast %cst_7 : f32 to vector<256x256xf32>
    %10 = arith.maximumf %8, %9 : vector<256x256xf32>
    %11 = arith.truncf %10 : vector<256x256xf32> to vector<256x256xbf16>
    %c0_8 = arith.constant 0 : index
    %c0_9 = arith.constant 0 : index
    %12 = vector.load %arg6[%c0_8, %c0_9] : memref<256x256xbf16, #tpu.memory_space<vmem>>, vector<256x256xbf16>
    tpu.vector_store %arg6[%c0_8, %c0_9], %11 {strides = array<i32>} : memref<256x256xbf16, #tpu.memory_space<vmem>>, vector<256x256xbf16>,
    return
  }
  func.func @transform_0(%arg0: i32, %arg1: i32) -> (i32, i32) {
    %c0_i32 = arith.constant 0 : i32
    %c0_i32_0 = arith.constant 0 : i32
    return %arg0, %c0_i32 : i32, i32
  }
  func.func @transform_1(%arg0: i32, %arg1: i32) -> (i32, i32) {
    %c0_i32 = arith.constant 0 : i32
    %c0_i32_0 = arith.constant 0 : i32
    return %c0_i32, %arg1 : i32, i32
  }
  func.func @transform_2(%arg0: i32, %arg1: i32) -> (i32, i32) {
    %c0_i32 = arith.constant 0 : i32
    return %arg0, %arg1 : i32, i32
  }
  func.func @transform_3(%arg0: i32, %arg1: i32) -> (i32, i32) {
    %c0_i32 = arith.constant 0 : i32
    %c0_i32_0 = arith.constant 0 : i32
    return %c0_i32, %arg1 : i32, i32
  }
  func.func @transform_4(%arg0: i32, %arg1: i32) -> (i32, i32) {
    %c0_i32 = arith.constant 0 : i32
    return %arg0, %arg1 : i32, i32
  }
}

module attributes {stable_mosaic.version = 11 : i64} {
  func.func @_gconv3x3_kernel(%arg0: i32, %arg1: memref<1x1x342x32xbf16, #tpu.memory_space<vmem>>, %arg2: memref<9x32x32xbf16, #tpu.memory_space<vmem>>, %arg3: memref<1x32xf32, #tpu.memory_space<vmem>>, %arg4: memref<1x16x16x32xbf16, #tpu.memory_space<vmem>>, %arg5: memref<288x32xf32, #tpu.memory_space<vmem>>) attributes {dimension_semantics = [#tpu.dimension_semantics<parallel>], iteration_bounds = array<i64: 2>, scalar_prefetch = 0 : i64, scratch_operands = 1 : i64, tpu.core_type = #tpu.core_type<tc>, window_params = [{transform_indices = @transform_0, window_bounds = array<i64: 1, 1, 342, 32>}, {pipeline_mode = #tpu.pipeline_mode<synchronous>, transform_indices = @transform_1, window_bounds = array<i64: 9, 32, 32>}, {pipeline_mode = #tpu.pipeline_mode<synchronous>, transform_indices = @transform_2, window_bounds = array<i64: 1, 32>}, {transform_indices = @transform_3, window_bounds = array<i64: 1, 16, 16, 32>}]} {
    %c0 = arith.constant 0 : index
    %c0_0 = arith.constant 0 : index
    %c0_1 = arith.constant 0 : index
    %c0_2 = arith.constant 0 : index
    %0 = vector.load %arg1[%c0, %c0_0, %c0_1, %c0_2] : memref<1x1x342x32xbf16, #tpu.memory_space<vmem>>, vector<1x1x288x32xbf16>
    %1 = vector.shape_cast %0 : vector<1x1x288x32xbf16> to vector<288x32xbf16>
    %c0_3 = arith.constant 0 : index
    %c0_4 = arith.constant 0 : index
    %c0_5 = arith.constant 0 : index
    %2 = vector.load %arg2[%c0_3, %c0_4, %c0_5] : memref<9x32x32xbf16, #tpu.memory_space<vmem>>, vector<1x32x32xbf16>
    %3 = vector.shape_cast %2 : vector<1x32x32xbf16> to vector<32x32xbf16>
    %cst = arith.constant dense<0.000000e+00> : vector<288x32xf32>
    %4 = tpu.matmul %1, %3, %cst {dimension_numbers = #tpu.dot_dimension_numbers<[1], [0], [0], [1], [0, 0, 1, 1], [], []>} : vector<288x32xbf16>, vector<32x32xbf16>, vector<288x32xf32> -> vector<288x32xf32>
    %c0_6 = arith.constant 0 : index
    %c0_7 = arith.constant 0 : index
    %5 = vector.load %arg5[%c0_6, %c0_7] : memref<288x32xf32, #tpu.memory_space<vmem>>, vector<288x32xf32>
    tpu.vector_store %arg5[%c0_6, %c0_7], %4 {strides = array<i32>} : memref<288x32xf32, #tpu.memory_space<vmem>>, vector<288x32xf32>,
    %c0_8 = arith.constant 0 : index
    %c0_9 = arith.constant 0 : index
    %c1 = arith.constant 1 : index
    %c0_10 = arith.constant 0 : index
    %6 = vector.load %arg1[%c0_8, %c0_9, %c1, %c0_10] : memref<1x1x342x32xbf16, #tpu.memory_space<vmem>>, vector<1x1x288x32xbf16>
    %7 = vector.shape_cast %6 : vector<1x1x288x32xbf16> to vector<288x32xbf16>
    %c1_11 = arith.constant 1 : index
    %c0_12 = arith.constant 0 : index
    %c0_13 = arith.constant 0 : index
    %8 = vector.load %arg2[%c1_11, %c0_12, %c0_13] : memref<9x32x32xbf16, #tpu.memory_space<vmem>>, vector<1x32x32xbf16>
    %9 = vector.shape_cast %8 : vector<1x32x32xbf16> to vector<32x32xbf16>
    %cst_14 = arith.constant dense<0.000000e+00> : vector<288x32xf32>
    %10 = tpu.matmul %7, %9, %cst_14 {dimension_numbers = #tpu.dot_dimension_numbers<[1], [0], [0], [1], [0, 0, 1, 1], [], []>} : vector<288x32xbf16>, vector<32x32xbf16>, vector<288x32xf32> -> vector<288x32xf32>
    %c0_15 = arith.constant 0 : index
    %c0_16 = arith.constant 0 : index
    %11 = vector.load %arg5[%c0_15, %c0_16] : memref<288x32xf32, #tpu.memory_space<vmem>>, vector<288x32xf32>
    %12 = arith.addf %11, %10 : vector<288x32xf32>
    %c0_17 = arith.constant 0 : index
    %c0_18 = arith.constant 0 : index
    %13 = vector.load %arg5[%c0_17, %c0_18] : memref<288x32xf32, #tpu.memory_space<vmem>>, vector<288x32xf32>
    tpu.vector_store %arg5[%c0_17, %c0_18], %12 {strides = array<i32>} : memref<288x32xf32, #tpu.memory_space<vmem>>, vector<288x32xf32>,
    %c0_19 = arith.constant 0 : index
    %c0_20 = arith.constant 0 : index
    %c2 = arith.constant 2 : index
    %c0_21 = arith.constant 0 : index
    %14 = vector.load %arg1[%c0_19, %c0_20, %c2, %c0_21] : memref<1x1x342x32xbf16, #tpu.memory_space<vmem>>, vector<1x1x288x32xbf16>
    %15 = vector.shape_cast %14 : vector<1x1x288x32xbf16> to vector<288x32xbf16>
    %c2_22 = arith.constant 2 : index
    %c0_23 = arith.constant 0 : index
    %c0_24 = arith.constant 0 : index
    %16 = vector.load %arg2[%c2_22, %c0_23, %c0_24] : memref<9x32x32xbf16, #tpu.memory_space<vmem>>, vector<1x32x32xbf16>
    %17 = vector.shape_cast %16 : vector<1x32x32xbf16> to vector<32x32xbf16>
    %cst_25 = arith.constant dense<0.000000e+00> : vector<288x32xf32>
    %18 = tpu.matmul %15, %17, %cst_25 {dimension_numbers = #tpu.dot_dimension_numbers<[1], [0], [0], [1], [0, 0, 1, 1], [], []>} : vector<288x32xbf16>, vector<32x32xbf16>, vector<288x32xf32> -> vector<288x32xf32>
    %c0_26 = arith.constant 0 : index
    %c0_27 = arith.constant 0 : index
    %19 = vector.load %arg5[%c0_26, %c0_27] : memref<288x32xf32, #tpu.memory_space<vmem>>, vector<288x32xf32>
    %20 = arith.addf %19, %18 : vector<288x32xf32>
    %c0_28 = arith.constant 0 : index
    %c0_29 = arith.constant 0 : index
    %21 = vector.load %arg5[%c0_28, %c0_29] : memref<288x32xf32, #tpu.memory_space<vmem>>, vector<288x32xf32>
    tpu.vector_store %arg5[%c0_28, %c0_29], %20 {strides = array<i32>} : memref<288x32xf32, #tpu.memory_space<vmem>>, vector<288x32xf32>,
    %c0_30 = arith.constant 0 : index
    %c0_31 = arith.constant 0 : index
    %c18 = arith.constant 18 : index
    %c0_32 = arith.constant 0 : index
    %22 = vector.load %arg1[%c0_30, %c0_31, %c18, %c0_32] : memref<1x1x342x32xbf16, #tpu.memory_space<vmem>>, vector<1x1x288x32xbf16>
    %23 = vector.shape_cast %22 : vector<1x1x288x32xbf16> to vector<288x32xbf16>
    %c3 = arith.constant 3 : index
    %c0_33 = arith.constant 0 : index
    %c0_34 = arith.constant 0 : index
    %24 = vector.load %arg2[%c3, %c0_33, %c0_34] : memref<9x32x32xbf16, #tpu.memory_space<vmem>>, vector<1x32x32xbf16>
    %25 = vector.shape_cast %24 : vector<1x32x32xbf16> to vector<32x32xbf16>
    %cst_35 = arith.constant dense<0.000000e+00> : vector<288x32xf32>
    %26 = tpu.matmul %23, %25, %cst_35 {dimension_numbers = #tpu.dot_dimension_numbers<[1], [0], [0], [1], [0, 0, 1, 1], [], []>} : vector<288x32xbf16>, vector<32x32xbf16>, vector<288x32xf32> -> vector<288x32xf32>
    %c0_36 = arith.constant 0 : index
    %c0_37 = arith.constant 0 : index
    %27 = vector.load %arg5[%c0_36, %c0_37] : memref<288x32xf32, #tpu.memory_space<vmem>>, vector<288x32xf32>
    %28 = arith.addf %27, %26 : vector<288x32xf32>
    %c0_38 = arith.constant 0 : index
    %c0_39 = arith.constant 0 : index
    %29 = vector.load %arg5[%c0_38, %c0_39] : memref<288x32xf32, #tpu.memory_space<vmem>>, vector<288x32xf32>
    tpu.vector_store %arg5[%c0_38, %c0_39], %28 {strides = array<i32>} : memref<288x32xf32, #tpu.memory_space<vmem>>, vector<288x32xf32>,
    %c0_40 = arith.constant 0 : index
    %c0_41 = arith.constant 0 : index
    %c19 = arith.constant 19 : index
    %c0_42 = arith.constant 0 : index
    %30 = vector.load %arg1[%c0_40, %c0_41, %c19, %c0_42] : memref<1x1x342x32xbf16, #tpu.memory_space<vmem>>, vector<1x1x288x32xbf16>
    %31 = vector.shape_cast %30 : vector<1x1x288x32xbf16> to vector<288x32xbf16>
    %c4 = arith.constant 4 : index
    %c0_43 = arith.constant 0 : index
    %c0_44 = arith.constant 0 : index
    %32 = vector.load %arg2[%c4, %c0_43, %c0_44] : memref<9x32x32xbf16, #tpu.memory_space<vmem>>, vector<1x32x32xbf16>
    %33 = vector.shape_cast %32 : vector<1x32x32xbf16> to vector<32x32xbf16>
    %cst_45 = arith.constant dense<0.000000e+00> : vector<288x32xf32>
    %34 = tpu.matmul %31, %33, %cst_45 {dimension_numbers = #tpu.dot_dimension_numbers<[1], [0], [0], [1], [0, 0, 1, 1], [], []>} : vector<288x32xbf16>, vector<32x32xbf16>, vector<288x32xf32> -> vector<288x32xf32>
    %c0_46 = arith.constant 0 : index
    %c0_47 = arith.constant 0 : index
    %35 = vector.load %arg5[%c0_46, %c0_47] : memref<288x32xf32, #tpu.memory_space<vmem>>, vector<288x32xf32>
    %36 = arith.addf %35, %34 : vector<288x32xf32>
    %c0_48 = arith.constant 0 : index
    %c0_49 = arith.constant 0 : index
    %37 = vector.load %arg5[%c0_48, %c0_49] : memref<288x32xf32, #tpu.memory_space<vmem>>, vector<288x32xf32>
    tpu.vector_store %arg5[%c0_48, %c0_49], %36 {strides = array<i32>} : memref<288x32xf32, #tpu.memory_space<vmem>>, vector<288x32xf32>,
    %c0_50 = arith.constant 0 : index
    %c0_51 = arith.constant 0 : index
    %c20 = arith.constant 20 : index
    %c0_52 = arith.constant 0 : index
    %38 = vector.load %arg1[%c0_50, %c0_51, %c20, %c0_52] : memref<1x1x342x32xbf16, #tpu.memory_space<vmem>>, vector<1x1x288x32xbf16>
    %39 = vector.shape_cast %38 : vector<1x1x288x32xbf16> to vector<288x32xbf16>
    %c5 = arith.constant 5 : index
    %c0_53 = arith.constant 0 : index
    %c0_54 = arith.constant 0 : index
    %40 = vector.load %arg2[%c5, %c0_53, %c0_54] : memref<9x32x32xbf16, #tpu.memory_space<vmem>>, vector<1x32x32xbf16>
    %41 = vector.shape_cast %40 : vector<1x32x32xbf16> to vector<32x32xbf16>
    %cst_55 = arith.constant dense<0.000000e+00> : vector<288x32xf32>
    %42 = tpu.matmul %39, %41, %cst_55 {dimension_numbers = #tpu.dot_dimension_numbers<[1], [0], [0], [1], [0, 0, 1, 1], [], []>} : vector<288x32xbf16>, vector<32x32xbf16>, vector<288x32xf32> -> vector<288x32xf32>
    %c0_56 = arith.constant 0 : index
    %c0_57 = arith.constant 0 : index
    %43 = vector.load %arg5[%c0_56, %c0_57] : memref<288x32xf32, #tpu.memory_space<vmem>>, vector<288x32xf32>
    %44 = arith.addf %43, %42 : vector<288x32xf32>
    %c0_58 = arith.constant 0 : index
    %c0_59 = arith.constant 0 : index
    %45 = vector.load %arg5[%c0_58, %c0_59] : memref<288x32xf32, #tpu.memory_space<vmem>>, vector<288x32xf32>
    tpu.vector_store %arg5[%c0_58, %c0_59], %44 {strides = array<i32>} : memref<288x32xf32, #tpu.memory_space<vmem>>, vector<288x32xf32>,
    %c0_60 = arith.constant 0 : index
    %c0_61 = arith.constant 0 : index
    %c36 = arith.constant 36 : index
    %c0_62 = arith.constant 0 : index
    %46 = vector.load %arg1[%c0_60, %c0_61, %c36, %c0_62] : memref<1x1x342x32xbf16, #tpu.memory_space<vmem>>, vector<1x1x288x32xbf16>
    %47 = vector.shape_cast %46 : vector<1x1x288x32xbf16> to vector<288x32xbf16>
    %c6 = arith.constant 6 : index
    %c0_63 = arith.constant 0 : index
    %c0_64 = arith.constant 0 : index
    %48 = vector.load %arg2[%c6, %c0_63, %c0_64] : memref<9x32x32xbf16, #tpu.memory_space<vmem>>, vector<1x32x32xbf16>
    %49 = vector.shape_cast %48 : vector<1x32x32xbf16> to vector<32x32xbf16>
    %cst_65 = arith.constant dense<0.000000e+00> : vector<288x32xf32>
    %50 = tpu.matmul %47, %49, %cst_65 {dimension_numbers = #tpu.dot_dimension_numbers<[1], [0], [0], [1], [0, 0, 1, 1], [], []>} : vector<288x32xbf16>, vector<32x32xbf16>, vector<288x32xf32> -> vector<288x32xf32>
    %c0_66 = arith.constant 0 : index
    %c0_67 = arith.constant 0 : index
    %51 = vector.load %arg5[%c0_66, %c0_67] : memref<288x32xf32, #tpu.memory_space<vmem>>, vector<288x32xf32>
    %52 = arith.addf %51, %50 : vector<288x32xf32>
    %c0_68 = arith.constant 0 : index
    %c0_69 = arith.constant 0 : index
    %53 = vector.load %arg5[%c0_68, %c0_69] : memref<288x32xf32, #tpu.memory_space<vmem>>, vector<288x32xf32>
    tpu.vector_store %arg5[%c0_68, %c0_69], %52 {strides = array<i32>} : memref<288x32xf32, #tpu.memory_space<vmem>>, vector<288x32xf32>,
    %c0_70 = arith.constant 0 : index
    %c0_71 = arith.constant 0 : index
    %c37 = arith.constant 37 : index
    %c0_72 = arith.constant 0 : index
    %54 = vector.load %arg1[%c0_70, %c0_71, %c37, %c0_72] : memref<1x1x342x32xbf16, #tpu.memory_space<vmem>>, vector<1x1x288x32xbf16>
    %55 = vector.shape_cast %54 : vector<1x1x288x32xbf16> to vector<288x32xbf16>
    %c7 = arith.constant 7 : index
    %c0_73 = arith.constant 0 : index
    %c0_74 = arith.constant 0 : index
    %56 = vector.load %arg2[%c7, %c0_73, %c0_74] : memref<9x32x32xbf16, #tpu.memory_space<vmem>>, vector<1x32x32xbf16>
    %57 = vector.shape_cast %56 : vector<1x32x32xbf16> to vector<32x32xbf16>
    %cst_75 = arith.constant dense<0.000000e+00> : vector<288x32xf32>
    %58 = tpu.matmul %55, %57, %cst_75 {dimension_numbers = #tpu.dot_dimension_numbers<[1], [0], [0], [1], [0, 0, 1, 1], [], []>} : vector<288x32xbf16>, vector<32x32xbf16>, vector<288x32xf32> -> vector<288x32xf32>
    %c0_76 = arith.constant 0 : index
    %c0_77 = arith.constant 0 : index
    %59 = vector.load %arg5[%c0_76, %c0_77] : memref<288x32xf32, #tpu.memory_space<vmem>>, vector<288x32xf32>
    %60 = arith.addf %59, %58 : vector<288x32xf32>
    %c0_78 = arith.constant 0 : index
    %c0_79 = arith.constant 0 : index
    %61 = vector.load %arg5[%c0_78, %c0_79] : memref<288x32xf32, #tpu.memory_space<vmem>>, vector<288x32xf32>
    tpu.vector_store %arg5[%c0_78, %c0_79], %60 {strides = array<i32>} : memref<288x32xf32, #tpu.memory_space<vmem>>, vector<288x32xf32>,
    %c0_80 = arith.constant 0 : index
    %c0_81 = arith.constant 0 : index
    %c38 = arith.constant 38 : index
    %c0_82 = arith.constant 0 : index
    %62 = vector.load %arg1[%c0_80, %c0_81, %c38, %c0_82] : memref<1x1x342x32xbf16, #tpu.memory_space<vmem>>, vector<1x1x288x32xbf16>
    %63 = vector.shape_cast %62 : vector<1x1x288x32xbf16> to vector<288x32xbf16>
    %c8 = arith.constant 8 : index
    %c0_83 = arith.constant 0 : index
    %c0_84 = arith.constant 0 : index
    %64 = vector.load %arg2[%c8, %c0_83, %c0_84] : memref<9x32x32xbf16, #tpu.memory_space<vmem>>, vector<1x32x32xbf16>
    %65 = vector.shape_cast %64 : vector<1x32x32xbf16> to vector<32x32xbf16>
    %cst_85 = arith.constant dense<0.000000e+00> : vector<288x32xf32>
    %66 = tpu.matmul %63, %65, %cst_85 {dimension_numbers = #tpu.dot_dimension_numbers<[1], [0], [0], [1], [0, 0, 1, 1], [], []>} : vector<288x32xbf16>, vector<32x32xbf16>, vector<288x32xf32> -> vector<288x32xf32>
    %c0_86 = arith.constant 0 : index
    %c0_87 = arith.constant 0 : index
    %67 = vector.load %arg5[%c0_86, %c0_87] : memref<288x32xf32, #tpu.memory_space<vmem>>, vector<288x32xf32>
    %68 = arith.addf %67, %66 : vector<288x32xf32>
    %c0_88 = arith.constant 0 : index
    %c0_89 = arith.constant 0 : index
    %69 = vector.load %arg5[%c0_88, %c0_89] : memref<288x32xf32, #tpu.memory_space<vmem>>, vector<288x32xf32>
    tpu.vector_store %arg5[%c0_88, %c0_89], %68 {strides = array<i32>} : memref<288x32xf32, #tpu.memory_space<vmem>>, vector<288x32xf32>,
    %c0_90 = arith.constant 0 : index
    %c0_91 = arith.constant 0 : index
    %70 = vector.load %arg5[%c0_90, %c0_91] : memref<288x32xf32, #tpu.memory_space<vmem>>, vector<288x32xf32>
    %c0_92 = arith.constant 0 : index
    %c0_93 = arith.constant 0 : index
    %71 = vector.load %arg3[%c0_92, %c0_93] : memref<1x32xf32, #tpu.memory_space<vmem>>, vector<1x32xf32>
    %72 = vector.broadcast %71 : vector<1x32xf32> to vector<288x32xf32>
    %73 = arith.addf %70, %72 : vector<288x32xf32>
    %cst_94 = arith.constant 0.000000e+00 : f32
    %74 = vector.broadcast %cst_94 : f32 to vector<288x32xf32>
    %75 = arith.maximumf %73, %74 : vector<288x32xf32>
    %76 = vector.extract_strided_slice %75 {offsets = [0, 0], sizes = [16, 32], strides = [1, 1]} : vector<288x32xf32> to vector<16x32xf32>
    %77 = arith.truncf %76 : vector<16x32xf32> to vector<16x32xbf16>
    %c0_95 = arith.constant 0 : index
    %c0_96 = arith.constant 0 : index
    %c0_97 = arith.constant 0 : index
    %c0_98 = arith.constant 0 : index
    %78 = vector.load %arg4[%c0_95, %c0_96, %c0_97, %c0_98] : memref<1x16x16x32xbf16, #tpu.memory_space<vmem>>, vector<1x1x16x32xbf16>
    %79 = vector.shape_cast %78 : vector<1x1x16x32xbf16> to vector<16x32xbf16>
    %80 = vector.shape_cast %77 : vector<16x32xbf16> to vector<1x1x16x32xbf16>
    tpu.vector_store %arg4[%c0_95, %c0_96, %c0_97, %c0_98], %80 {strides = array<i32>} : memref<1x16x16x32xbf16, #tpu.memory_space<vmem>>, vector<1x1x16x32xbf16>,
    %81 = vector.extract_strided_slice %75 {offsets = [18, 0], sizes = [16, 32], strides = [1, 1]} : vector<288x32xf32> to vector<16x32xf32>
    %82 = arith.truncf %81 : vector<16x32xf32> to vector<16x32xbf16>
    %c0_99 = arith.constant 0 : index
    %c1_100 = arith.constant 1 : index
    %c0_101 = arith.constant 0 : index
    %c0_102 = arith.constant 0 : index
    %83 = vector.load %arg4[%c0_99, %c1_100, %c0_101, %c0_102] : memref<1x16x16x32xbf16, #tpu.memory_space<vmem>>, vector<1x1x16x32xbf16>
    %84 = vector.shape_cast %83 : vector<1x1x16x32xbf16> to vector<16x32xbf16>
    %85 = vector.shape_cast %82 : vector<16x32xbf16> to vector<1x1x16x32xbf16>
    tpu.vector_store %arg4[%c0_99, %c1_100, %c0_101, %c0_102], %85 {strides = array<i32>} : memref<1x16x16x32xbf16, #tpu.memory_space<vmem>>, vector<1x1x16x32xbf16>,
    %86 = vector.extract_strided_slice %75 {offsets = [36, 0], sizes = [16, 32], strides = [1, 1]} : vector<288x32xf32> to vector<16x32xf32>
    %87 = arith.truncf %86 : vector<16x32xf32> to vector<16x32xbf16>
    %c0_103 = arith.constant 0 : index
    %c2_104 = arith.constant 2 : index
    %c0_105 = arith.constant 0 : index
    %c0_106 = arith.constant 0 : index
    %88 = vector.load %arg4[%c0_103, %c2_104, %c0_105, %c0_106] : memref<1x16x16x32xbf16, #tpu.memory_space<vmem>>, vector<1x1x16x32xbf16>
    %89 = vector.shape_cast %88 : vector<1x1x16x32xbf16> to vector<16x32xbf16>
    %90 = vector.shape_cast %87 : vector<16x32xbf16> to vector<1x1x16x32xbf16>
    tpu.vector_store %arg4[%c0_103, %c2_104, %c0_105, %c0_106], %90 {strides = array<i32>} : memref<1x16x16x32xbf16, #tpu.memory_space<vmem>>, vector<1x1x16x32xbf16>,
    %91 = vector.extract_strided_slice %75 {offsets = [54, 0], sizes = [16, 32], strides = [1, 1]} : vector<288x32xf32> to vector<16x32xf32>
    %92 = arith.truncf %91 : vector<16x32xf32> to vector<16x32xbf16>
    %c0_107 = arith.constant 0 : index
    %c3_108 = arith.constant 3 : index
    %c0_109 = arith.constant 0 : index
    %c0_110 = arith.constant 0 : index
    %93 = vector.load %arg4[%c0_107, %c3_108, %c0_109, %c0_110] : memref<1x16x16x32xbf16, #tpu.memory_space<vmem>>, vector<1x1x16x32xbf16>
    %94 = vector.shape_cast %93 : vector<1x1x16x32xbf16> to vector<16x32xbf16>
    %95 = vector.shape_cast %92 : vector<16x32xbf16> to vector<1x1x16x32xbf16>
    tpu.vector_store %arg4[%c0_107, %c3_108, %c0_109, %c0_110], %95 {strides = array<i32>} : memref<1x16x16x32xbf16, #tpu.memory_space<vmem>>, vector<1x1x16x32xbf16>,
    %96 = vector.extract_strided_slice %75 {offsets = [72, 0], sizes = [16, 32], strides = [1, 1]} : vector<288x32xf32> to vector<16x32xf32>
    %97 = arith.truncf %96 : vector<16x32xf32> to vector<16x32xbf16>
    %c0_111 = arith.constant 0 : index
    %c4_112 = arith.constant 4 : index
    %c0_113 = arith.constant 0 : index
    %c0_114 = arith.constant 0 : index
    %98 = vector.load %arg4[%c0_111, %c4_112, %c0_113, %c0_114] : memref<1x16x16x32xbf16, #tpu.memory_space<vmem>>, vector<1x1x16x32xbf16>
    %99 = vector.shape_cast %98 : vector<1x1x16x32xbf16> to vector<16x32xbf16>
    %100 = vector.shape_cast %97 : vector<16x32xbf16> to vector<1x1x16x32xbf16>
    tpu.vector_store %arg4[%c0_111, %c4_112, %c0_113, %c0_114], %100 {strides = array<i32>} : memref<1x16x16x32xbf16, #tpu.memory_space<vmem>>, vector<1x1x16x32xbf16>,
    %101 = vector.extract_strided_slice %75 {offsets = [90, 0], sizes = [16, 32], strides = [1, 1]} : vector<288x32xf32> to vector<16x32xf32>
    %102 = arith.truncf %101 : vector<16x32xf32> to vector<16x32xbf16>
    %c0_115 = arith.constant 0 : index
    %c5_116 = arith.constant 5 : index
    %c0_117 = arith.constant 0 : index
    %c0_118 = arith.constant 0 : index
    %103 = vector.load %arg4[%c0_115, %c5_116, %c0_117, %c0_118] : memref<1x16x16x32xbf16, #tpu.memory_space<vmem>>, vector<1x1x16x32xbf16>
    %104 = vector.shape_cast %103 : vector<1x1x16x32xbf16> to vector<16x32xbf16>
    %105 = vector.shape_cast %102 : vector<16x32xbf16> to vector<1x1x16x32xbf16>
    tpu.vector_store %arg4[%c0_115, %c5_116, %c0_117, %c0_118], %105 {strides = array<i32>} : memref<1x16x16x32xbf16, #tpu.memory_space<vmem>>, vector<1x1x16x32xbf16>,
    %106 = vector.extract_strided_slice %75 {offsets = [108, 0], sizes = [16, 32], strides = [1, 1]} : vector<288x32xf32> to vector<16x32xf32>
    %107 = arith.truncf %106 : vector<16x32xf32> to vector<16x32xbf16>
    %c0_119 = arith.constant 0 : index
    %c6_120 = arith.constant 6 : index
    %c0_121 = arith.constant 0 : index
    %c0_122 = arith.constant 0 : index
    %108 = vector.load %arg4[%c0_119, %c6_120, %c0_121, %c0_122] : memref<1x16x16x32xbf16, #tpu.memory_space<vmem>>, vector<1x1x16x32xbf16>
    %109 = vector.shape_cast %108 : vector<1x1x16x32xbf16> to vector<16x32xbf16>
    %110 = vector.shape_cast %107 : vector<16x32xbf16> to vector<1x1x16x32xbf16>
    tpu.vector_store %arg4[%c0_119, %c6_120, %c0_121, %c0_122], %110 {strides = array<i32>} : memref<1x16x16x32xbf16, #tpu.memory_space<vmem>>, vector<1x1x16x32xbf16>,
    %111 = vector.extract_strided_slice %75 {offsets = [126, 0], sizes = [16, 32], strides = [1, 1]} : vector<288x32xf32> to vector<16x32xf32>
    %112 = arith.truncf %111 : vector<16x32xf32> to vector<16x32xbf16>
    %c0_123 = arith.constant 0 : index
    %c7_124 = arith.constant 7 : index
    %c0_125 = arith.constant 0 : index
    %c0_126 = arith.constant 0 : index
    %113 = vector.load %arg4[%c0_123, %c7_124, %c0_125, %c0_126] : memref<1x16x16x32xbf16, #tpu.memory_space<vmem>>, vector<1x1x16x32xbf16>
    %114 = vector.shape_cast %113 : vector<1x1x16x32xbf16> to vector<16x32xbf16>
    %115 = vector.shape_cast %112 : vector<16x32xbf16> to vector<1x1x16x32xbf16>
    tpu.vector_store %arg4[%c0_123, %c7_124, %c0_125, %c0_126], %115 {strides = array<i32>} : memref<1x16x16x32xbf16, #tpu.memory_space<vmem>>, vector<1x1x16x32xbf16>,
    %116 = vector.extract_strided_slice %75 {offsets = [144, 0], sizes = [16, 32], strides = [1, 1]} : vector<288x32xf32> to vector<16x32xf32>
    %117 = arith.truncf %116 : vector<16x32xf32> to vector<16x32xbf16>
    %c0_127 = arith.constant 0 : index
    %c8_128 = arith.constant 8 : index
    %c0_129 = arith.constant 0 : index
    %c0_130 = arith.constant 0 : index
    %118 = vector.load %arg4[%c0_127, %c8_128, %c0_129, %c0_130] : memref<1x16x16x32xbf16, #tpu.memory_space<vmem>>, vector<1x1x16x32xbf16>
    %119 = vector.shape_cast %118 : vector<1x1x16x32xbf16> to vector<16x32xbf16>
    %120 = vector.shape_cast %117 : vector<16x32xbf16> to vector<1x1x16x32xbf16>
    tpu.vector_store %arg4[%c0_127, %c8_128, %c0_129, %c0_130], %120 {strides = array<i32>} : memref<1x16x16x32xbf16, #tpu.memory_space<vmem>>, vector<1x1x16x32xbf16>,
    %121 = vector.extract_strided_slice %75 {offsets = [162, 0], sizes = [16, 32], strides = [1, 1]} : vector<288x32xf32> to vector<16x32xf32>
    %122 = arith.truncf %121 : vector<16x32xf32> to vector<16x32xbf16>
    %c0_131 = arith.constant 0 : index
    %c9 = arith.constant 9 : index
    %c0_132 = arith.constant 0 : index
    %c0_133 = arith.constant 0 : index
    %123 = vector.load %arg4[%c0_131, %c9, %c0_132, %c0_133] : memref<1x16x16x32xbf16, #tpu.memory_space<vmem>>, vector<1x1x16x32xbf16>
    %124 = vector.shape_cast %123 : vector<1x1x16x32xbf16> to vector<16x32xbf16>
    %125 = vector.shape_cast %122 : vector<16x32xbf16> to vector<1x1x16x32xbf16>
    tpu.vector_store %arg4[%c0_131, %c9, %c0_132, %c0_133], %125 {strides = array<i32>} : memref<1x16x16x32xbf16, #tpu.memory_space<vmem>>, vector<1x1x16x32xbf16>,
    %126 = vector.extract_strided_slice %75 {offsets = [180, 0], sizes = [16, 32], strides = [1, 1]} : vector<288x32xf32> to vector<16x32xf32>
    %127 = arith.truncf %126 : vector<16x32xf32> to vector<16x32xbf16>
    %c0_134 = arith.constant 0 : index
    %c10 = arith.constant 10 : index
    %c0_135 = arith.constant 0 : index
    %c0_136 = arith.constant 0 : index
    %128 = vector.load %arg4[%c0_134, %c10, %c0_135, %c0_136] : memref<1x16x16x32xbf16, #tpu.memory_space<vmem>>, vector<1x1x16x32xbf16>
    %129 = vector.shape_cast %128 : vector<1x1x16x32xbf16> to vector<16x32xbf16>
    %130 = vector.shape_cast %127 : vector<16x32xbf16> to vector<1x1x16x32xbf16>
    tpu.vector_store %arg4[%c0_134, %c10, %c0_135, %c0_136], %130 {strides = array<i32>} : memref<1x16x16x32xbf16, #tpu.memory_space<vmem>>, vector<1x1x16x32xbf16>,
    %131 = vector.extract_strided_slice %75 {offsets = [198, 0], sizes = [16, 32], strides = [1, 1]} : vector<288x32xf32> to vector<16x32xf32>
    %132 = arith.truncf %131 : vector<16x32xf32> to vector<16x32xbf16>
    %c0_137 = arith.constant 0 : index
    %c11 = arith.constant 11 : index
    %c0_138 = arith.constant 0 : index
    %c0_139 = arith.constant 0 : index
    %133 = vector.load %arg4[%c0_137, %c11, %c0_138, %c0_139] : memref<1x16x16x32xbf16, #tpu.memory_space<vmem>>, vector<1x1x16x32xbf16>
    %134 = vector.shape_cast %133 : vector<1x1x16x32xbf16> to vector<16x32xbf16>
    %135 = vector.shape_cast %132 : vector<16x32xbf16> to vector<1x1x16x32xbf16>
    tpu.vector_store %arg4[%c0_137, %c11, %c0_138, %c0_139], %135 {strides = array<i32>} : memref<1x16x16x32xbf16, #tpu.memory_space<vmem>>, vector<1x1x16x32xbf16>,
    %136 = vector.extract_strided_slice %75 {offsets = [216, 0], sizes = [16, 32], strides = [1, 1]} : vector<288x32xf32> to vector<16x32xf32>
    %137 = arith.truncf %136 : vector<16x32xf32> to vector<16x32xbf16>
    %c0_140 = arith.constant 0 : index
    %c12 = arith.constant 12 : index
    %c0_141 = arith.constant 0 : index
    %c0_142 = arith.constant 0 : index
    %138 = vector.load %arg4[%c0_140, %c12, %c0_141, %c0_142] : memref<1x16x16x32xbf16, #tpu.memory_space<vmem>>, vector<1x1x16x32xbf16>
    %139 = vector.shape_cast %138 : vector<1x1x16x32xbf16> to vector<16x32xbf16>
    %140 = vector.shape_cast %137 : vector<16x32xbf16> to vector<1x1x16x32xbf16>
    tpu.vector_store %arg4[%c0_140, %c12, %c0_141, %c0_142], %140 {strides = array<i32>} : memref<1x16x16x32xbf16, #tpu.memory_space<vmem>>, vector<1x1x16x32xbf16>,
    %141 = vector.extract_strided_slice %75 {offsets = [234, 0], sizes = [16, 32], strides = [1, 1]} : vector<288x32xf32> to vector<16x32xf32>
    %142 = arith.truncf %141 : vector<16x32xf32> to vector<16x32xbf16>
    %c0_143 = arith.constant 0 : index
    %c13 = arith.constant 13 : index
    %c0_144 = arith.constant 0 : index
    %c0_145 = arith.constant 0 : index
    %143 = vector.load %arg4[%c0_143, %c13, %c0_144, %c0_145] : memref<1x16x16x32xbf16, #tpu.memory_space<vmem>>, vector<1x1x16x32xbf16>
    %144 = vector.shape_cast %143 : vector<1x1x16x32xbf16> to vector<16x32xbf16>
    %145 = vector.shape_cast %142 : vector<16x32xbf16> to vector<1x1x16x32xbf16>
    tpu.vector_store %arg4[%c0_143, %c13, %c0_144, %c0_145], %145 {strides = array<i32>} : memref<1x16x16x32xbf16, #tpu.memory_space<vmem>>, vector<1x1x16x32xbf16>,
    %146 = vector.extract_strided_slice %75 {offsets = [252, 0], sizes = [16, 32], strides = [1, 1]} : vector<288x32xf32> to vector<16x32xf32>
    %147 = arith.truncf %146 : vector<16x32xf32> to vector<16x32xbf16>
    %c0_146 = arith.constant 0 : index
    %c14 = arith.constant 14 : index
    %c0_147 = arith.constant 0 : index
    %c0_148 = arith.constant 0 : index
    %148 = vector.load %arg4[%c0_146, %c14, %c0_147, %c0_148] : memref<1x16x16x32xbf16, #tpu.memory_space<vmem>>, vector<1x1x16x32xbf16>
    %149 = vector.shape_cast %148 : vector<1x1x16x32xbf16> to vector<16x32xbf16>
    %150 = vector.shape_cast %147 : vector<16x32xbf16> to vector<1x1x16x32xbf16>
    tpu.vector_store %arg4[%c0_146, %c14, %c0_147, %c0_148], %150 {strides = array<i32>} : memref<1x16x16x32xbf16, #tpu.memory_space<vmem>>, vector<1x1x16x32xbf16>,
    %151 = vector.extract_strided_slice %75 {offsets = [270, 0], sizes = [16, 32], strides = [1, 1]} : vector<288x32xf32> to vector<16x32xf32>
    %152 = arith.truncf %151 : vector<16x32xf32> to vector<16x32xbf16>
    %c0_149 = arith.constant 0 : index
    %c15 = arith.constant 15 : index
    %c0_150 = arith.constant 0 : index
    %c0_151 = arith.constant 0 : index
    %153 = vector.load %arg4[%c0_149, %c15, %c0_150, %c0_151] : memref<1x16x16x32xbf16, #tpu.memory_space<vmem>>, vector<1x1x16x32xbf16>
    %154 = vector.shape_cast %153 : vector<1x1x16x32xbf16> to vector<16x32xbf16>
    %155 = vector.shape_cast %152 : vector<16x32xbf16> to vector<1x1x16x32xbf16>
    tpu.vector_store %arg4[%c0_149, %c15, %c0_150, %c0_151], %155 {strides = array<i32>} : memref<1x16x16x32xbf16, #tpu.memory_space<vmem>>, vector<1x1x16x32xbf16>,
    return
  }
  func.func @transform_0(%arg0: i32) -> (i32, i32, i32, i32) {
    %c0_i32 = arith.constant 0 : i32
    %c0_i32_0 = arith.constant 0 : i32
    %c0_i32_1 = arith.constant 0 : i32
    %c0_i32_2 = arith.constant 0 : i32
    return %arg0, %c0_i32, %c0_i32_0, %c0_i32_1 : i32, i32, i32, i32
  }
  func.func @transform_1(%arg0: i32) -> (i32, i32, i32) {
    %c0_i32 = arith.constant 0 : i32
    %c0_i32_0 = arith.constant 0 : i32
    %c0_i32_1 = arith.constant 0 : i32
    %c0_i32_2 = arith.constant 0 : i32
    return %c0_i32, %c0_i32_0, %c0_i32_1 : i32, i32, i32
  }
  func.func @transform_2(%arg0: i32) -> (i32, i32) {
    %c0_i32 = arith.constant 0 : i32
    %c0_i32_0 = arith.constant 0 : i32
    %c0_i32_1 = arith.constant 0 : i32
    return %c0_i32, %c0_i32_0 : i32, i32
  }
  func.func @transform_3(%arg0: i32) -> (i32, i32, i32, i32) {
    %c0_i32 = arith.constant 0 : i32
    %c0_i32_0 = arith.constant 0 : i32
    %c0_i32_1 = arith.constant 0 : i32
    %c0_i32_2 = arith.constant 0 : i32
    return %arg0, %c0_i32, %c0_i32_0, %c0_i32_1 : i32, i32, i32, i32
  }
}

</mosaic_0001>

<bundles_post_ra>
// kernel: _lambda_.3
= control target key start
LH: loop header
LB: loop body
LE: loop exit
PB: predicated region body
PF: predicated region fallthrough
CT: control target
= control target key end

     0   :  { %s1523_s12 = smov 0   ;;  %s1525_s13 = smov 0   ;;  %s1844_s0 = inlined_call_operand.vmem [shape: bf16[512,256], index: 0, kind: input, shape index: {}]   ;;  %s1845_s1 = inlined_call_operand.vmem [shape: bf16[256,32], index: 1, kind: input, shape index: {}]   ;;  %s1846_s2 = inlined_call_operand.vmem [shape: f32[1,32], index: 2, kind: input, shape index: {}]   ;;  %s1847_s3 = inlined_call_operand.vmem [shape: bf16[512,32], index: 3, kind: output, shape index: {}]  }
   0x1   :  { %s1527_s14 = smov 0  }
   0x2 LB: > { %s32_s15 = sadd.s32 1, %s1496_s13  ;;  %p1187_p0 = scmp.ge.s32.totalorder %s1500_s14, 1  ;;  %s1500_s14 = sphi %s1527_s14, %s13_s14   ;;  %s1496_s13 = sphi %s1525_s13, %s1849_s13   ;;  %s1492_s12 = sphi %s1523_s12, %s1848_s12  }
   0x3   : > { %p34_p1 = scmp.ge.s32.totalorder %s32_s15, 2  ;;  %p191_p2 = scmp.lt.s32.totalorder %s1500_s14, 3 }
   0x5   : > { %s1851_s15 = smov (%p34_p1, %s32_s15), 0  ;;  %p192_p3 = pnand %p1187_p0, %p191_p2 }
   0x6   : > { %s1188_s28 = sshll.u32 (!%p192_p3), %s1492_s12, 5 }
   0x7   : > { %195 = sbr.rel (%p192_p3) target bundleno = 317 (0x13d), region = 32  ;;  %p236_p4 = scmp.lt.s32.totalorder (!%p192_p3), %s1188_s28, 63 }
   0xc   : > { %v1427_v0 = vld [vmem:[%s1845_s1 + $0x38] sm:$0xff]  ;;  %v1426_v2 = vld [vmem:[%s1845_s1 + $0x30] sm:$0xff]  ;;  %v1425_v4 = vld [vmem:[%s1845_s1 + $0x28] sm:$0xff]  ;;  %s1853_s28 = smov (!%p236_p4, %s1188_s28), 63  ;;  %vm271_vm0 = vcmask 261120   ;;  %vm1034_vm1 = vcmask 257024  }
   0xd   : > { %v1435_v1 = vld [vmem:[%s1845_s1 + $0x78] sm:$0xff]  ;;  %656 = vmatpush.bf16.msra.mxu0 %v1427_v0  ;;  %1436 = vmatpush.bf16.msra.mxu2 %v1427_v0  ;;  %v1434_v3 = vld [vmem:[%s1845_s1 + $0x70] sm:$0xff]  ;;  %v1433_v5 = vld [vmem:[%s1845_s1 + $0x68] sm:$0xff]  ;;  %s1387_s17 = sshll.u32 %s1853_s28, 3  ;;  %s1192_s5 = sshll.u32 %s1853_s28, 2 }
   0xe   : > { %745 = vmatpush.bf16.msra.mxu1 %v1435_v1  ;;  %1444 = vmatpush.bf16.msra.mxu3 %v1435_v1  ;;  %v1424_v6 = vld [vmem:[%s1845_s1 + $0x20] sm:$0xff]  ;;  %v1423_v8 = vld [vmem:[%s1845_s1 + $0x18] sm:$0xff]  ;;  %v1422_v10 = vld [vmem:[%s1845_s1 + $0x10] sm:$0xff]  ;;  %s1589_s22 = scalar_lea.vmem %s1844_s0, %s1387_s17  ;;  %s1709_s8 = scalar_lea.vmem %s1847_s3, %s1192_s5 }
   0xf   : > { %v1432_v7 = vld [vmem:[%s1845_s1 + $0x60] sm:$0xff]  ;;  %v1431_v9 = vld [vmem:[%s1845_s1 + $0x58] sm:$0xff]  ;;  %v1430_v11 = vld [vmem:[%s1845_s1 + $0x50] sm:$0xff] }
  0x10   : > { %v1421_v12 = vld [vmem:[%s1845_s1 + $0x8] sm:$0xff]  ;;  %v1420_v14 = vld [vmem:[%s1845_s1] sm:$0xff]  ;;  %v1203_v28 = vld [vmem:[%s1589_s22 + $0x10] sm:$0xf] }
  0x11   : > { %657 = vmatpush.bf16.msra.mxu0 %v1426_v2  ;;  %1437 = vmatpush.bf16.msra.mxu2 %v1426_v2  ;;  %v1429_v13 = vld [vmem:[%s1845_s1 + $0x48] sm:$0xff]  ;;  %v1428_v15 = vld [vmem:[%s1845_s1 + $0x40] sm:$0xff]  ;;  %v1391_v29 = vld [vmem:[%s1589_s22 + $0x14] sm:$0xf0] }
  0x12   : > { %746 = vmatpush.bf16.msra.mxu1 %v1434_v3  ;;  %1445 = vmatpush.bf16.msra.mxu3 %v1434_v3  ;;  %v1195_v16 = vld [vmem:[%s1589_s22] sm:$0xf]  ;;  %v1389_v17 = vld [vmem:[%s1589_s22 + $0x4] sm:$0xf0]  ;;  %v1388_v20 = vld [vmem:[%s1589_s22 + $0x4] sm:$0xf]  ;;  %v1204_v36 = vor.u32 %v1391_v29, %v1203_v28 }
  0x13   : > { %v1259_v18 = vld [vmem:[%s1589_s22 + $0x80] sm:$0xf]  ;;  %v1405_v19 = vld [vmem:[%s1589_s22 + $0x84] sm:$0xf0]  ;;  %v1197_v21 = vld [vmem:[%s1589_s22 + $0x8] sm:$0xf0]  ;;  %v1196_v24 = vor.u32 %v1389_v17, %v1195_v16 }
  0x14   : > { %v1404_v22 = vld [vmem:[%s1589_s22 + $0x84] sm:$0xf]  ;;  %v1261_v23 = vld [vmem:[%s1589_s22 + $0x88] sm:$0xf0]  ;;  %v1260_v25 = vor.u32 %v1405_v19, %v1259_v18  ;;  %v1200_v26 = vor.u32 %v1388_v20, %v1197_v21  ;;  %v1267_v30 = vld [vmem:[%s1589_s22 + $0x90] sm:$0xf] }
  0x15   : > { %658 = vmatpush.bf16.msra.mxu0 %v1425_v4  ;;  %1438 = vmatpush.bf16.msra.mxu2 %v1425_v4  ;;  %v1264_v27 = vor.u32 %v1404_v22, %v1261_v23  ;;  %v1407_v31 = vld [vmem:[%s1589_s22 + $0x94] sm:$0xf0]  ;;  %v1390_v32 = vld [vmem:[%s1589_s22 + $0x14] sm:$0xf]  ;;  %v1205_v33 = vld [vmem:[%s1589_s22 + $0x18] sm:$0xf0] }
  0x16   : > { %747 = vmatpush.bf16.msra.mxu1 %v1433_v5  ;;  %1446 = vmatpush.bf16.msra.mxu3 %v1433_v5  ;;  %v1406_v34 = vld [vmem:[%s1589_s22 + $0x94] sm:$0xf]  ;;  %v1269_v35 = vld [vmem:[%s1589_s22 + $0x98] sm:$0xf0]  ;;  %v1268_v37 = vor.u32 %v1407_v31, %v1267_v30  ;;  %v1208_v38 = vor.u32 %v1390_v32, %v1205_v33  ;;  %v1211_v40 = vld [vmem:[%s1589_s22 + $0x20] sm:$0xf] }
  0x17   : > { %v1272_v39 = vor.u32 %v1406_v34, %v1269_v35  ;;  %v1393_v41 = vld [vmem:[%s1589_s22 + $0x24] sm:$0xf0]  ;;  %v1275_v42 = vld [vmem:[%s1589_s22 + $0xa0] sm:$0xf]  ;;  %v1392_v44 = vld [vmem:[%s1589_s22 + $0x24] sm:$0xf] }
  0x18   : > { %v1409_v43 = vld [vmem:[%s1589_s22 + $0xa4] sm:$0xf0]  ;;  %v1213_v45 = vld [vmem:[%s1589_s22 + $0x28] sm:$0xf0]  ;;  %v1408_v46 = vld [vmem:[%s1589_s22 + $0xa4] sm:$0xf]  ;;  %v1212_v48 = vor.u32 %v1393_v41, %v1211_v40 }
  0x19   : > { %659 = vmatpush.bf16.msra.mxu0 %v1424_v6  ;;  %1439 = vmatpush.bf16.msra.mxu2 %v1424_v6  ;;  %v1277_v47 = vld [vmem:[%s1589_s22 + $0xa8] sm:$0xf0]  ;;  %v1276_v49 = vor.u32 %v1409_v43, %v1275_v42  ;;  %v1216_v50 = vor.u32 %v1392_v44, %v1213_v45  ;;  %v1219_v52 = vld [vmem:[%s1589_s22 + $0x30] sm:$0xf]  ;;  %v1395_v53 = vld [vmem:[%s1589_s22 + $0x34] sm:$0xf0] }
  0x1a   : > { %748 = vmatpush.bf16.msra.mxu1 %v1432_v7  ;;  %1447 = vmatpush.bf16.msra.mxu3 %v1432_v7  ;;  %v1280_v51 = vor.u32 %v1408_v46, %v1277_v47  ;;  %v1283_v54 = vld [vmem:[%s1589_s22 + $0xb0] sm:$0xf]  ;;  %v1411_v55 = vld [vmem:[%s1589_s22 + $0xb4] sm:$0xf0]  ;;  %v1394_v56 = vld [vmem:[%s1589_s22 + $0x34] sm:$0xf]  ;;  %v1220_v60 = vor.u32 %v1395_v53, %v1219_v52 }
  0x1b   : > { %v1221_v57 = vld [vmem:[%s1589_s22 + $0x38] sm:$0xf0]  ;;  %v1410_v58 = vld [vmem:[%s1589_s22 + $0xb4] sm:$0xf]  ;;  %v1284_v61 = vor.u32 %v1411_v55, %v1283_v54  ;;  %v1227_v0 = vld [vmem:[%s1589_s22 + $0x40] sm:$0xf] }
  0x1c   : > { %v1285_v59 = vld [vmem:[%s1589_s22 + $0xb8] sm:$0xf0]  ;;  %v1224_v62 = vor.u32 %v1394_v56, %v1221_v57  ;;  %v1397_v1 = vld [vmem:[%s1589_s22 + $0x44] sm:$0xf0]  ;;  %v1291_v2 = vld [vmem:[%s1589_s22 + $0xc0] sm:$0xf] }
  0x1d   : > { %660 = vmatpush.bf16.msra.mxu0 %v1423_v8  ;;  %1440 = vmatpush.bf16.msra.mxu2 %v1423_v8  ;;  %v1288_v63 = vor.u32 %v1410_v58, %v1285_v59  ;;  %v1413_v3 = vld [vmem:[%s1589_s22 + $0xc4] sm:$0xf0]  ;;  %v1396_v4 = vld [vmem:[%s1589_s22 + $0x44] sm:$0xf]  ;;  %v1229_v5 = vld [vmem:[%s1589_s22 + $0x48] sm:$0xf0]  ;;  %v1228_v8 = vor.u32 %v1397_v1, %v1227_v0 }
  0x1e   : > { %749 = vmatpush.bf16.msra.mxu1 %v1431_v9  ;;  %1448 = vmatpush.bf16.msra.mxu3 %v1431_v9  ;;  %v1412_v6 = vld [vmem:[%s1589_s22 + $0xc4] sm:$0xf]  ;;  %v1293_v7 = vld [vmem:[%s1589_s22 + $0xc8] sm:$0xf0]  ;;  %v1292_v9 = vor.u32 %v1413_v3, %v1291_v2  ;;  %v1398_v16 = vld [vmem:[%s1589_s22 + $0x54] sm:$0xf] }
  0x1f   : > { %v1237_v17 = vld [vmem:[%s1589_s22 + $0x58] sm:$0xf0]  ;;  %v1414_v18 = vld [vmem:[%s1589_s22 + $0xd4] sm:$0xf]  ;;  %v1400_v28 = vld [vmem:[%s1589_s22 + $0x64] sm:$0xf] }
  0x20   : > { %v1301_v19 = vld [vmem:[%s1589_s22 + $0xd8] sm:$0xf0]  ;;  %v1240_v22 = vor.u32 %v1398_v16, %v1237_v17  ;;  %v1245_v29 = vld [vmem:[%s1589_s22 + $0x68] sm:$0xf0]  ;;  %v1416_v30 = vld [vmem:[%s1589_s22 + $0xe4] sm:$0xf] }
  0x21   : > { %661 = vmatpush.bf16.msra.mxu0 %v1422_v10  ;;  %1441 = vmatpush.bf16.msra.mxu2 %v1422_v10  ;;  %v1232_v10 = vor.u32 %v1396_v4, %v1229_v5  ;;  %v1304_v23 = vor.u32 %v1414_v18, %v1301_v19  ;;  %v1309_v31 = vld [vmem:[%s1589_s22 + $0xe8] sm:$0xf0]  ;;  %v1248_v34 = vor.u32 %v1400_v28, %v1245_v29  ;;  %v1419_v40 = vld [vmem:[%s1589_s22 + $0xf4] sm:$0xf0]  ;;  %v1402_v41 = vld [vmem:[%s1589_s22 + $0x74] sm:$0xf] }
  0x22   : > { %750 = vmatpush.bf16.msra.mxu1 %v1430_v11  ;;  %1449 = vmatpush.bf16.msra.mxu3 %v1430_v11  ;;  %v1296_v11 = vor.u32 %v1412_v6, %v1293_v7  ;;  %v1312_v35 = vor.u32 %v1416_v30, %v1309_v31  ;;  %v1253_v42 = vld [vmem:[%s1589_s22 + $0x78] sm:$0xf0]  ;;  %v1418_v43 = vld [vmem:[%s1589_s22 + $0xf4] sm:$0xf] }
  0x23   : > { %v1317_v44 = vld [vmem:[%s1589_s22 + $0xf8] sm:$0xf0]  ;;  %v1256_v47 = vor.u32 %v1402_v41, %v1253_v42 }
  0x25   : > { %662 = vmatpush.bf16.msra.mxu0 %v1421_v12  ;;  %1442 = vmatpush.bf16.msra.mxu2 %v1421_v12  ;;  %v1235_v12 = vld [vmem:[%s1589_s22 + $0x50] sm:$0xf] }
  0x26   : > { %751 = vmatpush.bf16.msra.mxu1 %v1429_v13  ;;  %1450 = vmatpush.bf16.msra.mxu3 %v1429_v13  ;;  %v1399_v13 = vld [vmem:[%s1589_s22 + $0x54] sm:$0xf0] }
  0x27   : > { %v1236_v20 = vor.u32 %v1399_v13, %v1235_v12 }
  0x29   : > { %663 = vmatpush.bf16.msra.mxu0 %v1420_v14  ;;  %1443 = vmatpush.bf16.msra.mxu2 %v1420_v14  ;;  %v1299_v14 = vld [vmem:[%s1589_s22 + $0xd0] sm:$0xf] }
  0x2a   : > { %752 = vmatpush.bf16.msra.mxu1 %v1428_v15  ;;  %1451 = vmatpush.bf16.msra.mxu3 %v1428_v15  ;;  %v1415_v15 = vld [vmem:[%s1589_s22 + $0xd4] sm:$0xf0] }
  0x2b   : > { %v1300_v21 = vor.u32 %v1415_v15, %v1299_v14 }
  0x2c   : > { %664 = vmatmul.bf16.vlgmr.msra.gmra.mxu0 %v1196_v24  ;;  %704 = vmatmul.bf16.vlgmr.msra.gmra.mxu2 %v1260_v25  ;;  %v1243_v24 = vld [vmem:[%s1589_s22 + $0x60] sm:$0xf]  ;;  %v1401_v25 = vld [vmem:[%s1589_s22 + $0x64] sm:$0xf0] }
  0x2d   : > { %753 = vmatmul.bf16.vlgmr.msra.gmra.mxu1 %v1200_v26  ;;  %793 = vmatmul.bf16.vlgmr.msra.gmra.mxu3 %v1264_v27  ;;  %v1307_v26 = vld [vmem:[%s1589_s22 + $0xe0] sm:$0xf]  ;;  %v1417_v27 = vld [vmem:[%s1589_s22 + $0xe4] sm:$0xf0]  ;;  %v1244_v32 = vor.u32 %v1401_v25, %v1243_v24 }
  0x2e   : > { %v1308_v33 = vor.u32 %v1417_v27, %v1307_v26 }
  0x3c   : > { %669 = vmatmul.bf16.gmra.mxu0 %v1204_v36  ;;  %709 = vmatmul.bf16.gmra.mxu2 %v1268_v37  ;;  %v1502_v36 = vmov 0.0   ;;  %v1251_v37 = vld [vmem:[%s1589_s22 + $0x70] sm:$0xf] }
  0x3d   : > { %758 = vmatmul.bf16.gmra.mxu1 %v1208_v38  ;;  %798 = vmatmul.bf16.gmra.mxu3 %v1272_v39  ;;  %272 = vst.msk [vmem:[#allocation2] sm:$0xff] %vm271_vm0, %v1502_v36  ;;  %v1403_v38 = vld [vmem:[%s1589_s22 + $0x74] sm:$0xf0]  ;;  %v1315_v39 = vld [vmem:[%s1589_s22 + $0xf0] sm:$0xf] }
  0x3e   : > { %273 = vst.msk [vmem:[#allocation2 + $0x8] sm:$0xff] %vm271_vm0, %v1502_v36  ;;  %v1252_v45 = vor.u32 %v1403_v38, %v1251_v37  ;;  %v1316_v46 = vor.u32 %v1419_v40, %v1315_v39 }
  0x3f   : > { %274 = vst.msk [vmem:[#allocation2 + $0x10] sm:$0xff] %vm271_vm0, %v1502_v36 }
  0x40   : > { %275 = vst.msk [vmem:[#allocation2 + $0x18] sm:$0xff] %vm271_vm0, %v1502_v36 }
  0x41   : > { %276 = vst.msk [vmem:[#allocation2 + $0x20] sm:$0xff] %vm271_vm0, %v1502_v36 }
  0x42   : > { %277 = vst.msk [vmem:[#allocation2 + $0x28] sm:$0xff] %vm271_vm0, %v1502_v36 }
  0x43   : > { %278 = vst.msk [vmem:[#allocation2 + $0x30] sm:$0xff] %vm271_vm0, %v1502_v36 }
  0x44   : > { %279 = vst.msk [vmem:[#allocation2 + $0x38] sm:$0xff] %vm271_vm0, %v1502_v36 }
  0x45   : > { %280 = vst.msk [vmem:[#allocation2 + $0x40] sm:$0xff] %vm271_vm0, %v1502_v36  ;;  %v305_v59 = vld [vmem:[#allocation2 + $0x8] sm:$0xff] }
  0x46   : > { %281 = vst.msk [vmem:[#allocation2 + $0x48] sm:$0xff] %vm271_vm0, %v1502_v36 }
  0x47   : > { %282 = vst.msk [vmem:[#allocation2 + $0x50] sm:$0xff] %vm271_vm0, %v1502_v36  ;;  %v307_v27 = vld [vmem:[#allocation2 + $0x18] sm:$0xff] }
  0x48   : > { %283 = vst.msk [vmem:[#allocation2 + $0x58] sm:$0xff] %vm271_vm0, %v1502_v36 }
  0x49   : > { %284 = vst.msk [vmem:[#allocation2 + $0x60] sm:$0xff] %vm271_vm0, %v1502_v36 }
  0x4a   : > { %285 = vst.msk [vmem:[#allocation2 + $0x68] sm:$0xff] %vm271_vm0, %v1502_v36 }
  0x4b   : > { %286 = vst.msk [vmem:[#allocation2 + $0x70] sm:$0xff] %vm271_vm0, %v1502_v36 }
  0x4c   : > { %674 = vmatmul.bf16.gmra.mxu0 %v1212_v48  ;;  %714 = vmatmul.bf16.gmra.mxu2 %v1276_v49  ;;  %v1320_v48 = vor.u32 %v1418_v43, %v1317_v44  ;;  %287 = vst.msk [vmem:[#allocation2 + $0x78] sm:$0xff] %vm271_vm0, %v1502_v36 }
  0x4d   : > { %763 = vmatmul.bf16.gmra.mxu1 %v1216_v50  ;;  %803 = vmatmul.bf16.gmra.mxu3 %v1280_v51  ;;  %288 = vst.msk [vmem:[#allocation2 + $0x80] sm:$0xff] %vm271_vm0, %v1502_v36  ;;  %v304_v50 = vld [vmem:[#allocation2] sm:$0xff] }
  0x4e   : > { %289 = vst.msk [vmem:[#allocation2 + $0x88] sm:$0xff] %vm271_vm0, %v1502_v36 }
  0x4f   : > { %290 = vst.msk [vmem:[#allocation2 + $0x90] sm:$0xff] %vm271_vm0, %v1502_v36 }
  0x50   : > { %291 = vst.msk [vmem:[#allocation2 + $0x98] sm:$0xff] %vm271_vm0, %v1502_v36 }
  0x51   : > { %292 = vst.msk [vmem:[#allocation2 + $0xa0] sm:$0xff] %vm271_vm0, %v1502_v36 }
  0x52   : > { %293 = vst.msk [vmem:[#allocation2 + $0xa8] sm:$0xff] %vm271_vm0, %v1502_v36 }
  0x53   : > { %294 = vst.msk [vmem:[#allocation2 + $0xb0] sm:$0xff] %vm271_vm0, %v1502_v36 }
  0x54   : > { %295 = vst.msk [vmem:[#allocation2 + $0xb8] sm:$0xff] %vm271_vm0, %v1502_v36  ;;  %v320_v55 = vld [vmem:[#allocation2 + $0x80] sm:$0xff] }
  0x55   : > { %296 = vst.msk [vmem:[#allocation2 + $0xc0] sm:$0xff] %vm271_vm0, %v1502_v36  ;;  %v321_v4 = vld [vmem:[#allocation2 + $0x88] sm:$0xff] }
  0x56   : > { %297 = vst.msk [vmem:[#allocation2 + $0xc8] sm:$0xff] %vm271_vm0, %v1502_v36 }
  0x57   : > { %298 = vst.msk [vmem:[#allocation2 + $0xd0] sm:$0xff] %vm271_vm0, %v1502_v36  ;;  %v323_v39 = vld [vmem:[#allocation2 + $0x98] sm:$0xff] }
  0x58   : > { %299 = vst.msk [vmem:[#allocation2 + $0xd8] sm:$0xff] %vm271_vm0, %v1502_v36 }
  0x59   : > { %300 = vst.msk [vmem:[#allocation2 + $0xe0] sm:$0xff] %vm271_vm0, %v1502_v36 }
  0x5a   : > { %301 = vst.msk [vmem:[#allocation2 + $0xe8] sm:$0xff] %vm271_vm0, %v1502_v36 }
  0x5b   : > { %302 = vst.msk [vmem:[#allocation2 + $0xf0] sm:$0xff] %vm271_vm0, %v1502_v36 }
  0x5c   : > { %679 = vmatmul.bf16.gmra.mxu0 %v1220_v60  ;;  %719 = vmatmul.bf16.gmra.mxu2 %v1284_v61  ;;  %303 = vst.msk [vmem:[#allocation2 + $0xf8] sm:$0xff] %vm271_vm0, %v1502_v36  ;;  %v1700_v61 = vld [vmem:[%s1846_s2] ss:$0 sm:$0xff] }
  0x5d   : > { %768 = vmatmul.bf16.gmra.mxu1 %v1224_v62  ;;  %808 = vmatmul.bf16.gmra.mxu3 %v1288_v63 }
  0x6c   : > { %684 = vmatmul.bf16.gmra.mxu0 %v1228_v8  ;;  %724 = vmatmul.bf16.gmra.mxu2 %v1292_v9  ;;  %v306_v9 = vld [vmem:[#allocation2 + $0x10] sm:$0xff] }
  0x6d   : > { %773 = vmatmul.bf16.gmra.mxu1 %v1232_v10  ;;  %813 = vmatmul.bf16.gmra.mxu3 %v1296_v11 }
  0x7c   : > { %689 = vmatmul.bf16.gmra.mxu0 %v1236_v20  ;;  %729 = vmatmul.bf16.gmra.mxu2 %v1300_v21  ;;  %v322_v21 = vld [vmem:[#allocation2 + $0x90] sm:$0xff] }
  0x7d   : > { %778 = vmatmul.bf16.gmra.mxu1 %v1240_v22  ;;  %818 = vmatmul.bf16.gmra.mxu3 %v1304_v23 }
  0x8c   : > { %694 = vmatmul.bf16.gmra.mxu0 %v1244_v32  ;;  %734 = vmatmul.bf16.gmra.mxu2 %v1308_v33 }
  0x8d   : > { %783 = vmatmul.bf16.gmra.mxu1 %v1248_v34  ;;  %823 = vmatmul.bf16.gmra.mxu3 %v1312_v35 }
  0x9c   : > { %699 = vmatmul.bf16.gmra.mxu0 %v1252_v45  ;;  %739 = vmatmul.bf16.gmra.mxu2 %v1316_v46  ;;  %v308_v45 = vld [vmem:[#allocation2 + $0x20] sm:$0xff] }
  0x9d   : > { %788 = vmatmul.bf16.gmra.mxu1 %v1256_v47  ;;  %828 = vmatmul.bf16.gmra.mxu3 %v1320_v48 }
  0xa9   : > { %v665_v49 = vpop.f32.mrf.mxu0 }
  0xaa   : > { %v754_v51 = vpop.f32.mrf.mxu1 }
  0xab   : > { %v755_v52 = vadd.f32 %v754_v51, %v665_v49 }
  0xad   : > { %v834_v53 = vadd.f32 %v755_v52, %v304_v50 }
  0xaf   : > { %867 = vst.msk [vmem:[#allocation2] sm:$0xff] %vm271_vm0, %v834_v53  ;;  %v705_v54 = vpop.f32.mrf.mxu2 }
  0xb0   : > { %v794_v56 = vpop.f32.mrf.mxu3 }
  0xb1   : > { %v795_v57 = vadd.f32 %v794_v56, %v705_v54  ;;  %v667_v58 = vpop.f32.mrf.mxu0 }
  0xb2   : > { %v756_v60 = vpop.f32.mrf.mxu1 }
  0xb3   : > { %v850_v62 = vadd.f32 %v795_v57, %v320_v55  ;;  %v757_v63 = vadd.f32 %v756_v60, %v667_v58  ;;  %v324_v57 = vld [vmem:[#allocation2 + $0xa0] sm:$0xff] }
  0xb5   : > { %883 = vst.msk [vmem:[#allocation2 + $0x80] sm:$0xff] %vm271_vm0, %v850_v62  ;;  %v835_v0 = vadd.f32 %v757_v63, %v305_v59 }
  0xb6   : > { %v902_v1 = vld [vmem:[#allocation2] sm:$0xff] }
  0xb7   : > { %v938_v2 = vadd.f32 %v1700_v61, %v902_v1  ;;  %868 = vst.msk [vmem:[#allocation2 + $0x8] sm:$0xff] %vm271_vm0, %v835_v0  ;;  %v707_v3 = vpop.f32.mrf.mxu2  ;;  %v309_v0 = vld [vmem:[#allocation2 + $0x28] sm:$0xff] }
  0xb8   : > { %v796_v5 = vpop.f32.mrf.mxu3 }
  0xb9   : > { %v970_v6 = vmax.f32 %v938_v2, 0.0  ;;  %v797_v7 = vadd.f32 %v796_v5, %v707_v3  ;;  %v670_v8 = vpop.f32.mrf.mxu0 }
  0xba   : > { %v759_v10 = vpop.f32.mrf.mxu1 }
  0xbb   : > { %v1002_v11 = vpack.c.bf16 %v970_v6, %v970_v6  ;;  %v851_v12 = vadd.f32 %v797_v7, %v321_v4  ;;  %v760_v13 = vadd.f32 %v759_v10, %v670_v8 }
  0xbc   : > { %v918_v14 = vld [vmem:[#allocation2 + $0x80] sm:$0xff] }
  0xbd   : > { %1035 = vst.msk [vmem:[%s1709_s8] sm:$0xf] %vm1034_vm1, %v1002_v11  ;;  %v954_v15 = vadd.f32 %v1700_v61, %v918_v14  ;;  %v836_v16 = vadd.f32 %v760_v13, %v306_v9 }
  0xbe   : > { %v903_v17 = vld [vmem:[#allocation2 + $0x8] sm:$0xff]  ;;  %884 = vst.msk [vmem:[#allocation2 + $0x88] sm:$0xff] %vm271_vm0, %v851_v12 }
  0xbf   : > { %v986_v18 = vmax.f32 %v954_v15, 0.0  ;;  %v939_v19 = vadd.f32 %v1700_v61, %v903_v17  ;;  %869 = vst.msk [vmem:[#allocation2 + $0x10] sm:$0xff] %vm271_vm0, %v836_v16  ;;  %v710_v20 = vpop.f32.mrf.mxu2  ;;  %v325_v12 = vld [vmem:[#allocation2 + $0xa8] sm:$0xff] }
  0xc0   : > { %v799_v22 = vpop.f32.mrf.mxu3 }
  0xc1   : > { %v1018_v23 = vpack.c.bf16 %v986_v18, %v986_v18  ;;  %v971_v24 = vmax.f32 %v939_v19, 0.0  ;;  %v800_v25 = vadd.f32 %v799_v22, %v710_v20  ;;  %v672_v26 = vpop.f32.mrf.mxu0  ;;  %v310_v18 = vld [vmem:[#allocation2 + $0x30] sm:$0xff] }
  0xc2   : > { %v761_v28 = vpop.f32.mrf.mxu1 }
  0xc3   : > { %1051 = vst.msk [vmem:[%s1709_s8 + $0x40] sm:$0xf] %vm1034_vm1, %v1018_v23  ;;  %v1003_v29 = vpack.c.bf16 %v971_v24, %v971_v24  ;;  %v852_v30 = vadd.f32 %v800_v25, %v322_v21  ;;  %v762_v31 = vadd.f32 %v761_v28, %v672_v26 }
  0xc5   : > { %1036 = vst.msk [vmem:[%s1709_s8 + $0x4] sm:$0xf] %vm1034_vm1, %v1003_v29  ;;  %v919_v32 = vld [vmem:[#allocation2 + $0x88] sm:$0xff]  ;;  %v837_v33 = vadd.f32 %v762_v31, %v307_v27 }
  0xc6   : > { %v955_v34 = vadd.f32 %v1700_v61, %v919_v32  ;;  %v904_v35 = vld [vmem:[#allocation2 + $0x10] sm:$0xff]  ;;  %885 = vst.msk [vmem:[#allocation2 + $0x90] sm:$0xff] %vm271_vm0, %v852_v30 }
  0xc7   : > { %v940_v36 = vadd.f32 %v1700_v61, %v904_v35  ;;  %870 = vst.msk [vmem:[#allocation2 + $0x18] sm:$0xff] %vm271_vm0, %v837_v33  ;;  %v712_v37 = vpop.f32.mrf.mxu2  ;;  %v326_v30 = vld [vmem:[#allocation2 + $0xb0] sm:$0xff] }
  0xc8   : > { %v987_v38 = vmax.f32 %v955_v34, 0.0  ;;  %v801_v40 = vpop.f32.mrf.mxu3 }
  0xc9   : > { %v972_v41 = vmax.f32 %v940_v36, 0.0  ;;  %v802_v42 = vadd.f32 %v801_v40, %v712_v37  ;;  %v675_v43 = vpop.f32.mrf.mxu0  ;;  %v311_v36 = vld [vmem:[#allocation2 + $0x38] sm:$0xff] }
  0xca   : > { %v1019_v44 = vpack.c.bf16 %v987_v38, %v987_v38  ;;  %v764_v46 = vpop.f32.mrf.mxu1 }
  0xcb   : > { %v1004_v47 = vpack.c.bf16 %v972_v41, %v972_v41  ;;  %v853_v48 = vadd.f32 %v802_v42, %v323_v39  ;;  %v765_v49 = vadd.f32 %v764_v46, %v675_v43 }
  0xcc   : > { %1052 = vst.msk [vmem:[%s1709_s8 + $0x44] sm:$0xf] %vm1034_vm1, %v1019_v44 }
  0xcd   : > { %1037 = vst.msk [vmem:[%s1709_s8 + $0x8] sm:$0xf] %vm1034_vm1, %v1004_v47  ;;  %v920_v50 = vld [vmem:[#allocation2 + $0x90] sm:$0xff]  ;;  %v838_v51 = vadd.f32 %v765_v49, %v308_v45 }
  0xce   : > { %v956_v52 = vadd.f32 %v1700_v61, %v920_v50  ;;  %v905_v53 = vld [vmem:[#allocation2 + $0x18] sm:$0xff]  ;;  %886 = vst.msk [vmem:[#allocation2 + $0x98] sm:$0xff] %vm271_vm0, %v853_v48 }
  0xcf   : > { %v941_v54 = vadd.f32 %v1700_v61, %v905_v53  ;;  %871 = vst.msk [vmem:[#allocation2 + $0x20] sm:$0xff] %vm271_vm0, %v838_v51  ;;  %v715_v55 = vpop.f32.mrf.mxu2  ;;  %v327_v48 = vld [vmem:[#allocation2 + $0xb8] sm:$0xff] }
  0xd0   : > { %v988_v56 = vmax.f32 %v956_v52, 0.0  ;;  %v804_v58 = vpop.f32.mrf.mxu3 }
  0xd1   : > { %v973_v59 = vmax.f32 %v941_v54, 0.0  ;;  %v805_v60 = vadd.f32 %v804_v58, %v715_v55  ;;  %v677_v62 = vpop.f32.mrf.mxu0  ;;  %v312_v54 = vld [vmem:[#allocation2 + $0x40] sm:$0xff] }
  0xd2   : > { %v1020_v63 = vpack.c.bf16 %v988_v56, %v988_v56  ;;  %v766_v1 = vpop.f32.mrf.mxu1 }
  0xd3   : > { %v1005_v2 = vpack.c.bf16 %v973_v59, %v973_v59  ;;  %v854_v3 = vadd.f32 %v805_v60, %v324_v57  ;;  %v767_v4 = vadd.f32 %v766_v1, %v677_v62 }
  0xd4   : > { %1053 = vst.msk [vmem:[%s1709_s8 + $0x48] sm:$0xf] %vm1034_vm1, %v1020_v63 }
  0xd5   : > { %1038 = vst.msk [vmem:[%s1709_s8 + $0xc] sm:$0xf] %vm1034_vm1, %v1005_v2  ;;  %v921_v5 = vld [vmem:[#allocation2 + $0x98] sm:$0xff]  ;;  %v839_v6 = vadd.f32 %v767_v4, %v309_v0 }
  0xd6   : > { %v957_v7 = vadd.f32 %v1700_v61, %v921_v5  ;;  %v906_v8 = vld [vmem:[#allocation2 + $0x20] sm:$0xff]  ;;  %887 = vst.msk [vmem:[#allocation2 + $0xa0] sm:$0xff] %vm271_vm0, %v854_v3 }
  0xd7   : > { %v942_v9 = vadd.f32 %v1700_v61, %v906_v8  ;;  %872 = vst.msk [vmem:[#allocation2 + $0x28] sm:$0xff] %vm271_vm0, %v839_v6  ;;  %v717_v10 = vpop.f32.mrf.mxu2  ;;  %v328_v3 = vld [vmem:[#allocation2 + $0xc0] sm:$0xff] }
  0xd8   : > { %v989_v11 = vmax.f32 %v957_v7, 0.0  ;;  %v806_v13 = vpop.f32.mrf.mxu3 }
  0xd9   : > { %v974_v14 = vmax.f32 %v942_v9, 0.0  ;;  %v807_v15 = vadd.f32 %v806_v13, %v717_v10  ;;  %v680_v16 = vpop.f32.mrf.mxu0  ;;  %v313_v9 = vld [vmem:[#allocation2 + $0x48] sm:$0xff] }
  0xda   : > { %v1021_v17 = vpack.c.bf16 %v989_v11, %v989_v11  ;;  %v769_v19 = vpop.f32.mrf.mxu1 }
  0xdb   : > { %v1006_v20 = vpack.c.bf16 %v974_v14, %v974_v14  ;;  %v855_v21 = vadd.f32 %v807_v15, %v325_v12  ;;  %v770_v22 = vadd.f32 %v769_v19, %v680_v16 }
  0xdc   : > { %1054 = vst.msk [vmem:[%s1709_s8 + $0x4c] sm:$0xf] %vm1034_vm1, %v1021_v17 }
  0xdd   : > { %1039 = vst.msk [vmem:[%s1709_s8 + $0x10] sm:$0xf] %vm1034_vm1, %v1006_v20  ;;  %v922_v23 = vld [vmem:[#allocation2 + $0xa0] sm:$0xff]  ;;  %v840_v24 = vadd.f32 %v770_v22, %v310_v18 }
  0xde   : > { %v958_v25 = vadd.f32 %v1700_v61, %v922_v23  ;;  %v907_v26 = vld [vmem:[#allocation2 + $0x28] sm:$0xff]  ;;  %888 = vst.msk [vmem:[#allocation2 + $0xa8] sm:$0xff] %vm271_vm0, %v855_v21 }
  0xdf   : > { %v943_v27 = vadd.f32 %v1700_v61, %v907_v26  ;;  %873 = vst.msk [vmem:[#allocation2 + $0x30] sm:$0xff] %vm271_vm0, %v840_v24  ;;  %v720_v28 = vpop.f32.mrf.mxu2  ;;  %v329_v21 = vld [vmem:[#allocation2 + $0xc8] sm:$0xff] }
  0xe0   : > { %v990_v29 = vmax.f32 %v958_v25, 0.0  ;;  %v809_v31 = vpop.f32.mrf.mxu3 }
  0xe1   : > { %v975_v32 = vmax.f32 %v943_v27, 0.0  ;;  %v810_v33 = vadd.f32 %v809_v31, %v720_v28  ;;  %v682_v34 = vpop.f32.mrf.mxu0  ;;  %v314_v27 = vld [vmem:[#allocation2 + $0x50] sm:$0xff] }
  0xe2   : > { %v1022_v35 = vpack.c.bf16 %v990_v29, %v990_v29  ;;  %v771_v37 = vpop.f32.mrf.mxu1 }
  0xe3   : > { %v1007_v38 = vpack.c.bf16 %v975_v32, %v975_v32  ;;  %v856_v39 = vadd.f32 %v810_v33, %v326_v30  ;;  %v772_v40 = vadd.f32 %v771_v37, %v682_v34 }
  0xe4   : > { %1055 = vst.msk [vmem:[%s1709_s8 + $0x50] sm:$0xf] %vm1034_vm1, %v1022_v35 }
  0xe5   : > { %1040 = vst.msk [vmem:[%s1709_s8 + $0x14] sm:$0xf] %vm1034_vm1, %v1007_v38  ;;  %v923_v41 = vld [vmem:[#allocation2 + $0xa8] sm:$0xff]  ;;  %v841_v42 = vadd.f32 %v772_v40, %v311_v36 }
  0xe6   : > { %v959_v43 = vadd.f32 %v1700_v61, %v923_v41  ;;  %v908_v44 = vld [vmem:[#allocation2 + $0x30] sm:$0xff]  ;;  %889 = vst.msk [vmem:[#allocation2 + $0xb0] sm:$0xff] %vm271_vm0, %v856_v39 }
  0xe7   : > { %v944_v45 = vadd.f32 %v1700_v61, %v908_v44  ;;  %874 = vst.msk [vmem:[#allocation2 + $0x38] sm:$0xff] %vm271_vm0, %v841_v42  ;;  %v722_v46 = vpop.f32.mrf.mxu2  ;;  %v330_v39 = vld [vmem:[#allocation2 + $0xd0] sm:$0xff] }
  0xe8   : > { %v991_v47 = vmax.f32 %v959_v43, 0.0  ;;  %v811_v49 = vpop.f32.mrf.mxu3 }
  0xe9   : > { %v976_v50 = vmax.f32 %v944_v45, 0.0  ;;  %v812_v51 = vadd.f32 %v811_v49, %v722_v46  ;;  %v685_v52 = vpop.f32.mrf.mxu0  ;;  %v315_v45 = vld [vmem:[#allocation2 + $0x58] sm:$0xff] }
  0xea   : > { %v1023_v53 = vpack.c.bf16 %v991_v47, %v991_v47  ;;  %v774_v55 = vpop.f32.mrf.mxu1 }
  0xeb   : > { %v1008_v56 = vpack.c.bf16 %v976_v50, %v976_v50  ;;  %v857_v57 = vadd.f32 %v812_v51, %v327_v48  ;;  %v775_v58 = vadd.f32 %v774_v55, %v685_v52 }
  0xec   : > { %1056 = vst.msk [vmem:[%s1709_s8 + $0x54] sm:$0xf] %vm1034_vm1, %v1023_v53 }
  0xed   : > { %1041 = vst.msk [vmem:[%s1709_s8 + $0x18] sm:$0xf] %vm1034_vm1, %v1008_v56  ;;  %v924_v59 = vld [vmem:[#allocation2 + $0xb0] sm:$0xff]  ;;  %v842_v60 = vadd.f32 %v775_v58, %v312_v54 }
  0xee   : > { %v960_v62 = vadd.f32 %v1700_v61, %v924_v59  ;;  %v909_v63 = vld [vmem:[#allocation2 + $0x38] sm:$0xff]  ;;  %890 = vst.msk [vmem:[#allocation2 + $0xb8] sm:$0xff] %vm271_vm0, %v857_v57 }
  0xef   : > { %v945_v0 = vadd.f32 %v1700_v61, %v909_v63  ;;  %875 = vst.msk [vmem:[#allocation2 + $0x40] sm:$0xff] %vm271_vm0, %v842_v60  ;;  %v725_v1 = vpop.f32.mrf.mxu2  ;;  %v331_v57 = vld [vmem:[#allocation2 + $0xd8] sm:$0xff] }
  0xf0   : > { %v992_v2 = vmax.f32 %v960_v62, 0.0  ;;  %v814_v4 = vpop.f32.mrf.mxu3 }
  0xf1   : > { %v977_v5 = vmax.f32 %v945_v0, 0.0  ;;  %v815_v6 = vadd.f32 %v814_v4, %v725_v1  ;;  %v687_v7 = vpop.f32.mrf.mxu0  ;;  %v316_v0 = vld [vmem:[#allocation2 + $0x60] sm:$0xff] }
  0xf2   : > { %v1024_v8 = vpack.c.bf16 %v992_v2, %v992_v2  ;;  %v776_v10 = vpop.f32.mrf.mxu1 }
  0xf3   : > { %v1009_v11 = vpack.c.bf16 %v977_v5, %v977_v5  ;;  %v858_v12 = vadd.f32 %v815_v6, %v328_v3  ;;  %v777_v13 = vadd.f32 %v776_v10, %v687_v7 }
  0xf4   : > { %1057 = vst.msk [vmem:[%s1709_s8 + $0x58] sm:$0xf] %vm1034_vm1, %v1024_v8 }
  0xf5   : > { %1042 = vst.msk [vmem:[%s1709_s8 + $0x1c] sm:$0xf] %vm1034_vm1, %v1009_v11  ;;  %v925_v14 = vld [vmem:[#allocation2 + $0xb8] sm:$0xff]  ;;  %v843_v15 = vadd.f32 %v777_v13, %v313_v9 }
  0xf6   : > { %v961_v16 = vadd.f32 %v1700_v61, %v925_v14  ;;  %v910_v17 = vld [vmem:[#allocation2 + $0x40] sm:$0xff]  ;;  %891 = vst.msk [vmem:[#allocation2 + $0xc0] sm:$0xff] %vm271_vm0, %v858_v12 }
  0xf7   : > { %v946_v18 = vadd.f32 %v1700_v61, %v910_v17  ;;  %876 = vst.msk [vmem:[#allocation2 + $0x48] sm:$0xff] %vm271_vm0, %v843_v15  ;;  %v727_v19 = vpop.f32.mrf.mxu2  ;;  %v332_v12 = vld [vmem:[#allocation2 + $0xe0] sm:$0xff] }
  0xf8   : > { %v993_v20 = vmax.f32 %v961_v16, 0.0  ;;  %v816_v22 = vpop.f32.mrf.mxu3 }
  0xf9   : > { %v978_v23 = vmax.f32 %v946_v18, 0.0  ;;  %v817_v24 = vadd.f32 %v816_v22, %v727_v19  ;;  %v690_v25 = vpop.f32.mrf.mxu0  ;;  %v317_v18 = vld [vmem:[#allocation2 + $0x68] sm:$0xff] }
  0xfa   : > { %v1025_v26 = vpack.c.bf16 %v993_v20, %v993_v20  ;;  %v779_v28 = vpop.f32.mrf.mxu1 }
  0xfb   : > { %v1010_v29 = vpack.c.bf16 %v978_v23, %v978_v23  ;;  %v859_v30 = vadd.f32 %v817_v24, %v329_v21  ;;  %v780_v31 = vadd.f32 %v779_v28, %v690_v25 }
  0xfc   : > { %1058 = vst.msk [vmem:[%s1709_s8 + $0x5c] sm:$0xf] %vm1034_vm1, %v1025_v26 }
  0xfd   : > { %1043 = vst.msk [vmem:[%s1709_s8 + $0x20] sm:$0xf] %vm1034_vm1, %v1010_v29  ;;  %v926_v32 = vld [vmem:[#allocation2 + $0xc0] sm:$0xff]  ;;  %v844_v33 = vadd.f32 %v780_v31, %v314_v27 }
  0xfe   : > { %v962_v34 = vadd.f32 %v1700_v61, %v926_v32  ;;  %v911_v35 = vld [vmem:[#allocation2 + $0x48] sm:$0xff]  ;;  %892 = vst.msk [vmem:[#allocation2 + $0xc8] sm:$0xff] %vm271_vm0, %v859_v30 }
  0xff   : > { %v947_v36 = vadd.f32 %v1700_v61, %v911_v35  ;;  %877 = vst.msk [vmem:[#allocation2 + $0x50] sm:$0xff] %vm271_vm0, %v844_v33  ;;  %v730_v37 = vpop.f32.mrf.mxu2  ;;  %v333_v30 = vld [vmem:[#allocation2 + $0xe8] sm:$0xff] }
 0x100   : > { %v994_v38 = vmax.f32 %v962_v34, 0.0  ;;  %v819_v40 = vpop.f32.mrf.mxu3 }
 0x101   : > { %v979_v41 = vmax.f32 %v947_v36, 0.0  ;;  %v820_v42 = vadd.f32 %v819_v40, %v730_v37  ;;  %v692_v43 = vpop.f32.mrf.mxu0  ;;  %v318_v36 = vld [vmem:[#allocation2 + $0x70] sm:$0xff] }
 0x102   : > { %v1026_v44 = vpack.c.bf16 %v994_v38, %v994_v38  ;;  %v781_v46 = vpop.f32.mrf.mxu1 }
 0x103   : > { %v1011_v47 = vpack.c.bf16 %v979_v41, %v979_v41  ;;  %v860_v48 = vadd.f32 %v820_v42, %v330_v39  ;;  %v782_v49 = vadd.f32 %v781_v46, %v692_v43 }
 0x104   : > { %1059 = vst.msk [vmem:[%s1709_s8 + $0x60] sm:$0xf] %vm1034_vm1, %v1026_v44 }
 0x105   : > { %1044 = vst.msk [vmem:[%s1709_s8 + $0x24] sm:$0xf] %vm1034_vm1, %v1011_v47  ;;  %v927_v50 = vld [vmem:[#allocation2 + $0xc8] sm:$0xff]  ;;  %v845_v51 = vadd.f32 %v782_v49, %v315_v45 }
 0x106   : > { %v963_v52 = vadd.f32 %v1700_v61, %v927_v50  ;;  %v912_v53 = vld [vmem:[#allocation2 + $0x50] sm:$0xff]  ;;  %893 = vst.msk [vmem:[#allocation2 + $0xd0] sm:$0xff] %vm271_vm0, %v860_v48 }
 0x107   : > { %v948_v54 = vadd.f32 %v1700_v61, %v912_v53  ;;  %878 = vst.msk [vmem:[#allocation2 + $0x58] sm:$0xff] %vm271_vm0, %v845_v51  ;;  %v732_v55 = vpop.f32.mrf.mxu2  ;;  %v334_v48 = vld [vmem:[#allocation2 + $0xf0] sm:$0xff] }
 0x108   : > { %v995_v56 = vmax.f32 %v963_v52, 0.0  ;;  %v821_v58 = vpop.f32.mrf.mxu3 }
 0x109   : > { %v980_v59 = vmax.f32 %v948_v54, 0.0  ;;  %v822_v60 = vadd.f32 %v821_v58, %v732_v55  ;;  %v695_v62 = vpop.f32.mrf.mxu0  ;;  %v319_v54 = vld [vmem:[#allocation2 + $0x78] sm:$0xff] }
 0x10a   : > { %v1027_v63 = vpack.c.bf16 %v995_v56, %v995_v56  ;;  %v784_v1 = vpop.f32.mrf.mxu1 }
 0x10b   : > { %v1012_v2 = vpack.c.bf16 %v980_v59, %v980_v59  ;;  %v861_v3 = vadd.f32 %v822_v60, %v331_v57  ;;  %v785_v4 = vadd.f32 %v784_v1, %v695_v62 }
 0x10c   : > { %1060 = vst.msk [vmem:[%s1709_s8 + $0x64] sm:$0xf] %vm1034_vm1, %v1027_v63 }
 0x10d   : > { %1045 = vst.msk [vmem:[%s1709_s8 + $0x28] sm:$0xf] %vm1034_vm1, %v1012_v2  ;;  %v928_v5 = vld [vmem:[#allocation2 + $0xd0] sm:$0xff]  ;;  %v846_v6 = vadd.f32 %v785_v4, %v316_v0 }
 0x10e   : > { %v964_v7 = vadd.f32 %v1700_v61, %v928_v5  ;;  %v913_v8 = vld [vmem:[#allocation2 + $0x58] sm:$0xff]  ;;  %894 = vst.msk [vmem:[#allocation2 + $0xd8] sm:$0xff] %vm271_vm0, %v861_v3 }
 0x10f   : > { %v949_v9 = vadd.f32 %v1700_v61, %v913_v8  ;;  %879 = vst.msk [vmem:[#allocation2 + $0x60] sm:$0xff] %vm271_vm0, %v846_v6  ;;  %v735_v10 = vpop.f32.mrf.mxu2  ;;  %v335_v3 = vld [vmem:[#allocation2 + $0xf8] sm:$0xff] }
 0x110   : > { %v996_v11 = vmax.f32 %v964_v7, 0.0  ;;  %v824_v13 = vpop.f32.mrf.mxu3 }
 0x111   : > { %v981_v14 = vmax.f32 %v949_v9, 0.0  ;;  %v825_v15 = vadd.f32 %v824_v13, %v735_v10  ;;  %v697_v16 = vpop.f32.mrf.mxu0 }
 0x112   : > { %v1028_v17 = vpack.c.bf16 %v996_v11, %v996_v11  ;;  %v786_v19 = vpop.f32.mrf.mxu1 }
 0x113   : > { %v1013_v20 = vpack.c.bf16 %v981_v14, %v981_v14  ;;  %v862_v21 = vadd.f32 %v825_v15, %v332_v12  ;;  %v787_v22 = vadd.f32 %v786_v19, %v697_v16 }
 0x114   : > { %1061 = vst.msk [vmem:[%s1709_s8 + $0x68] sm:$0xf] %vm1034_vm1, %v1028_v17 }
 0x115   : > { %1046 = vst.msk [vmem:[%s1709_s8 + $0x2c] sm:$0xf] %vm1034_vm1, %v1013_v20  ;;  %v929_v23 = vld [vmem:[#allocation2 + $0xd8] sm:$0xff]  ;;  %v847_v24 = vadd.f32 %v787_v22, %v317_v18 }
 0x116   : > { %v965_v25 = vadd.f32 %v1700_v61, %v929_v23  ;;  %v914_v26 = vld [vmem:[#allocation2 + $0x60] sm:$0xff]  ;;  %895 = vst.msk [vmem:[#allocation2 + $0xe0] sm:$0xff] %vm271_vm0, %v862_v21 }
 0x117   : > { %v950_v27 = vadd.f32 %v1700_v61, %v914_v26  ;;  %880 = vst.msk [vmem:[#allocation2 + $0x68] sm:$0xff] %vm271_vm0, %v847_v24  ;;  %v737_v28 = vpop.f32.mrf.mxu2 }
 0x118   : > { %v997_v29 = vmax.f32 %v965_v25, 0.0  ;;  %v826_v31 = vpop.f32.mrf.mxu3 }
 0x119   : > { %v982_v32 = vmax.f32 %v950_v27, 0.0  ;;  %v827_v33 = vadd.f32 %v826_v31, %v737_v28  ;;  %v700_v34 = vpop.f32.mrf.mxu0 }
 0x11a   : > { %v1029_v35 = vpack.c.bf16 %v997_v29, %v997_v29  ;;  %v789_v37 = vpop.f32.mrf.mxu1 }
 0x11b   : > { %v1014_v38 = vpack.c.bf16 %v982_v32, %v982_v32  ;;  %v863_v39 = vadd.f32 %v827_v33, %v333_v30  ;;  %v790_v40 = vadd.f32 %v789_v37, %v700_v34 }
 0x11c   : > { %1062 = vst.msk [vmem:[%s1709_s8 + $0x6c] sm:$0xf] %vm1034_vm1, %v1029_v35 }
 0x11d   : > { %1047 = vst.msk [vmem:[%s1709_s8 + $0x30] sm:$0xf] %vm1034_vm1, %v1014_v38  ;;  %v930_v41 = vld [vmem:[#allocation2 + $0xe0] sm:$0xff]  ;;  %v848_v42 = vadd.f32 %v790_v40, %v318_v36 }
 0x11e   : > { %v966_v43 = vadd.f32 %v1700_v61, %v930_v41  ;;  %v915_v44 = vld [vmem:[#allocation2 + $0x68] sm:$0xff]  ;;  %896 = vst.msk [vmem:[#allocation2 + $0xe8] sm:$0xff] %vm271_vm0, %v863_v39 }
 0x11f   : > { %v951_v45 = vadd.f32 %v1700_v61, %v915_v44  ;;  %881 = vst.msk [vmem:[#allocation2 + $0x70] sm:$0xff] %vm271_vm0, %v848_v42  ;;  %v740_v46 = vpop.f32.mrf.mxu2 }
 0x120   : > { %v998_v47 = vmax.f32 %v966_v43, 0.0  ;;  %v829_v49 = vpop.f32.mrf.mxu3 }
 0x121   : > { %v983_v50 = vmax.f32 %v951_v45, 0.0  ;;  %v830_v51 = vadd.f32 %v829_v49, %v740_v46  ;;  %v702_v52 = vpop.f32.mrf.mxu0 }
 0x122   : > { %v1030_v53 = vpack.c.bf16 %v998_v47, %v998_v47  ;;  %v791_v55 = vpop.f32.mrf.mxu1 }
 0x123   : > { %v1015_v56 = vpack.c.bf16 %v983_v50, %v983_v50  ;;  %v864_v57 = vadd.f32 %v830_v51, %v334_v48  ;;  %v792_v58 = vadd.f32 %v791_v55, %v702_v52 }
 0x124   : > { %1063 = vst.msk [vmem:[%s1709_s8 + $0x70] sm:$0xf] %vm1034_vm1, %v1030_v53 }
 0x125   : > { %1048 = vst.msk [vmem:[%s1709_s8 + $0x34] sm:$0xf] %vm1034_vm1, %v1015_v56  ;;  %v931_v59 = vld [vmem:[#allocation2 + $0xe8] sm:$0xff]  ;;  %v849_v60 = vadd.f32 %v792_v58, %v319_v54 }
 0x126   : > { %v967_v62 = vadd.f32 %v1700_v61, %v931_v59  ;;  %v916_v63 = vld [vmem:[#allocation2 + $0x70] sm:$0xff]  ;;  %897 = vst.msk [vmem:[#allocation2 + $0xf0] sm:$0xff] %vm271_vm0, %v864_v57 }
 0x127   : > { %v952_v0 = vadd.f32 %v1700_v61, %v916_v63  ;;  %882 = vst.msk [vmem:[#allocation2 + $0x78] sm:$0xff] %vm271_vm0, %v849_v60  ;;  %v742_v1 = vpop.f32.mrf.mxu2 }
 0x128   : > { %v999_v2 = vmax.f32 %v967_v62, 0.0  ;;  %v831_v4 = vpop.f32.mrf.mxu3 }
 0x129   : > { %v984_v5 = vmax.f32 %v952_v0, 0.0  ;;  %v832_v6 = vadd.f32 %v831_v4, %v742_v1 }
 0x12a   : > { %v1031_v7 = vpack.c.bf16 %v999_v2, %v999_v2 }
 0x12b   : > { %v1016_v8 = vpack.c.bf16 %v984_v5, %v984_v5  ;;  %v865_v9 = vadd.f32 %v832_v6, %v335_v3 }
 0x12c   : > { %1064 = vst.msk [vmem:[%s1709_s8 + $0x74] sm:$0xf] %vm1034_vm1, %v1031_v7 }
 0x12d   : > { %1049 = vst.msk [vmem:[%s1709_s8 + $0x38] sm:$0xf] %vm1034_vm1, %v1016_v8  ;;  %v932_v10 = vld [vmem:[#allocation2 + $0xf0] sm:$0xff] }
 0x12e   : > { %v968_v11 = vadd.f32 %v1700_v61, %v932_v10  ;;  %v917_v12 = vld [vmem:[#allocation2 + $0x78] sm:$0xff]  ;;  %898 = vst.msk [vmem:[#allocation2 + $0xf8] sm:$0xff] %vm271_vm0, %v865_v9 }
 0x12f   : > { %v953_v13 = vadd.f32 %v1700_v61, %v917_v12 }
 0x130   : > { %v1000_v14 = vmax.f32 %v968_v11, 0.0 }
 0x131   : > { %v985_v15 = vmax.f32 %v953_v13, 0.0 }
 0x132   : > { %v1032_v16 = vpack.c.bf16 %v1000_v14, %v1000_v14 }
 0x133   : > { %v1017_v17 = vpack.c.bf16 %v985_v15, %v985_v15 }
 0x134   : > { %1065 = vst.msk [vmem:[%s1709_s8 + $0x78] sm:$0xf] %vm1034_vm1, %v1032_v16 }
 0x135   : > { %1050 = vst.msk [vmem:[%s1709_s8 + $0x3c] sm:$0xf] %vm1034_vm1, %v1017_v17  ;;  %v933_v18 = vld [vmem:[#allocation2 + $0xf8] sm:$0xff] }
 0x136   : > { %v969_v19 = vadd.f32 %v1700_v61, %v933_v18 }
 0x138   : > { %v1001_v20 = vmax.f32 %v969_v19, 0.0 }
 0x13a   : > { %v1033_v21 = vpack.c.bf16 %v1001_v20, %v1001_v20 }
 0x13c   : > { %1066 = vst.msk [vmem:[%s1709_s8 + $0x7c] sm:$0xf] %vm1034_vm1, %v1033_v21 }
 0x13d PF: > { %s13_s14 = sadd.s32 1, %s1500_s14   ;;  %s1848_s12 = smov %s1496_s13 }
 0x13e   : > { %p10_p5 = scmp.ge.s32.totalorder %s13_s14, 4   ;;  %s1849_s13 = smov %s1851_s15 }
 0x140   :  { %12 = sbr.rel (!%p10_p5) target bundleno = 2 (0x2), region = 76 }

// kernel: _lambda_.5
= control target key start
LH: loop header
LB: loop body
LE: loop exit
PB: predicated region body
PF: predicated region fallthrough
CT: control target
= control target key end

     0   :  { %s1323_s15 = smov 0   ;;  %s1325_s16 = smov 0   ;;  %s1576_s0 = inlined_call_operand.vmem [shape: bf16[512,32], index: 0, kind: input, shape index: {}]   ;;  %s1577_s1 = inlined_call_operand.vmem [shape: bf16[32,256], index: 1, kind: input, shape index: {}]   ;;  %s1578_s2 = inlined_call_operand.vmem [shape: bf16[512,256], index: 2, kind: input, shape index: {}]   ;;  %s1579_s3 = inlined_call_operand.vmem [shape: f32[1,256], index: 3, kind: input, shape index: {}]   ;;  %s1580_s4 = inlined_call_operand.vmem [shape: bf16[512,256], index: 4, kind: output, shape index: {}]  }
   0x1   :  { %s1327_s17 = smov 0  }
   0x2 LB: > { %s26_s18 = sadd.s32 1, %s1292_s16  ;;  %p1101_p0 = scmp.ge.s32.totalorder %s1296_s17, 1  ;;  %s1296_s17 = sphi %s1327_s17, %s14_s17   ;;  %s1292_s16 = sphi %s1325_s16, %s1582_s16   ;;  %s1288_s15 = sphi %s1323_s15, %s1581_s15  }
   0x3   : > { %p28_p1 = scmp.ge.s32.totalorder %s26_s18, 2  ;;  %p217_p2 = scmp.lt.s32.totalorder %s1296_s17, 3 }
   0x5   : > { %s1584_s18 = smov (%p28_p1, %s26_s18), 0  ;;  %p218_p3 = pnand %p1101_p0, %p217_p2 }
   0x6   : > { %s1102_s9 = sshll.u32 (!%p218_p3), %s1288_s15, 5 }
   0x7   : > { %221 = sbr.rel (%p218_p3) target bundleno = 284 (0x11c), region = 36  ;;  %p268_p4 = scmp.lt.s32.totalorder (!%p218_p3), %s1102_s9, 63 }
   0xc   : > { %v1184_v0 = vld [vmem:[%s1577_s1 + $0x10] sm:$0xf]  ;;  %v1245_v1 = vld [vmem:[%s1577_s1 + $0x14] sm:$0xf0]  ;;  %v1244_v2 = vld [vmem:[%s1577_s1 + $0x14] sm:$0xf] }
   0xd   : > { %v1185_v3 = vor.u32 %v1245_v1, %v1184_v0  ;;  %v1186_v4 = vld [vmem:[%s1577_s1 + $0x18] sm:$0xf0]  ;;  %v1176_v5 = vld [vmem:[%s1577_s1] sm:$0xf]  ;;  %v1243_v6 = vld [vmem:[%s1577_s1 + $0x4] sm:$0xf0] }
   0xe   : > { %v1189_v7 = vor.u32 %v1244_v2, %v1186_v4  ;;  %v1242_v8 = vld [vmem:[%s1577_s1 + $0x4] sm:$0xf]  ;;  %v1178_v9 = vld [vmem:[%s1577_s1 + $0x8] sm:$0xf0]  ;;  %v1177_v10 = vor.u32 %v1243_v6, %v1176_v5  ;;  %s1586_s9 = smov (!%p268_p4, %s1102_s9), 63  ;;  %vm541_vm0 = vcmask 261120  }
   0xf   : > { %596 = vmatpush.bf16.msra.mxu0 %v1185_v3  ;;  %1246 = vmatpush.bf16.msra.mxu2 %v1185_v3  ;;  %v1181_v11 = vor.u32 %v1242_v8, %v1178_v9  ;;  %s1103_s10 = sshll.u32 %s1586_s9, 2  ;;  %s1224_s14 = sshll.u32 %s1586_s9, 3  ;;  %v768_v29 = vld [vmem:[%s1579_s3] sm:$0x3] }
  0x10   : > { %685 = vmatpush.bf16.msra.mxu1 %v1189_v7  ;;  %1248 = vmatpush.bf16.msra.mxu3 %v1189_v7  ;;  %s1371_s13 = scalar_lea.vmem %s1576_s0, %s1103_s10  ;;  %s1425_s20 = scalar_lea.vmem %s1578_s2, %s1224_s14  ;;  %v1431_v32 = vperm.slane %v768_v29, 0  ;;  %v1433_v34 = vperm.slane %v768_v29, 1 }
  0x11   : > { %v1226_v12 = vld [vmem:[%s1371_s13] sm:$0xff]  ;;  %v1227_v14 = vld [vmem:[%s1371_s13 + $0x8] sm:$0xff]  ;;  %v1228_v16 = vld [vmem:[%s1371_s13 + $0x10] sm:$0xff]  ;;  %s1442_s25 = scalar_lea.vmem %s1580_s4, %s1224_s14 }
  0x12   : > { %v1234_v13 = vld [vmem:[%s1371_s13 + $0x40] sm:$0xff]  ;;  %v1235_v15 = vld [vmem:[%s1371_s13 + $0x48] sm:$0xff]  ;;  %v1236_v17 = vld [vmem:[%s1371_s13 + $0x50] sm:$0xff] }
  0x13   : > { %597 = vmatpush.bf16.msra.mxu0 %v1177_v10  ;;  %1247 = vmatpush.bf16.msra.mxu2 %v1177_v10  ;;  %v1229_v18 = vld [vmem:[%s1371_s13 + $0x18] sm:$0xff]  ;;  %v1230_v20 = vld [vmem:[%s1371_s13 + $0x20] sm:$0xff]  ;;  %v1231_v22 = vld [vmem:[%s1371_s13 + $0x28] sm:$0xff] }
  0x14   : > { %686 = vmatpush.bf16.msra.mxu1 %v1181_v11  ;;  %1249 = vmatpush.bf16.msra.mxu3 %v1181_v11  ;;  %v1237_v19 = vld [vmem:[%s1371_s13 + $0x58] sm:$0xff]  ;;  %v1238_v21 = vld [vmem:[%s1371_s13 + $0x60] sm:$0xff]  ;;  %v1239_v23 = vld [vmem:[%s1371_s13 + $0x68] sm:$0xff] }
  0x15   : > { %v1232_v24 = vld [vmem:[%s1371_s13 + $0x30] sm:$0xff]  ;;  %v1233_v26 = vld [vmem:[%s1371_s13 + $0x38] sm:$0xff]  ;;  %v345_v28 = vld [vmem:[%s1425_s20] sm:$0xff] }
  0x16   : > { %1190 = vmatmul.msk.bf16.vlgmr.msra.gmra.mxu0 %vm541_vm0, %v1226_v12  ;;  %1198 = vmatmul.msk.bf16.vlgmr.msra.gmra.mxu2 %vm541_vm0, %v1234_v13  ;;  %v1240_v25 = vld [vmem:[%s1371_s13 + $0x70] sm:$0xff]  ;;  %v1241_v27 = vld [vmem:[%s1371_s13 + $0x78] sm:$0xff]  ;;  %v377_v30 = vunpack.c.l.bf16 %v345_v28  ;;  %v378_v31 = vunpack.c.h.bf16 %v345_v28  ;;  %v361_v35 = vld [vmem:[%s1425_s20 + $0x80] sm:$0xff] }
  0x17   : > { %1206 = vmatmul.msk.bf16.vlgmr.msra.gmra.mxu1 %vm541_vm0, %v1226_v12  ;;  %1214 = vmatmul.msk.bf16.vlgmr.msra.gmra.mxu3 %vm541_vm0, %v1234_v13  ;;  %v346_v39 = vld [vmem:[%s1425_s20 + $0x8] sm:$0xff]  ;;  %v409_v41 = vunpack.c.l.bf16 %v361_v35  ;;  %v410_v43 = vunpack.c.h.bf16 %v361_v35  ;;  %v347_v60 = vld [vmem:[%s1425_s20 + $0x10] sm:$0xff] }
  0x18   : > { %v379_v45 = vunpack.c.l.bf16 %v346_v39  ;;  %v380_v48 = vunpack.c.h.bf16 %v346_v39  ;;  %v362_v54 = vld [vmem:[%s1425_s20 + $0x88] sm:$0xff]  ;;  %v381_v4 = vunpack.c.l.bf16 %v347_v60  ;;  %v382_v8 = vunpack.c.h.bf16 %v347_v60 }
  0x19   : > { %v411_v63 = vunpack.c.l.bf16 %v362_v54  ;;  %v412_v2 = vunpack.c.h.bf16 %v362_v54 }
  0x26   : > { %1191 = vmatmul.msk.bf16.gmra.mxu0 %vm541_vm0, %v1227_v14  ;;  %1199 = vmatmul.msk.bf16.gmra.mxu2 %vm541_vm0, %v1235_v15 }
  0x27   : > { %1207 = vmatmul.msk.bf16.gmra.mxu1 %vm541_vm0, %v1227_v14  ;;  %1215 = vmatmul.msk.bf16.gmra.mxu3 %vm541_vm0, %v1235_v15  ;;  %v363_v14 = vld [vmem:[%s1425_s20 + $0x90] sm:$0xff] }
  0x36   : > { %1192 = vmatmul.msk.bf16.gmra.mxu0 %vm541_vm0, %v1228_v16  ;;  %1200 = vmatmul.msk.bf16.gmra.mxu2 %vm541_vm0, %v1236_v17 }
  0x37   : > { %1208 = vmatmul.msk.bf16.gmra.mxu1 %vm541_vm0, %v1228_v16  ;;  %1216 = vmatmul.msk.bf16.gmra.mxu3 %vm541_vm0, %v1236_v17 }
  0x46   : > { %1193 = vmatmul.msk.bf16.gmra.mxu0 %vm541_vm0, %v1229_v18  ;;  %1201 = vmatmul.msk.bf16.gmra.mxu2 %vm541_vm0, %v1237_v19 }
  0x47   : > { %1209 = vmatmul.msk.bf16.gmra.mxu1 %vm541_vm0, %v1229_v18  ;;  %1217 = vmatmul.msk.bf16.gmra.mxu3 %vm541_vm0, %v1237_v19 }
  0x56   : > { %1194 = vmatmul.msk.bf16.gmra.mxu0 %vm541_vm0, %v1230_v20  ;;  %1202 = vmatmul.msk.bf16.gmra.mxu2 %vm541_vm0, %v1238_v21 }
  0x57   : > { %1210 = vmatmul.msk.bf16.gmra.mxu1 %vm541_vm0, %v1230_v20  ;;  %1218 = vmatmul.msk.bf16.gmra.mxu3 %vm541_vm0, %v1238_v21  ;;  %v348_v20 = vld [vmem:[%s1425_s20 + $0x18] sm:$0xff] }
  0x58   : > { %v383_v28 = vunpack.c.l.bf16 %v348_v20 }
  0x66   : > { %1195 = vmatmul.msk.bf16.gmra.mxu0 %vm541_vm0, %v1231_v22  ;;  %1203 = vmatmul.msk.bf16.gmra.mxu2 %vm541_vm0, %v1239_v23 }
  0x67   : > { %1211 = vmatmul.msk.bf16.gmra.mxu1 %vm541_vm0, %v1231_v22  ;;  %1219 = vmatmul.msk.bf16.gmra.mxu3 %vm541_vm0, %v1239_v23  ;;  %v413_v23 = vunpack.c.l.bf16 %v363_v14 }
  0x76   : > { %1196 = vmatmul.msk.bf16.gmra.mxu0 %vm541_vm0, %v1232_v24  ;;  %1204 = vmatmul.msk.bf16.gmra.mxu2 %vm541_vm0, %v1240_v25 }
  0x77   : > { %1212 = vmatmul.msk.bf16.gmra.mxu1 %vm541_vm0, %v1232_v24  ;;  %1220 = vmatmul.msk.bf16.gmra.mxu3 %vm541_vm0, %v1240_v25 }
  0x86   : > { %1197 = vmatmul.msk.bf16.gmra.mxu0 %vm541_vm0, %v1233_v26  ;;  %1205 = vmatmul.msk.bf16.gmra.mxu2 %vm541_vm0, %v1241_v27 }
  0x87   : > { %1213 = vmatmul.msk.bf16.gmra.mxu1 %vm541_vm0, %v1233_v26  ;;  %1221 = vmatmul.msk.bf16.gmra.mxu3 %vm541_vm0, %v1241_v27  ;;  %v414_v26 = vunpack.c.h.bf16 %v363_v14 }
  0x93   : > { %v599_v33 = vpop.f32.mrf.mxu0 }
  0x94   : > { %v600_v36 = vadd.f32 %v599_v33, %v377_v30  ;;  %v688_v37 = vpop.f32.mrf.mxu1  ;;  %v384_v33 = vunpack.c.h.bf16 %v348_v20 }
  0x95   : > { %v689_v38 = vadd.f32 %v688_v37, %v378_v31 }
  0x96   : > { %v774_v40 = vadd.f32 %v1431_v32, %v600_v36 }
  0x97   : > { %v775_v42 = vadd.f32 %v1433_v34, %v689_v38 }
  0x98   : > { %v838_v44 = vmax.f32 %v774_v40, 0.0  ;;  %v364_v40 = vld [vmem:[%s1425_s20 + $0x98] sm:$0xff] }
  0x99   : > { %v839_v46 = vmax.f32 %v775_v42, 0.0  ;;  %v639_v47 = vpop.f32.mrf.mxu2 }
  0x9a   : > { %v640_v49 = vadd.f32 %v639_v47, %v409_v41  ;;  %v728_v50 = vpop.f32.mrf.mxu3 }
  0x9b   : > { %v902_v51 = vpack.c.bf16 %v839_v46, %v838_v44  ;;  %v729_v52 = vadd.f32 %v728_v50, %v410_v43  ;;  %v601_v53 = vpop.f32.mrf.mxu0  ;;  %v349_v46 = vld [vmem:[%s1425_s20 + $0x20] sm:$0xff] }
  0x9c   : > { %v806_v55 = vadd.f32 %v1431_v32, %v640_v49  ;;  %v602_v56 = vadd.f32 %v601_v53, %v379_v45  ;;  %v690_v57 = vpop.f32.mrf.mxu1  ;;  %v415_v49 = vunpack.c.l.bf16 %v364_v40  ;;  %v385_v54 = vunpack.c.l.bf16 %v349_v46 }
  0x9d   : > { %934 = vst [vmem:[%s1442_s25] sm:$0xff] %v902_v51  ;;  %v807_v58 = vadd.f32 %v1433_v34, %v729_v52  ;;  %v691_v59 = vadd.f32 %v690_v57, %v380_v48  ;;  %v416_v52 = vunpack.c.h.bf16 %v364_v40 }
  0x9e   : > { %v870_v61 = vmax.f32 %v806_v55, 0.0  ;;  %v776_v62 = vadd.f32 %v1431_v32, %v602_v56 }
  0x9f   : > { %v871_v0 = vmax.f32 %v807_v58, 0.0  ;;  %v777_v1 = vadd.f32 %v1433_v34, %v691_v59  ;;  %v386_v58 = vunpack.c.h.bf16 %v349_v46 }
  0xa0   : > { %v840_v3 = vmax.f32 %v776_v62, 0.0 }
  0xa1   : > { %v918_v5 = vpack.c.bf16 %v871_v0, %v870_v61  ;;  %v841_v6 = vmax.f32 %v777_v1, 0.0  ;;  %v641_v7 = vpop.f32.mrf.mxu2  ;;  %v365_v0 = vld [vmem:[%s1425_s20 + $0xa0] sm:$0xff] }
  0xa2   : > { %v642_v9 = vadd.f32 %v641_v7, %v411_v63  ;;  %v730_v10 = vpop.f32.mrf.mxu3 }
  0xa3   : > { %950 = vst [vmem:[%s1442_s25 + $0x80] sm:$0xff] %v918_v5  ;;  %v903_v11 = vpack.c.bf16 %v841_v6, %v840_v3  ;;  %v731_v12 = vadd.f32 %v730_v10, %v412_v2  ;;  %v604_v13 = vpop.f32.mrf.mxu0  ;;  %v350_v6 = vld [vmem:[%s1425_s20 + $0x28] sm:$0xff] }
  0xa4   : > { %v808_v15 = vadd.f32 %v1431_v32, %v642_v9  ;;  %v605_v16 = vadd.f32 %v604_v13, %v381_v4  ;;  %v693_v17 = vpop.f32.mrf.mxu1  ;;  %v417_v9 = vunpack.c.l.bf16 %v365_v0  ;;  %v387_v14 = vunpack.c.l.bf16 %v350_v6 }
  0xa5   : > { %935 = vst [vmem:[%s1442_s25 + $0x8] sm:$0xff] %v903_v11  ;;  %v809_v18 = vadd.f32 %v1433_v34, %v731_v12  ;;  %v694_v19 = vadd.f32 %v693_v17, %v382_v8  ;;  %v418_v12 = vunpack.c.h.bf16 %v365_v0 }
  0xa6   : > { %v872_v21 = vmax.f32 %v808_v15, 0.0  ;;  %v778_v22 = vadd.f32 %v1431_v32, %v605_v16 }
  0xa7   : > { %v873_v24 = vmax.f32 %v809_v18, 0.0  ;;  %v779_v25 = vadd.f32 %v1433_v34, %v694_v19  ;;  %v388_v18 = vunpack.c.h.bf16 %v350_v6 }
  0xa8   : > { %v842_v27 = vmax.f32 %v778_v22, 0.0 }
  0xa9   : > { %v919_v29 = vpack.c.bf16 %v873_v24, %v872_v21  ;;  %v843_v30 = vmax.f32 %v779_v25, 0.0  ;;  %v644_v31 = vpop.f32.mrf.mxu2  ;;  %v366_v24 = vld [vmem:[%s1425_s20 + $0xa8] sm:$0xff] }
  0xaa   : > { %v645_v35 = vadd.f32 %v644_v31, %v413_v23  ;;  %v733_v36 = vpop.f32.mrf.mxu3 }
  0xab   : > { %951 = vst [vmem:[%s1442_s25 + $0x88] sm:$0xff] %v919_v29  ;;  %v904_v37 = vpack.c.bf16 %v843_v30, %v842_v27  ;;  %v734_v38 = vadd.f32 %v733_v36, %v414_v26  ;;  %v606_v39 = vpop.f32.mrf.mxu0  ;;  %v351_v30 = vld [vmem:[%s1425_s20 + $0x30] sm:$0xff] }
  0xac   : > { %v810_v41 = vadd.f32 %v1431_v32, %v645_v35  ;;  %v607_v42 = vadd.f32 %v606_v39, %v383_v28  ;;  %v695_v43 = vpop.f32.mrf.mxu1  ;;  %v419_v35 = vunpack.c.l.bf16 %v366_v24  ;;  %v389_v40 = vunpack.c.l.bf16 %v351_v30 }
  0xad   : > { %936 = vst [vmem:[%s1442_s25 + $0x10] sm:$0xff] %v904_v37  ;;  %v811_v44 = vadd.f32 %v1433_v34, %v734_v38  ;;  %v696_v45 = vadd.f32 %v695_v43, %v384_v33  ;;  %v420_v38 = vunpack.c.h.bf16 %v366_v24 }
  0xae   : > { %v874_v47 = vmax.f32 %v810_v41, 0.0  ;;  %v780_v48 = vadd.f32 %v1431_v32, %v607_v42 }
  0xaf   : > { %v875_v50 = vmax.f32 %v811_v44, 0.0  ;;  %v781_v51 = vadd.f32 %v1433_v34, %v696_v45  ;;  %v390_v44 = vunpack.c.h.bf16 %v351_v30 }
  0xb0   : > { %v844_v53 = vmax.f32 %v780_v48, 0.0 }
  0xb1   : > { %v920_v55 = vpack.c.bf16 %v875_v50, %v874_v47  ;;  %v845_v56 = vmax.f32 %v781_v51, 0.0  ;;  %v646_v57 = vpop.f32.mrf.mxu2  ;;  %v367_v50 = vld [vmem:[%s1425_s20 + $0xb0] sm:$0xff] }
  0xb2   : > { %v647_v59 = vadd.f32 %v646_v57, %v415_v49  ;;  %v735_v60 = vpop.f32.mrf.mxu3 }
  0xb3   : > { %952 = vst [vmem:[%s1442_s25 + $0x90] sm:$0xff] %v920_v55  ;;  %v905_v61 = vpack.c.bf16 %v845_v56, %v844_v53  ;;  %v736_v62 = vadd.f32 %v735_v60, %v416_v52  ;;  %v609_v63 = vpop.f32.mrf.mxu0  ;;  %v352_v56 = vld [vmem:[%s1425_s20 + $0x38] sm:$0xff] }
  0xb4   : > { %v812_v1 = vadd.f32 %v1431_v32, %v647_v59  ;;  %v610_v2 = vadd.f32 %v609_v63, %v385_v54  ;;  %v698_v3 = vpop.f32.mrf.mxu1  ;;  %v421_v59 = vunpack.c.l.bf16 %v367_v50  ;;  %v391_v0 = vunpack.c.l.bf16 %v352_v56 }
  0xb5   : > { %937 = vst [vmem:[%s1442_s25 + $0x18] sm:$0xff] %v905_v61  ;;  %v813_v4 = vadd.f32 %v1433_v34, %v736_v62  ;;  %v699_v5 = vadd.f32 %v698_v3, %v386_v58  ;;  %v422_v62 = vunpack.c.h.bf16 %v367_v50 }
  0xb6   : > { %v876_v7 = vmax.f32 %v812_v1, 0.0  ;;  %v782_v8 = vadd.f32 %v1431_v32, %v610_v2 }
  0xb7   : > { %v877_v10 = vmax.f32 %v813_v4, 0.0  ;;  %v783_v11 = vadd.f32 %v1433_v34, %v699_v5  ;;  %v392_v4 = vunpack.c.h.bf16 %v352_v56 }
  0xb8   : > { %v846_v13 = vmax.f32 %v782_v8, 0.0 }
  0xb9   : > { %v921_v15 = vpack.c.bf16 %v877_v10, %v876_v7  ;;  %v847_v16 = vmax.f32 %v783_v11, 0.0  ;;  %v649_v17 = vpop.f32.mrf.mxu2  ;;  %v368_v10 = vld [vmem:[%s1425_s20 + $0xb8] sm:$0xff] }
  0xba   : > { %v650_v19 = vadd.f32 %v649_v17, %v417_v9  ;;  %v738_v20 = vpop.f32.mrf.mxu3 }
  0xbb   : > { %953 = vst [vmem:[%s1442_s25 + $0x98] sm:$0xff] %v921_v15  ;;  %v906_v21 = vpack.c.bf16 %v847_v16, %v846_v13  ;;  %v739_v22 = vadd.f32 %v738_v20, %v418_v12  ;;  %v611_v23 = vpop.f32.mrf.mxu0  ;;  %v353_v16 = vld [vmem:[%s1425_s20 + $0x40] sm:$0xff] }
  0xbc   : > { %v814_v25 = vadd.f32 %v1431_v32, %v650_v19  ;;  %v612_v26 = vadd.f32 %v611_v23, %v387_v14  ;;  %v700_v27 = vpop.f32.mrf.mxu1  ;;  %v423_v19 = vunpack.c.l.bf16 %v368_v10  ;;  %v393_v24 = vunpack.c.l.bf16 %v353_v16 }
  0xbd   : > { %938 = vst [vmem:[%s1442_s25 + $0x20] sm:$0xff] %v906_v21  ;;  %v815_v28 = vadd.f32 %v1433_v34, %v739_v22  ;;  %v701_v29 = vadd.f32 %v700_v27, %v388_v18  ;;  %v424_v22 = vunpack.c.h.bf16 %v368_v10 }
  0xbe   : > { %v878_v31 = vmax.f32 %v814_v25, 0.0  ;;  %v784_v33 = vadd.f32 %v1431_v32, %v612_v26 }
  0xbf   : > { %v879_v36 = vmax.f32 %v815_v28, 0.0  ;;  %v785_v37 = vadd.f32 %v1433_v34, %v701_v29  ;;  %v394_v28 = vunpack.c.h.bf16 %v353_v16 }
  0xc0   : > { %v848_v39 = vmax.f32 %v784_v33, 0.0 }
  0xc1   : > { %v922_v41 = vpack.c.bf16 %v879_v36, %v878_v31  ;;  %v849_v42 = vmax.f32 %v785_v37, 0.0  ;;  %v651_v43 = vpop.f32.mrf.mxu2  ;;  %v369_v36 = vld [vmem:[%s1425_s20 + $0xc0] sm:$0xff] }
  0xc2   : > { %v652_v45 = vadd.f32 %v651_v43, %v419_v35  ;;  %v740_v46 = vpop.f32.mrf.mxu3 }
  0xc3   : > { %954 = vst [vmem:[%s1442_s25 + $0xa0] sm:$0xff] %v922_v41  ;;  %v907_v47 = vpack.c.bf16 %v849_v42, %v848_v39  ;;  %v741_v48 = vadd.f32 %v740_v46, %v420_v38  ;;  %v614_v49 = vpop.f32.mrf.mxu0  ;;  %v354_v42 = vld [vmem:[%s1425_s20 + $0x48] sm:$0xff] }
  0xc4   : > { %v816_v51 = vadd.f32 %v1431_v32, %v652_v45  ;;  %v615_v52 = vadd.f32 %v614_v49, %v389_v40  ;;  %v703_v53 = vpop.f32.mrf.mxu1  ;;  %v425_v45 = vunpack.c.l.bf16 %v369_v36  ;;  %v395_v50 = vunpack.c.l.bf16 %v354_v42 }
  0xc5   : > { %939 = vst [vmem:[%s1442_s25 + $0x28] sm:$0xff] %v907_v47  ;;  %v817_v54 = vadd.f32 %v1433_v34, %v741_v48  ;;  %v704_v55 = vadd.f32 %v703_v53, %v390_v44  ;;  %v426_v48 = vunpack.c.h.bf16 %v369_v36 }
  0xc6   : > { %v880_v57 = vmax.f32 %v816_v51, 0.0  ;;  %v786_v58 = vadd.f32 %v1431_v32, %v615_v52 }
  0xc7   : > { %v881_v60 = vmax.f32 %v817_v54, 0.0  ;;  %v787_v61 = vadd.f32 %v1433_v34, %v704_v55  ;;  %v396_v54 = vunpack.c.h.bf16 %v354_v42 }
  0xc8   : > { %v850_v63 = vmax.f32 %v786_v58, 0.0 }
  0xc9   : > { %v923_v1 = vpack.c.bf16 %v881_v60, %v880_v57  ;;  %v851_v2 = vmax.f32 %v787_v61, 0.0  ;;  %v654_v3 = vpop.f32.mrf.mxu2  ;;  %v370_v60 = vld [vmem:[%s1425_s20 + $0xc8] sm:$0xff] }
  0xca   : > { %v655_v5 = vadd.f32 %v654_v3, %v421_v59  ;;  %v743_v6 = vpop.f32.mrf.mxu3 }
  0xcb   : > { %955 = vst [vmem:[%s1442_s25 + $0xa8] sm:$0xff] %v923_v1  ;;  %v908_v7 = vpack.c.bf16 %v851_v2, %v850_v63  ;;  %v744_v8 = vadd.f32 %v743_v6, %v422_v62  ;;  %v616_v9 = vpop.f32.mrf.mxu0  ;;  %v355_v2 = vld [vmem:[%s1425_s20 + $0x50] sm:$0xff] }
  0xcc   : > { %v818_v11 = vadd.f32 %v1431_v32, %v655_v5  ;;  %v617_v12 = vadd.f32 %v616_v9, %v391_v0  ;;  %v705_v13 = vpop.f32.mrf.mxu1  ;;  %v427_v5 = vunpack.c.l.bf16 %v370_v60  ;;  %v397_v10 = vunpack.c.l.bf16 %v355_v2 }
  0xcd   : > { %940 = vst [vmem:[%s1442_s25 + $0x30] sm:$0xff] %v908_v7  ;;  %v819_v14 = vadd.f32 %v1433_v34, %v744_v8  ;;  %v706_v15 = vadd.f32 %v705_v13, %v392_v4  ;;  %v428_v8 = vunpack.c.h.bf16 %v370_v60 }
  0xce   : > { %v882_v17 = vmax.f32 %v818_v11, 0.0  ;;  %v788_v18 = vadd.f32 %v1431_v32, %v617_v12 }
  0xcf   : > { %v883_v20 = vmax.f32 %v819_v14, 0.0  ;;  %v789_v21 = vadd.f32 %v1433_v34, %v706_v15  ;;  %v398_v14 = vunpack.c.h.bf16 %v355_v2 }
  0xd0   : > { %v852_v23 = vmax.f32 %v788_v18, 0.0 }
  0xd1   : > { %v924_v25 = vpack.c.bf16 %v883_v20, %v882_v17  ;;  %v853_v26 = vmax.f32 %v789_v21, 0.0  ;;  %v656_v27 = vpop.f32.mrf.mxu2  ;;  %v371_v20 = vld [vmem:[%s1425_s20 + $0xd0] sm:$0xff] }
  0xd2   : > { %v657_v29 = vadd.f32 %v656_v27, %v423_v19  ;;  %v745_v30 = vpop.f32.mrf.mxu3 }
  0xd3   : > { %956 = vst [vmem:[%s1442_s25 + $0xb0] sm:$0xff] %v924_v25  ;;  %v909_v31 = vpack.c.bf16 %v853_v26, %v852_v23  ;;  %v746_v33 = vadd.f32 %v745_v30, %v424_v22  ;;  %v619_v35 = vpop.f32.mrf.mxu0  ;;  %v356_v26 = vld [vmem:[%s1425_s20 + $0x58] sm:$0xff] }
  0xd4   : > { %v820_v37 = vadd.f32 %v1431_v32, %v657_v29  ;;  %v620_v38 = vadd.f32 %v619_v35, %v393_v24  ;;  %v708_v39 = vpop.f32.mrf.mxu1  ;;  %v429_v29 = vunpack.c.l.bf16 %v371_v20  ;;  %v399_v36 = vunpack.c.l.bf16 %v356_v26 }
  0xd5   : > { %941 = vst [vmem:[%s1442_s25 + $0x38] sm:$0xff] %v909_v31  ;;  %v821_v40 = vadd.f32 %v1433_v34, %v746_v33  ;;  %v709_v41 = vadd.f32 %v708_v39, %v394_v28  ;;  %v430_v33 = vunpack.c.h.bf16 %v371_v20 }
  0xd6   : > { %v884_v43 = vmax.f32 %v820_v37, 0.0  ;;  %v790_v44 = vadd.f32 %v1431_v32, %v620_v38 }
  0xd7   : > { %v885_v46 = vmax.f32 %v821_v40, 0.0  ;;  %v791_v47 = vadd.f32 %v1433_v34, %v709_v41  ;;  %v400_v40 = vunpack.c.h.bf16 %v356_v26 }
  0xd8   : > { %v854_v49 = vmax.f32 %v790_v44, 0.0 }
  0xd9   : > { %v925_v51 = vpack.c.bf16 %v885_v46, %v884_v43  ;;  %v855_v52 = vmax.f32 %v791_v47, 0.0  ;;  %v659_v53 = vpop.f32.mrf.mxu2  ;;  %v372_v46 = vld [vmem:[%s1425_s20 + $0xd8] sm:$0xff] }
  0xda   : > { %v660_v55 = vadd.f32 %v659_v53, %v425_v45  ;;  %v748_v56 = vpop.f32.mrf.mxu3 }
  0xdb   : > { %957 = vst [vmem:[%s1442_s25 + $0xb8] sm:$0xff] %v925_v51  ;;  %v910_v57 = vpack.c.bf16 %v855_v52, %v854_v49  ;;  %v749_v58 = vadd.f32 %v748_v56, %v426_v48  ;;  %v621_v59 = vpop.f32.mrf.mxu0  ;;  %v357_v52 = vld [vmem:[%s1425_s20 + $0x60] sm:$0xff] }
  0xdc   : > { %v822_v61 = vadd.f32 %v1431_v32, %v660_v55  ;;  %v622_v62 = vadd.f32 %v621_v59, %v395_v50  ;;  %v710_v63 = vpop.f32.mrf.mxu1  ;;  %v431_v55 = vunpack.c.l.bf16 %v372_v46  ;;  %v401_v60 = vunpack.c.l.bf16 %v357_v52 }
  0xdd   : > { %942 = vst [vmem:[%s1442_s25 + $0x40] sm:$0xff] %v910_v57  ;;  %v823_v0 = vadd.f32 %v1433_v34, %v749_v58  ;;  %v711_v1 = vadd.f32 %v710_v63, %v396_v54  ;;  %v432_v58 = vunpack.c.h.bf16 %v372_v46 }
  0xde   : > { %v886_v3 = vmax.f32 %v822_v61, 0.0  ;;  %v792_v4 = vadd.f32 %v1431_v32, %v622_v62 }
  0xdf   : > { %v887_v6 = vmax.f32 %v823_v0, 0.0  ;;  %v793_v7 = vadd.f32 %v1433_v34, %v711_v1  ;;  %v402_v0 = vunpack.c.h.bf16 %v357_v52 }
  0xe0   : > { %v856_v9 = vmax.f32 %v792_v4, 0.0 }
  0xe1   : > { %v926_v11 = vpack.c.bf16 %v887_v6, %v886_v3  ;;  %v857_v12 = vmax.f32 %v793_v7, 0.0  ;;  %v661_v13 = vpop.f32.mrf.mxu2  ;;  %v373_v6 = vld [vmem:[%s1425_s20 + $0xe0] sm:$0xff] }
  0xe2   : > { %v662_v15 = vadd.f32 %v661_v13, %v427_v5  ;;  %v750_v16 = vpop.f32.mrf.mxu3 }
  0xe3   : > { %958 = vst [vmem:[%s1442_s25 + $0xc0] sm:$0xff] %v926_v11  ;;  %v911_v17 = vpack.c.bf16 %v857_v12, %v856_v9  ;;  %v751_v18 = vadd.f32 %v750_v16, %v428_v8  ;;  %v624_v19 = vpop.f32.mrf.mxu0  ;;  %v358_v12 = vld [vmem:[%s1425_s20 + $0x68] sm:$0xff] }
  0xe4   : > { %v824_v21 = vadd.f32 %v1431_v32, %v662_v15  ;;  %v625_v22 = vadd.f32 %v624_v19, %v397_v10  ;;  %v713_v23 = vpop.f32.mrf.mxu1  ;;  %v433_v15 = vunpack.c.l.bf16 %v373_v6  ;;  %v403_v20 = vunpack.c.l.bf16 %v358_v12 }
  0xe5   : > { %943 = vst [vmem:[%s1442_s25 + $0x48] sm:$0xff] %v911_v17  ;;  %v825_v24 = vadd.f32 %v1433_v34, %v751_v18  ;;  %v714_v25 = vadd.f32 %v713_v23, %v398_v14  ;;  %v434_v18 = vunpack.c.h.bf16 %v373_v6 }
  0xe6   : > { %v888_v27 = vmax.f32 %v824_v21, 0.0  ;;  %v794_v28 = vadd.f32 %v1431_v32, %v625_v22 }
  0xe7   : > { %v889_v30 = vmax.f32 %v825_v24, 0.0  ;;  %v795_v31 = vadd.f32 %v1433_v34, %v714_v25  ;;  %v404_v24 = vunpack.c.h.bf16 %v358_v12 }
  0xe8   : > { %v858_v35 = vmax.f32 %v794_v28, 0.0 }
  0xe9   : > { %v927_v37 = vpack.c.bf16 %v889_v30, %v888_v27  ;;  %v859_v38 = vmax.f32 %v795_v31, 0.0  ;;  %v664_v39 = vpop.f32.mrf.mxu2  ;;  %v374_v30 = vld [vmem:[%s1425_s20 + $0xe8] sm:$0xff] }
  0xea   : > { %v665_v41 = vadd.f32 %v664_v39, %v429_v29  ;;  %v753_v42 = vpop.f32.mrf.mxu3 }
  0xeb   : > { %959 = vst [vmem:[%s1442_s25 + $0xc8] sm:$0xff] %v927_v37  ;;  %v912_v43 = vpack.c.bf16 %v859_v38, %v858_v35  ;;  %v754_v44 = vadd.f32 %v753_v42, %v430_v33  ;;  %v626_v45 = vpop.f32.mrf.mxu0  ;;  %v359_v38 = vld [vmem:[%s1425_s20 + $0x70] sm:$0xff] }
  0xec   : > { %v826_v47 = vadd.f32 %v1431_v32, %v665_v41  ;;  %v627_v48 = vadd.f32 %v626_v45, %v399_v36  ;;  %v715_v49 = vpop.f32.mrf.mxu1  ;;  %v435_v41 = vunpack.c.l.bf16 %v374_v30  ;;  %v405_v46 = vunpack.c.l.bf16 %v359_v38 }
  0xed   : > { %944 = vst [vmem:[%s1442_s25 + $0x50] sm:$0xff] %v912_v43  ;;  %v827_v50 = vadd.f32 %v1433_v34, %v754_v44  ;;  %v716_v51 = vadd.f32 %v715_v49, %v400_v40  ;;  %v436_v44 = vunpack.c.h.bf16 %v374_v30 }
  0xee   : > { %v890_v53 = vmax.f32 %v826_v47, 0.0  ;;  %v796_v54 = vadd.f32 %v1431_v32, %v627_v48 }
  0xef   : > { %v891_v56 = vmax.f32 %v827_v50, 0.0  ;;  %v797_v57 = vadd.f32 %v1433_v34, %v716_v51  ;;  %v406_v50 = vunpack.c.h.bf16 %v359_v38 }
  0xf0   : > { %v860_v59 = vmax.f32 %v796_v54, 0.0 }
  0xf1   : > { %v928_v61 = vpack.c.bf16 %v891_v56, %v890_v53  ;;  %v861_v62 = vmax.f32 %v797_v57, 0.0  ;;  %v666_v63 = vpop.f32.mrf.mxu2  ;;  %v375_v56 = vld [vmem:[%s1425_s20 + $0xf0] sm:$0xff] }
  0xf2   : > { %v667_v1 = vadd.f32 %v666_v63, %v431_v55  ;;  %v755_v2 = vpop.f32.mrf.mxu3 }
  0xf3   : > { %960 = vst [vmem:[%s1442_s25 + $0xd0] sm:$0xff] %v928_v61  ;;  %v913_v3 = vpack.c.bf16 %v861_v62, %v860_v59  ;;  %v756_v4 = vadd.f32 %v755_v2, %v432_v58  ;;  %v629_v5 = vpop.f32.mrf.mxu0  ;;  %v360_v62 = vld [vmem:[%s1425_s20 + $0x78] sm:$0xff] }
  0xf4   : > { %v828_v7 = vadd.f32 %v1431_v32, %v667_v1  ;;  %v630_v8 = vadd.f32 %v629_v5, %v401_v60  ;;  %v718_v9 = vpop.f32.mrf.mxu1  ;;  %v437_v1 = vunpack.c.l.bf16 %v375_v56  ;;  %v407_v6 = vunpack.c.l.bf16 %v360_v62 }
  0xf5   : > { %945 = vst [vmem:[%s1442_s25 + $0x58] sm:$0xff] %v913_v3  ;;  %v829_v10 = vadd.f32 %v1433_v34, %v756_v4  ;;  %v719_v11 = vadd.f32 %v718_v9, %v402_v0  ;;  %v438_v4 = vunpack.c.h.bf16 %v375_v56 }
  0xf6   : > { %v892_v13 = vmax.f32 %v828_v7, 0.0  ;;  %v798_v14 = vadd.f32 %v1431_v32, %v630_v8 }
  0xf7   : > { %v893_v16 = vmax.f32 %v829_v10, 0.0  ;;  %v799_v17 = vadd.f32 %v1433_v34, %v719_v11  ;;  %v408_v10 = vunpack.c.h.bf16 %v360_v62 }
  0xf8   : > { %v862_v19 = vmax.f32 %v798_v14, 0.0 }
  0xf9   : > { %v929_v21 = vpack.c.bf16 %v893_v16, %v892_v13  ;;  %v863_v22 = vmax.f32 %v799_v17, 0.0  ;;  %v669_v23 = vpop.f32.mrf.mxu2  ;;  %v376_v16 = vld [vmem:[%s1425_s20 + $0xf8] sm:$0xff] }
  0xfa   : > { %v670_v25 = vadd.f32 %v669_v23, %v433_v15  ;;  %v758_v26 = vpop.f32.mrf.mxu3 }
  0xfb   : > { %961 = vst [vmem:[%s1442_s25 + $0xd8] sm:$0xff] %v929_v21  ;;  %v914_v27 = vpack.c.bf16 %v863_v22, %v862_v19  ;;  %v759_v28 = vadd.f32 %v758_v26, %v434_v18  ;;  %v631_v29 = vpop.f32.mrf.mxu0 }
  0xfc   : > { %v830_v31 = vadd.f32 %v1431_v32, %v670_v25  ;;  %v632_v33 = vadd.f32 %v631_v29, %v403_v20  ;;  %v720_v35 = vpop.f32.mrf.mxu1 }
  0xfd   : > { %946 = vst [vmem:[%s1442_s25 + $0x60] sm:$0xff] %v914_v27  ;;  %v831_v36 = vadd.f32 %v1433_v34, %v759_v28  ;;  %v721_v37 = vadd.f32 %v720_v35, %v404_v24  ;;  %v439_v24 = vunpack.c.l.bf16 %v376_v16  ;;  %v440_v27 = vunpack.c.h.bf16 %v376_v16 }
  0xfe   : > { %v894_v39 = vmax.f32 %v830_v31, 0.0  ;;  %v800_v40 = vadd.f32 %v1431_v32, %v632_v33 }
  0xff   : > { %v895_v42 = vmax.f32 %v831_v36, 0.0  ;;  %v801_v43 = vadd.f32 %v1433_v34, %v721_v37 }
 0x100   : > { %v864_v45 = vmax.f32 %v800_v40, 0.0 }
 0x101   : > { %v930_v47 = vpack.c.bf16 %v895_v42, %v894_v39  ;;  %v865_v48 = vmax.f32 %v801_v43, 0.0  ;;  %v671_v49 = vpop.f32.mrf.mxu2 }
 0x102   : > { %v672_v51 = vadd.f32 %v671_v49, %v435_v41  ;;  %v760_v52 = vpop.f32.mrf.mxu3 }
 0x103   : > { %962 = vst [vmem:[%s1442_s25 + $0xe0] sm:$0xff] %v930_v47  ;;  %v915_v53 = vpack.c.bf16 %v865_v48, %v864_v45  ;;  %v761_v54 = vadd.f32 %v760_v52, %v436_v44  ;;  %v634_v55 = vpop.f32.mrf.mxu0 }
 0x104   : > { %v832_v57 = vadd.f32 %v1431_v32, %v672_v51  ;;  %v635_v58 = vadd.f32 %v634_v55, %v405_v46  ;;  %v723_v59 = vpop.f32.mrf.mxu1 }
 0x105   : > { %947 = vst [vmem:[%s1442_s25 + $0x68] sm:$0xff] %v915_v53  ;;  %v833_v60 = vadd.f32 %v1433_v34, %v761_v54  ;;  %v724_v61 = vadd.f32 %v723_v59, %v406_v50 }
 0x106   : > { %v896_v63 = vmax.f32 %v832_v57, 0.0  ;;  %v802_v0 = vadd.f32 %v1431_v32, %v635_v58 }
 0x107   : > { %v897_v2 = vmax.f32 %v833_v60, 0.0  ;;  %v803_v3 = vadd.f32 %v1433_v34, %v724_v61 }
 0x108   : > { %v866_v5 = vmax.f32 %v802_v0, 0.0 }
 0x109   : > { %v931_v7 = vpack.c.bf16 %v897_v2, %v896_v63  ;;  %v867_v8 = vmax.f32 %v803_v3, 0.0  ;;  %v674_v9 = vpop.f32.mrf.mxu2 }
 0x10a   : > { %v675_v11 = vadd.f32 %v674_v9, %v437_v1  ;;  %v763_v12 = vpop.f32.mrf.mxu3 }
 0x10b   : > { %963 = vst [vmem:[%s1442_s25 + $0xe8] sm:$0xff] %v931_v7  ;;  %v916_v13 = vpack.c.bf16 %v867_v8, %v866_v5  ;;  %v764_v14 = vadd.f32 %v763_v12, %v438_v4  ;;  %v636_v15 = vpop.f32.mrf.mxu0 }
 0x10c   : > { %v834_v17 = vadd.f32 %v1431_v32, %v675_v11  ;;  %v637_v18 = vadd.f32 %v636_v15, %v407_v6  ;;  %v725_v19 = vpop.f32.mrf.mxu1 }
 0x10d   : > { %948 = vst [vmem:[%s1442_s25 + $0x70] sm:$0xff] %v916_v13  ;;  %v835_v20 = vadd.f32 %v1433_v34, %v764_v14  ;;  %v726_v21 = vadd.f32 %v725_v19, %v408_v10 }
 0x10e   : > { %v898_v22 = vmax.f32 %v834_v17, 0.0  ;;  %v804_v23 = vadd.f32 %v1431_v32, %v637_v18 }
 0x10f   : > { %v899_v25 = vmax.f32 %v835_v20, 0.0  ;;  %v805_v26 = vadd.f32 %v1433_v34, %v726_v21 }
 0x110   : > { %v868_v28 = vmax.f32 %v804_v23, 0.0 }
 0x111   : > { %v932_v29 = vpack.c.bf16 %v899_v25, %v898_v22  ;;  %v869_v30 = vmax.f32 %v805_v26, 0.0  ;;  %v676_v31 = vpop.f32.mrf.mxu2 }
 0x112   : > { %v677_v33 = vadd.f32 %v676_v31, %v439_v24  ;;  %v765_v35 = vpop.f32.mrf.mxu3 }
 0x113   : > { %964 = vst [vmem:[%s1442_s25 + $0xf0] sm:$0xff] %v932_v29  ;;  %v917_v36 = vpack.c.bf16 %v869_v30, %v868_v28  ;;  %v766_v37 = vadd.f32 %v765_v35, %v440_v27 }
 0x114   : > { %v836_v38 = vadd.f32 %v1431_v32, %v677_v33 }
 0x115   : > { %949 = vst [vmem:[%s1442_s25 + $0x78] sm:$0xff] %v917_v36  ;;  %v837_v39 = vadd.f32 %v1433_v34, %v766_v37 }
 0x116   : > { %v900_v40 = vmax.f32 %v836_v38, 0.0 }
 0x117   : > { %v901_v41 = vmax.f32 %v837_v39, 0.0 }
 0x119   : > { %v933_v42 = vpack.c.bf16 %v901_v41, %v900_v40 }
 0x11b   : > { %965 = vst [vmem:[%s1442_s25 + $0xf8] sm:$0xff] %v933_v42 }
 0x11c PF: > { %s14_s17 = sadd.s32 1, %s1296_s17   ;;  %s1581_s15 = smov %s1292_s16 }
 0x11d   : > { %p11_p5 = scmp.ge.s32.totalorder %s14_s17, 4   ;;  %s1582_s16 = smov %s1584_s18 }
 0x11f   :  { %13 = sbr.rel (!%p11_p5) target bundleno = 2 (0x2), region = 75 }

// kernel: _lambda_.4
= control target key start
LH: loop header
LB: loop body
LE: loop exit
PB: predicated region body
PF: predicated region fallthrough
CT: control target
= control target key end

     0   :  { %s6035_s12 = smov 0   ;;  %s8012_s0 = inlined_call_operand.vmem [shape: bf16[2,1,342,32], index: 0, kind: input, shape index: {}]   ;;  %s8013_s1 = inlined_call_operand.vmem [shape: bf16[9,32,32], index: 1, kind: input, shape index: {}]   ;;  %s8014_s2 = inlined_call_operand.vmem [shape: f32[1,32], index: 2, kind: input, shape index: {}]   ;;  %s8015_s3 = inlined_call_operand.vmem [shape: bf16[2,16,16,32], index: 3, kind: output, shape index: {}]  }
   0x1 LB: > { %s4843_s13 = sadd.s32 4294967295, %s6013_s12   ;;  %p4847_p0 = scmp.ge.s32.totalorder %s6013_s12, 1  ;;  %s6013_s12 = sphi %s6035_s12, %s13_s12  }
   0x2   : > { %p137_p1 = scmp.lt.s32.totalorder %s6013_s12, 3 }
   0x4   : > { %p138_p2 = pnand %p4847_p0, %p137_p1 }
   0x5   : > { %p161_p3 = scmp.lt.s32.totalorder (!%p138_p2), %s4843_s13, 1 }
   0x6   : > { %141 = sbr.rel (%p138_p2) target bundleno = 843 (0x34b), region = 32 }
   0xb   : > { %v5829_v0 = vld [vmem:[%s8013_s1 + $0x8] sm:$0xff]  ;;  %v5828_v1 = vld [vmem:[%s8013_s1] sm:$0xff]  ;;  %s8023_s13 = smov (!%p161_p3, %s4843_s13), 1  ;;  %v5849_v2 = vld [vmem:[%s8013_s1 + $0x18] sm:$0xff]  ;;  %vm314_vm0 = vcmask 261120   ;;  %vm1196_vm1 = vcmask 1046528  }
   0xc   : > { %5990 = vmatpush.bf16.msra.mxu1 %v5829_v0  ;;  %5991 = vmatpush.bf16.msra.mxu2 %v5829_v0  ;;  %v5869_v3 = vld [vmem:[%s8013_s1 + $0x28] sm:$0xff]  ;;  %s5996_s22 = smul.u32 172, %s8023_s13  ;;  %v5848_v9 = vld [vmem:[%s8013_s1 + $0x10] sm:$0xff]  ;;  %v5868_v10 = vld [vmem:[%s8013_s1 + $0x20] sm:$0xff]  ;;  %vm639_vm2 = vsmask.f32 7424 }
   0xd   : > { %375 = vmatpush.bf16.msra.mxu0 %v5829_v0  ;;  %5992 = vmatpush.bf16.msra.mxu3 %v5829_v0  ;;  %v5909_v4 = vld [vmem:[%s8013_s1 + $0x48] sm:$0xff]  ;;  %v5889_v11 = vld [vmem:[%s8013_s1 + $0x38] sm:$0xff]  ;;  %v5888_v20 = vld [vmem:[%s8013_s1 + $0x30] sm:$0xff]  ;;  %vm2087_vm3 = vsmask.f32 6400  ;;  %vm2666_vm5 = vcmask 1045504  }
   0xe   : > { %s6061_s25 = scalar_lea.vmem %s8012_s0, %s5996_s22  ;;  %v5908_v21 = vld [vmem:[%s8013_s1 + $0x40] sm:$0xff]  ;;  %v5929_v25 = vld [vmem:[%s8013_s1 + $0x58] sm:$0xff]  ;;  %v5949_v26 = vld [vmem:[%s8013_s1 + $0x68] sm:$0xff]  ;;  %vm3557_vm4 = vsmask.f32 5376  ;;  %vm4136_vm6 = vcmask 1044480  }
   0xf   : > { %v5815_v5 = vld [vmem:[%s6061_s25 + $0x28] sm:$0xff]  ;;  %v5820_v6 = vld [vmem:[%s6061_s25 + $0x50] sm:$0xff]  ;;  %v5810_v7 = vld [vmem:[%s6061_s25] sm:$0xff]  ;;  %s5809_s5 = sshll.u32 %s8023_s13, 7  ;;  %vm4561_vm7 = vcmask 257024   ;;  %vm4570_vm8 = vcmask 1042432  }
  0x10   : > { %5993 = vmatpush.bf16.msra.mxu1 %v5828_v1  ;;  %5994 = vmatpush.bf16.msra.mxu2 %v5828_v1  ;;  %v5825_v8 = vld [vmem:[%s6061_s25 + $0x78] sm:$0xff]  ;;  %v5816_v12 = vld [vmem:[%s6061_s25 + $0x30] sm:$0xff]  ;;  %v5811_v14 = vld [vmem:[%s6061_s25 + $0x8] sm:$0xff]  ;;  %s7378_s7 = scalar_lea.vmem %s8015_s3, %s5809_s5  ;;  %vm4571_vm9 = vcmask 1046532   ;;  %vm4589_vm11 = vcmask 1041408   ;;  %vm4590_vm12 = vcmask 1045508  }
  0x11   : > { %376 = vmatpush.bf16.msra.mxu0 %v5828_v1  ;;  %5995 = vmatpush.bf16.msra.mxu3 %v5828_v1  ;;  %v5821_v13 = vld [vmem:[%s6061_s25 + $0x58] sm:$0xff]  ;;  %v5826_v15 = vld [vmem:[%s6061_s25 + $0x80] sm:$0xff]  ;;  %v5812_v18 = vld [vmem:[%s6061_s25 + $0x10] sm:$0xff]  ;;  %vm4608_vm14 = vcmask 1040384   ;;  %vm4609_vm15 = vcmask 1044484  }
  0x12   : > { %v5817_v16 = vld [vmem:[%s6061_s25 + $0x38] sm:$0xff]  ;;  %v5822_v17 = vld [vmem:[%s6061_s25 + $0x60] sm:$0xff]  ;;  %v5827_v19 = vld [vmem:[%s6061_s25 + $0x88] sm:$0xff] }
  0x13   : > { %4936 = vmatmul.msk.bf16.vlgmr.msra.gmra.mxu1 %vm314_vm0, %v5815_v5  ;;  %4941 = vmatmul.msk.bf16.vlgmr.msra.gmra.mxu2 %vm314_vm0, %v5820_v6  ;;  %v5818_v22 = vld [vmem:[%s6061_s25 + $0x40] sm:$0xff]  ;;  %v5823_v23 = vld [vmem:[%s6061_s25 + $0x68] sm:$0xff]  ;;  %v5813_v24 = vld [vmem:[%s6061_s25 + $0x18] sm:$0xff] }
  0x14   : > { %860 = vmatpush.bf16.msrb.mxu1 %v5849_v2  ;;  %1306 = vmatpush.bf16.msrb.mxu2 %v5869_v3  ;;  %v5159_v27 = vld [vmem:[%s6061_s25 + $0x8] sm:$0xe]  ;;  %v5870_v28 = vld [vmem:[%s6061_s25 + $0x8] sm:$0xf0]  ;;  %v5871_v29 = vld [vmem:[%s6061_s25 + $0x10] sm:$0xff] }
  0x15   : > { %2330 = vmatpush.bf16.msrb.mxu0 %v5909_v4  ;;  %4946 = vmatmul.msk.bf16.vlgmr.msra.gmra.mxu3 %vm314_vm0, %v5825_v8  ;;  %v5160_v30 = vor.u32 %v5870_v28, %v5159_v27  ;;  %v5969_v31 = vld [vmem:[%s8013_s1 + $0x78] sm:$0xff]  ;;  %v1643_v32 = vrot.slane %v5871_v29, 1  ;;  %v5819_v35 = vld [vmem:[%s6061_s25 + $0x48] sm:$0xff]  ;;  %v5824_v36 = vld [vmem:[%s6061_s25 + $0x70] sm:$0xff] }
  0x16   : > { %4931 = vmatmul.msk.bf16.vlgmr.msra.gmra.mxu0 %vm314_vm0, %v5810_v7  ;;  %1751 = vmatpush.bf16.msrb.mxu3 %v5889_v11  ;;  %v5261_v37 = vld [vmem:[%s6061_s25 + $0x8] sm:$0xe]  ;;  %v5890_v38 = vld [vmem:[%s6061_s25 + $0x8] sm:$0xf0]  ;;  %v5830_v39 = vld [vmem:[%s6061_s25] sm:$0xff] }
  0x17   : > { %v1642_v33 = vrot.slane %v5160_v30, 1  ;;  %v5814_v40 = vld [vmem:[%s6061_s25 + $0x20] sm:$0xff]  ;;  %v5891_v41 = vld [vmem:[%s6061_s25 + $0x10] sm:$0xff]  ;;  %v5262_v42 = vor.u32 %v5890_v38, %v5261_v37  ;;  %v5872_v43 = vld [vmem:[%s6061_s25 + $0x18] sm:$0xff]  ;;  %v643_v46 = vshll.u32 %v5830_v39, 16  ;;  %v641_v55 = vshrl.u32 %v5830_v39, 16 }
  0x18   : > { %861 = vmatpush.bf16.msrb.mxu1 %v5848_v9  ;;  %1307 = vmatpush.bf16.msrb.mxu2 %v5868_v10  ;;  %v5989_v44 = vld [vmem:[%s8013_s1 + $0x88] sm:$0xff]  ;;  %v5057_v47 = vld [vmem:[%s6061_s25] sm:$0xe]  ;;  %v5850_v48 = vld [vmem:[%s6061_s25] sm:$0xf0]  ;;  %v1645_v49 = vrot.slane %v5872_v43, 1 }
  0x19   : > { %2331 = vmatpush.bf16.msrb.mxu0 %v5908_v21  ;;  %v1644_v34 = vsel %vm1196_vm1, %v1642_v33, %v1643_v32  ;;  %v5831_v45 = vld [vmem:[%s6061_s25 + $0x8] sm:$0xff]  ;;  %v2089_v50 = vshrl.u32 %v5262_v42, 16  ;;  %v2092_v51 = vshll.u32 %v5262_v42, 16  ;;  %v2097_v52 = vshrl.u32 %v5891_v41, 16  ;;  %v5892_v9 = vld [vmem:[%s6061_s25 + $0x18] sm:$0xff]  ;;  %v5873_v10 = vld [vmem:[%s6061_s25 + $0x20] sm:$0xff] }
  0x1a   : > { %1752 = vmatpush.bf16.msrb.mxu3 %v5888_v20  ;;  %v2100_v53 = vshll.u32 %v5891_v41, 16  ;;  %v1646_v54 = vsel %vm1196_vm1, %v1643_v32, %v1645_v49  ;;  %v645_v56 = vrot.slane %v643_v46, 1  ;;  %v648_v57 = vshll.u32 %v5831_v45, 16  ;;  %v5851_v58 = vld [vmem:[%s6061_s25 + $0x8] sm:$0xff]  ;;  %v5832_v11 = vld [vmem:[%s6061_s25 + $0x10] sm:$0xff]  ;;  %v5893_v28 = vld [vmem:[%s6061_s25 + $0x20] sm:$0xff] }
  0x1b   : > { %v5058_v59 = vor.u32 %v5850_v48, %v5057_v47  ;;  %v2091_v60 = vrot.slane %v2089_v50, 1  ;;  %v2094_v61 = vrot.slane %v2092_v51, 2  ;;  %v2099_v62 = vrot.slane %v2097_v52, 1  ;;  %v5833_v29 = vld [vmem:[%s6061_s25 + $0x18] sm:$0xff]  ;;  %v5874_v30 = vld [vmem:[%s6061_s25 + $0x28] sm:$0xff]  ;;  %v5834_v48 = vld [vmem:[%s6061_s25 + $0x20] sm:$0xff] }
  0x1c   : > { %2776 = vmatpush.bf16.msra.mxu1 %v5929_v25  ;;  %3221 = vmatpush.bf16.msra.mxu2 %v5949_v26  ;;  %v2102_v63 = vrot.slane %v2100_v53, 2  ;;  %v646_v0 = vor.u32 %v645_v56, %v641_v55  ;;  %v650_v1 = vrot.slane %v648_v57, 1  ;;  %v1198_v3 = vrot.slane %v5851_v58, 1  ;;  %v5894_v47 = vld [vmem:[%s6061_s25 + $0x28] sm:$0xff]  ;;  %v5854_v55 = vld [vmem:[%s6061_s25 + $0x20] sm:$0xff]  ;;  %vm7481_vm10 = vmor %vm4570_vm8, %vm4571_vm9 }
  0x1d   : > { %4246 = vmatpush.bf16.msra.mxu0 %v5989_v44  ;;  %v1197_v2 = vrot.slane %v5058_v59, 1  ;;  %v2095_v4 = vor.u32 %v2094_v61, %v2091_v60  ;;  %v2115_v32 = vshrl.u32 %v5893_v28, 16  ;;  %v2118_v33 = vshll.u32 %v5893_v28, 16  ;;  %vm7549_vm13 = vmor %vm4589_vm11, %vm4590_vm12 }
  0x1e   : > { %3800 = vmatpush.bf16.msra.mxu3 %v5969_v31  ;;  %v2103_v5 = vor.u32 %v2102_v63, %v2099_v62  ;;  %v651_v6 = vsel %vm639_vm2, %v646_v0, %v650_v1  ;;  %v1649_v31 = vrot.slane %v5874_v30, 1  ;;  %v2124_v51 = vshrl.u32 %v5894_v47, 16  ;;  %v5896_v30 = vld [vmem:[%s6061_s25 + $0x38] sm:$0xff] }
  0x1f   : > { %v1199_v7 = vsel %vm1196_vm1, %v1197_v2, %v1198_v3  ;;  %v2117_v38 = vrot.slane %v2115_v32, 1  ;;  %v2120_v39 = vrot.slane %v2118_v33, 2  ;;  %v2127_v52 = vshll.u32 %v5894_v47, 16  ;;  %v5836_v32 = vld [vmem:[%s6061_s25 + $0x30] sm:$0xff]  ;;  %v5877_v33 = vld [vmem:[%s6061_s25 + $0x40] sm:$0xff] }
  0x20   : > { %v2104_v8 = vsel %vm2087_vm3, %v2095_v4, %v2103_v5  ;;  %v668_v53 = vshrl.u32 %v5833_v29, 16  ;;  %v2126_v57 = vrot.slane %v2124_v51, 1  ;;  %v1204_v61 = vrot.slane %v5854_v55, 1  ;;  %v5895_v4 = vld [vmem:[%s6061_s25 + $0x30] sm:$0xff] }
  0x21   : > { %v2121_v43 = vor.u32 %v2120_v39, %v2117_v38  ;;  %v2129_v58 = vrot.slane %v2127_v52, 2 }
  0x23   : > { %4937 = vmatmul.msk.bf16.gmra.mxu1 %vm314_vm0, %v5816_v12  ;;  %4942 = vmatmul.msk.bf16.gmra.mxu2 %vm314_vm0, %v5821_v13  ;;  %v1647_v12 = vrot.slane %v5873_v10, 1  ;;  %v2106_v13 = vshrl.u32 %v5892_v9, 16  ;;  %v2130_v62 = vor.u32 %v2129_v58, %v2126_v57  ;;  %v2136_v10 = vshll.u32 %v5895_v4, 16  ;;  %v5897_v57 = vld [vmem:[%s6061_s25 + $0x40] sm:$0xff] }
  0x25   : > { %4947 = vmatmul.msk.bf16.gmra.mxu3 %vm314_vm0, %v5826_v15  ;;  %v1648_v15 = vsel %vm1196_vm1, %v1645_v49, %v1647_v12  ;;  %v1650_v37 = vsel %vm1196_vm1, %v1647_v12, %v1649_v31  ;;  %v5875_v49 = vld [vmem:[%s6061_s25 + $0x30] sm:$0xff]  ;;  %v676_v12 = vshrl.u32 %v5834_v48, 16 }
  0x26   : > { %4932 = vmatmul.msk.bf16.gmra.mxu0 %vm314_vm0, %v5811_v14  ;;  %v2109_v14 = vshll.u32 %v5892_v9, 16  ;;  %v1651_v50 = vrot.slane %v5875_v49, 1  ;;  %v2133_v9 = vshrl.u32 %v5895_v4, 16  ;;  %v5857_v4 = vld [vmem:[%s6061_s25 + $0x38] sm:$0xff] }
  0x28   : > { %v2111_v20 = vrot.slane %v2109_v14, 2  ;;  %v1652_v56 = vsel %vm1196_vm1, %v1649_v31, %v1651_v50  ;;  %v5855_v14 = vld [vmem:[%s6061_s25 + $0x28] sm:$0xff] }
  0x33   : > { %4938 = vmatmul.msk.bf16.gmra.mxu1 %vm314_vm0, %v5817_v16  ;;  %4943 = vmatmul.msk.bf16.gmra.mxu2 %vm314_vm0, %v5822_v17  ;;  %v652_v16 = vshrl.u32 %v5831_v45, 16  ;;  %v656_v17 = vshll.u32 %v5832_v11, 16 }
  0x35   : > { %4948 = vmatmul.msk.bf16.gmra.mxu3 %vm314_vm0, %v5827_v19  ;;  %v2108_v19 = vrot.slane %v2106_v13, 1  ;;  %v654_v21 = vor.u32 %v652_v16, %v650_v1 }
  0x36   : > { %4933 = vmatmul.msk.bf16.gmra.mxu0 %vm314_vm0, %v5812_v18  ;;  %v5852_v18 = vld [vmem:[%s6061_s25 + $0x10] sm:$0xff] }
  0x43   : > { %4939 = vmatmul.msk.bf16.gmra.mxu1 %vm314_vm0, %v5818_v22  ;;  %4944 = vmatmul.msk.bf16.gmra.mxu2 %vm314_vm0, %v5823_v23  ;;  %v658_v22 = vrot.slane %v656_v17, 1  ;;  %v1200_v23 = vrot.slane %v5852_v18, 1  ;;  %v2135_v18 = vrot.slane %v2133_v9, 1 }
  0x45   : > { %5237 = vmatmul.msk.bf16.vlgmr.msrb.gmra.mxu3 %vm314_vm0, %v1644_v34  ;;  %v659_v25 = vsel %vm639_vm2, %v654_v21, %v658_v22  ;;  %v1201_v26 = vsel %vm1196_vm1, %v1198_v3, %v1200_v23  ;;  %v660_v34 = vshrl.u32 %v5832_v11, 16  ;;  %v2131_v3 = vsel %vm2087_vm3, %v2121_v43, %v2130_v62 }
  0x46   : > { %4934 = vmatmul.msk.bf16.gmra.mxu0 %vm314_vm0, %v5813_v24  ;;  %v2112_v24 = vor.u32 %v2111_v20, %v2108_v19  ;;  %v2138_v19 = vrot.slane %v2136_v10, 2 }
  0x48   : > { %v2113_v27 = vsel %vm2087_vm3, %v2103_v5, %v2112_v24  ;;  %v2122_v46 = vsel %vm2087_vm3, %v2112_v24, %v2121_v43  ;;  %v5835_v5 = vld [vmem:[%s6061_s25 + $0x28] sm:$0xff]  ;;  %v2139_v24 = vor.u32 %v2138_v19, %v2135_v18 }
  0x49   : > { %v680_v13 = vshll.u32 %v5835_v5, 16  ;;  %v684_v39 = vshrl.u32 %v5835_v5, 16 }
  0x4b   : > { %v682_v21 = vrot.slane %v680_v13, 1 }
  0x4d   : > { %v686_v47 = vor.u32 %v684_v39, %v682_v21 }
  0x53   : > { %4940 = vmatmul.msk.bf16.gmra.mxu1 %vm314_vm0, %v5819_v35  ;;  %4945 = vmatmul.msk.bf16.gmra.mxu2 %vm314_vm0, %v5824_v36  ;;  %v664_v35 = vshll.u32 %v5833_v29, 16  ;;  %v5853_v36 = vld [vmem:[%s6061_s25 + $0x18] sm:$0xff]  ;;  %v2140_v29 = vsel %vm2087_vm3, %v2130_v62, %v2139_v24 }
  0x54   : > { %v1202_v42 = vrot.slane %v5853_v36, 1  ;;  %v2142_v36 = vshrl.u32 %v5896_v30, 16 }
  0x55   : > { %5238 = vmatmul.msk.bf16.gmra.mxu3 %vm314_vm0, %v1646_v54  ;;  %v666_v41 = vrot.slane %v664_v35, 1  ;;  %v672_v54 = vshll.u32 %v5834_v48, 16  ;;  %v1655_v35 = vrot.slane %v5877_v33, 1 }
  0x56   : > { %4935 = vmatmul.msk.bf16.gmra.mxu0 %vm314_vm0, %v5814_v40  ;;  %v662_v40 = vor.u32 %v660_v34, %v658_v22  ;;  %v1203_v45 = vsel %vm1196_vm1, %v1200_v23, %v1202_v42  ;;  %v1205_v1 = vsel %vm1196_vm1, %v1202_v42, %v1204_v61  ;;  %v1206_v22 = vrot.slane %v5855_v14, 1 }
  0x57   : > { %v670_v59 = vor.u32 %v668_v53, %v666_v41  ;;  %v674_v60 = vrot.slane %v672_v54, 1 }
  0x58   : > { %v667_v44 = vsel %vm639_vm2, %v662_v40, %v666_v41  ;;  %v688_v40 = vshll.u32 %v5836_v32, 16  ;;  %v5856_v41 = vld [vmem:[%s6061_s25 + $0x30] sm:$0xff] }
  0x59   : > { %v675_v0 = vsel %vm639_vm2, %v670_v59, %v674_v60  ;;  %v678_v20 = vor.u32 %v676_v12, %v674_v60  ;;  %v1208_v49 = vrot.slane %v5856_v41, 1  ;;  %v5837_v59 = vld [vmem:[%s6061_s25 + $0x38] sm:$0xff]  ;;  %v5878_v60 = vld [vmem:[%s6061_s25 + $0x48] sm:$0xff]  ;;  %v1210_v12 = vrot.slane %v5857_v4, 1 }
  0x5a   : > { %v690_v48 = vrot.slane %v688_v40, 1  ;;  %v1657_v62 = vrot.slane %v5878_v60, 1 }
  0x5b   : > { %v1209_v54 = vsel %vm1196_vm1, %v1206_v22, %v1208_v49 }
  0x5c   : > { %v691_v53 = vsel %vm639_vm2, %v686_v47, %v690_v48  ;;  %v1658_v5 = vsel %vm1196_vm1, %v1655_v35, %v1657_v62  ;;  %v5899_v47 = vld [vmem:[%s6061_s25 + $0x50] sm:$0xff] }
  0x63   : > { %5033 = vmatmul.msk.bf16.vlgmr.msrb.gmra.mxu1 %vm314_vm0, %v651_v6  ;;  %5135 = vmatmul.msk.bf16.vlgmr.msrb.gmra.mxu2 %vm314_vm0, %v1199_v7  ;;  %v5876_v6 = vld [vmem:[%s6061_s25 + $0x38] sm:$0xff] }
  0x65   : > { %5239 = vmatmul.msk.bf16.gmra.mxu3 %vm314_vm0, %v1648_v15 }
  0x66   : > { %5339 = vmatmul.msk.bf16.vlgmr.msrb.gmra.mxu0 %vm314_vm0, %v2104_v8  ;;  %v1653_v8 = vrot.slane %v5876_v6, 1 }
  0x68   : > { %v1654_v15 = vsel %vm1196_vm1, %v1651_v50, %v1653_v8  ;;  %v1656_v42 = vsel %vm1196_vm1, %v1653_v8, %v1655_v35 }
  0x73   : > { %5034 = vmatmul.msk.bf16.gmra.mxu1 %vm314_vm0, %v659_v25  ;;  %5136 = vmatmul.msk.bf16.gmra.mxu2 %vm314_vm0, %v1201_v26  ;;  %v683_v26 = vsel %vm639_vm2, %v678_v20, %v682_v21  ;;  %v5898_v20 = vld [vmem:[%s6061_s25 + $0x48] sm:$0xff] }
  0x75   : > { %5240 = vmatmul.msk.bf16.gmra.mxu3 %vm314_vm0, %v1650_v37  ;;  %v2145_v37 = vshll.u32 %v5896_v30, 16 }
  0x76   : > { %5340 = vmatmul.msk.bf16.gmra.mxu0 %vm314_vm0, %v2113_v27  ;;  %v1207_v27 = vsel %vm1196_vm1, %v1204_v61, %v1206_v22  ;;  %v5838_v22 = vld [vmem:[%s6061_s25 + $0x40] sm:$0xff] }
  0x77   : > { %v704_v30 = vshll.u32 %v5838_v22, 16 }
  0x83   : > { %5035 = vmatmul.msk.bf16.gmra.mxu1 %vm314_vm0, %v667_v44  ;;  %5137 = vmatmul.msk.bf16.gmra.mxu2 %vm314_vm0, %v1203_v45  ;;  %v2144_v44 = vrot.slane %v2142_v36, 1  ;;  %v2147_v45 = vrot.slane %v2145_v37, 2  ;;  %v706_v37 = vrot.slane %v704_v30, 1 }
  0x85   : > { %5241 = vmatmul.msk.bf16.gmra.mxu3 %vm314_vm0, %v1652_v56  ;;  %v2148_v51 = vor.u32 %v2147_v45, %v2144_v44 }
  0x86   : > { %5341 = vmatmul.msk.bf16.gmra.mxu0 %vm314_vm0, %v2122_v46 }
  0x87   : > { %v2149_v56 = vsel %vm2087_vm3, %v2139_v24, %v2148_v51 }
  0x90   : > { %v403_v63 = vpop.f32.mrf.mxu1 }
  0x91   : > { %478 = vst.msk [vmem:[#allocation2 + $0x50] sm:$0xff] %vm314_vm0, %v403_v63  ;;  %v2151_v63 = vshrl.u32 %v5897_v57, 16 }
  0x93   : > { %v378_v2 = vpop.f32.mrf.mxu0  ;;  %5036 = vmatmul.msk.bf16.gmra.mxu1 %vm314_vm0, %v675_v0  ;;  %5138 = vmatmul.msk.bf16.gmra.mxu2 %vm314_vm0, %v1205_v1  ;;  %v2154_v0 = vshll.u32 %v5897_v57, 16  ;;  %v708_v57 = vshrl.u32 %v5838_v22, 16 }
  0x94   : > { %468 = vst.msk [vmem:[#allocation2] sm:$0xff] %vm314_vm0, %v378_v2  ;;  %v692_v2 = vshrl.u32 %v5836_v32, 16 }
  0x95   : > { %5242 = vmatmul.msk.bf16.gmra.mxu3 %vm314_vm0, %v1654_v15  ;;  %v2156_v8 = vrot.slane %v2154_v0, 2  ;;  %v710_v0 = vor.u32 %v708_v57, %v706_v37 }
  0x96   : > { %5342 = vmatmul.msk.bf16.gmra.mxu0 %vm314_vm0, %v2131_v3  ;;  %v428_v7 = vpop.f32.mrf.mxu2  ;;  %v696_v3 = vshll.u32 %v5837_v59, 16  ;;  %v694_v10 = vor.u32 %v692_v2, %v690_v48  ;;  %v6270_v48 = vld [vmem:[%s6061_s25 + $0x48] sm:$0xff] }
  0x97   : > { %488 = vst.msk [vmem:[#allocation2 + $0xa0] sm:$0xff] %vm314_vm0, %v428_v7  ;;  %v2153_v7 = vrot.slane %v2151_v63, 1 }
  0x98   : > { %v405_v11 = vpop.f32.mrf.mxu1  ;;  %v453_v16 = vpop.f32.mrf.mxu3 }
  0x99   : > { %479 = vst.msk [vmem:[#allocation2 + $0x58] sm:$0xff] %vm314_vm0, %v405_v11  ;;  %v698_v11 = vrot.slane %v696_v3, 1  ;;  %v2157_v14 = vor.u32 %v2156_v8, %v2153_v7 }
  0x9a   : > { %498 = vst.msk [vmem:[#allocation2 + $0xf0] sm:$0xff] %vm314_vm0, %v453_v16 }
  0x9b   : > { %v380_v17 = vpop.f32.mrf.mxu0  ;;  %v699_v16 = vsel %vm639_vm2, %v694_v10, %v698_v11  ;;  %v2158_v19 = vsel %vm2087_vm3, %v2148_v51, %v2157_v14  ;;  %v953_v7 = vld [vmem:[#allocation2] sm:$0xff] }
  0x9c   : > { %469 = vst.msk [vmem:[#allocation2 + $0x8] sm:$0xff] %vm314_vm0, %v380_v17  ;;  %v1211_v17 = vsel %vm1196_vm1, %v1208_v49, %v1210_v12  ;;  %v5880_v49 = vld [vmem:[%s6061_s25 + $0x58] sm:$0xff] }
  0x9e   : > { %v430_v23 = vpop.f32.mrf.mxu2 }
  0x9f   : > { %489 = vst.msk [vmem:[#allocation2 + $0xa8] sm:$0xff] %vm314_vm0, %v430_v23  ;;  %v5879_v23 = vld [vmem:[%s6061_s25 + $0x50] sm:$0xff] }
  0xa0   : > { %v408_v25 = vpop.f32.mrf.mxu1  ;;  %v455_v31 = vpop.f32.mrf.mxu3 }
  0xa1   : > { %480 = vst.msk [vmem:[#allocation2 + $0x60] sm:$0xff] %vm314_vm0, %v408_v25  ;;  %v1659_v25 = vrot.slane %v5879_v23, 1 }
  0xa2   : > { %499 = vst.msk [vmem:[#allocation2 + $0xf8] sm:$0xff] %vm314_vm0, %v455_v31  ;;  %v5858_v31 = vld [vmem:[%s6061_s25 + $0x40] sm:$0xff] }
  0xa3   : > { %v383_v28 = vpop.f32.mrf.mxu0  ;;  %5037 = vmatmul.msk.bf16.gmra.mxu1 %vm314_vm0, %v683_v26  ;;  %5139 = vmatmul.msk.bf16.gmra.mxu2 %vm314_vm0, %v1207_v27  ;;  %v2160_v26 = vshrl.u32 %v5898_v20, 16  ;;  %v2163_v27 = vshll.u32 %v5898_v20, 16  ;;  %v1660_v32 = vsel %vm1196_vm1, %v1657_v62, %v1659_v25  ;;  %v954_v23 = vld [vmem:[#allocation2 + $0x8] sm:$0xff] }
  0xa4   : > { %470 = vst.msk [vmem:[#allocation2 + $0x10] sm:$0xff] %vm314_vm0, %v383_v28 }
  0xa5   : > { %5243 = vmatmul.msk.bf16.gmra.mxu3 %vm314_vm0, %v1656_v42  ;;  %v2165_v35 = vrot.slane %v2163_v27, 2 }
  0xa6   : > { %5343 = vmatmul.msk.bf16.gmra.mxu0 %vm314_vm0, %v2140_v29  ;;  %v433_v34 = vpop.f32.mrf.mxu2  ;;  %v700_v29 = vshrl.u32 %v5837_v59, 16  ;;  %v6282_v59 = vld [vmem:[%s6061_s25 + $0x48] sm:$0xff] }
  0xa7   : > { %490 = vst.msk [vmem:[#allocation2 + $0xb0] sm:$0xff] %vm314_vm0, %v433_v34  ;;  %v2162_v34 = vrot.slane %v2160_v26, 1  ;;  %v1214_v2 = vrot.slane %v6282_v59, 1  ;;  %v6314_v26 = vld [vmem:[%s6061_s25 + $0x50] sm:$0xff] }
  0xa8   : > { %v410_v38 = vpop.f32.mrf.mxu1  ;;  %v458_v46 = vpop.f32.mrf.mxu3  ;;  %v702_v36 = vor.u32 %v700_v29, %v698_v11  ;;  %v5948_v11 = vld [vmem:[%s8013_s1 + $0x60] sm:$0xff]  ;;  %v5968_v29 = vld [vmem:[%s8013_s1 + $0x70] sm:$0xff] }
  0xa9   : > { %481 = vst.msk [vmem:[#allocation2 + $0x68] sm:$0xff] %vm314_vm0, %v410_v38  ;;  %v1212_v38 = vrot.slane %v5858_v31, 1  ;;  %v2166_v41 = vor.u32 %v2165_v35, %v2162_v34  ;;  %3222 = vmatpush.bf16.msra.mxu2 %v5948_v11  ;;  %3801 = vmatpush.bf16.msra.mxu3 %v5968_v29  ;;  %v5902_v29 = vld [vmem:[%s6061_s25 + $0x68] sm:$0xff] }
  0xaa   : > { %500 = vst.msk [vmem:[#allocation2 + $0x100] sm:$0xff] %vm314_vm0, %v458_v46 }
  0xab   : > { %v385_v43 = vpop.f32.mrf.mxu0  ;;  %v1213_v44 = vsel %vm1196_vm1, %v1210_v12, %v1212_v38  ;;  %v2167_v46 = vsel %vm2087_vm3, %v2157_v14, %v2166_v41  ;;  %v5900_v14 = vld [vmem:[%s6061_s25 + $0x58] sm:$0xff] }
  0xac   : > { %471 = vst.msk [vmem:[#allocation2 + $0x18] sm:$0xff] %vm314_vm0, %v385_v43  ;;  %v707_v43 = vsel %vm639_vm2, %v702_v36, %v706_v37  ;;  %v2178_v20 = vshrl.u32 %v5900_v14, 16  ;;  %v1216_v37 = vrot.slane %v6314_v26, 1 }
  0xae   : > { %v435_v50 = vpop.f32.mrf.mxu2 }
  0xaf   : > { %491 = vst.msk [vmem:[#allocation2 + $0xb8] sm:$0xff] %vm314_vm0, %v435_v50 }
  0xb0   : > { %v413_v52 = vpop.f32.mrf.mxu1  ;;  %v460_v58 = vpop.f32.mrf.mxu3 }
  0xb1   : > { %482 = vst.msk [vmem:[#allocation2 + $0x70] sm:$0xff] %vm314_vm0, %v413_v52  ;;  %v1661_v52 = vrot.slane %v5880_v49, 1 }
  0xb2   : > { %501 = vst.msk [vmem:[#allocation2 + $0x108] sm:$0xff] %vm314_vm0, %v460_v58  ;;  %v712_v58 = vshll.u32 %v6270_v48, 16 }
  0xb3   : > { %v388_v55 = vpop.f32.mrf.mxu0  ;;  %5038 = vmatmul.msk.bf16.gmra.mxu1 %vm314_vm0, %v691_v53  ;;  %5140 = vmatmul.msk.bf16.gmra.mxu2 %vm314_vm0, %v1209_v54  ;;  %v2169_v53 = vshrl.u32 %v5899_v47, 16  ;;  %v2172_v54 = vshll.u32 %v5899_v47, 16  ;;  %v1662_v60 = vsel %vm1196_vm1, %v1659_v25, %v1661_v52 }
  0xb4   : > { %472 = vst.msk [vmem:[#allocation2 + $0x20] sm:$0xff] %vm314_vm0, %v388_v55  ;;  %v5928_v55 = vld [vmem:[%s8013_s1 + $0x50] sm:$0xff] }
  0xb5   : > { %5244 = vmatmul.msk.bf16.gmra.mxu3 %vm314_vm0, %v1658_v5  ;;  %2777 = vmatpush.bf16.msra.mxu1 %v5928_v55  ;;  %v2171_v62 = vrot.slane %v2169_v53, 1  ;;  %v2174_v63 = vrot.slane %v2172_v54, 2  ;;  %v6341_v54 = vld [vmem:[%s6061_s25 + $0x58] sm:$0xff]  ;;  %v6344_v55 = vld [vmem:[%s6061_s25 + $0x68] sm:$0xff] }
  0xb6   : > { %5344 = vmatmul.msk.bf16.gmra.mxu0 %vm314_vm0, %v2149_v56  ;;  %v438_v61 = vpop.f32.mrf.mxu2  ;;  %v1665_v59 = vrot.slane %v6344_v55, 1 }
  0xb7   : > { %492 = vst.msk [vmem:[#allocation2 + $0xc0] sm:$0xff] %vm314_vm0, %v438_v61  ;;  %v2175_v5 = vor.u32 %v2174_v63, %v2171_v62  ;;  %v956_v63 = vld [vmem:[#allocation2 + $0x18] sm:$0xff] }
  0xb8   : > { %v415_v1 = vpop.f32.mrf.mxu1  ;;  %v463_v9 = vpop.f32.mrf.mxu3 }
  0xb9   : > { %483 = vst.msk [vmem:[#allocation2 + $0x78] sm:$0xff] %vm314_vm0, %v415_v1  ;;  %v714_v1 = vrot.slane %v712_v58, 1 }
  0xba   : > { %502 = vst.msk [vmem:[#allocation2 + $0x110] sm:$0xff] %vm314_vm0, %v463_v9  ;;  %v1215_v9 = vsel %vm1196_vm1, %v1212_v38, %v1214_v2 }
  0xbb   : > { %v390_v6 = vpop.f32.mrf.mxu0  ;;  %v715_v8 = vsel %vm639_vm2, %v710_v0, %v714_v1 }
  0xbc   : > { %473 = vst.msk [vmem:[#allocation2 + $0x28] sm:$0xff] %vm314_vm0, %v390_v6 }
  0xbe   : > { %v440_v13 = vpop.f32.mrf.mxu2 }
  0xbf   : > { %493 = vst.msk [vmem:[#allocation2 + $0xc8] sm:$0xff] %vm314_vm0, %v440_v13  ;;  %v2176_v13 = vsel %vm2087_vm3, %v2166_v41, %v2175_v5 }
  0xc0   : > { %v418_v15 = vpop.f32.mrf.mxu1  ;;  %v465_v21 = vpop.f32.mrf.mxu3 }
  0xc1   : > { %484 = vst.msk [vmem:[#allocation2 + $0x80] sm:$0xff] %vm314_vm0, %v418_v15  ;;  %v6305_v15 = vld [vmem:[%s6061_s25 + $0x50] sm:$0xff] }
  0xc2   : > { %503 = vst.msk [vmem:[#allocation2 + $0x118] sm:$0xff] %vm314_vm0, %v465_v21  ;;  %v2181_v21 = vshll.u32 %v5900_v14, 16  ;;  %v720_v25 = vshll.u32 %v6305_v15, 16  ;;  %v724_v0 = vshrl.u32 %v6305_v15, 16 }
  0xc3   : > { %v393_v18 = vpop.f32.mrf.mxu0  ;;  %5039 = vmatmul.msk.bf16.gmra.mxu1 %vm314_vm0, %v699_v16  ;;  %5141 = vmatmul.msk.bf16.gmra.mxu2 %vm314_vm0, %v1211_v17  ;;  %v5881_v16 = vld [vmem:[%s6061_s25 + $0x60] sm:$0xff] }
  0xc4   : > { %474 = vst.msk [vmem:[#allocation2 + $0x30] sm:$0xff] %vm314_vm0, %v393_v18  ;;  %v722_v36 = vrot.slane %v720_v25, 1 }
  0xc5   : > { %5245 = vmatmul.msk.bf16.gmra.mxu3 %vm314_vm0, %v1660_v32  ;;  %v2180_v32 = vrot.slane %v2178_v20, 1 }
  0xc6   : > { %5345 = vmatmul.msk.bf16.gmra.mxu0 %vm314_vm0, %v2158_v19  ;;  %v443_v24 = vpop.f32.mrf.mxu2  ;;  %v1663_v19 = vrot.slane %v5881_v16, 1 }
  0xc7   : > { %494 = vst.msk [vmem:[#allocation2 + $0xd0] sm:$0xff] %vm314_vm0, %v443_v24  ;;  %v716_v24 = vshrl.u32 %v6270_v48, 16 }
  0xc8   : > { %v420_v28 = vpop.f32.mrf.mxu1  ;;  %v6258_v39 = vpop.f32.mrf.mxu3  ;;  %v1664_v27 = vsel %vm1196_vm1, %v1661_v52, %v1663_v19 }
  0xc9   : > { %485 = vst.msk [vmem:[#allocation2 + $0x88] sm:$0xff] %vm314_vm0, %v420_v28  ;;  %v718_v35 = vor.u32 %v716_v24, %v714_v1  ;;  %v728_v1 = vshll.u32 %v6341_v54, 16  ;;  %v957_v24 = vld [vmem:[#allocation2 + $0x20] sm:$0xff] }
  0xcb   : > { %v395_v33 = vpop.f32.mrf.mxu0  ;;  %v730_v14 = vrot.slane %v728_v1, 1 }
  0xcc   : > { %475 = vst.msk [vmem:[#allocation2 + $0x38] sm:$0xff] %vm314_vm0, %v395_v33  ;;  %v2183_v33 = vrot.slane %v2181_v21, 2 }
  0xce   : > { %v445_v40 = vpop.f32.mrf.mxu2  ;;  %v6328_v41 = vor.u32 %v2183_v33, %v2180_v32  ;;  %v6392_v33 = vld [vmem:[%s6061_s25 + $0x60] sm:$0xff] }
  0xcf   : > { %495 = vst.msk [vmem:[#allocation2 + $0xd8] sm:$0xff] %vm314_vm0, %v445_v40 }
  0xd0   : > { %v423_v42 = vpop.f32.mrf.mxu1  ;;  %v6274_v50 = vpop.f32.mrf.mxu3  ;;  %v2185_v49 = vsel %vm2087_vm3, %v2175_v5, %v6328_v41  ;;  %v5988_v5 = vld [vmem:[%s8013_s1 + $0x80] sm:$0xff] }
  0xd1   : > { %486 = vst.msk [vmem:[#allocation2 + $0x90] sm:$0xff] %vm314_vm0, %v423_v42  ;;  %4247 = vmatpush.bf16.msra.mxu0 %v5988_v5 }
  0xd3   : > { %v398_v45 = vpop.f32.mrf.mxu0  ;;  %5040 = vmatmul.msk.bf16.gmra.mxu1 %vm314_vm0, %v707_v43  ;;  %5142 = vmatmul.msk.bf16.gmra.mxu2 %vm314_vm0, %v1213_v44  ;;  %v955_v43 = vld [vmem:[#allocation2 + $0x10] sm:$0xff]  ;;  %v723_v44 = vsel %vm639_vm2, %v718_v35, %v722_v36 }
  0xd4   : > { %476 = vst.msk [vmem:[#allocation2 + $0x40] sm:$0xff] %vm314_vm0, %v398_v45  ;;  %v1217_v45 = vsel %vm1196_vm1, %v1214_v2, %v1216_v37  ;;  %v1666_v2 = vsel %vm1196_vm1, %v1663_v19, %v1665_v59 }
  0xd5   : > { %5246 = vmatmul.msk.bf16.gmra.mxu3 %vm314_vm0, %v1662_v60 }
  0xd6   : > { %5346 = vmatmul.msk.bf16.gmra.mxu0 %vm314_vm0, %v2167_v46  ;;  %v448_v51 = vpop.f32.mrf.mxu2 }
  0xd7   : > { %496 = vst.msk [vmem:[#allocation2 + $0xe0] sm:$0xff] %vm314_vm0, %v448_v51  ;;  %v5901_v51 = vld [vmem:[%s6061_s25 + $0x60] sm:$0xff] }
  0xd8   : > { %v425_v56 = vpop.f32.mrf.mxu1  ;;  %v6289_v3 = vpop.f32.mrf.mxu3  ;;  %v2187_v60 = vshrl.u32 %v5901_v51, 16 }
  0xd9   : > { %487 = vst.msk [vmem:[#allocation2 + $0x98] sm:$0xff] %vm314_vm0, %v425_v56 }
  0xdb   : > { %v400_v61 = vpop.f32.mrf.mxu0 }
  0xdc   : > { %477 = vst.msk [vmem:[#allocation2 + $0x48] sm:$0xff] %vm314_vm0, %v400_v61  ;;  %v2190_v61 = vshll.u32 %v5901_v51, 16 }
  0xde   : > { %v450_v4 = vpop.f32.mrf.mxu2 }
  0xdf   : > { %497 = vst.msk [vmem:[#allocation2 + $0xe8] sm:$0xff] %vm314_vm0, %v450_v4 }
  0xe0   : > { %v863_v6 = vpop.f32.mrf.mxu1  ;;  %v6309_v17 = vpop.f32.mrf.mxu3 }
  0xe1   : > { %v989_v10 = vadd.f32 %v953_v7, %v863_v6 }
  0xe3   : > { %v6297_v12 = vpop.f32.mrf.mxu0  ;;  %1025 = vst.msk [vmem:[#allocation2] sm:$0xff] %vm314_vm0, %v989_v10  ;;  %5041 = vmatmul.msk.bf16.gmra.mxu1 %vm314_vm0, %v715_v8  ;;  %5143 = vmatmul.msk.bf16.gmra.mxu2 %vm314_vm0, %v1215_v9  ;;  %v2189_v8 = vrot.slane %v2187_v60, 1  ;;  %v2192_v9 = vrot.slane %v2190_v61, 2 }
  0xe5   : > { %5247 = vmatmul.msk.bf16.gmra.mxu3 %vm314_vm0, %v1664_v27  ;;  %v6373_v21 = vor.u32 %v2192_v9, %v2189_v8 }
  0xe6   : > { %5347 = vmatmul.msk.bf16.gmra.mxu0 %vm314_vm0, %v2176_v13  ;;  %v1309_v18 = vpop.f32.mrf.mxu2  ;;  %v726_v13 = vor.u32 %v724_v0, %v722_v36 }
  0xe8   : > { %v865_v22 = vpop.f32.mrf.mxu1  ;;  %v6326_v38 = vpop.f32.mrf.mxu3  ;;  %v731_v25 = vsel %vm639_vm2, %v726_v13, %v730_v14  ;;  %v5903_v13 = vld [vmem:[%s6061_s25 + $0x70] sm:$0xff] }
  0xe9   : > { %v990_v28 = vadd.f32 %v954_v23, %v865_v22 }
  0xea   : > { %v1399_v30 = vld [vmem:[#allocation2] sm:$0xff] }
  0xeb   : > { %v6320_v31 = vpop.f32.mrf.mxu0  ;;  %v1435_v34 = vadd.f32 %v1399_v30, %v1309_v18  ;;  %1026 = vst.msk [vmem:[#allocation2 + $0x8] sm:$0xff] %vm314_vm0, %v990_v28 }
  0xed   : > { %1471 = vst.msk [vmem:[#allocation2] sm:$0xff] %vm314_vm0, %v1435_v34  ;;  %v6395_v34 = vld [vmem:[%s6061_s25 + $0x70] sm:$0xff] }
  0xee   : > { %v1311_v40 = vpop.f32.mrf.mxu2 }
  0xf0   : > { %v868_v42 = vpop.f32.mrf.mxu1  ;;  %v6349_v57 = vpop.f32.mrf.mxu3 }
  0xf1   : > { %v991_v46 = vadd.f32 %v955_v43, %v868_v42  ;;  %v2196_v42 = vshrl.u32 %v5902_v29, 16  ;;  %v2199_v43 = vshll.u32 %v5902_v29, 16  ;;  %v6462_v29 = vld [vmem:[%s6061_s25 + $0x68] sm:$0xff] }
  0xf2   : > { %v1400_v47 = vld [vmem:[#allocation2 + $0x8] sm:$0xff] }
  0xf3   : > { %v6332_v48 = vpop.f32.mrf.mxu0  ;;  %v1436_v52 = vadd.f32 %v1400_v47, %v1311_v40  ;;  %1027 = vst.msk [vmem:[#allocation2 + $0x10] sm:$0xff] %vm314_vm0, %v991_v46  ;;  %5042 = vmatmul.msk.bf16.gmra.mxu1 %vm314_vm0, %v723_v44  ;;  %5144 = vmatmul.msk.bf16.gmra.mxu2 %vm314_vm0, %v1217_v45  ;;  %v958_v46 = vld [vmem:[#allocation2 + $0x28] sm:$0xff]  ;;  %v736_v47 = vshll.u32 %v6392_v33, 16 }
  0xf4   : > { %v1844_v53 = vld [vmem:[#allocation2] sm:$0xff] }
  0xf5   : > { %v1880_v56 = vadd.f32 %v1844_v53, %v6258_v39  ;;  %1472 = vst.msk [vmem:[#allocation2 + $0x8] sm:$0xff] %vm314_vm0, %v1436_v52  ;;  %v6356_v39 = vld [vmem:[%s6061_s25 + $0x58] sm:$0xff]  ;;  %5248 = vmatmul.msk.bf16.gmra.mxu3 %vm314_vm0, %v1666_v2 }
  0xf6   : > { %5348 = vmatmul.msk.bf16.gmra.mxu0 %vm314_vm0, %v2185_v49  ;;  %v1314_v58 = vpop.f32.mrf.mxu2  ;;  %v1218_v15 = vrot.slane %v6356_v39, 1  ;;  %v6408_v49 = vld [vmem:[%s6061_s25 + $0x60] sm:$0xff] }
  0xf7   : > { %1916 = vst.msk [vmem:[#allocation2] sm:$0xff] %vm314_vm0, %v1880_v56  ;;  %v1220_v55 = vrot.slane %v6408_v49, 1 }
  0xf8   : > { %v870_v62 = vpop.f32.mrf.mxu1  ;;  %v6371_v18 = vpop.f32.mrf.mxu3 }
  0xf9   : > { %v992_v4 = vadd.f32 %v956_v63, %v870_v62  ;;  %v738_v62 = vrot.slane %v736_v47, 1 }
  0xfa   : > { %v1401_v6 = vld [vmem:[#allocation2 + $0x10] sm:$0xff] }
  0xfb   : > { %v6364_v7 = vpop.f32.mrf.mxu0  ;;  %v1437_v10 = vadd.f32 %v1401_v6, %v1314_v58  ;;  %1028 = vst.msk [vmem:[#allocation2 + $0x18] sm:$0xff] %vm314_vm0, %v992_v4  ;;  %v959_v6 = vld [vmem:[#allocation2 + $0x30] sm:$0xff] }
  0xfc   : > { %v1845_v11 = vld [vmem:[#allocation2 + $0x8] sm:$0xff] }
  0xfd   : > { %v1881_v16 = vadd.f32 %v1845_v11, %v6274_v50  ;;  %1473 = vst.msk [vmem:[#allocation2 + $0x10] sm:$0xff] %vm314_vm0, %v1437_v10  ;;  %v1219_v50 = vsel %vm1196_vm1, %v1216_v37, %v1218_v15 }
  0xfe   : > { %v2423_v19 = vld [vmem:[#allocation2] sm:$0xff]  ;;  %v1316_v20 = vpop.f32.mrf.mxu2 }
  0xff   : > { %1917 = vst.msk [vmem:[#allocation2 + $0x8] sm:$0xff] %vm314_vm0, %v1881_v16  ;;  %v2459_v22 = vadd.f32 %v2423_v19, %v6297_v12  ;;  %v2194_v12 = vsel %vm2087_vm3, %v6328_v41, %v6373_v21  ;;  %v1667_v41 = vrot.slane %v6395_v34, 1  ;;  %v6449_v16 = vld [vmem:[%s6061_s25 + $0x78] sm:$0xff]  ;;  %v1222_v34 = vrot.slane %v6462_v29, 1 }
 0x100   : > { %v873_v23 = vpop.f32.mrf.mxu1  ;;  %v6400_v36 = vpop.f32.mrf.mxu3 }
 0x101   : > { %2495 = vst.msk [vmem:[#allocation2] sm:$0xff] %vm314_vm0, %v2459_v22  ;;  %v993_v26 = vadd.f32 %v957_v24, %v873_v23  ;;  %v1668_v51 = vsel %vm1196_vm1, %v1665_v59, %v1667_v41  ;;  %v1669_v23 = vrot.slane %v6449_v16, 1  ;;  %v2205_v24 = vshrl.u32 %v5903_v13, 16 }
 0x102   : > { %v1402_v27 = vld [vmem:[#allocation2 + $0x18] sm:$0xff] }
 0x103   : > { %v6382_v28 = vpop.f32.mrf.mxu0  ;;  %v1438_v30 = vadd.f32 %v1402_v27, %v1316_v20  ;;  %1029 = vst.msk [vmem:[#allocation2 + $0x20] sm:$0xff] %vm314_vm0, %v993_v26  ;;  %5043 = vmatmul.msk.bf16.gmra.mxu1 %vm314_vm0, %v731_v25  ;;  %5145 = vmatmul.msk.bf16.gmra.mxu2 %vm314_vm0, %v1219_v50  ;;  %v2208_v25 = vshll.u32 %v5903_v13, 16  ;;  %v960_v27 = vld [vmem:[#allocation2 + $0x38] sm:$0xff]  ;;  %v6516_v13 = vld [vmem:[%s6061_s25 + $0x70] sm:$0xff] }
 0x104   : > { %v1846_v32 = vld [vmem:[#allocation2 + $0x10] sm:$0xff]  ;;  %v1224_v16 = vrot.slane %v6516_v13, 1 }
 0x105   : > { %v1882_v35 = vadd.f32 %v1846_v32, %v6289_v3  ;;  %1474 = vst.msk [vmem:[#allocation2 + $0x18] sm:$0xff] %vm314_vm0, %v1438_v30  ;;  %v732_v3 = vshrl.u32 %v6341_v54, 16  ;;  %5249 = vmatmul.msk.bf16.gmra.mxu3 %vm314_vm0, %v1668_v51  ;;  %v2201_v54 = vrot.slane %v2199_v43, 2  ;;  %v1670_v30 = vsel %vm1196_vm1, %v1667_v41, %v1669_v23 }
 0x106   : > { %5349 = vmatmul.msk.bf16.gmra.mxu0 %vm314_vm0, %v2194_v12  ;;  %v2424_v37 = vld [vmem:[#allocation2 + $0x8] sm:$0xff]  ;;  %v1319_v40 = vpop.f32.mrf.mxu2 }
 0x107   : > { %1918 = vst.msk [vmem:[#allocation2 + $0x10] sm:$0xff] %vm314_vm0, %v1882_v35  ;;  %v2460_v44 = vadd.f32 %v2424_v37, %v6320_v31  ;;  %v2198_v31 = vrot.slane %v2196_v42, 1  ;;  %v734_v61 = vor.u32 %v732_v3, %v730_v14 }
 0x108   : > { %v875_v45 = vpop.f32.mrf.mxu1  ;;  %v6423_v63 = vpop.f32.mrf.mxu3 }
 0x109   : > { %2496 = vst.msk [vmem:[#allocation2 + $0x8] sm:$0xff] %vm314_vm0, %v2460_v44  ;;  %v994_v52 = vadd.f32 %v958_v46, %v875_v45  ;;  %v6425_v2 = vor.u32 %v2201_v54, %v2198_v31  ;;  %v739_v8 = vsel %vm639_vm2, %v734_v61, %v738_v62  ;;  %v5904_v61 = vld [vmem:[%s6061_s25 + $0x78] sm:$0xff] }
 0x10a   : > { %v1403_v53 = vld [vmem:[#allocation2 + $0x20] sm:$0xff] }
 0x10b   : > { %v6416_v56 = vpop.f32.mrf.mxu0  ;;  %v1439_v58 = vadd.f32 %v1403_v53, %v1319_v40  ;;  %1030 = vst.msk [vmem:[#allocation2 + $0x28] sm:$0xff] %vm314_vm0, %v994_v52  ;;  %v961_v53 = vld [vmem:[#allocation2 + $0x40] sm:$0xff] }
 0x10c   : > { %v1847_v60 = vld [vmem:[#allocation2 + $0x18] sm:$0xff] }
 0x10d   : > { %v1883_v59 = vadd.f32 %v1847_v60, %v6309_v17  ;;  %1475 = vst.msk [vmem:[#allocation2 + $0x20] sm:$0xff] %vm314_vm0, %v1439_v58  ;;  %v1221_v17 = vsel %vm1196_vm1, %v1218_v15, %v1220_v55  ;;  %v6446_v15 = vld [vmem:[%s6061_s25 + $0x68] sm:$0xff] }
 0x10e   : > { %v2425_v0 = vld [vmem:[#allocation2 + $0x10] sm:$0xff]  ;;  %v1321_v1 = vpop.f32.mrf.mxu2  ;;  %v744_v12 = vshll.u32 %v6446_v15, 16 }
 0x10f   : > { %1919 = vst.msk [vmem:[#allocation2 + $0x18] sm:$0xff] %vm314_vm0, %v1883_v59  ;;  %v2461_v4 = vadd.f32 %v2425_v0, %v6332_v48  ;;  %v2203_v48 = vsel %vm2087_vm3, %v6373_v21, %v6425_v2  ;;  %v6503_v59 = vld [vmem:[%s6061_s25 + $0x80] sm:$0xff] }
 0x110   : > { %v878_v5 = vpop.f32.mrf.mxu1  ;;  %v6454_v20 = vpop.f32.mrf.mxu3  ;;  %v746_v44 = vrot.slane %v744_v12, 1 }
 0x111   : > { %2497 = vst.msk [vmem:[#allocation2 + $0x10] sm:$0xff] %vm314_vm0, %v2461_v4  ;;  %v995_v9 = vadd.f32 %v959_v6, %v878_v5  ;;  %v1671_v5 = vrot.slane %v6503_v59, 1  ;;  %v2214_v6 = vshrl.u32 %v5904_v61, 16 }
 0x112   : > { %v1404_v10 = vld [vmem:[#allocation2 + $0x28] sm:$0xff] }
 0x113   : > { %v6436_v11 = vpop.f32.mrf.mxu0  ;;  %v1440_v14 = vadd.f32 %v1404_v10, %v1321_v1  ;;  %1031 = vst.msk [vmem:[#allocation2 + $0x30] sm:$0xff] %vm314_vm0, %v995_v9  ;;  %5044 = vmatmul.msk.bf16.gmra.mxu1 %vm314_vm0, %v739_v8  ;;  %5146 = vmatmul.msk.bf16.gmra.mxu2 %vm314_vm0, %v1221_v17  ;;  %v2217_v8 = vshll.u32 %v5904_v61, 16  ;;  %v962_v10 = vld [vmem:[#allocation2 + $0x48] sm:$0xff]  ;;  %v6570_v61 = vld [vmem:[%s6061_s25 + $0x78] sm:$0xff] }
 0x114   : > { %v1848_v39 = vld [vmem:[#allocation2 + $0x20] sm:$0xff]  ;;  %v1226_v59 = vrot.slane %v6570_v61, 1 }
 0x115   : > { %v1884_v19 = vadd.f32 %v1848_v39, %v6326_v38  ;;  %1476 = vst.msk [vmem:[#allocation2 + $0x28] sm:$0xff] %vm314_vm0, %v1440_v14  ;;  %v740_v38 = vshrl.u32 %v6392_v33, 16  ;;  %5250 = vmatmul.msk.bf16.gmra.mxu3 %vm314_vm0, %v1670_v30  ;;  %v2210_v33 = vrot.slane %v2208_v25, 2  ;;  %v1672_v14 = vsel %vm1196_vm1, %v1669_v23, %v1671_v5 }
 0x116   : > { %5350 = vmatmul.msk.bf16.gmra.mxu0 %vm314_vm0, %v2203_v48  ;;  %v2426_v21 = vld [vmem:[#allocation2 + $0x18] sm:$0xff]  ;;  %v1324_v22 = vpop.f32.mrf.mxu2 }
 0x117   : > { %1920 = vst.msk [vmem:[#allocation2 + $0x20] sm:$0xff] %vm314_vm0, %v1884_v19  ;;  %v2462_v50 = vadd.f32 %v2426_v21, %v6364_v7  ;;  %v2207_v7 = vrot.slane %v2205_v24, 1  ;;  %v742_v43 = vor.u32 %v740_v38, %v738_v62 }
 0x118   : > { %v880_v26 = vpop.f32.mrf.mxu1  ;;  %v6477_v45 = vpop.f32.mrf.mxu3 }
 0x119   : > { %2498 = vst.msk [vmem:[#allocation2 + $0x18] sm:$0xff] %vm314_vm0, %v2462_v50  ;;  %v996_v32 = vadd.f32 %v960_v27, %v880_v26  ;;  %v6479_v47 = vor.u32 %v2210_v33, %v2207_v7  ;;  %v747_v31 = vsel %vm639_vm2, %v742_v43, %v746_v44  ;;  %v5905_v43 = vld [vmem:[%s6061_s25 + $0x80] sm:$0xff] }
 0x11a   : > { %v1405_v35 = vld [vmem:[#allocation2 + $0x30] sm:$0xff] }
 0x11b   : > { %v6470_v37 = vpop.f32.mrf.mxu0  ;;  %v1441_v40 = vadd.f32 %v1405_v35, %v1324_v22  ;;  %1032 = vst.msk [vmem:[#allocation2 + $0x38] sm:$0xff] %vm314_vm0, %v996_v32  ;;  %v963_v35 = vld [vmem:[#allocation2 + $0x50] sm:$0xff] }
 0x11c   : > { %v1849_v42 = vld [vmem:[#allocation2 + $0x28] sm:$0xff] }
 0x11d   : > { %v1885_v41 = vadd.f32 %v1849_v42, %v6349_v57  ;;  %1477 = vst.msk [vmem:[#allocation2 + $0x30] sm:$0xff] %vm314_vm0, %v1441_v40  ;;  %v1223_v57 = vsel %vm1196_vm1, %v1220_v55, %v1222_v34  ;;  %v6500_v55 = vld [vmem:[%s6061_s25 + $0x70] sm:$0xff] }
 0x11e   : > { %v2427_v46 = vld [vmem:[#allocation2 + $0x20] sm:$0xff]  ;;  %v1326_v3 = vpop.f32.mrf.mxu2  ;;  %v752_v48 = vshll.u32 %v6500_v55, 16 }
 0x11f   : > { %1921 = vst.msk [vmem:[#allocation2 + $0x28] sm:$0xff] %vm314_vm0, %v1885_v41  ;;  %v2463_v51 = vadd.f32 %v2427_v46, %v6382_v28  ;;  %v2212_v28 = vsel %vm2087_vm3, %v6425_v2, %v6479_v47  ;;  %v6557_v41 = vld [vmem:[%s6061_s25 + $0x88] sm:$0xff] }
 0x120   : > { %v883_v52 = vpop.f32.mrf.mxu1  ;;  %v6508_v1 = vpop.f32.mrf.mxu3  ;;  %v754_v50 = vrot.slane %v752_v48, 1 }
 0x121   : > { %2499 = vst.msk [vmem:[#allocation2 + $0x20] sm:$0xff] %vm314_vm0, %v2463_v51  ;;  %v997_v54 = vadd.f32 %v961_v53, %v883_v52  ;;  %v1673_v52 = vrot.slane %v6557_v41, 1  ;;  %v2223_v53 = vshrl.u32 %v5905_v43, 16 }
 0x122   : > { %v1406_v58 = vld [vmem:[#allocation2 + $0x38] sm:$0xff] }
 0x123   : > { %v6490_v60 = vpop.f32.mrf.mxu0  ;;  %v1442_v62 = vadd.f32 %v1406_v58, %v1326_v3  ;;  %1033 = vst.msk [vmem:[#allocation2 + $0x40] sm:$0xff] %vm314_vm0, %v997_v54  ;;  %5045 = vmatmul.msk.bf16.gmra.mxu1 %vm314_vm0, %v747_v31  ;;  %5147 = vmatmul.msk.bf16.gmra.mxu2 %vm314_vm0, %v1223_v57  ;;  %v2226_v31 = vshll.u32 %v5905_v43, 16  ;;  %v964_v58 = vld [vmem:[#allocation2 + $0x58] sm:$0xff]  ;;  %v6624_v43 = vld [vmem:[%s6061_s25 + $0x80] sm:$0xff] }
 0x124   : > { %v1850_v49 = vld [vmem:[#allocation2 + $0x30] sm:$0xff]  ;;  %v1228_v41 = vrot.slane %v6624_v43, 1 }
 0x125   : > { %v1886_v0 = vadd.f32 %v1850_v49, %v6371_v18  ;;  %1478 = vst.msk [vmem:[#allocation2 + $0x38] sm:$0xff] %vm314_vm0, %v1442_v62  ;;  %v748_v18 = vshrl.u32 %v6446_v15, 16  ;;  %5251 = vmatmul.msk.bf16.gmra.mxu3 %vm314_vm0, %v1672_v14  ;;  %v2219_v15 = vrot.slane %v2217_v8, 2  ;;  %v1674_v62 = vsel %vm1196_vm1, %v1671_v5, %v1673_v52 }
 0x126   : > { %5351 = vmatmul.msk.bf16.gmra.mxu0 %vm314_vm0, %v2212_v28  ;;  %v2428_v2 = vld [vmem:[#allocation2 + $0x28] sm:$0xff]  ;;  %v1329_v4 = vpop.f32.mrf.mxu2 }
 0x127   : > { %1922 = vst.msk [vmem:[#allocation2 + $0x30] sm:$0xff] %vm314_vm0, %v1886_v0  ;;  %v2464_v17 = vadd.f32 %v2428_v2, %v6416_v56  ;;  %v2216_v56 = vrot.slane %v2214_v6, 1  ;;  %v750_v25 = vor.u32 %v748_v18, %v746_v44 }
 0x128   : > { %v885_v9 = vpop.f32.mrf.mxu1  ;;  %v6531_v26 = vpop.f32.mrf.mxu3 }
 0x129   : > { %2500 = vst.msk [vmem:[#allocation2 + $0x28] sm:$0xff] %vm314_vm0, %v2464_v17  ;;  %v998_v39 = vadd.f32 %v962_v10, %v885_v9  ;;  %v6533_v12 = vor.u32 %v2219_v15, %v2216_v56  ;;  %v755_v7 = vsel %vm639_vm2, %v750_v25, %v754_v50  ;;  %v5906_v25 = vld [vmem:[%s6061_s25 + $0x88] sm:$0xff] }
 0x12a   : > { %v1407_v19 = vld [vmem:[#allocation2 + $0x40] sm:$0xff] }
 0x12b   : > { %v6524_v21 = vpop.f32.mrf.mxu0  ;;  %v1443_v22 = vadd.f32 %v1407_v19, %v1329_v4  ;;  %1034 = vst.msk [vmem:[#allocation2 + $0x48] sm:$0xff] %vm314_vm0, %v998_v39  ;;  %v965_v19 = vld [vmem:[#allocation2 + $0x60] sm:$0xff] }
 0x12c   : > { %v1851_v24 = vld [vmem:[#allocation2 + $0x38] sm:$0xff] }
 0x12d   : > { %v1887_v23 = vadd.f32 %v1851_v24, %v6400_v36  ;;  %1479 = vst.msk [vmem:[#allocation2 + $0x40] sm:$0xff] %vm314_vm0, %v1443_v22  ;;  %v1225_v36 = vsel %vm1196_vm1, %v1222_v34, %v1224_v16  ;;  %v6554_v34 = vld [vmem:[%s6061_s25 + $0x78] sm:$0xff] }
 0x12e   : > { %v2429_v27 = vld [vmem:[#allocation2 + $0x30] sm:$0xff]  ;;  %v1331_v38 = vpop.f32.mrf.mxu2  ;;  %v760_v28 = vshll.u32 %v6554_v34, 16 }
 0x12f   : > { %1923 = vst.msk [vmem:[#allocation2 + $0x38] sm:$0xff] %vm314_vm0, %v1887_v23  ;;  %v2465_v30 = vadd.f32 %v2429_v27, %v6436_v11  ;;  %v2221_v11 = vsel %vm2087_vm3, %v6479_v47, %v6533_v12  ;;  %v6611_v23 = vld [vmem:[%s6061_s25 + $0x90] sm:$0xff] }
 0x130   : > { %v888_v32 = vpop.f32.mrf.mxu1  ;;  %v6562_v3 = vpop.f32.mrf.mxu3  ;;  %v762_v17 = vrot.slane %v760_v28, 1 }
 0x131   : > { %2501 = vst.msk [vmem:[#allocation2 + $0x30] sm:$0xff] %vm314_vm0, %v2465_v30  ;;  %v999_v33 = vadd.f32 %v963_v35, %v888_v32  ;;  %v1675_v32 = vrot.slane %v6611_v23, 1  ;;  %v2232_v35 = vshrl.u32 %v5906_v25, 16 }
 0x132   : > { %v1408_v40 = vld [vmem:[#allocation2 + $0x48] sm:$0xff] }
 0x133   : > { %v6544_v42 = vpop.f32.mrf.mxu0  ;;  %v1444_v44 = vadd.f32 %v1408_v40, %v1331_v38  ;;  %1035 = vst.msk [vmem:[#allocation2 + $0x50] sm:$0xff] %vm314_vm0, %v999_v33  ;;  %5046 = vmatmul.msk.bf16.gmra.mxu1 %vm314_vm0, %v755_v7  ;;  %5148 = vmatmul.msk.bf16.gmra.mxu2 %vm314_vm0, %v1225_v36  ;;  %v2235_v7 = vshll.u32 %v5906_v25, 16  ;;  %v966_v40 = vld [vmem:[#allocation2 + $0x68] sm:$0xff]  ;;  %v968_v25 = vld [vmem:[#allocation2 + $0x78] sm:$0xff] }
 0x134   : > { %v1852_v29 = vld [vmem:[#allocation2 + $0x40] sm:$0xff] }
 0x135   : > { %v1888_v46 = vadd.f32 %v1852_v29, %v6423_v63  ;;  %1480 = vst.msk [vmem:[#allocation2 + $0x48] sm:$0xff] %vm314_vm0, %v1444_v44  ;;  %v756_v63 = vshrl.u32 %v6500_v55, 16  ;;  %5252 = vmatmul.msk.bf16.gmra.mxu3 %vm314_vm0, %v1674_v62  ;;  %v2228_v55 = vrot.slane %v2226_v31, 2  ;;  %v1676_v44 = vsel %vm1196_vm1, %v1673_v52, %v1675_v32 }
 0x136   : > { %5352 = vmatmul.msk.bf16.gmra.mxu0 %vm314_vm0, %v2221_v11  ;;  %v2430_v47 = vld [vmem:[#allocation2 + $0x38] sm:$0xff]  ;;  %v1334_v51 = vpop.f32.mrf.mxu2 }
 0x137   : > { %1924 = vst.msk [vmem:[#allocation2 + $0x40] sm:$0xff] %vm314_vm0, %v1888_v46  ;;  %v2466_v57 = vadd.f32 %v2430_v47, %v6470_v37  ;;  %v2225_v37 = vrot.slane %v2223_v53, 1  ;;  %v758_v8 = vor.u32 %v756_v63, %v754_v50 }
 0x138   : > { %v890_v54 = vpop.f32.mrf.mxu1  ;;  %v6585_v9 = vpop.f32.mrf.mxu3 }
 0x139   : > { %2502 = vst.msk [vmem:[#allocation2 + $0x38] sm:$0xff] %vm314_vm0, %v2466_v57  ;;  %v1000_v49 = vadd.f32 %v964_v58, %v890_v54  ;;  %v6587_v48 = vor.u32 %v2228_v55, %v2225_v37  ;;  %v763_v56 = vsel %vm639_vm2, %v758_v8, %v762_v17 }
 0x13a   : > { %v1409_v0 = vld [vmem:[#allocation2 + $0x50] sm:$0xff] }
 0x13b   : > { %v6578_v2 = vpop.f32.mrf.mxu0  ;;  %v1445_v4 = vadd.f32 %v1409_v0, %v1334_v51  ;;  %1036 = vst.msk [vmem:[#allocation2 + $0x58] sm:$0xff] %vm314_vm0, %v1000_v49  ;;  %v967_v0 = vld [vmem:[#allocation2 + $0x70] sm:$0xff] }
 0x13c   : > { %v1853_v6 = vld [vmem:[#allocation2 + $0x48] sm:$0xff] }
 0x13d   : > { %v1889_v5 = vadd.f32 %v1853_v6, %v6454_v20  ;;  %1481 = vst.msk [vmem:[#allocation2 + $0x50] sm:$0xff] %vm314_vm0, %v1445_v4  ;;  %v1227_v20 = vsel %vm1196_vm1, %v1224_v16, %v1226_v59  ;;  %v6608_v16 = vld [vmem:[%s6061_s25 + $0x80] sm:$0xff]  ;;  %v1543_v4 = vld [vmem:[%s6061_s25 + $0x98] sm:$0x1] }
 0x13e   : > { %v2431_v10 = vld [vmem:[#allocation2 + $0x40] sm:$0xff]  ;;  %v1336_v18 = vpop.f32.mrf.mxu2  ;;  %v768_v11 = vshll.u32 %v6608_v16, 16 }
 0x13f   : > { %1925 = vst.msk [vmem:[#allocation2 + $0x48] sm:$0xff] %vm314_vm0, %v1889_v5  ;;  %v2467_v14 = vadd.f32 %v2431_v10, %v6490_v60  ;;  %v2230_v60 = vsel %vm2087_vm3, %v6533_v12, %v6587_v48  ;;  %v5907_v5 = vld [vmem:[%s6061_s25 + $0x90] sm:$0xff] }
 0x140   : > { %v893_v39 = vpop.f32.mrf.mxu1  ;;  %v6616_v38 = vpop.f32.mrf.mxu3  ;;  %v770_v57 = vrot.slane %v768_v11, 1 }
 0x141   : > { %2503 = vst.msk [vmem:[#allocation2 + $0x40] sm:$0xff] %vm314_vm0, %v2467_v14  ;;  %v1001_v15 = vadd.f32 %v965_v19, %v893_v39 }
 0x142   : > { %v1410_v22 = vld [vmem:[#allocation2 + $0x58] sm:$0xff] }
 0x143   : > { %v6598_v24 = vpop.f32.mrf.mxu0  ;;  %v1446_v50 = vadd.f32 %v1410_v22, %v1336_v18  ;;  %1037 = vst.msk [vmem:[#allocation2 + $0x60] sm:$0xff] %vm314_vm0, %v1001_v15  ;;  %5047 = vmatmul.msk.bf16.gmra.mxu1 %vm314_vm0, %v763_v56  ;;  %5149 = vmatmul.msk.bf16.gmra.mxu2 %vm314_vm0, %v1227_v20  ;;  %v2241_v20 = vshrl.u32 %v5907_v5, 16  ;;  %v2244_v15 = vshll.u32 %v5907_v5, 16 }
 0x144   : > { %v1854_v13 = vld [vmem:[#allocation2 + $0x50] sm:$0xff] }
 0x145   : > { %v1890_v27 = vadd.f32 %v1854_v13, %v6477_v45  ;;  %1482 = vst.msk [vmem:[#allocation2 + $0x58] sm:$0xff] %vm314_vm0, %v1446_v50  ;;  %v764_v45 = vshrl.u32 %v6554_v34, 16  ;;  %5253 = vmatmul.msk.bf16.gmra.mxu3 %vm314_vm0, %v1676_v44  ;;  %v2237_v34 = vrot.slane %v2235_v7, 2  ;;  %v772_v50 = vshrl.u32 %v6608_v16, 16  ;;  %v6675_v13 = vld [vmem:[%s6061_s25 + $0x88] sm:$0xff] }
 0x146   : > { %5353 = vmatmul.msk.bf16.gmra.mxu0 %vm314_vm0, %v2230_v60  ;;  %v2432_v12 = vld [vmem:[#allocation2 + $0x48] sm:$0xff]  ;;  %v1339_v30 = vpop.f32.mrf.mxu2  ;;  %v2246_v7 = vrot.slane %v2244_v15, 2 }
 0x147   : > { %1926 = vst.msk [vmem:[#allocation2 + $0x50] sm:$0xff] %vm314_vm0, %v1890_v27  ;;  %v2468_v36 = vadd.f32 %v2432_v12, %v6524_v21  ;;  %v2234_v21 = vrot.slane %v2232_v35, 1  ;;  %v766_v31 = vor.u32 %v764_v45, %v762_v17  ;;  %v1622_v17 = vunpack.c.l.b16 %v1543_v4  ;;  %v540_v45 = vld [vmem:[%s6061_s25 + $0x90] sm:$0x1] }
 0x148   : > { %v895_v33 = vpop.f32.mrf.mxu1  ;;  %v6639_v54 = vpop.f32.mrf.mxu3 }
 0x149   : > { %2504 = vst.msk [vmem:[#allocation2 + $0x48] sm:$0xff] %vm314_vm0, %v2468_v36  ;;  %v1002_v29 = vadd.f32 %v966_v40, %v895_v33  ;;  %v6641_v28 = vor.u32 %v2237_v34, %v2234_v21  ;;  %v771_v37 = vsel %vm639_vm2, %v766_v31, %v770_v57  ;;  %v1641_v18 = vpack.c.b16 %v1622_v17, %v1622_v17  ;;  %v1988_v34 = vld [vmem:[%s6061_s25 + $0x98] sm:$0x3] }
 0x14a   : > { %v1411_v46 = vld [vmem:[#allocation2 + $0x60] sm:$0xff]  ;;  %v774_v33 = vor.u32 %v772_v50, %v770_v57  ;;  %v619_v57 = vunpack.c.l.b16 %v540_v45 }
 0x14b   : > { %v6632_v47 = vpop.f32.mrf.mxu0  ;;  %v1447_v51 = vadd.f32 %v1411_v46, %v1339_v30  ;;  %1038 = vst.msk [vmem:[#allocation2 + $0x68] sm:$0xff] %vm314_vm0, %v1002_v29  ;;  %v1677_v56 = vrot.slane %v1641_v18, 1 }
 0x14c   : > { %v1855_v53 = vld [vmem:[#allocation2 + $0x58] sm:$0xff]  ;;  %v638_v5 = vpack.c.b16 %v619_v57, %v619_v57 }
 0x14d   : > { %v1891_v52 = vadd.f32 %v1855_v53, %v6508_v1  ;;  %1483 = vst.msk [vmem:[#allocation2 + $0x60] sm:$0xff] %vm314_vm0, %v1447_v51  ;;  %v1229_v1 = vsel %vm1196_vm1, %v1226_v59, %v1228_v41  ;;  %v6663_v59 = vld [vmem:[%s6061_s25 + $0x88] sm:$0xff]  ;;  %v1678_v27 = vsel %vm1196_vm1, %v1675_v32, %v1677_v56  ;;  %v1230_v32 = vrot.slane %v6675_v13, 1 }
 0x14e   : > { %v2433_v58 = vld [vmem:[#allocation2 + $0x50] sm:$0xff]  ;;  %v1341_v63 = vpop.f32.mrf.mxu2  ;;  %v5363_v13 = vld [vmem:[%s6061_s25 + $0x8] sm:$0xc] }
 0x14f   : > { %1927 = vst.msk [vmem:[#allocation2 + $0x58] sm:$0xff] %vm314_vm0, %v1891_v52  ;;  %v2469_v62 = vadd.f32 %v2433_v58, %v6544_v42  ;;  %v2239_v42 = vsel %vm2087_vm3, %v6587_v48, %v6641_v28  ;;  %v1231_v31 = vsel %vm1196_vm1, %v1228_v41, %v1230_v32  ;;  %v2067_v52 = vunpack.c.l.b16 %v1988_v34  ;;  %v5567_v58 = vld [vmem:[%s6061_s25 + $0x10] sm:$0xc] }
 0x150   : > { %v898_v49 = vpop.f32.mrf.mxu1  ;;  %v6668_v48 = vpop.f32.mrf.mxu3 }
 0x151   : > { %2505 = vst.msk [vmem:[#allocation2 + $0x50] sm:$0xff] %vm314_vm0, %v2469_v62  ;;  %v1003_v55 = vadd.f32 %v967_v0, %v898_v49  ;;  %v5951_v49 = vld [vmem:[%s6061_s25 + $0x18] sm:$0xff]  ;;  %v2086_v43 = vpack.c.b16 %v2067_v52, %v2067_v52 }
 0x152   : > { %v1412_v6 = vld [vmem:[#allocation2 + $0x68] sm:$0xff] }
 0x153   : > { %v6653_v8 = vpop.f32.mrf.mxu0  ;;  %v1448_v10 = vadd.f32 %v1412_v6, %v1341_v63  ;;  %1039 = vst.msk [vmem:[#allocation2 + $0x70] sm:$0xff] %vm314_vm0, %v1003_v55  ;;  %5048 = vmatmul.msk.bf16.gmra.mxu1 %vm314_vm0, %v771_v37  ;;  %5150 = vmatmul.msk.bf16.gmra.mxu2 %vm314_vm0, %v1229_v1  ;;  %v5950_v63 = vld [vmem:[%s6061_s25 + $0x10] sm:$0xf0]  ;;  %v2250_v15 = vshrl.u32 %v2086_v43, 16 }
 0x154   : > { %v1856_v61 = vld [vmem:[#allocation2 + $0x60] sm:$0xff]  ;;  %v5568_v0 = vor.u32 %v5950_v63, %v5567_v58  ;;  %v971_v58 = vld [vmem:[#allocation2 + $0x90] sm:$0xff] }
 0x155   : > { %v1892_v14 = vadd.f32 %v1856_v61, %v6531_v26  ;;  %1484 = vst.msk [vmem:[#allocation2 + $0x68] sm:$0xff] %vm314_vm0, %v1448_v10  ;;  %v776_v26 = vshll.u32 %v6663_v59, 16  ;;  %5254 = vmatmul.msk.bf16.gmra.mxu3 %vm314_vm0, %v1678_v27  ;;  %v3570_v61 = vshll.u32 %v5951_v49, 16  ;;  %v780_v27 = vshrl.u32 %v6663_v59, 16  ;;  %v5952_v63 = vld [vmem:[%s6061_s25 + $0x20] sm:$0xff] }
 0x156   : > { %5354 = vmatmul.msk.bf16.gmra.mxu0 %vm314_vm0, %v2239_v42  ;;  %v2434_v39 = vld [vmem:[#allocation2 + $0x58] sm:$0xff]  ;;  %v1344_v19 = vpop.f32.mrf.mxu2  ;;  %v3559_v41 = vshrl.u32 %v5568_v0, 16  ;;  %v3562_v6 = vshll.u32 %v5568_v0, 16  ;;  %v3567_v42 = vshrl.u32 %v5951_v49, 16  ;;  %v3576_v0 = vshrl.u32 %v5952_v63, 16 }
 0x157   : > { %1928 = vst.msk [vmem:[#allocation2 + $0x60] sm:$0xff] %vm314_vm0, %v1892_v14  ;;  %v2470_v22 = vadd.f32 %v2434_v39, %v6578_v2  ;;  %v2243_v2 = vrot.slane %v2241_v20, 1  ;;  %v6685_v23 = vrot.slane %v776_v26, 1  ;;  %v970_v26 = vld [vmem:[#allocation2 + $0x88] sm:$0xff] }
 0x158   : > { %v900_v60 = vpop.f32.mrf.mxu1  ;;  %v6691_v11 = vpop.f32.mrf.mxu3  ;;  %v3561_v14 = vrot.slane %v3559_v41, 2  ;;  %v3564_v39 = vrot.slane %v3562_v6, 3 }
 0x159   : > { %2506 = vst.msk [vmem:[#allocation2 + $0x58] sm:$0xff] %vm314_vm0, %v2470_v22  ;;  %v1004_v12 = vadd.f32 %v968_v25, %v900_v60  ;;  %v6693_v46 = vor.u32 %v2246_v7, %v2243_v2  ;;  %v779_v53 = vsel %vm639_vm2, %v774_v33, %v6685_v23  ;;  %v2253_v22 = vshll.u32 %v2086_v43, 16  ;;  %v5910_v43 = vld [vmem:[%s6061_s25 + $0x8] sm:$0xf0] }
 0x15a   : > { %v1413_v30 = vld [vmem:[#allocation2 + $0x70] sm:$0xff]  ;;  %v3572_v60 = vrot.slane %v3570_v61, 3  ;;  %v2252_v33 = vrot.slane %v2250_v15, 1  ;;  %v6774_v15 = vld [vmem:[%s6061_s25 + $0x18] sm:$0xff] }
 0x15b   : > { %v6681_v35 = vpop.f32.mrf.mxu0  ;;  %v1449_v16 = vadd.f32 %v1413_v30, %v1344_v19  ;;  %1040 = vst.msk [vmem:[#allocation2 + $0x78] sm:$0xff] %vm314_vm0, %v1004_v12  ;;  %v2248_v55 = vsel %vm2087_vm3, %v6641_v28, %v6693_v46  ;;  %v3569_v19 = vrot.slane %v3567_v42, 2  ;;  %v784_v12 = vshll.u32 %v638_v5, 16  ;;  %v5930_v42 = vld [vmem:[%s6061_s25 + $0x10] sm:$0xf0] }
 0x15c   : > { %v1857_v36 = vld [vmem:[#allocation2 + $0x68] sm:$0xff] }
 0x15d   : > { %v1893_v40 = vadd.f32 %v1857_v36, %v6562_v3  ;;  %1485 = vst.msk [vmem:[#allocation2 + $0x70] sm:$0xff] %vm314_vm0, %v1449_v16  ;;  %v969_v3 = vld [vmem:[#allocation2 + $0x80] sm:$0xff]  ;;  %v6726_v2 = vor.u32 %v3572_v60, %v3569_v19  ;;  %v972_v19 = vld [vmem:[#allocation2 + $0x98] sm:$0xff] }
 0x15e   : > { %v2435_v44 = vld [vmem:[#allocation2 + $0x60] sm:$0xff]  ;;  %v1346_v29 = vpop.f32.mrf.mxu2 }
 0x15f   : > { %1929 = vst.msk [vmem:[#allocation2 + $0x68] sm:$0xff] %vm314_vm0, %v1893_v40  ;;  %v2471_v21 = vadd.f32 %v2435_v44, %v6598_v24  ;;  %v1097_v24 = vld [vmem:[%s6061_s25 + $0x90] sm:$0x1]  ;;  %v2255_v40 = vrot.slane %v2253_v22, 2  ;;  %v782_v44 = vor.u32 %v780_v27, %v6685_v23 }
 0x160   : > { %v903_v51 = vpop.f32.mrf.mxu1  ;;  %v1176_v10 = vunpack.c.l.b16 %v1097_v24  ;;  %v6721_v28 = vpop.f32.mrf.mxu3 }
 0x161   : > { %2507 = vst.msk [vmem:[#allocation2 + $0x60] sm:$0xff] %vm314_vm0, %v2471_v21  ;;  %v1005_v62 = vadd.f32 %v969_v3, %v903_v51 }
 0x162   : > { %v1414_v37 = vld [vmem:[#allocation2 + $0x78] sm:$0xff]  ;;  %v1195_v30 = vpack.c.b16 %v1176_v10, %v1176_v10 }
 0x163   : > { %v6710_v1 = vpop.f32.mrf.mxu0  ;;  %v1450_v4 = vadd.f32 %v1414_v37, %v1346_v29  ;;  %1041 = vst.msk [vmem:[#allocation2 + $0x80] sm:$0xff] %vm314_vm0, %v1005_v62  ;;  %5049 = vmatmul.msk.bf16.gmra.mxu1 %vm314_vm0, %v779_v53  ;;  %5151 = vmatmul.msk.bf16.gmra.mxu2 %vm314_vm0, %v1231_v31  ;;  %v786_v29 = vrot.slane %v784_v12, 1  ;;  %v2256_v31 = vor.u32 %v2255_v40, %v2252_v33  ;;  %v3579_v37 = vshll.u32 %v5952_v63, 16 }
 0x164   : > { %v1858_v17 = vld [vmem:[#allocation2 + $0x70] sm:$0xff]  ;;  %v1232_v21 = vrot.slane %v1195_v30, 1 }
 0x165   : > { %v1894_v18 = vadd.f32 %v1858_v17, %v6585_v9  ;;  %1486 = vst.msk [vmem:[#allocation2 + $0x78] sm:$0xff] %vm314_vm0, %v1450_v4  ;;  %v3565_v9 = vor.u32 %v3564_v39, %v3561_v14  ;;  %v787_v23 = vsel %vm639_vm2, %v782_v44, %v786_v29  ;;  %v3578_v4 = vrot.slane %v3576_v0, 2  ;;  %v5669_v14 = vld [vmem:[%s6061_s25 + $0x10] sm:$0x8] }
 0x166   : > { %5355 = vmatmul.msk.bf16.gmra.mxu0 %vm314_vm0, %v2248_v55  ;;  %v2436_v56 = vld [vmem:[#allocation2 + $0x68] sm:$0xff]  ;;  %v1349_v20 = vpop.f32.mrf.mxu2  ;;  %v3581_v41 = vrot.slane %v3579_v37, 3 }
 0x167   : > { %1930 = vst.msk [vmem:[#allocation2 + $0x70] sm:$0xff] %vm314_vm0, %v1894_v18  ;;  %v2472_v25 = vadd.f32 %v2436_v56, %v6632_v47  ;;  %v3574_v47 = vsel %vm3557_vm4, %v3565_v9, %v6726_v2  ;;  %v6771_v56 = vld [vmem:[%s6061_s25 + $0x10] sm:$0xff] }
 0x168   : > { %v905_v50 = vpop.f32.mrf.mxu1  ;;  %5645 = vmatmul.msk.bf16.vlgmr.msra.gmra.mxu3 %vm314_vm0, %v3574_v47  ;;  %v6738_v51 = vpop.f32.mrf.mxu3  ;;  %v6764_v61 = vor.u32 %v3581_v41, %v3578_v4  ;;  %v974_v4 = vld [vmem:[#allocation2 + $0xa8] sm:$0xff]  ;;  %v6820_v41 = vld [vmem:[%s6061_s25 + $0x18] sm:$0xff] }
 0x169   : > { %2508 = vst.msk [vmem:[#allocation2 + $0x68] sm:$0xff] %vm314_vm0, %v2472_v25  ;;  %v1006_v7 = vadd.f32 %v970_v26, %v905_v50 }
 0x16a   : > { %v1415_v16 = vld [vmem:[#allocation2 + $0x80] sm:$0xff]  ;;  %v3583_v60 = vsel %vm3557_vm4, %v6726_v2, %v6764_v61  ;;  %v3113_v2 = vrot.slane %v6774_v15, 2 }
 0x16b   : > { %v6729_v36 = vpop.f32.mrf.mxu0  ;;  %v1451_v45 = vadd.f32 %v1415_v16, %v1349_v20  ;;  %1042 = vst.msk [vmem:[#allocation2 + $0x88] sm:$0xff] %vm314_vm0, %v1006_v7  ;;  %v5364_v20 = vor.u32 %v5910_v43, %v5363_v13  ;;  %v2668_v7 = vrot.slane %v6771_v56, 2 }
 0x16c   : > { %v1859_v59 = vld [vmem:[#allocation2 + $0x78] sm:$0xff] }
 0x16d   : > { %v1895_v34 = vadd.f32 %v1859_v59, %v6616_v38  ;;  %1487 = vst.msk [vmem:[#allocation2 + $0x80] sm:$0xff] %vm314_vm0, %v1451_v45  ;;  %v1233_v38 = vsel %vm1196_vm1, %v1230_v32, %v1232_v21  ;;  %v2667_v30 = vrot.slane %v5364_v20, 2  ;;  %vm7620_vm1 = vmor %vm4608_vm14, %vm4609_vm15 }
 0x16e   : > { %v2437_v3 = vld [vmem:[#allocation2 + $0x70] sm:$0xff]  ;;  %v1351_v53 = vpop.f32.mrf.mxu2 }
 0x16f   : > { %1931 = vst.msk [vmem:[#allocation2 + $0x78] sm:$0xff] %vm314_vm0, %v1895_v34  ;;  %v2473_v57 = vadd.f32 %v2437_v3, %v6653_v8  ;;  %v2257_v8 = vsel %vm2087_vm3, %v6693_v46, %v2256_v31  ;;  %v5465_v46 = vld [vmem:[%s6061_s25 + $0x10] sm:$0xc]  ;;  %v973_v34 = vld [vmem:[#allocation2 + $0xa0] sm:$0xff] }
 0x170   : > { %v908_v52 = vpop.f32.mrf.mxu1  ;;  %v6762_v17 = vpop.f32.mrf.mxu3  ;;  %v5466_v22 = vor.u32 %v5930_v42, %v5465_v46 }
 0x171   : > { %2509 = vst.msk [vmem:[#allocation2 + $0x70] sm:$0xff] %vm314_vm0, %v2473_v57  ;;  %v1007_v62 = vadd.f32 %v971_v58, %v908_v52 }
 0x172   : > { %v1416_v24 = vld [vmem:[#allocation2 + $0x88] sm:$0xff]  ;;  %v3112_v16 = vrot.slane %v5466_v22, 2 }
 0x173   : > { %v6748_v49 = vpop.f32.mrf.mxu0  ;;  %v1452_v55 = vadd.f32 %v1416_v24, %v1351_v53  ;;  %1043 = vst.msk [vmem:[#allocation2 + $0x90] sm:$0xff] %vm314_vm0, %v1007_v62  ;;  %5050 = vmatmul.msk.bf16.gmra.mxu1 %vm314_vm0, %v787_v23  ;;  %5152 = vmatmul.msk.bf16.gmra.mxu2 %vm314_vm0, %v1233_v38  ;;  %v5953_v53 = vld [vmem:[%s6061_s25 + $0x28] sm:$0xff] }
 0x174   : > { %v1860_v32 = vld [vmem:[#allocation2 + $0x80] sm:$0xff]  ;;  %v3114_v3 = vsel %vm2666_vm5, %v3112_v16, %v3113_v2  ;;  %v3585_v58 = vshrl.u32 %v5953_v53, 16  ;;  %v3588_v23 = vshll.u32 %v5953_v53, 16  ;;  %v6877_v53 = vld [vmem:[%s6061_s25 + $0x28] sm:$0xff] }
 0x175   : > { %v1896_v6 = vadd.f32 %v1860_v32, %v6639_v54  ;;  %1488 = vst.msk [vmem:[#allocation2 + $0x88] sm:$0xff] %vm314_vm0, %v1452_v55  ;;  %v5970_v54 = vld [vmem:[%s6061_s25 + $0x10] sm:$0xf0] }
 0x176   : > { %5356 = vmatmul.msk.bf16.gmra.mxu0 %vm314_vm0, %v2257_v8  ;;  %v2438_v5 = vld [vmem:[#allocation2 + $0x78] sm:$0xff]  ;;  %v1354_v10 = vpop.f32.mrf.mxu2  ;;  %v5670_v26 = vor.u32 %v5970_v54, %v5669_v14  ;;  %v3587_v62 = vrot.slane %v3585_v58, 2  ;;  %v3590_v24 = vrot.slane %v3588_v23, 3  ;;  %v2670_v14 = vrot.slane %v6820_v41, 2  ;;  %v6884_v58 = vld [vmem:[%s6061_s25 + $0x28] sm:$0xff] }
 0x177   : > { %1932 = vst.msk [vmem:[#allocation2 + $0x80] sm:$0xff] %vm314_vm0, %v1896_v6  ;;  %v2474_v18 = vadd.f32 %v2438_v5, %v6681_v35  ;;  %v6783_v35 = vld [vmem:[%s6061_s25 + $0x18] sm:$0xff]  ;;  %v6823_v6 = vld [vmem:[%s6061_s25 + $0x20] sm:$0xff] }
 0x178   : > { %v910_v39 = vpop.f32.mrf.mxu1  ;;  %5646 = vmatmul.msk.bf16.gmra.mxu3 %vm314_vm0, %v3583_v60  ;;  %v6791_v40 = vpop.f32.mrf.mxu3  ;;  %v4137_v59 = vrot.slane %v5670_v26, 3  ;;  %v4138_v44 = vrot.slane %v6783_v35, 3  ;;  %v3591_v13 = vor.u32 %v3590_v24, %v3587_v62  ;;  %v3115_v54 = vrot.slane %v6823_v6, 2 }
 0x179   : > { %2510 = vst.msk [vmem:[#allocation2 + $0x78] sm:$0xff] %vm314_vm0, %v2474_v18  ;;  %v1008_v25 = vadd.f32 %v972_v19, %v910_v39 }
 0x17a   : > { %v1417_v9 = vld [vmem:[#allocation2 + $0x90] sm:$0xff]  ;;  %v3116_v26 = vsel %vm2666_vm5, %v3113_v2, %v3115_v54 }
 0x17b   : > { %v6780_v50 = vpop.f32.mrf.mxu0  ;;  %v1453_v27 = vadd.f32 %v1417_v9, %v1354_v10  ;;  %1044 = vst.msk [vmem:[#allocation2 + $0x98] sm:$0xff] %vm314_vm0, %v1008_v25  ;;  %v6831_v10 = vld [vmem:[%s6061_s25 + $0x20] sm:$0xff]  ;;  %v975_v9 = vld [vmem:[#allocation2 + $0xb0] sm:$0xff] }
 0x17c   : > { %v1861_v12 = vld [vmem:[#allocation2 + $0x88] sm:$0xff]  ;;  %v4140_v22 = vrot.slane %v6831_v10, 3 }
 0x17d   : > { %v1897_v33 = vadd.f32 %v1861_v12, %v6668_v48  ;;  %1489 = vst.msk [vmem:[#allocation2 + $0x90] sm:$0xff] %vm314_vm0, %v1453_v27  ;;  %v2669_v48 = vsel %vm2666_vm5, %v2667_v30, %v2668_v7  ;;  %v5954_v27 = vld [vmem:[%s6061_s25 + $0x30] sm:$0xff] }
 0x17e   : > { %v2439_v47 = vld [vmem:[#allocation2 + $0x80] sm:$0xff]  ;;  %v1356_v45 = vpop.f32.mrf.mxu2  ;;  %v4141_v56 = vsel %vm4136_vm6, %v4138_v44, %v4140_v22  ;;  %v3597_v16 = vshll.u32 %v5954_v27, 16 }
 0x17f   : > { %1933 = vst.msk [vmem:[#allocation2 + $0x88] sm:$0xff] %vm314_vm0, %v1897_v33  ;;  %v2475_v29 = vadd.f32 %v2439_v47, %v6710_v1  ;;  %v4139_v1 = vsel %vm4136_vm6, %v4137_v59, %v4138_v44 }
 0x180   : > { %v913_v21 = vpop.f32.mrf.mxu1  ;;  %v6815_v0 = vpop.f32.mrf.mxu3  ;;  %v3599_v47 = vrot.slane %v3597_v16, 3 }
 0x181   : > { %2511 = vst.msk [vmem:[#allocation2 + $0x80] sm:$0xff] %vm314_vm0, %v2475_v29  ;;  %v1009_v31 = vadd.f32 %v973_v34, %v913_v21 }
 0x182   : > { %v1418_v57 = vld [vmem:[#allocation2 + $0x98] sm:$0xff] }
 0x183   : > { %v6804_v52 = vpop.f32.mrf.mxu0  ;;  %v1454_v38 = vadd.f32 %v1418_v57, %v1356_v45  ;;  %1045 = vst.msk [vmem:[#allocation2 + $0xa0] sm:$0xff] %vm314_vm0, %v1009_v31  ;;  %5441 = vmatmul.msk.bf16.vlgmr.msra.gmra.mxu1 %vm314_vm0, %v2669_v48  ;;  %5543 = vmatmul.msk.bf16.vlgmr.msra.gmra.mxu2 %vm314_vm0, %v3114_v3  ;;  %v976_v48 = vld [vmem:[#allocation2 + $0xb8] sm:$0xff]  ;;  %v6874_v3 = vld [vmem:[%s6061_s25 + $0x20] sm:$0xff] }
 0x184   : > { %v1862_v63 = vld [vmem:[#allocation2 + $0x90] sm:$0xff] }
 0x185   : > { %v1898_v8 = vadd.f32 %v1862_v63, %v6691_v11  ;;  %1490 = vst.msk [vmem:[#allocation2 + $0x98] sm:$0xff] %vm314_vm0, %v1454_v38  ;;  %v3592_v11 = vsel %vm3557_vm4, %v6764_v61, %v3591_v13  ;;  %v2672_v38 = vrot.slane %v6874_v3, 2  ;;  %v3117_v63 = vrot.slane %v6877_v53, 2 }
 0x186   : > { %5747 = vmatmul.msk.bf16.vlgmr.msra.gmra.mxu0 %vm314_vm0, %v4139_v1  ;;  %v2440_v37 = vld [vmem:[#allocation2 + $0x88] sm:$0xff]  ;;  %v1359_v55 = vpop.f32.mrf.mxu2 }
 0x187   : > { %1934 = vst.msk [vmem:[#allocation2 + $0x90] sm:$0xff] %vm314_vm0, %v1898_v8  ;;  %v2476_v32 = vadd.f32 %v2440_v37, %v6729_v36 }
 0x188   : > { %v915_v43 = vpop.f32.mrf.mxu1  ;;  %5647 = vmatmul.msk.bf16.gmra.mxu3 %vm314_vm0, %v3592_v11  ;;  %v6839_v39 = vpop.f32.mrf.mxu3  ;;  %v5955_v11 = vld [vmem:[%s6061_s25 + $0x38] sm:$0xff] }
 0x189   : > { %2512 = vst.msk [vmem:[#allocation2 + $0x88] sm:$0xff] %vm314_vm0, %v2476_v32  ;;  %v1010_v46 = vadd.f32 %v974_v4, %v915_v43  ;;  %v977_v43 = vld [vmem:[#allocation2 + $0xc0] sm:$0xff]  ;;  %v3118_v4 = vsel %vm2666_vm5, %v3115_v54, %v3117_v63 }
 0x18a   : > { %v1419_v42 = vld [vmem:[#allocation2 + $0xa0] sm:$0xff] }
 0x18b   : > { %v6828_v5 = vpop.f32.mrf.mxu0  ;;  %v1455_v18 = vadd.f32 %v1419_v42, %v1359_v55  ;;  %1046 = vst.msk [vmem:[#allocation2 + $0xa8] sm:$0xff] %vm314_vm0, %v1010_v46  ;;  %v4142_v55 = vrot.slane %v6884_v58, 3 }
 0x18c   : > { %v1863_v36 = vld [vmem:[#allocation2 + $0x98] sm:$0xff] }
 0x18d   : > { %v1899_v61 = vadd.f32 %v1863_v36, %v6721_v28  ;;  %1491 = vst.msk [vmem:[#allocation2 + $0xa0] sm:$0xff] %vm314_vm0, %v1455_v18  ;;  %v2671_v28 = vsel %vm2666_vm5, %v2668_v7, %v2670_v14  ;;  %v3594_v7 = vshrl.u32 %v5954_v27, 16  ;;  %v4143_v41 = vsel %vm4136_vm6, %v4140_v22, %v4142_v55  ;;  %v6930_v27 = vld [vmem:[%s6061_s25 + $0x30] sm:$0xff] }
 0x18e   : > { %v2441_v19 = vld [vmem:[#allocation2 + $0x90] sm:$0xff]  ;;  %v1361_v20 = vpop.f32.mrf.mxu2  ;;  %v3603_v18 = vshrl.u32 %v5955_v11, 16  ;;  %v3606_v36 = vshll.u32 %v5955_v11, 16  ;;  %v6983_v11 = vld [vmem:[%s6061_s25 + $0x38] sm:$0xff] }
 0x18f   : > { %1935 = vst.msk [vmem:[#allocation2 + $0x98] sm:$0xff] %vm314_vm0, %v1899_v61  ;;  %v2477_v60 = vadd.f32 %v2441_v19, %v6748_v49  ;;  %v3596_v2 = vrot.slane %v3594_v7, 2  ;;  %v6937_v7 = vld [vmem:[%s6061_s25 + $0x30] sm:$0xff] }
 0x190   : > { %v918_v25 = vpop.f32.mrf.mxu1  ;;  %v6869_v35 = vpop.f32.mrf.mxu3  ;;  %v3605_v54 = vrot.slane %v3603_v18, 2  ;;  %v3608_v61 = vrot.slane %v3606_v36, 3  ;;  %v6990_v18 = vld [vmem:[%s6061_s25 + $0x38] sm:$0xff] }
 0x191   : > { %2513 = vst.msk [vmem:[#allocation2 + $0x90] sm:$0xff] %vm314_vm0, %v2477_v60  ;;  %v1011_v12 = vadd.f32 %v975_v9, %v918_v25  ;;  %v3600_v29 = vor.u32 %v3599_v47, %v3596_v2 }
 0x192   : > { %v1420_v30 = vld [vmem:[#allocation2 + $0xa8] sm:$0xff]  ;;  %v3609_v60 = vor.u32 %v3608_v61, %v3605_v54 }
 0x193   : > { %v6856_v49 = vpop.f32.mrf.mxu0  ;;  %v1456_v33 = vadd.f32 %v1420_v30, %v1361_v20  ;;  %1047 = vst.msk [vmem:[#allocation2 + $0xb0] sm:$0xff] %vm314_vm0, %v1011_v12  ;;  %5442 = vmatmul.msk.bf16.gmra.mxu1 %vm314_vm0, %v2671_v28  ;;  %5544 = vmatmul.msk.bf16.gmra.mxu2 %vm314_vm0, %v3116_v26  ;;  %v978_v28 = vld [vmem:[#allocation2 + $0xc8] sm:$0xff] }
 0x194   : > { %v1864_v15 = vld [vmem:[#allocation2 + $0xa0] sm:$0xff]  ;;  %v6927_v26 = vld [vmem:[%s6061_s25 + $0x28] sm:$0xff] }
 0x195   : > { %v1900_v45 = vadd.f32 %v1864_v15, %v6738_v51  ;;  %1492 = vst.msk [vmem:[#allocation2 + $0xa8] sm:$0xff] %vm314_vm0, %v1456_v33  ;;  %v3601_v51 = vsel %vm3557_vm4, %v3591_v13, %v3600_v29  ;;  %v2674_v33 = vrot.slane %v6927_v26, 2  ;;  %v3119_v15 = vrot.slane %v6930_v27, 2 }
 0x196   : > { %5748 = vmatmul.msk.bf16.gmra.mxu0 %vm314_vm0, %v4141_v56  ;;  %v2442_v59 = vld [vmem:[#allocation2 + $0x98] sm:$0xff]  ;;  %v1364_v44 = vpop.f32.mrf.mxu2 }
 0x197   : > { %1936 = vst.msk [vmem:[#allocation2 + $0xa0] sm:$0xff] %vm314_vm0, %v1900_v45  ;;  %v2478_v21 = vadd.f32 %v2442_v59, %v6780_v50 }
 0x198   : > { %v920_v34 = vpop.f32.mrf.mxu1  ;;  %5648 = vmatmul.msk.bf16.gmra.mxu3 %vm314_vm0, %v3601_v51  ;;  %v6892_v24 = vpop.f32.mrf.mxu3  ;;  %v5956_v51 = vld [vmem:[%s6061_s25 + $0x40] sm:$0xff] }
 0x199   : > { %2514 = vst.msk [vmem:[#allocation2 + $0x98] sm:$0xff] %vm314_vm0, %v2478_v21  ;;  %v1012_v31 = vadd.f32 %v976_v48, %v920_v34  ;;  %v979_v34 = vld [vmem:[#allocation2 + $0xd0] sm:$0xff]  ;;  %v3120_v48 = vsel %vm2666_vm5, %v3117_v63, %v3119_v15 }
 0x19a   : > { %v1421_v57 = vld [vmem:[#allocation2 + $0xb0] sm:$0xff] }
 0x19b   : > { %v6881_v1 = vpop.f32.mrf.mxu0  ;;  %v1457_v23 = vadd.f32 %v1421_v57, %v1364_v44  ;;  %1048 = vst.msk [vmem:[#allocation2 + $0xb8] sm:$0xff] %vm314_vm0, %v1012_v31  ;;  %v4144_v44 = vrot.slane %v6937_v7, 3 }
 0x19c   : > { %v1865_v50 = vld [vmem:[#allocation2 + $0xa8] sm:$0xff] }
 0x19d   : > { %v1901_v62 = vadd.f32 %v1865_v50, %v6762_v17  ;;  %1493 = vst.msk [vmem:[#allocation2 + $0xb0] sm:$0xff] %vm314_vm0, %v1457_v23  ;;  %v2673_v17 = vsel %vm2666_vm5, %v2670_v14, %v2672_v38  ;;  %v4145_v3 = vsel %vm4136_vm6, %v4142_v55, %v4144_v44  ;;  %v3612_v23 = vshrl.u32 %v5956_v51, 16 }
 0x19e   : > { %v2443_v8 = vld [vmem:[#allocation2 + $0xa0] sm:$0xff]  ;;  %v1366_v37 = vpop.f32.mrf.mxu2  ;;  %v3615_v50 = vshll.u32 %v5956_v51, 16 }
 0x19f   : > { %1937 = vst.msk [vmem:[#allocation2 + $0xa8] sm:$0xff] %vm314_vm0, %v1901_v62  ;;  %v2479_v13 = vadd.f32 %v2443_v8, %v6804_v52  ;;  %v3614_v63 = vrot.slane %v3612_v23, 2  ;;  %v7036_v51 = vld [vmem:[%s6061_s25 + $0x40] sm:$0xff] }
 0x1a0   : > { %v923_v32 = vpop.f32.mrf.mxu1  ;;  %v6922_v10 = vpop.f32.mrf.mxu3  ;;  %v3617_v62 = vrot.slane %v3615_v50, 3  ;;  %v7043_v23 = vld [vmem:[%s6061_s25 + $0x40] sm:$0xff] }
 0x1a1   : > { %2515 = vst.msk [vmem:[#allocation2 + $0xa0] sm:$0xff] %vm314_vm0, %v2479_v13  ;;  %v1013_v46 = vadd.f32 %v977_v43, %v923_v32 }
 0x1a2   : > { %v1422_v42 = vld [vmem:[#allocation2 + $0xb8] sm:$0xff]  ;;  %v3618_v13 = vor.u32 %v3617_v62, %v3614_v63 }
 0x1a3   : > { %v6909_v52 = vpop.f32.mrf.mxu0  ;;  %v1458_v14 = vadd.f32 %v1422_v42, %v1366_v37  ;;  %1049 = vst.msk [vmem:[#allocation2 + $0xc0] sm:$0xff] %vm314_vm0, %v1013_v46  ;;  %5443 = vmatmul.msk.bf16.gmra.mxu1 %vm314_vm0, %v2673_v17  ;;  %5545 = vmatmul.msk.bf16.gmra.mxu2 %vm314_vm0, %v3118_v4  ;;  %v980_v17 = vld [vmem:[#allocation2 + $0xd8] sm:$0xff]  ;;  %v6980_v4 = vld [vmem:[%s6061_s25 + $0x30] sm:$0xff] }
 0x1a4   : > { %v1866_v6 = vld [vmem:[#allocation2 + $0xb0] sm:$0xff] }
 0x1a5   : > { %v1902_v19 = vadd.f32 %v1866_v6, %v6791_v40  ;;  %1494 = vst.msk [vmem:[#allocation2 + $0xb8] sm:$0xff] %vm314_vm0, %v1458_v14  ;;  %v3610_v40 = vsel %vm3557_vm4, %v3600_v29, %v3609_v60  ;;  %v2676_v14 = vrot.slane %v6980_v4, 2  ;;  %v3121_v6 = vrot.slane %v6983_v11, 2 }
 0x1a6   : > { %5749 = vmatmul.msk.bf16.gmra.mxu0 %vm314_vm0, %v4143_v41  ;;  %v2444_v20 = vld [vmem:[#allocation2 + $0xa8] sm:$0xff]  ;;  %v1369_v22 = vpop.f32.mrf.mxu2 }
 0x1a7   : > { %1938 = vst.msk [vmem:[#allocation2 + $0xb0] sm:$0xff] %vm314_vm0, %v1902_v19  ;;  %v2480_v25 = vadd.f32 %v2444_v20, %v6828_v5 }
 0x1a8   : > { %v925_v9 = vpop.f32.mrf.mxu1  ;;  %5649 = vmatmul.msk.bf16.gmra.mxu3 %vm314_vm0, %v3610_v40  ;;  %v6945_v47 = vpop.f32.mrf.mxu3  ;;  %v5957_v40 = vld [vmem:[%s6061_s25 + $0x48] sm:$0xff] }
 0x1a9   : > { %2516 = vst.msk [vmem:[#allocation2 + $0xa8] sm:$0xff] %vm314_vm0, %v2480_v25  ;;  %v1014_v12 = vadd.f32 %v978_v28, %v925_v9  ;;  %v981_v9 = vld [vmem:[#allocation2 + $0xe0] sm:$0xff]  ;;  %v3122_v28 = vsel %vm2666_vm5, %v3119_v15, %v3121_v6 }
 0x1aa   : > { %v1423_v30 = vld [vmem:[#allocation2 + $0xc0] sm:$0xff] }
 0x1ab   : > { %v6934_v56 = vpop.f32.mrf.mxu0  ;;  %v1459_v16 = vadd.f32 %v1423_v30, %v1369_v22  ;;  %1050 = vst.msk [vmem:[#allocation2 + $0xc8] sm:$0xff] %vm314_vm0, %v1014_v12  ;;  %v4146_v22 = vrot.slane %v6990_v18, 3 }
 0x1ac   : > { %v1867_v5 = vld [vmem:[#allocation2 + $0xb8] sm:$0xff] }
 0x1ad   : > { %v1903_v2 = vadd.f32 %v1867_v5, %v6815_v0  ;;  %1495 = vst.msk [vmem:[#allocation2 + $0xc0] sm:$0xff] %vm314_vm0, %v1459_v16  ;;  %v2675_v0 = vsel %vm2666_vm5, %v2672_v38, %v2674_v33  ;;  %v4147_v26 = vsel %vm4136_vm6, %v4144_v44, %v4146_v22  ;;  %v3621_v16 = vshrl.u32 %v5957_v40, 16 }
 0x1ae   : > { %v2445_v45 = vld [vmem:[#allocation2 + $0xb0] sm:$0xff]  ;;  %v1371_v59 = vpop.f32.mrf.mxu2  ;;  %v3624_v5 = vshll.u32 %v5957_v40, 16  ;;  %v7089_v40 = vld [vmem:[%s6061_s25 + $0x48] sm:$0xff] }
 0x1af   : > { %1939 = vst.msk [vmem:[#allocation2 + $0xb8] sm:$0xff] %vm314_vm0, %v1903_v2  ;;  %v2481_v29 = vadd.f32 %v2445_v45, %v6856_v49  ;;  %v3623_v15 = vrot.slane %v3621_v16, 2  ;;  %v7096_v16 = vld [vmem:[%s6061_s25 + $0x48] sm:$0xff] }
 0x1b0   : > { %v928_v21 = vpop.f32.mrf.mxu1  ;;  %v6975_v58 = vpop.f32.mrf.mxu3  ;;  %v3626_v2 = vrot.slane %v3624_v5, 3 }
 0x1b1   : > { %2517 = vst.msk [vmem:[#allocation2 + $0xb0] sm:$0xff] %vm314_vm0, %v2481_v29  ;;  %v1015_v31 = vadd.f32 %v979_v34, %v928_v21 }
 0x1b2   : > { %v1424_v57 = vld [vmem:[#allocation2 + $0xc8] sm:$0xff]  ;;  %v3627_v29 = vor.u32 %v3626_v2, %v3623_v15 }
 0x1b3   : > { %v6962_v49 = vpop.f32.mrf.mxu0  ;;  %v1460_v38 = vadd.f32 %v1424_v57, %v1371_v59  ;;  %1051 = vst.msk [vmem:[#allocation2 + $0xd0] sm:$0xff] %vm314_vm0, %v1015_v31  ;;  %5444 = vmatmul.msk.bf16.gmra.mxu1 %vm314_vm0, %v2675_v0  ;;  %5546 = vmatmul.msk.bf16.gmra.mxu2 %vm314_vm0, %v3120_v48  ;;  %v982_v0 = vld [vmem:[#allocation2 + $0xe8] sm:$0xff]  ;;  %v7033_v48 = vld [vmem:[%s6061_s25 + $0x38] sm:$0xff] }
 0x1b4   : > { %v1868_v53 = vld [vmem:[#allocation2 + $0xc0] sm:$0xff] }
 0x1b5   : > { %v1904_v8 = vadd.f32 %v1868_v53, %v6839_v39  ;;  %1496 = vst.msk [vmem:[#allocation2 + $0xc8] sm:$0xff] %vm314_vm0, %v1460_v38  ;;  %v3619_v39 = vsel %vm3557_vm4, %v3609_v60, %v3618_v13  ;;  %v2678_v38 = vrot.slane %v7033_v48, 2  ;;  %v3123_v53 = vrot.slane %v7036_v51, 2 }
 0x1b6   : > { %5750 = vmatmul.msk.bf16.gmra.mxu0 %vm314_vm0, %v4145_v3  ;;  %v2446_v37 = vld [vmem:[#allocation2 + $0xb8] sm:$0xff]  ;;  %v1374_v55 = vpop.f32.mrf.mxu2 }
 0x1b7   : > { %1940 = vst.msk [vmem:[#allocation2 + $0xc0] sm:$0xff] %vm314_vm0, %v1904_v8  ;;  %v2482_v32 = vadd.f32 %v2446_v37, %v6881_v1 }
 0x1b8   : > { %v930_v43 = vpop.f32.mrf.mxu1  ;;  %5650 = vmatmul.msk.bf16.gmra.mxu3 %vm314_vm0, %v3619_v39  ;;  %v6998_v61 = vpop.f32.mrf.mxu3  ;;  %v5958_v39 = vld [vmem:[%s6061_s25 + $0x50] sm:$0xff] }
 0x1b9   : > { %2518 = vst.msk [vmem:[#allocation2 + $0xb8] sm:$0xff] %vm314_vm0, %v2482_v32  ;;  %v1016_v46 = vadd.f32 %v980_v17, %v930_v43  ;;  %v983_v43 = vld [vmem:[#allocation2 + $0xf0] sm:$0xff]  ;;  %v3124_v17 = vsel %vm2666_vm5, %v3121_v6, %v3123_v53 }
 0x1ba   : > { %v1425_v42 = vld [vmem:[#allocation2 + $0xd0] sm:$0xff] }
 0x1bb   : > { %v6987_v41 = vpop.f32.mrf.mxu0  ;;  %v1461_v36 = vadd.f32 %v1425_v42, %v1374_v55  ;;  %1052 = vst.msk [vmem:[#allocation2 + $0xd8] sm:$0xff] %vm314_vm0, %v1016_v46  ;;  %v4148_v55 = vrot.slane %v7043_v23, 3 }
 0x1bc   : > { %v1869_v1 = vld [vmem:[#allocation2 + $0xc8] sm:$0xff] }
 0x1bd   : > { %v1905_v54 = vadd.f32 %v1869_v1, %v6869_v35  ;;  %1497 = vst.msk [vmem:[#allocation2 + $0xd0] sm:$0xff] %vm314_vm0, %v1461_v36  ;;  %v2677_v35 = vsel %vm2666_vm5, %v2674_v33, %v2676_v14  ;;  %v4149_v4 = vsel %vm4136_vm6, %v4146_v22, %v4148_v55  ;;  %v3630_v36 = vshrl.u32 %v5958_v39, 16 }
 0x1be   : > { %v2447_v19 = vld [vmem:[#allocation2 + $0xc0] sm:$0xff]  ;;  %v1376_v20 = vpop.f32.mrf.mxu2  ;;  %v3633_v1 = vshll.u32 %v5958_v39, 16  ;;  %v7142_v39 = vld [vmem:[%s6061_s25 + $0x50] sm:$0xff] }
 0x1bf   : > { %1941 = vst.msk [vmem:[#allocation2 + $0xc8] sm:$0xff] %vm314_vm0, %v1905_v54  ;;  %v2483_v60 = vadd.f32 %v2447_v19, %v6909_v52  ;;  %v3632_v6 = vrot.slane %v3630_v36, 2  ;;  %v7149_v36 = vld [vmem:[%s6061_s25 + $0x50] sm:$0xff] }
 0x1c0   : > { %v933_v25 = vpop.f32.mrf.mxu1  ;;  %v7028_v7 = vpop.f32.mrf.mxu3  ;;  %v3635_v54 = vrot.slane %v3633_v1, 3 }
 0x1c1   : > { %2519 = vst.msk [vmem:[#allocation2 + $0xc0] sm:$0xff] %vm314_vm0, %v2483_v60  ;;  %v1017_v12 = vadd.f32 %v981_v9, %v933_v25 }
 0x1c2   : > { %v1426_v30 = vld [vmem:[#allocation2 + $0xd8] sm:$0xff]  ;;  %v3636_v60 = vor.u32 %v3635_v54, %v3632_v6 }
 0x1c3   : > { %v7015_v52 = vpop.f32.mrf.mxu0  ;;  %v1462_v33 = vadd.f32 %v1426_v30, %v1376_v20  ;;  %1053 = vst.msk [vmem:[#allocation2 + $0xe0] sm:$0xff] %vm314_vm0, %v1017_v12  ;;  %5445 = vmatmul.msk.bf16.gmra.mxu1 %vm314_vm0, %v2677_v35  ;;  %5547 = vmatmul.msk.bf16.gmra.mxu2 %vm314_vm0, %v3122_v28  ;;  %v984_v35 = vld [vmem:[#allocation2 + $0xf8] sm:$0xff]  ;;  %v7086_v28 = vld [vmem:[%s6061_s25 + $0x40] sm:$0xff] }
 0x1c4   : > { %v1870_v27 = vld [vmem:[#allocation2 + $0xd0] sm:$0xff] }
 0x1c5   : > { %v1906_v45 = vadd.f32 %v1870_v27, %v6892_v24  ;;  %1498 = vst.msk [vmem:[#allocation2 + $0xd8] sm:$0xff] %vm314_vm0, %v1462_v33  ;;  %v3628_v24 = vsel %vm3557_vm4, %v3618_v13, %v3627_v29  ;;  %v2680_v33 = vrot.slane %v7086_v28, 2  ;;  %v3125_v27 = vrot.slane %v7089_v40, 2 }
 0x1c6   : > { %5751 = vmatmul.msk.bf16.gmra.mxu0 %vm314_vm0, %v4147_v26  ;;  %v2448_v59 = vld [vmem:[#allocation2 + $0xc8] sm:$0xff]  ;;  %v1379_v44 = vpop.f32.mrf.mxu2 }
 0x1c7   : > { %1942 = vst.msk [vmem:[#allocation2 + $0xd0] sm:$0xff] %vm314_vm0, %v1906_v45  ;;  %v2484_v21 = vadd.f32 %v2448_v59, %v6934_v56 }
 0x1c8   : > { %v935_v34 = vpop.f32.mrf.mxu1  ;;  %5651 = vmatmul.msk.bf16.gmra.mxu3 %vm314_vm0, %v3628_v24  ;;  %v7051_v62 = vpop.f32.mrf.mxu3  ;;  %v5959_v24 = vld [vmem:[%s6061_s25 + $0x58] sm:$0xff] }
 0x1c9   : > { %2520 = vst.msk [vmem:[#allocation2 + $0xc8] sm:$0xff] %vm314_vm0, %v2484_v21  ;;  %v1018_v31 = vadd.f32 %v982_v0, %v935_v34  ;;  %v985_v34 = vld [vmem:[#allocation2 + $0x100] sm:$0xff]  ;;  %v3126_v0 = vsel %vm2666_vm5, %v3123_v53, %v3125_v27 }
 0x1ca   : > { %v1427_v57 = vld [vmem:[#allocation2 + $0xe0] sm:$0xff] }
 0x1cb   : > { %v7040_v3 = vpop.f32.mrf.mxu0  ;;  %v1463_v50 = vadd.f32 %v1427_v57, %v1379_v44  ;;  %1054 = vst.msk [vmem:[#allocation2 + $0xe8] sm:$0xff] %vm314_vm0, %v1018_v31  ;;  %v4150_v44 = vrot.slane %v7096_v16, 3 }
 0x1cc   : > { %v1871_v56 = vld [vmem:[#allocation2 + $0xd8] sm:$0xff] }
 0x1cd   : > { %v1907_v63 = vadd.f32 %v1871_v56, %v6922_v10  ;;  %1499 = vst.msk [vmem:[#allocation2 + $0xe0] sm:$0xff] %vm314_vm0, %v1463_v50  ;;  %v2679_v10 = vsel %vm2666_vm5, %v2676_v14, %v2678_v38  ;;  %v4151_v48 = vsel %vm4136_vm6, %v4148_v55, %v4150_v44  ;;  %v3639_v50 = vshrl.u32 %v5959_v24, 16 }
 0x1ce   : > { %v2449_v8 = vld [vmem:[#allocation2 + $0xd0] sm:$0xff]  ;;  %v1381_v37 = vpop.f32.mrf.mxu2  ;;  %v3642_v56 = vshll.u32 %v5959_v24, 16  ;;  %v7195_v24 = vld [vmem:[%s6061_s25 + $0x58] sm:$0xff] }
 0x1cf   : > { %1943 = vst.msk [vmem:[#allocation2 + $0xd8] sm:$0xff] %vm314_vm0, %v1907_v63  ;;  %v2485_v13 = vadd.f32 %v2449_v8, %v6962_v49  ;;  %v3641_v53 = vrot.slane %v3639_v50, 2  ;;  %v7202_v50 = vld [vmem:[%s6061_s25 + $0x58] sm:$0xff] }
 0x1d0   : > { %v938_v32 = vpop.f32.mrf.mxu1  ;;  %v7081_v18 = vpop.f32.mrf.mxu3  ;;  %v3644_v63 = vrot.slane %v3642_v56, 3 }
 0x1d1   : > { %2521 = vst.msk [vmem:[#allocation2 + $0xd0] sm:$0xff] %vm314_vm0, %v2485_v13  ;;  %v1019_v46 = vadd.f32 %v983_v43, %v938_v32 }
 0x1d2   : > { %v1428_v42 = vld [vmem:[#allocation2 + $0xe8] sm:$0xff]  ;;  %v3645_v13 = vor.u32 %v3644_v63, %v3641_v53 }
 0x1d3   : > { %v7068_v49 = vpop.f32.mrf.mxu0  ;;  %v1464_v14 = vadd.f32 %v1428_v42, %v1381_v37  ;;  %1055 = vst.msk [vmem:[#allocation2 + $0xf0] sm:$0xff] %vm314_vm0, %v1019_v46  ;;  %5446 = vmatmul.msk.bf16.gmra.mxu1 %vm314_vm0, %v2679_v10  ;;  %5548 = vmatmul.msk.bf16.gmra.mxu2 %vm314_vm0, %v3124_v17  ;;  %v986_v10 = vld [vmem:[#allocation2 + $0x108] sm:$0xff] }
 0x1d4   : > { %v1872_v11 = vld [vmem:[#allocation2 + $0xe0] sm:$0xff]  ;;  %v7139_v17 = vld [vmem:[%s6061_s25 + $0x48] sm:$0xff] }
 0x1d5   : > { %v1908_v19 = vadd.f32 %v1872_v11, %v6945_v47  ;;  %1500 = vst.msk [vmem:[#allocation2 + $0xe8] sm:$0xff] %vm314_vm0, %v1464_v14  ;;  %v3637_v47 = vsel %vm3557_vm4, %v3627_v29, %v3636_v60  ;;  %v2682_v14 = vrot.slane %v7139_v17, 2  ;;  %v3127_v11 = vrot.slane %v7142_v39, 2 }
 0x1d6   : > { %5752 = vmatmul.msk.bf16.gmra.mxu0 %vm314_vm0, %v4149_v4  ;;  %v2450_v20 = vld [vmem:[#allocation2 + $0xd8] sm:$0xff]  ;;  %v1384_v22 = vpop.f32.mrf.mxu2 }
 0x1d7   : > { %1944 = vst.msk [vmem:[#allocation2 + $0xe0] sm:$0xff] %vm314_vm0, %v1908_v19  ;;  %v2486_v25 = vadd.f32 %v2450_v20, %v6987_v41  ;;  %v4152_v20 = vrot.slane %v7149_v36, 3 }
 0x1d8   : > { %v940_v9 = vpop.f32.mrf.mxu1  ;;  %5652 = vmatmul.msk.bf16.gmra.mxu3 %vm314_vm0, %v3637_v47  ;;  %v7104_v2 = vpop.f32.mrf.mxu3  ;;  %v5960_v47 = vld [vmem:[%s6061_s25 + $0x60] sm:$0xff] }
 0x1d9   : > { %2522 = vst.msk [vmem:[#allocation2 + $0xd8] sm:$0xff] %vm314_vm0, %v2486_v25  ;;  %v1020_v12 = vadd.f32 %v984_v35, %v940_v9  ;;  %v987_v9 = vld [vmem:[#allocation2 + $0x110] sm:$0xff]  ;;  %v3128_v35 = vsel %vm2666_vm5, %v3125_v27, %v3127_v11  ;;  %v4153_v28 = vsel %vm4136_vm6, %v4150_v44, %v4152_v20 }
 0x1da   : > { %v1429_v30 = vld [vmem:[#allocation2 + $0xf0] sm:$0xff] }
 0x1db   : > { %v7093_v26 = vpop.f32.mrf.mxu0  ;;  %v1465_v5 = vadd.f32 %v1429_v30, %v1384_v22  ;;  %1056 = vst.msk [vmem:[#allocation2 + $0xf8] sm:$0xff] %vm314_vm0, %v1020_v12 }
 0x1dc   : > { %v1873_v41 = vld [vmem:[#allocation2 + $0xe8] sm:$0xff] }
 0x1dd   : > { %v1909_v15 = vadd.f32 %v1873_v41, %v6975_v58  ;;  %1501 = vst.msk [vmem:[#allocation2 + $0xf0] sm:$0xff] %vm314_vm0, %v1465_v5  ;;  %v2681_v58 = vsel %vm2666_vm5, %v2678_v38, %v2680_v33  ;;  %v3648_v5 = vshrl.u32 %v5960_v47, 16  ;;  %v3651_v41 = vshll.u32 %v5960_v47, 16 }
 0x1de   : > { %v2451_v45 = vld [vmem:[#allocation2 + $0xe0] sm:$0xff]  ;;  %v1386_v59 = vpop.f32.mrf.mxu2 }
 0x1df   : > { %1945 = vst.msk [vmem:[#allocation2 + $0xe8] sm:$0xff] %vm314_vm0, %v1909_v15  ;;  %v2487_v29 = vadd.f32 %v2451_v45, %v7015_v52  ;;  %v3650_v27 = vrot.slane %v3648_v5, 2  ;;  %v3653_v15 = vrot.slane %v3651_v41, 3  ;;  %v7255_v5 = vld [vmem:[%s6061_s25 + $0x60] sm:$0xff] }
 0x1e0   : > { %v943_v21 = vpop.f32.mrf.mxu1  ;;  %v7134_v23 = vpop.f32.mrf.mxu3 }
 0x1e1   : > { %2523 = vst.msk [vmem:[#allocation2 + $0xe0] sm:$0xff] %vm314_vm0, %v2487_v29  ;;  %v1021_v31 = vadd.f32 %v985_v34, %v943_v21  ;;  %v3654_v29 = vor.u32 %v3653_v15, %v3650_v27 }
 0x1e2   : > { %v1430_v57 = vld [vmem:[#allocation2 + $0xf8] sm:$0xff] }
 0x1e3   : > { %v7121_v52 = vpop.f32.mrf.mxu0  ;;  %v1466_v38 = vadd.f32 %v1430_v57, %v1386_v59  ;;  %1057 = vst.msk [vmem:[#allocation2 + $0x100] sm:$0xff] %vm314_vm0, %v1021_v31  ;;  %5447 = vmatmul.msk.bf16.gmra.mxu1 %vm314_vm0, %v2681_v58  ;;  %5549 = vmatmul.msk.bf16.gmra.mxu2 %vm314_vm0, %v3126_v0  ;;  %v988_v58 = vld [vmem:[#allocation2 + $0x118] sm:$0xff]  ;;  %v7192_v0 = vld [vmem:[%s6061_s25 + $0x50] sm:$0xff] }
 0x1e4   : > { %v1874_v51 = vld [vmem:[#allocation2 + $0xf0] sm:$0xff] }
 0x1e5   : > { %v1910_v8 = vadd.f32 %v1874_v51, %v6998_v61  ;;  %1502 = vst.msk [vmem:[#allocation2 + $0xf8] sm:$0xff] %vm314_vm0, %v1466_v38  ;;  %v3646_v61 = vsel %vm3557_vm4, %v3636_v60, %v3645_v13  ;;  %v2684_v38 = vrot.slane %v7192_v0, 2  ;;  %v3129_v51 = vrot.slane %v7195_v24, 2 }
 0x1e6   : > { %5753 = vmatmul.msk.bf16.gmra.mxu0 %vm314_vm0, %v4151_v48  ;;  %v2452_v37 = vld [vmem:[#allocation2 + $0xe8] sm:$0xff]  ;;  %v1389_v55 = vpop.f32.mrf.mxu2 }
 0x1e7   : > { %1946 = vst.msk [vmem:[#allocation2 + $0xf0] sm:$0xff] %vm314_vm0, %v1910_v8  ;;  %v2488_v32 = vadd.f32 %v2452_v37, %v7040_v3  ;;  %v4154_v37 = vrot.slane %v7202_v50, 3 }
 0x1e8   : > { %v945_v43 = vpop.f32.mrf.mxu1  ;;  %5653 = vmatmul.msk.bf16.gmra.mxu3 %vm314_vm0, %v3646_v61 }
 0x1e9   : > { %2524 = vst.msk [vmem:[#allocation2 + $0xe8] sm:$0xff] %vm314_vm0, %v2488_v32  ;;  %v1022_v46 = vadd.f32 %v986_v10, %v945_v43  ;;  %v2869_v43 = vld [vmem:[#allocation2] sm:$0xff]  ;;  %v3130_v10 = vsel %vm2666_vm5, %v3127_v11, %v3129_v51  ;;  %v4155_v17 = vsel %vm4136_vm6, %v4152_v20, %v4154_v37 }
 0x1ea   : > { %v1431_v42 = vld [vmem:[#allocation2 + $0x100] sm:$0xff] }
 0x1eb   : > { %v7146_v4 = vpop.f32.mrf.mxu0  ;;  %v1467_v1 = vadd.f32 %v1431_v42, %v1389_v55  ;;  %1058 = vst.msk [vmem:[#allocation2 + $0x108] sm:$0xff] %vm314_vm0, %v1022_v46  ;;  %v7158_v22 = vpop.f32.mrf.mxu3  ;;  %v5961_v46 = vld [vmem:[%s6061_s25 + $0x68] sm:$0xff] }
 0x1ec   : > { %v1875_v3 = vld [vmem:[#allocation2 + $0xf8] sm:$0xff]  ;;  %v3657_v39 = vshrl.u32 %v5961_v46, 16 }
 0x1ed   : > { %v1911_v6 = vadd.f32 %v1875_v3, %v7028_v7  ;;  %1503 = vst.msk [vmem:[#allocation2 + $0x100] sm:$0xff] %vm314_vm0, %v1467_v1  ;;  %v2683_v7 = vsel %vm2666_vm5, %v2680_v33, %v2682_v14  ;;  %v3660_v3 = vshll.u32 %v5961_v46, 16 }
 0x1ee   : > { %v2453_v54 = vld [vmem:[#allocation2 + $0xf0] sm:$0xff]  ;;  %v1391_v19 = vpop.f32.mrf.mxu2  ;;  %v3659_v36 = vrot.slane %v3657_v39, 2 }
 0x1ef   : > { %1947 = vst.msk [vmem:[#allocation2 + $0xf8] sm:$0xff] %vm314_vm0, %v1911_v6  ;;  %v2489_v60 = vadd.f32 %v2453_v54, %v7068_v49  ;;  %v3662_v6 = vrot.slane %v3660_v3, 3 }
 0x1f0   : > { %v948_v25 = vpop.f32.mrf.mxu1 }
 0x1f1   : > { %2525 = vst.msk [vmem:[#allocation2 + $0xf0] sm:$0xff] %vm314_vm0, %v2489_v60  ;;  %v1023_v12 = vadd.f32 %v987_v9, %v948_v25  ;;  %v3663_v25 = vor.u32 %v3662_v6, %v3659_v36 }
 0x1f2   : > { %v1432_v30 = vld [vmem:[#allocation2 + $0x108] sm:$0xff] }
 0x1f3   : > { %v7174_v49 = vpop.f32.mrf.mxu0  ;;  %v1468_v33 = vadd.f32 %v1432_v30, %v1391_v19  ;;  %1059 = vst.msk [vmem:[#allocation2 + $0x110] sm:$0xff] %vm314_vm0, %v1023_v12  ;;  %5448 = vmatmul.msk.bf16.gmra.mxu1 %vm314_vm0, %v2683_v7  ;;  %5550 = vmatmul.msk.bf16.gmra.mxu2 %vm314_vm0, %v3128_v35  ;;  %v7187_v44 = vpop.f32.mrf.mxu3  ;;  %v2870_v7 = vld [vmem:[#allocation2 + $0x8] sm:$0xff]  ;;  %v7245_v35 = vld [vmem:[%s6061_s25 + $0x58] sm:$0xff]  ;;  %v3664_v12 = vsel %vm3557_vm4, %v3654_v29, %v3663_v25 }
 0x1f4   : > { %v1876_v40 = vld [vmem:[#allocation2 + $0x100] sm:$0xff] }
 0x1f5   : > { %v1912_v45 = vadd.f32 %v1876_v40, %v7051_v62  ;;  %1504 = vst.msk [vmem:[#allocation2 + $0x108] sm:$0xff] %vm314_vm0, %v1468_v33  ;;  %v3655_v62 = vsel %vm3557_vm4, %v3645_v13, %v3654_v29  ;;  %v2686_v33 = vrot.slane %v7245_v35, 2 }
 0x1f6   : > { %5754 = vmatmul.msk.bf16.gmra.mxu0 %vm314_vm0, %v4153_v28  ;;  %v2454_v16 = vld [vmem:[#allocation2 + $0xf8] sm:$0xff]  ;;  %v1394_v59 = vpop.f32.mrf.mxu2 }
 0x1f7   : > { %1948 = vst.msk [vmem:[#allocation2 + $0x100] sm:$0xff] %vm314_vm0, %v1912_v45  ;;  %v2490_v21 = vadd.f32 %v2454_v16, %v7093_v26  ;;  %v4156_v16 = vrot.slane %v7255_v5, 3 }
 0x1f8   : > { %v950_v34 = vpop.f32.mrf.mxu1  ;;  %5654 = vmatmul.msk.bf16.gmra.mxu3 %vm314_vm0, %v3655_v62 }
 0x1f9   : > { %2526 = vst.msk [vmem:[#allocation2 + $0xf8] sm:$0xff] %vm314_vm0, %v2490_v21  ;;  %v1024_v31 = vadd.f32 %v988_v58, %v950_v34  ;;  %v2871_v34 = vld [vmem:[#allocation2 + $0x10] sm:$0xff]  ;;  %v4157_v0 = vsel %vm4136_vm6, %v4154_v37, %v4156_v16 }
 0x1fa   : > { %v1433_v57 = vld [vmem:[#allocation2 + $0x110] sm:$0xff] }
 0x1fb   : > { %v7199_v48 = vpop.f32.mrf.mxu0  ;;  %v1469_v56 = vadd.f32 %v1433_v57, %v1394_v59  ;;  %1060 = vst.msk [vmem:[#allocation2 + $0x118] sm:$0xff] %vm314_vm0, %v1024_v31  ;;  %v7211_v55 = vpop.f32.mrf.mxu3  ;;  %v5962_v31 = vld [vmem:[%s6061_s25 + $0x70] sm:$0xff] }
 0x1fc   : > { %v1877_v26 = vld [vmem:[#allocation2 + $0x108] sm:$0xff] }
 0x1fd   : > { %v1913_v53 = vadd.f32 %v1877_v26, %v7081_v18  ;;  %1505 = vst.msk [vmem:[#allocation2 + $0x110] sm:$0xff] %vm314_vm0, %v1469_v56  ;;  %v2685_v18 = vsel %vm2666_vm5, %v2682_v14, %v2684_v38  ;;  %v3666_v26 = vshrl.u32 %v5962_v31, 16 }
 0x1fe   : > { %v2455_v63 = vld [vmem:[#allocation2 + $0x100] sm:$0xff]  ;;  %v1396_v8 = vpop.f32.mrf.mxu2 }
 0x1ff   : > { %1949 = vst.msk [vmem:[#allocation2 + $0x108] sm:$0xff] %vm314_vm0, %v1913_v53  ;;  %v2491_v13 = vadd.f32 %v2455_v63, %v7121_v52 }
 0x200   : > { %v2779_v32 = vpop.f32.mrf.mxu1 }
 0x201   : > { %2527 = vst.msk [vmem:[#allocation2 + $0x100] sm:$0xff] %vm314_vm0, %v2491_v13  ;;  %v2905_v61 = vadd.f32 %v2869_v43, %v2779_v32  ;;  %v2872_v43 = vld [vmem:[#allocation2 + $0x18] sm:$0xff] }
 0x202   : > { %v1434_v42 = vld [vmem:[#allocation2 + $0x118] sm:$0xff] }
 0x203   : > { %v7227_v52 = vpop.f32.mrf.mxu0  ;;  %v1470_v1 = vadd.f32 %v1434_v42, %v1396_v8  ;;  %2941 = vst.msk [vmem:[#allocation2] sm:$0xff] %vm314_vm0, %v2905_v61  ;;  %5449 = vmatmul.msk.bf16.gmra.mxu1 %vm314_vm0, %v2685_v18  ;;  %5551 = vmatmul.msk.bf16.gmra.mxu2 %vm314_vm0, %v3130_v10  ;;  %v7240_v20 = vpop.f32.mrf.mxu3  ;;  %v3668_v8 = vrot.slane %v3666_v26, 2  ;;  %v7298_v18 = vld [vmem:[%s6061_s25 + $0x60] sm:$0xff]  ;;  %v7371_v26 = vld [vmem:[%s6061_s25 + $0x70] sm:$0xff] }
 0x204   : > { %v1878_v14 = vld [vmem:[#allocation2 + $0x110] sm:$0xff]  ;;  %v2688_v3 = vrot.slane %v7298_v18, 2 }
 0x205   : > { %v1914_v11 = vadd.f32 %v1878_v14, %v7104_v2  ;;  %1506 = vst.msk [vmem:[#allocation2 + $0x118] sm:$0xff] %vm314_vm0, %v1470_v1  ;;  %v7248_v2 = vld [vmem:[%s6061_s25 + $0x60] sm:$0xff]  ;;  %v7308_v1 = vld [vmem:[%s6061_s25 + $0x68] sm:$0xff] }
 0x206   : > { %5755 = vmatmul.msk.bf16.gmra.mxu0 %vm314_vm0, %v4155_v17  ;;  %v2456_v54 = vld [vmem:[#allocation2 + $0x108] sm:$0xff]  ;;  %v3224_v19 = vpop.f32.mrf.mxu2  ;;  %v3131_v40 = vrot.slane %v7248_v2, 2 }
 0x207   : > { %1950 = vst.msk [vmem:[#allocation2 + $0x110] sm:$0xff] %vm314_vm0, %v1914_v11  ;;  %v2492_v60 = vadd.f32 %v2456_v54, %v7146_v4  ;;  %v4158_v54 = vrot.slane %v7308_v1, 3 }
 0x208   : > { %v2781_v9 = vpop.f32.mrf.mxu1  ;;  %5655 = vmatmul.msk.bf16.gmra.mxu3 %vm314_vm0, %v3664_v12  ;;  %v3132_v58 = vsel %vm2666_vm5, %v3129_v51, %v3131_v40  ;;  %v5963_v12 = vld [vmem:[%s6061_s25 + $0x78] sm:$0xff] }
 0x209   : > { %2528 = vst.msk [vmem:[#allocation2 + $0x108] sm:$0xff] %vm314_vm0, %v2492_v60  ;;  %v2906_v47 = vadd.f32 %v2870_v7, %v2781_v9  ;;  %v2873_v9 = vld [vmem:[#allocation2 + $0x20] sm:$0xff]  ;;  %v4159_v35 = vsel %vm4136_vm6, %v4156_v16, %v4158_v54 }
 0x20a   : > { %v3314_v30 = vld [vmem:[#allocation2] sm:$0xff] }
 0x20b   : > { %v7252_v28 = vpop.f32.mrf.mxu0  ;;  %v3350_v41 = vadd.f32 %v3314_v30, %v3224_v19  ;;  %2942 = vst.msk [vmem:[#allocation2 + $0x8] sm:$0xff] %vm314_vm0, %v2906_v47  ;;  %v7264_v59 = vpop.f32.mrf.mxu3 }
 0x20c   : > { %v1879_v4 = vld [vmem:[#allocation2 + $0x118] sm:$0xff] }
 0x20d   : > { %v1915_v27 = vadd.f32 %v1879_v4, %v7134_v23  ;;  %3386 = vst.msk [vmem:[#allocation2] sm:$0xff] %vm314_vm0, %v3350_v41  ;;  %v2687_v23 = vsel %vm2666_vm5, %v2684_v38, %v2686_v33  ;;  %v3669_v38 = vshll.u32 %v5962_v31, 16  ;;  %v3675_v4 = vshrl.u32 %v5963_v12, 16 }
 0x20e   : > { %v2457_v15 = vld [vmem:[#allocation2 + $0x110] sm:$0xff]  ;;  %v3226_v45 = vpop.f32.mrf.mxu2 }
 0x20f   : > { %1951 = vst.msk [vmem:[#allocation2 + $0x118] sm:$0xff] %vm314_vm0, %v1915_v27  ;;  %v2493_v29 = vadd.f32 %v2457_v15, %v7174_v49  ;;  %v3671_v37 = vrot.slane %v3669_v38, 3  ;;  %v3677_v16 = vrot.slane %v3675_v4, 2  ;;  %v2876_v4 = vld [vmem:[#allocation2 + $0x38] sm:$0xff] }
 0x210   : > { %v2784_v21 = vpop.f32.mrf.mxu1 }
 0x211   : > { %2529 = vst.msk [vmem:[#allocation2 + $0x110] sm:$0xff] %vm314_vm0, %v2493_v29  ;;  %v2907_v62 = vadd.f32 %v2871_v34, %v2784_v21  ;;  %v3672_v10 = vor.u32 %v3671_v37, %v3668_v8  ;;  %v2874_v34 = vld [vmem:[#allocation2 + $0x28] sm:$0xff] }
 0x212   : > { %v3315_v57 = vld [vmem:[#allocation2 + $0x8] sm:$0xff] }
 0x213   : > { %v7280_v49 = vpop.f32.mrf.mxu0  ;;  %v3351_v56 = vadd.f32 %v3315_v57, %v3226_v45  ;;  %2943 = vst.msk [vmem:[#allocation2 + $0x10] sm:$0xff] %vm314_vm0, %v2907_v62  ;;  %5450 = vmatmul.msk.bf16.gmra.mxu1 %vm314_vm0, %v2687_v23  ;;  %5552 = vmatmul.msk.bf16.gmra.mxu2 %vm314_vm0, %v3132_v58  ;;  %v7293_v63 = vpop.f32.mrf.mxu3  ;;  %v3673_v17 = vsel %vm3557_vm4, %v3663_v25, %v3672_v10  ;;  %v7359_v62 = vld [vmem:[%s6061_s25 + $0x70] sm:$0xff] }
 0x214   : > { %v3893_v24 = vld [vmem:[#allocation2] sm:$0xff]  ;;  %v3135_v8 = vrot.slane %v7359_v62, 2 }
 0x215   : > { %v3929_v51 = vadd.f32 %v3893_v24, %v7158_v22  ;;  %3387 = vst.msk [vmem:[#allocation2 + $0x8] sm:$0xff] %vm314_vm0, %v3351_v56  ;;  %v7301_v22 = vld [vmem:[%s6061_s25 + $0x68] sm:$0xff] }
 0x216   : > { %5756 = vmatmul.msk.bf16.gmra.mxu0 %vm314_vm0, %v4157_v0  ;;  %v2458_v50 = vld [vmem:[#allocation2 + $0x118] sm:$0xff]  ;;  %v3229_v53 = vpop.f32.mrf.mxu2  ;;  %v3133_v14 = vrot.slane %v7301_v22, 2 }
 0x217   : > { %3965 = vst.msk [vmem:[#allocation2] sm:$0xff] %vm314_vm0, %v3929_v51  ;;  %v2494_v13 = vadd.f32 %v2458_v50, %v7199_v48 }
 0x218   : > { %v2786_v32 = vpop.f32.mrf.mxu1  ;;  %5656 = vmatmul.msk.bf16.gmra.mxu3 %vm314_vm0, %v3673_v17  ;;  %v3134_v7 = vsel %vm2666_vm5, %v3131_v40, %v3133_v14  ;;  %v7346_v40 = vld [vmem:[%s8014_s2] ss:$0 sm:$0xff] }
 0x219   : > { %2530 = vst.msk [vmem:[#allocation2 + $0x118] sm:$0xff] %vm314_vm0, %v2494_v13  ;;  %v2908_v61 = vadd.f32 %v2872_v43, %v2786_v32 }
 0x21a   : > { %v3316_v46 = vld [vmem:[#allocation2 + $0x10] sm:$0xff] }
 0x21b   : > { %v7304_v42 = vpop.f32.mrf.mxu0  ;;  %v3352_v39 = vadd.f32 %v3316_v46, %v3229_v53  ;;  %2944 = vst.msk [vmem:[#allocation2 + $0x18] sm:$0xff] %vm314_vm0, %v2908_v61  ;;  %v7317_v19 = vpop.f32.mrf.mxu3 }
 0x21c   : > { %v3894_v48 = vld [vmem:[#allocation2 + $0x8] sm:$0xff] }
 0x21d   : > { %v3930_v11 = vadd.f32 %v3894_v48, %v7187_v44  ;;  %3388 = vst.msk [vmem:[#allocation2 + $0x10] sm:$0xff] %vm314_vm0, %v3352_v39  ;;  %v2689_v44 = vsel %vm2666_vm5, %v2686_v33, %v2688_v3  ;;  %v3678_v33 = vshll.u32 %v5963_v12, 16  ;;  %v2875_v48 = vld [vmem:[#allocation2 + $0x30] sm:$0xff] }
 0x21e   : > { %v4339_v36 = vld [vmem:[#allocation2] sm:$0xff]  ;;  %v3231_v6 = vpop.f32.mrf.mxu2 }
 0x21f   : > { %3966 = vst.msk [vmem:[#allocation2 + $0x8] sm:$0xff] %vm314_vm0, %v3930_v11  ;;  %v4375_v60 = vadd.f32 %v4339_v36, %v7227_v52  ;;  %v3680_v29 = vrot.slane %v3678_v33, 3  ;;  %v3136_v11 = vsel %vm2666_vm5, %v3133_v14, %v3135_v8  ;;  %v7427_v33 = vld [vmem:[%s6061_s25 + $0x78] sm:$0xff] }
 0x220   : > { %v2789_v25 = vpop.f32.mrf.mxu1 }
 0x221   : > { %4411 = vst.msk [vmem:[#allocation2] sm:$0xff] %vm314_vm0, %v4375_v60  ;;  %v2909_v47 = vadd.f32 %v2873_v9, %v2789_v25  ;;  %v7361_v31 = vor.u32 %v3680_v29, %v3677_v16 }
 0x222   : > { %v3317_v30 = vld [vmem:[#allocation2 + $0x18] sm:$0xff] }
 0x223   : > { %v7333_v52 = vpop.f32.mrf.mxu0  ;;  %v3353_v41 = vadd.f32 %v3317_v30, %v3231_v6  ;;  %2945 = vst.msk [vmem:[#allocation2 + $0x20] sm:$0xff] %vm314_vm0, %v2909_v47  ;;  %5451 = vmatmul.msk.bf16.gmra.mxu1 %vm314_vm0, %v2689_v44  ;;  %5553 = vmatmul.msk.bf16.gmra.mxu2 %vm314_vm0, %v3134_v7  ;;  %v7351_v45 = vpop.f32.mrf.mxu3  ;;  %v5964_v6 = vld [vmem:[%s6061_s25 + $0x80] sm:$0xff] }
 0x224   : > { %v3895_v2 = vld [vmem:[#allocation2 + $0x10] sm:$0xff]  ;;  %v3684_v14 = vshrl.u32 %v5964_v6, 16  ;;  %v3687_v44 = vshll.u32 %v5964_v6, 16 }
 0x225   : > { %v3931_v5 = vadd.f32 %v3895_v2, %v7211_v55  ;;  %3389 = vst.msk [vmem:[#allocation2 + $0x18] sm:$0xff] %vm314_vm0, %v3353_v41  ;;  %v7356_v55 = vld [vmem:[%s6061_s25 + $0x68] sm:$0xff] }
 0x226   : > { %5757 = vmatmul.msk.bf16.gmra.mxu0 %vm314_vm0, %v4159_v35  ;;  %v4340_v27 = vld [vmem:[#allocation2 + $0x8] sm:$0xff]  ;;  %v3234_v15 = vpop.f32.mrf.mxu2  ;;  %v2690_v53 = vrot.slane %v7356_v55, 2  ;;  %v3686_v12 = vrot.slane %v3684_v14, 2  ;;  %v3689_v30 = vrot.slane %v3687_v44, 3 }
 0x227   : > { %3967 = vst.msk [vmem:[#allocation2 + $0x10] sm:$0xff] %vm314_vm0, %v3931_v5  ;;  %v4376_v21 = vadd.f32 %v4340_v27, %v7252_v28  ;;  %v3682_v28 = vsel %vm3557_vm4, %v3672_v10, %v7361_v31  ;;  %v4160_v10 = vrot.slane %v7371_v26, 3 }
 0x228   : > { %v4447_v23 = vld [vmem:[#allocation2] sm:$0xff]  ;;  %v2791_v58 = vpop.f32.mrf.mxu1  ;;  %5657 = vmatmul.msk.bf16.gmra.mxu3 %vm314_vm0, %v3682_v28  ;;  %v7429_v5 = vor.u32 %v3689_v30, %v3686_v12 }
 0x229   : > { %v4487_v57 = vadd.f32 %v7346_v40, %v4447_v23  ;;  %4412 = vst.msk [vmem:[#allocation2 + $0x8] sm:$0xff] %vm314_vm0, %v4376_v21  ;;  %v2910_v0 = vadd.f32 %v2874_v34, %v2791_v58  ;;  %v4161_v18 = vsel %vm4136_vm6, %v4158_v54, %v4160_v10  ;;  %v7491_v12 = vld [vmem:[%s6061_s25 + $0x80] sm:$0xff] }
 0x22a   : > { %v3318_v56 = vld [vmem:[#allocation2 + $0x20] sm:$0xff]  ;;  %v3691_v21 = vsel %vm3557_vm4, %v7361_v31, %v7429_v5 }
 0x22b   : > { %v7366_v24 = vpop.f32.mrf.mxu0  ;;  %v4523_v38 = vmax.f32 %v4487_v57, 0.0  ;;  %v3354_v51 = vadd.f32 %v3318_v56, %v3234_v15  ;;  %2946 = vst.msk [vmem:[#allocation2 + $0x28] sm:$0xff] %vm314_vm0, %v2910_v0  ;;  %v7385_v61 = vpop.f32.mrf.mxu3  ;;  %v3137_v0 = vrot.slane %v7427_v33, 2 }
 0x22c   : > { %v3896_v50 = vld [vmem:[#allocation2 + $0x18] sm:$0xff] }
 0x22d   : > { %v4559_v37 = vpack.c.bf16 %v4523_v38, %v4523_v38  ;;  %v3932_v13 = vadd.f32 %v3896_v50, %v7240_v20  ;;  %3390 = vst.msk [vmem:[#allocation2 + $0x20] sm:$0xff] %vm314_vm0, %v3354_v51  ;;  %v2691_v20 = vsel %vm2666_vm5, %v2688_v3, %v2690_v53 }
 0x22e   : > { %v4341_v32 = vld [vmem:[#allocation2 + $0x10] sm:$0xff]  ;;  %v3236_v43 = vpop.f32.mrf.mxu2 }
 0x22f   : > { %4562 = vst.msk [vmem:[%s7378_s7] sm:$0xf] %vm4561_vm7, %v4559_v37  ;;  %v4377_v46 = vadd.f32 %v4341_v32, %v7280_v49  ;;  %v2877_v32 = vld [vmem:[#allocation2 + $0x40] sm:$0xff] }
 0x230   : > { %v4448_v17 = vld [vmem:[#allocation2 + $0x8] sm:$0xff]  ;;  %3968 = vst.msk [vmem:[#allocation2 + $0x18] sm:$0xff] %vm314_vm0, %v3932_v13  ;;  %v2794_v39 = vpop.f32.mrf.mxu1 }
 0x231   : > { %v4488_v36 = vadd.f32 %v7346_v40, %v4448_v17  ;;  %4413 = vst.msk [vmem:[#allocation2 + $0x10] sm:$0xff] %vm314_vm0, %v4377_v46  ;;  %v2911_v49 = vadd.f32 %v2875_v48, %v2794_v39 }
 0x232   : > { %v3319_v60 = vld [vmem:[#allocation2 + $0x28] sm:$0xff] }
 0x233   : > { %v7404_v25 = vpop.f32.mrf.mxu0  ;;  %v4524_v3 = vmax.f32 %v4488_v36, 0.0  ;;  %v3355_v22 = vadd.f32 %v3319_v60, %v3236_v43  ;;  %2947 = vst.msk [vmem:[#allocation2 + $0x30] sm:$0xff] %vm314_vm0, %v2911_v49  ;;  %5452 = vmatmul.msk.bf16.gmra.mxu1 %vm314_vm0, %v2691_v20  ;;  %5554 = vmatmul.msk.bf16.gmra.mxu2 %vm314_vm0, %v3136_v11  ;;  %v7417_v54 = vpop.f32.mrf.mxu3  ;;  %v3138_v43 = vsel %vm2666_vm5, %v3135_v8, %v3137_v0 }
 0x234   : > { %v3897_v9 = vld [vmem:[#allocation2 + $0x20] sm:$0xff] }
 0x235   : > { %v4560_v7 = vpack.c.bf16 %v4524_v3, %v4524_v3  ;;  %v3933_v47 = vadd.f32 %v3897_v9, %v7264_v59  ;;  %3391 = vst.msk [vmem:[#allocation2 + $0x28] sm:$0xff] %vm314_vm0, %v3355_v22  ;;  %v7424_v59 = vld [vmem:[%s6061_s25 + $0x70] sm:$0xff] }
 0x236   : > { %5758 = vmatmul.msk.bf16.gmra.mxu0 %vm314_vm0, %v4161_v18  ;;  %v3239_v1 = vpop.f32.mrf.mxu2  ;;  %v2692_v57 = vrot.slane %v7424_v59, 2 }
 0x237   : > { %4563 = vst.msk [vmem:[%s7378_s7 + $0x4] sm:$0xf] %vm4561_vm7, %v4560_v7  ;;  %v4342_v35 = vld [vmem:[#allocation2 + $0x18] sm:$0xff] }
 0x238   : > { %3969 = vst.msk [vmem:[#allocation2 + $0x20] sm:$0xff] %vm314_vm0, %v3933_v47  ;;  %v4378_v41 = vadd.f32 %v4342_v35, %v7304_v42  ;;  %v2796_v2 = vpop.f32.mrf.mxu1  ;;  %v4449_v27 = vld [vmem:[#allocation2 + $0x10] sm:$0xff]  ;;  %v7438_v42 = vld [vmem:[%s6061_s25 + $0x78] sm:$0xff]  ;;  %5658 = vmatmul.msk.bf16.gmra.mxu3 %vm314_vm0, %v3691_v21  ;;  %v2878_v47 = vld [vmem:[#allocation2 + $0x48] sm:$0xff] }
 0x239   : > { %v2912_v15 = vadd.f32 %v2876_v4, %v2796_v2  ;;  %v4489_v23 = vadd.f32 %v7346_v40, %v4449_v27  ;;  %v4162_v31 = vrot.slane %v7438_v42, 3 }
 0x23a   : > { %4414 = vst.msk [vmem:[#allocation2 + $0x18] sm:$0xff] %vm314_vm0, %v4378_v41  ;;  %v3320_v16 = vld [vmem:[#allocation2 + $0x30] sm:$0xff] }
 0x23b   : > { %v7432_v29 = vpop.f32.mrf.mxu0  ;;  %v3356_v34 = vadd.f32 %v3320_v16, %v3239_v1  ;;  %2948 = vst.msk [vmem:[#allocation2 + $0x38] sm:$0xff] %vm314_vm0, %v2912_v15  ;;  %v7448_v38 = vpop.f32.mrf.mxu3  ;;  %v4525_v50 = vmax.f32 %v4489_v23, 0.0  ;;  %v4163_v55 = vsel %vm4136_vm6, %v4160_v10, %v4162_v31  ;;  %v7488_v1 = vld [vmem:[%s6061_s25 + $0x78] sm:$0xff]  ;;  %v7502_v15 = vld [vmem:[%s6061_s25 + $0x80] sm:$0xff] }
 0x23c   : > { %v3898_v58 = vld [vmem:[#allocation2 + $0x28] sm:$0xff] }
 0x23d   : > { %v3934_v56 = vadd.f32 %v3898_v58, %v7293_v63  ;;  %3392 = vst.msk [vmem:[#allocation2 + $0x30] sm:$0xff] %vm314_vm0, %v3356_v34  ;;  %v2693_v63 = vsel %vm2666_vm5, %v2690_v53, %v2692_v57  ;;  %v5965_v53 = vld [vmem:[%s6061_s25 + $0x88] sm:$0xff]  ;;  %v4564_v8 = vpack.c.bf16 %v4525_v50, %v4525_v50  ;;  %v2694_v58 = vrot.slane %v7488_v1, 2 }
 0x23e   : > { %v3241_v28 = vpop.f32.mrf.mxu2  ;;  %v3693_v36 = vshrl.u32 %v5965_v53, 16  ;;  %v3696_v26 = vshll.u32 %v5965_v53, 16 }
 0x23f   : > { %3970 = vst.msk [vmem:[#allocation2 + $0x28] sm:$0xff] %vm314_vm0, %v3934_v56  ;;  %v4343_v51 = vld [vmem:[#allocation2 + $0x20] sm:$0xff]  ;;  %v5765_v9 = vrot.slane %v4564_v8, 9  ;;  %v3139_v56 = vrot.slane %v7491_v12, 2 }
 0x240   : > { %v4379_v37 = vadd.f32 %v4343_v51, %v7333_v52  ;;  %v2799_v13 = vpop.f32.mrf.mxu1  ;;  %v3695_v3 = vrot.slane %v3693_v36, 2  ;;  %v3698_v14 = vrot.slane %v3696_v26, 3 }
 0x241   : > { %v4450_v46 = vld [vmem:[#allocation2 + $0x18] sm:$0xff]  ;;  %v2913_v17 = vadd.f32 %v2877_v32, %v2799_v13  ;;  %v4164_v13 = vrot.slane %v7502_v15, 3 }
 0x242   : > { %v4490_v39 = vadd.f32 %v7346_v40, %v4450_v46  ;;  %4415 = vst.msk [vmem:[#allocation2 + $0x20] sm:$0xff] %vm314_vm0, %v4379_v37  ;;  %v3321_v52 = vld [vmem:[#allocation2 + $0x38] sm:$0xff]  ;;  %v7494_v41 = vor.u32 %v3698_v14, %v3695_v3 }
 0x243   : > { %v7464_v48 = vpop.f32.mrf.mxu0  ;;  %v3357_v62 = vadd.f32 %v3321_v52, %v3241_v28  ;;  %2949 = vst.msk [vmem:[#allocation2 + $0x40] sm:$0xff] %vm314_vm0, %v2913_v17  ;;  %5453 = vmatmul.msk.bf16.gmra.mxu1 %vm314_vm0, %v2693_v63  ;;  %5555 = vmatmul.msk.bf16.gmra.mxu2 %vm314_vm0, %v3138_v43  ;;  %v7478_v18 = vpop.f32.mrf.mxu3  ;;  %v3140_v52 = vsel %vm2666_vm5, %v3137_v0, %v3139_v56  ;;  %v2880_v14 = vld [vmem:[#allocation2 + $0x58] sm:$0xff] }
 0x244   : > { %v4526_v20 = vmax.f32 %v4490_v39, 0.0  ;;  %v3899_v11 = vld [vmem:[#allocation2 + $0x30] sm:$0xff]  ;;  %v3700_v21 = vsel %vm3557_vm4, %v7429_v5, %v7494_v41  ;;  %v2695_v39 = vsel %vm2666_vm5, %v2692_v57, %v2694_v58  ;;  %v4165_v59 = vsel %vm4136_vm6, %v4162_v31, %v4164_v13 }
 0x245   : > { %v3935_v49 = vadd.f32 %v3899_v11, %v7317_v19  ;;  %3393 = vst.msk [vmem:[#allocation2 + $0x38] sm:$0xff] %vm314_vm0, %v3357_v62  ;;  %v5966_v57 = vld [vmem:[%s6061_s25 + $0x90] sm:$0xff] }
 0x246   : > { %5759 = vmatmul.msk.bf16.gmra.mxu0 %vm314_vm0, %v4163_v55  ;;  %v4565_v10 = vpack.c.bf16 %v4526_v20, %v4526_v20  ;;  %v4344_v6 = vld [vmem:[#allocation2 + $0x28] sm:$0xff]  ;;  %v3244_v60 = vpop.f32.mrf.mxu2  ;;  %v3702_v11 = vshrl.u32 %v5966_v57, 16  ;;  %v3705_v31 = vshll.u32 %v5966_v57, 16 }
 0x247   : > { %3971 = vst.msk [vmem:[#allocation2 + $0x30] sm:$0xff] %vm314_vm0, %v3935_v49  ;;  %v4380_v19 = vadd.f32 %v4344_v6, %v7366_v24 }
 0x248   : > { %v4575_v44 = vrot.slane %v4565_v10, 5  ;;  %v2801_v7 = vpop.f32.mrf.mxu1  ;;  %5659 = vmatmul.msk.bf16.gmra.mxu3 %vm314_vm0, %v3700_v21 }
 0x249   : > { %v4451_v30 = vld [vmem:[#allocation2 + $0x20] sm:$0xff]  ;;  %4416 = vst.msk [vmem:[#allocation2 + $0x28] sm:$0xff] %vm314_vm0, %v4380_v19  ;;  %v2914_v35 = vadd.f32 %v2878_v47, %v2801_v7 }
 0x24a   : > { %v4576_v24 = vsel %vm7481_vm10, %v5765_v9, %v4575_v44  ;;  %v4491_v2 = vadd.f32 %v7346_v40, %v4451_v30  ;;  %v3322_v4 = vld [vmem:[#allocation2 + $0x40] sm:$0xff]  ;;  %v4577_v63 = vrot.slane %v4575_v44, 4  ;;  %v3707_v9 = vrot.slane %v3705_v31, 3  ;;  %v7562_v30 = vld [vmem:[%s6061_s25 + $0x88] sm:$0xff] }
 0x24b   : > { %v7499_v27 = vpop.f32.mrf.mxu0  ;;  %5766 = vst.msk [vmem:[%s7378_s7 + $0x8] sm:$0xf] %vm4561_vm7, %v4576_v24  ;;  %v3358_v16 = vadd.f32 %v3322_v4, %v3244_v60  ;;  %v7516_v5 = vpop.f32.mrf.mxu3  ;;  %v3704_v60 = vrot.slane %v3702_v11, 2  ;;  %v7559_v47 = vld [vmem:[%s6061_s25 + $0x80] sm:$0xff] }
 0x24c   : > { %v4527_v34 = vmax.f32 %v4491_v2, 0.0  ;;  %v3900_v23 = vld [vmem:[#allocation2 + $0x38] sm:$0xff]  ;;  %2950 = vst.msk [vmem:[#allocation2 + $0x48] sm:$0xff] %vm314_vm0, %v2914_v35 }
 0x24d   : > { %v3936_v28 = vadd.f32 %v3900_v23, %v7351_v45  ;;  %3394 = vst.msk [vmem:[#allocation2 + $0x40] sm:$0xff] %vm314_vm0, %v3358_v16  ;;  %v2879_v45 = vld [vmem:[#allocation2 + $0x50] sm:$0xff]  ;;  %v7575_v16 = vld [vmem:[%s6061_s25 + $0x88] sm:$0xff] }
 0x24e   : > { %v4566_v51 = vpack.c.bf16 %v4527_v34, %v4527_v34  ;;  %v4345_v50 = vld [vmem:[#allocation2 + $0x30] sm:$0xff]  ;;  %v3246_v37 = vpop.f32.mrf.mxu2 }
 0x24f   : > { %3972 = vst.msk [vmem:[#allocation2 + $0x38] sm:$0xff] %vm314_vm0, %v3936_v28  ;;  %v4381_v32 = vadd.f32 %v4345_v50, %v7404_v25  ;;  %v2696_v28 = vrot.slane %v7559_v47, 2 }
 0x250   : > { %v4578_v43 = vrot.slane %v4566_v51, 5  ;;  %v4452_v46 = vld [vmem:[#allocation2 + $0x28] sm:$0xff]  ;;  %v2804_v17 = vpop.f32.mrf.mxu1  ;;  %v5768_v3 = vrot.slane %v4566_v51, 10  ;;  %v3141_v51 = vrot.slane %v7562_v30, 2 }
 0x251   : > { %v4492_v55 = vadd.f32 %v7346_v40, %v4452_v46  ;;  %4417 = vst.msk [vmem:[#allocation2 + $0x30] sm:$0xff] %vm314_vm0, %v4381_v32  ;;  %v2915_v25 = vadd.f32 %v2879_v45, %v2804_v17  ;;  %v4166_v17 = vrot.slane %v7575_v16, 3 }
 0x252   : > { %v4579_v53 = vsel %vm7481_vm10, %v4577_v63, %v4578_v43 }
 0x253   : > { %v7534_v62 = vpop.f32.mrf.mxu0  ;;  %5767 = vst.msk [vmem:[%s7378_s7 + $0xc] sm:$0xf] %vm4561_vm7, %v4579_v53  ;;  %v4528_v33 = vmax.f32 %v4492_v55, 0.0  ;;  %v3323_v0 = vld [vmem:[#allocation2 + $0x48] sm:$0xff]  ;;  %5454 = vmatmul.msk.bf16.gmra.mxu1 %vm314_vm0, %v2695_v39  ;;  %5556 = vmatmul.msk.bf16.gmra.mxu2 %vm314_vm0, %v3140_v52  ;;  %v7554_v6 = vpop.f32.mrf.mxu3  ;;  %v2881_v53 = vld [vmem:[#allocation2 + $0x60] sm:$0xff]  ;;  %v4167_v12 = vsel %vm4136_vm6, %v4164_v13, %v4166_v17 }
 0x254   : > { %v3901_v8 = vld [vmem:[#allocation2 + $0x40] sm:$0xff]  ;;  %v3359_v20 = vadd.f32 %v3323_v0, %v3246_v37  ;;  %2951 = vst.msk [vmem:[#allocation2 + $0x50] sm:$0xff] %vm314_vm0, %v2915_v25 }
 0x255   : > { %v4585_v36 = vpack.c.bf16 %v4528_v33, %v4528_v33  ;;  %v3937_v42 = vadd.f32 %v3901_v8, %v7385_v61 }
 0x256   : > { %5760 = vmatmul.msk.bf16.gmra.mxu0 %vm314_vm0, %v4165_v59  ;;  %3395 = vst.msk [vmem:[#allocation2 + $0x48] sm:$0xff] %vm314_vm0, %v3359_v20  ;;  %v4346_v26 = vld [vmem:[#allocation2 + $0x38] sm:$0xff]  ;;  %v3249_v10 = vpop.f32.mrf.mxu2  ;;  %v3142_v59 = vsel %vm2666_vm5, %v3139_v56, %v3141_v51 }
 0x257   : > { %v4594_v19 = vrot.slane %v4585_v36, 6  ;;  %3973 = vst.msk [vmem:[#allocation2 + $0x40] sm:$0xff] %vm314_vm0, %v3937_v42  ;;  %v4382_v61 = vadd.f32 %v4346_v26, %v7432_v29  ;;  %v7572_v29 = vor.u32 %v3707_v9, %v3704_v60 }
 0x258   : > { %v4453_v44 = vld [vmem:[#allocation2 + $0x30] sm:$0xff]  ;;  %v2806_v7 = vpop.f32.mrf.mxu1 }
 0x259   : > { %v4595_v35 = vsel %vm7549_vm13, %v5768_v3, %v4594_v19  ;;  %v4493_v24 = vadd.f32 %v7346_v40, %v4453_v44  ;;  %4418 = vst.msk [vmem:[#allocation2 + $0x38] sm:$0xff] %vm314_vm0, %v4382_v61  ;;  %v2916_v2 = vadd.f32 %v2880_v14, %v2806_v7  ;;  %v3709_v50 = vsel %vm3557_vm4, %v7494_v41, %v7572_v29  ;;  %v2882_v14 = vld [vmem:[#allocation2 + $0x68] sm:$0xff] }
 0x25a   : > { %5769 = vst.msk [vmem:[%s7378_s7 + $0x10] sm:$0xf] %vm4561_vm7, %v4595_v35  ;;  %5660 = vmatmul.msk.bf16.gmra.mxu3 %vm314_vm0, %v3709_v50  ;;  %v4596_v39 = vrot.slane %v4594_v19, 4  ;;  %v7630_v35 = vld [vmem:[%s6061_s25 + $0x88] sm:$0xff] }
 0x25b   : > { %v7570_v4 = vpop.f32.mrf.mxu0  ;;  %v4529_v21 = vmax.f32 %v4493_v24, 0.0  ;;  %v3324_v34 = vld [vmem:[#allocation2 + $0x50] sm:$0xff]  ;;  %2952 = vst.msk [vmem:[#allocation2 + $0x58] sm:$0xff] %vm314_vm0, %v2916_v2  ;;  %v7587_v45 = vpop.f32.mrf.mxu3 }
 0x25c   : > { %v3360_v23 = vadd.f32 %v3324_v34, %v3249_v10 }
 0x25d   : > { %v4586_v37 = vpack.c.bf16 %v4529_v21, %v4529_v21  ;;  %v3902_v32 = vld [vmem:[#allocation2 + $0x48] sm:$0xff] }
 0x25e   : > { %v3938_v63 = vadd.f32 %v3902_v32, %v7417_v54  ;;  %3396 = vst.msk [vmem:[#allocation2 + $0x50] sm:$0xff] %vm314_vm0, %v3360_v23  ;;  %v4347_v43 = vld [vmem:[#allocation2 + $0x40] sm:$0xff]  ;;  %v3251_v46 = vpop.f32.mrf.mxu2  ;;  %v2697_v54 = vsel %vm2666_vm5, %v2694_v58, %v2696_v28  ;;  %v5967_v58 = vld [vmem:[%s6061_s25 + $0x98] sm:$0xff] }
 0x25f   : > { %v4597_v52 = vrot.slane %v4586_v37, 6  ;;  %v4383_v41 = vadd.f32 %v4347_v43, %v7464_v48  ;;  %v3711_v20 = vshrl.u32 %v5967_v58, 16  ;;  %v3714_v11 = vshll.u32 %v5967_v58, 16 }
 0x260   : > { %v4454_v55 = vld [vmem:[#allocation2 + $0x38] sm:$0xff]  ;;  %3974 = vst.msk [vmem:[#allocation2 + $0x48] sm:$0xff] %vm314_vm0, %v3938_v63  ;;  %v2809_v25 = vpop.f32.mrf.mxu1  ;;  %v5771_v3 = vrot.slane %v4586_v37, 11  ;;  %v7648_v37 = vld [vmem:[%s6061_s25 + $0x90] sm:$0xff] }
 0x261   : > { %v4598_v48 = vsel %vm7549_vm13, %v4596_v39, %v4597_v52  ;;  %v4494_v57 = vadd.f32 %v7346_v40, %v4454_v55  ;;  %4419 = vst.msk [vmem:[#allocation2 + $0x40] sm:$0xff] %vm314_vm0, %v4383_v41  ;;  %v2917_v33 = vadd.f32 %v2881_v53, %v2809_v25  ;;  %v3713_v10 = vrot.slane %v3711_v20, 2 }
 0x262   : > { %5770 = vst.msk [vmem:[%s7378_s7 + $0x14] sm:$0xf] %vm4561_vm7, %v4598_v48  ;;  %v3325_v0 = vld [vmem:[#allocation2 + $0x58] sm:$0xff]  ;;  %v3716_v60 = vrot.slane %v3714_v11, 3  ;;  %v4168_v55 = vrot.slane %v7648_v37, 3 }
 0x263   : > { %v7607_v1 = vpop.f32.mrf.mxu0  ;;  %v4530_v56 = vmax.f32 %v4494_v57, 0.0  ;;  %v3361_v8 = vadd.f32 %v3325_v0, %v3251_v46  ;;  %2953 = vst.msk [vmem:[#allocation2 + $0x60] sm:$0xff] %vm314_vm0, %v2917_v33  ;;  %5455 = vmatmul.msk.bf16.gmra.mxu1 %vm314_vm0, %v2697_v54  ;;  %5557 = vmatmul.msk.bf16.gmra.mxu2 %vm314_vm0, %v3142_v59  ;;  %v7625_v26 = vpop.f32.mrf.mxu3  ;;  %v2698_v46 = vrot.slane %v7630_v35, 2  ;;  %v3458_v48 = vld [vmem:[%s6061_s25 + $0xa0] sm:$0x7] }
 0x264   : > { %v7635_v24 = vor.u32 %v3716_v60, %v3713_v10  ;;  %v3537_v58 = vunpack.c.l.b16 %v3458_v48  ;;  %v4169_v47 = vsel %vm4136_vm6, %v4166_v17, %v4168_v55 }
 0x265   : > { %v4604_v36 = vpack.c.bf16 %v4530_v56, %v4530_v56  ;;  %v3903_v42 = vld [vmem:[#allocation2 + $0x50] sm:$0xff]  ;;  %3397 = vst.msk [vmem:[#allocation2 + $0x58] sm:$0xff] %vm314_vm0, %v3361_v8  ;;  %v2699_v0 = vsel %vm2666_vm5, %v2696_v28, %v2698_v46 }
 0x266   : > { %5761 = vmatmul.msk.bf16.gmra.mxu0 %vm314_vm0, %v4167_v12  ;;  %v3939_v13 = vadd.f32 %v3903_v42, %v7448_v38  ;;  %v3254_v31 = vpop.f32.mrf.mxu2  ;;  %v7633_v38 = vld [vmem:[%s6061_s25 + $0x90] sm:$0xff]  ;;  %v3556_v28 = vpack.c.b16 %v3537_v58, %v3537_v58  ;;  %v2567_v58 = vld [vmem:[%s6061_s25 + $0x98] sm:$0x3] }
 0x267   : > { %v4613_v19 = vrot.slane %v4604_v36, 7  ;;  %v4348_v61 = vld [vmem:[#allocation2 + $0x48] sm:$0xff]  ;;  %v3143_v39 = vrot.slane %v7633_v38, 2 }
 0x268   : > { %v4455_v9 = vld [vmem:[#allocation2 + $0x40] sm:$0xff]  ;;  %3975 = vst.msk [vmem:[#allocation2 + $0x50] sm:$0xff] %vm314_vm0, %v3939_v13  ;;  %v4384_v44 = vadd.f32 %v4348_v61, %v7499_v27  ;;  %v2811_v7 = vpop.f32.mrf.mxu1  ;;  %v3718_v27 = vsel %vm3557_vm4, %v7572_v29, %v7635_v24  ;;  %v3720_v42 = vshrl.u32 %v3556_v28, 16  ;;  %v3723_v17 = vshll.u32 %v3556_v28, 16 }
 0x269   : > { %v4614_v2 = vsel %vm7620_vm1, %v5771_v3, %v4613_v19  ;;  %v4495_v21 = vadd.f32 %v7346_v40, %v4455_v9  ;;  %v2918_v34 = vadd.f32 %v2882_v14, %v2811_v7  ;;  %v4615_v53 = vrot.slane %v4613_v19, 4  ;;  %v7700_v7 = vld [vmem:[%s6061_s25 + $0x98] sm:$0xff]  ;;  %v4037_v28 = vld [vmem:[%s6061_s25 + $0xa0] sm:$0x7] }
 0x26a   : > { %5772 = vst.msk [vmem:[%s7378_s7 + $0x18] sm:$0xf] %vm4561_vm7, %v4614_v2  ;;  %v3326_v23 = vld [vmem:[#allocation2 + $0x60] sm:$0xff]  ;;  %5661 = vmatmul.msk.bf16.gmra.mxu3 %vm314_vm0, %v3718_v27  ;;  %v3144_v12 = vsel %vm2666_vm5, %v3141_v51, %v3143_v39  ;;  %v3722_v60 = vrot.slane %v3720_v42, 2  ;;  %v3725_v14 = vrot.slane %v3723_v17, 3  ;;  %v7708_v27 = vld [vmem:[%s6061_s25 + $0x98] sm:$0xff] }
 0x26b   : > { %v7642_v50 = vpop.f32.mrf.mxu0  ;;  %v4531_v32 = vmax.f32 %v4495_v21, 0.0  ;;  %4420 = vst.msk [vmem:[#allocation2 + $0x48] sm:$0xff] %vm314_vm0, %v4384_v44  ;;  %v3362_v63 = vadd.f32 %v3326_v23, %v3254_v31  ;;  %v7658_v25 = vpop.f32.mrf.mxu3  ;;  %v7697_v44 = vld [vmem:[%s6061_s25 + $0x90] sm:$0xff] }
 0x26c   : > { %v3904_v43 = vld [vmem:[#allocation2 + $0x58] sm:$0xff]  ;;  %2954 = vst.msk [vmem:[#allocation2 + $0x68] sm:$0xff] %vm314_vm0, %v2918_v34  ;;  %v3726_v21 = vor.u32 %v3725_v14, %v3722_v60 }
 0x26d   : > { %v4605_v52 = vpack.c.bf16 %v4531_v32, %v4531_v32  ;;  %v3940_v41 = vadd.f32 %v3904_v43, %v7478_v18  ;;  %3398 = vst.msk [vmem:[#allocation2 + $0x60] sm:$0xff] %vm314_vm0, %v3362_v63  ;;  %v2883_v18 = vld [vmem:[#allocation2 + $0x70] sm:$0xff] }
 0x26e   : > { %v3256_v29 = vpop.f32.mrf.mxu2  ;;  %v3727_v63 = vsel %vm3557_vm4, %v7635_v24, %v3726_v21  ;;  %v4170_v24 = vrot.slane %v7708_v27, 3 }
 0x26f   : > { %v4616_v54 = vrot.slane %v4605_v52, 7  ;;  %3976 = vst.msk [vmem:[#allocation2 + $0x58] sm:$0xff] %vm314_vm0, %v3940_v41  ;;  %v4349_v59 = vld [vmem:[#allocation2 + $0x50] sm:$0xff]  ;;  %v2700_v52 = vrot.slane %v7697_v44, 2  ;;  %v3145_v41 = vrot.slane %v7700_v7, 2 }
 0x270   : > { %v4385_v57 = vadd.f32 %v4349_v59, %v7534_v62  ;;  %v2814_v33 = vpop.f32.mrf.mxu1  ;;  %v4171_v38 = vsel %vm4136_vm6, %v4168_v55, %v4170_v24 }
 0x271   : > { %v4617_v56 = vsel %vm7620_vm1, %v4615_v53, %v4616_v54  ;;  %v2919_v8 = vadd.f32 %v2883_v18, %v2814_v33 }
 0x272   : > { %5773 = vst.msk [vmem:[%s7378_s7 + $0x1c] sm:$0xf] %vm4561_vm7, %v4617_v56  ;;  %v4456_v62 = vld [vmem:[#allocation2 + $0x48] sm:$0xff] }
 0x273   : > { %v7677_v20 = vpop.f32.mrf.mxu0  ;;  %v4496_v30 = vadd.f32 %v7346_v40, %v4456_v62  ;;  %4421 = vst.msk [vmem:[#allocation2 + $0x50] sm:$0xff] %vm314_vm0, %v4385_v57  ;;  %v3327_v51 = vld [vmem:[#allocation2 + $0x68] sm:$0xff]  ;;  %5456 = vmatmul.msk.bf16.gmra.mxu1 %vm314_vm0, %v2699_v0  ;;  %5558 = vmatmul.msk.bf16.gmra.mxu2 %vm314_vm0, %v3144_v12  ;;  %v7694_v61 = vpop.f32.mrf.mxu3  ;;  %v2885_v0 = vld [vmem:[#allocation2 + $0x80] sm:$0xff]  ;;  %v3146_v12 = vsel %vm2666_vm5, %v3143_v39, %v3145_v41  ;;  %v2646_v39 = vunpack.c.l.b16 %v2567_v58 }
 0x274   : > { %v3905_v11 = vld [vmem:[#allocation2 + $0x60] sm:$0xff]  ;;  %v3363_v36 = vadd.f32 %v3327_v51, %v3256_v29  ;;  %2955 = vst.msk [vmem:[#allocation2 + $0x70] sm:$0xff] %vm314_vm0, %v2919_v8 }
 0x275   : > { %v4532_v13 = vmax.f32 %v4496_v30, 0.0  ;;  %v3941_v16 = vadd.f32 %v3905_v11, %v7516_v5  ;;  %v2884_v5 = vld [vmem:[#allocation2 + $0x78] sm:$0xff]  ;;  %v3013_v8 = vld [vmem:[%s6061_s25 + $0xa0] sm:$0x3] }
 0x276   : > { %5762 = vmatmul.msk.bf16.gmra.mxu0 %vm314_vm0, %v4169_v47  ;;  %3399 = vst.msk [vmem:[#allocation2 + $0x68] sm:$0xff] %vm314_vm0, %v3363_v36  ;;  %v4350_v31 = vld [vmem:[#allocation2 + $0x58] sm:$0xff]  ;;  %v3259_v10 = vpop.f32.mrf.mxu2  ;;  %v3092_v51 = vunpack.c.l.b16 %v3013_v8  ;;  %v4116_v36 = vunpack.c.l.b16 %v4037_v28 }
 0x277   : > { %v4623_v3 = vpack.c.bf16 %v4532_v13, %v4532_v13  ;;  %3977 = vst.msk [vmem:[#allocation2 + $0x60] sm:$0xff] %vm314_vm0, %v3941_v16  ;;  %v4386_v19 = vadd.f32 %v4350_v31, %v7570_v4  ;;  %v2665_v13 = vpack.c.b16 %v2646_v39, %v2646_v39 }
 0x278   : > { %v2816_v9 = vpop.f32.mrf.mxu1  ;;  %v3111_v60 = vpack.c.b16 %v3092_v51, %v3092_v51 }
 0x279   : > { %5774 = vst.msk [vmem:[%s7378_s7 + $0x20] sm:$0xf] %vm4561_vm7, %v4623_v3  ;;  %v2920_v2 = vadd.f32 %v2884_v5, %v2816_v9  ;;  %v4135_v5 = vpack.c.b16 %v4116_v36, %v4116_v36  ;;  %v2702_v21 = vrot.slane %v2665_v13, 2 }
 0x27a   : > { %v4457_v34 = vld [vmem:[#allocation2 + $0x50] sm:$0xff]  ;;  %4422 = vst.msk [vmem:[#allocation2 + $0x58] sm:$0xff] %vm314_vm0, %v4386_v19  ;;  %5662 = vmatmul.msk.bf16.gmra.mxu3 %vm314_vm0, %v3727_v63  ;;  %v3147_v63 = vrot.slane %v3111_v60, 2 }
 0x27b   : > { %v7705_v23 = vpop.f32.mrf.mxu0  ;;  %v4497_v4 = vadd.f32 %v7346_v40, %v4457_v34  ;;  %v3328_v32 = vld [vmem:[#allocation2 + $0x70] sm:$0xff]  ;;  %2956 = vst.msk [vmem:[#allocation2 + $0x78] sm:$0xff] %vm314_vm0, %v2920_v2  ;;  %v7736_v62 = vpop.f32.mrf.mxu3 }
 0x27c   : > { %v3364_v43 = vadd.f32 %v3328_v32, %v3259_v10  ;;  %v2886_v10 = vld [vmem:[#allocation2 + $0x88] sm:$0xff] }
 0x27d   : > { %v4533_v29 = vmax.f32 %v4497_v4, 0.0  ;;  %v3906_v53 = vld [vmem:[#allocation2 + $0x68] sm:$0xff] }
 0x27e   : > { %v3942_v54 = vadd.f32 %v3906_v53, %v7554_v6  ;;  %3400 = vst.msk [vmem:[#allocation2 + $0x70] sm:$0xff] %vm314_vm0, %v3364_v43  ;;  %v4351_v59 = vld [vmem:[#allocation2 + $0x60] sm:$0xff]  ;;  %v3261_v48 = vpop.f32.mrf.mxu2  ;;  %v2701_v6 = vsel %vm2666_vm5, %v2698_v46, %v2700_v52 }
 0x27f   : > { %v4624_v57 = vpack.c.bf16 %v4533_v29, %v4533_v29  ;;  %v4387_v33 = vadd.f32 %v4351_v59, %v7607_v1 }
 0x280   : > { %3978 = vst.msk [vmem:[#allocation2 + $0x68] sm:$0xff] %vm314_vm0, %v3942_v54  ;;  %v2819_v18 = vpop.f32.mrf.mxu1  ;;  %v4172_v54 = vrot.slane %v4135_v5, 3 }
 0x281   : > { %5775 = vst.msk [vmem:[%s7378_s7 + $0x24] sm:$0xf] %vm4561_vm7, %v4624_v57  ;;  %v4458_v1 = vld [vmem:[#allocation2 + $0x58] sm:$0xff]  ;;  %v2921_v56 = vadd.f32 %v2885_v0, %v2819_v18 }
 0x282   : > { %4423 = vst.msk [vmem:[#allocation2 + $0x60] sm:$0xff] %vm314_vm0, %v4387_v33  ;;  %v3329_v35 = vld [vmem:[#allocation2 + $0x78] sm:$0xff]  ;;  %v4498_v30 = vadd.f32 %v7346_v40, %v4458_v1 }
 0x283   : > { %v7739_v47 = vpop.f32.mrf.mxu0  ;;  %v3365_v46 = vadd.f32 %v3329_v35, %v3261_v48  ;;  %2957 = vst.msk [vmem:[#allocation2 + $0x80] sm:$0xff] %vm314_vm0, %v2921_v56  ;;  %5457 = vmatmul.msk.bf16.gmra.mxu1 %vm314_vm0, %v2701_v6  ;;  %5559 = vmatmul.msk.bf16.gmra.mxu2 %vm314_vm0, %v3146_v12  ;;  %v7761_v34 = vpop.f32.mrf.mxu3  ;;  %v2703_v48 = vsel %vm2666_vm5, %v2700_v52, %v2702_v21  ;;  %v2887_v6 = vld [vmem:[#allocation2 + $0x90] sm:$0xff] }
 0x284   : > { %v4534_v16 = vmax.f32 %v4498_v30, 0.0 }
 0x285   : > { %v3907_v11 = vld [vmem:[#allocation2 + $0x70] sm:$0xff]  ;;  %3401 = vst.msk [vmem:[#allocation2 + $0x78] sm:$0xff] %vm314_vm0, %v3365_v46 }
 0x286   : > { %5763 = vmatmul.msk.bf16.gmra.mxu0 %vm314_vm0, %v4171_v38  ;;  %v3943_v37 = vadd.f32 %v3907_v11, %v7587_v45  ;;  %v3264_v55 = vpop.f32.mrf.mxu2  ;;  %v2888_v11 = vld [vmem:[#allocation2 + $0x98] sm:$0xff] }
 0x287   : > { %v4352_v42 = vld [vmem:[#allocation2 + $0x68] sm:$0xff] }
 0x288   : > { %3979 = vst.msk [vmem:[#allocation2 + $0x70] sm:$0xff] %vm314_vm0, %v3943_v37  ;;  %v4388_v17 = vadd.f32 %v4352_v42, %v7642_v50  ;;  %v2821_v31 = vpop.f32.mrf.mxu1  ;;  %v4628_v50 = vpack.c.bf16 %v4534_v16, %v4534_v16 }
 0x289   : > { %v4459_v3 = vld [vmem:[#allocation2 + $0x60] sm:$0xff]  ;;  %v2922_v19 = vadd.f32 %v2886_v10, %v2821_v31 }
 0x28a   : > { %v4499_v14 = vadd.f32 %v7346_v40, %v4459_v3  ;;  %4424 = vst.msk [vmem:[#allocation2 + $0x68] sm:$0xff] %vm314_vm0, %v4388_v17  ;;  %v3330_v9 = vld [vmem:[#allocation2 + $0x80] sm:$0xff]  ;;  %v5776_v57 = vrot.slane %v4628_v50, 9 }
 0x28b   : > { %v7758_v45 = vpop.f32.mrf.mxu0  ;;  %v3366_v2 = vadd.f32 %v3330_v9, %v3264_v55  ;;  %2958 = vst.msk [vmem:[#allocation2 + $0x88] sm:$0xff] %vm314_vm0, %v2922_v19  ;;  %v7790_v27 = vpop.f32.mrf.mxu3  ;;  %v2889_v50 = vld [vmem:[#allocation2 + $0xa0] sm:$0xff] }
 0x28c   : > { %v4535_v4 = vmax.f32 %v4499_v14, 0.0  ;;  %v3908_v32 = vld [vmem:[#allocation2 + $0x78] sm:$0xff] }
 0x28d   : > { %v3944_v43 = vadd.f32 %v3908_v32, %v7625_v26  ;;  %3402 = vst.msk [vmem:[#allocation2 + $0x80] sm:$0xff] %vm314_vm0, %v3366_v2  ;;  %v3148_v26 = vsel %vm2666_vm5, %v3145_v41, %v3147_v63 }
 0x28e   : > { %v4629_v29 = vpack.c.bf16 %v4535_v4, %v4535_v4  ;;  %v3266_v53 = vpop.f32.mrf.mxu2 }
 0x28f   : > { %3980 = vst.msk [vmem:[#allocation2 + $0x78] sm:$0xff] %vm314_vm0, %v3944_v43  ;;  %v4353_v59 = vld [vmem:[#allocation2 + $0x70] sm:$0xff] }
 0x290   : > { %v4636_v33 = vrot.slane %v4629_v29, 5  ;;  %v4389_v18 = vadd.f32 %v4353_v59, %v7677_v20  ;;  %v2824_v0 = vpop.f32.mrf.mxu1  ;;  %v4173_v20 = vsel %vm4136_vm6, %v4170_v24, %v4172_v54 }
 0x291   : > { %v4460_v12 = vld [vmem:[#allocation2 + $0x68] sm:$0xff]  ;;  %v2923_v58 = vadd.f32 %v2887_v6, %v2824_v0 }
 0x292   : > { %v4637_v1 = vsel %vm7481_vm10, %v5776_v57, %v4636_v33  ;;  %v4500_v44 = vadd.f32 %v7346_v40, %v4460_v12  ;;  %4425 = vst.msk [vmem:[#allocation2 + $0x70] sm:$0xff] %vm314_vm0, %v4389_v18  ;;  %v3331_v52 = vld [vmem:[#allocation2 + $0x88] sm:$0xff]  ;;  %v4638_v28 = vrot.slane %v4636_v33, 4 }
 0x293   : > { %v7777_v56 = vpop.f32.mrf.mxu0  ;;  %5777 = vst.msk [vmem:[%s7378_s7 + $0x28] sm:$0xf] %vm4561_vm7, %v4637_v1  ;;  %v3367_v7 = vadd.f32 %v3331_v52, %v3266_v53  ;;  %5458 = vmatmul.msk.bf16.gmra.mxu1 %vm314_vm0, %v2703_v48  ;;  %5560 = vmatmul.msk.bf16.gmra.mxu2 %vm314_vm0, %v3148_v26  ;;  %v7807_v14 = vpop.f32.mrf.mxu3  ;;  %v2890_v26 = vld [vmem:[#allocation2 + $0xa8] sm:$0xff] }
 0x294   : > { %v4536_v41 = vmax.f32 %v4500_v44, 0.0  ;;  %v3909_v8 = vld [vmem:[#allocation2 + $0x80] sm:$0xff]  ;;  %2959 = vst.msk [vmem:[#allocation2 + $0x90] sm:$0xff] %vm314_vm0, %v2923_v58 }
 0x295   : > { %v3945_v35 = vadd.f32 %v3909_v8, %v7658_v25  ;;  %3403 = vst.msk [vmem:[#allocation2 + $0x88] sm:$0xff] %vm314_vm0, %v3367_v7 }
 0x296   : > { %5764 = vmatmul.msk.bf16.gmra.mxu0 %vm314_vm0, %v4173_v20  ;;  %v4630_v24 = vpack.c.bf16 %v4536_v41, %v4536_v41  ;;  %v4354_v38 = vld [vmem:[#allocation2 + $0x78] sm:$0xff]  ;;  %v3269_v46 = vpop.f32.mrf.mxu2 }
 0x297   : > { %3981 = vst.msk [vmem:[#allocation2 + $0x80] sm:$0xff] %vm314_vm0, %v3945_v35  ;;  %v4390_v39 = vadd.f32 %v4354_v38, %v7705_v23 }
 0x298   : > { %v4639_v30 = vrot.slane %v4630_v24, 5  ;;  %v2826_v51 = vpop.f32.mrf.mxu1  ;;  %v5779_v9 = vrot.slane %v4630_v24, 10 }
 0x299   : > { %v4461_v37 = vld [vmem:[#allocation2 + $0x70] sm:$0xff]  ;;  %4426 = vst.msk [vmem:[#allocation2 + $0x78] sm:$0xff] %vm314_vm0, %v4390_v39  ;;  %v2924_v25 = vadd.f32 %v2888_v11, %v2826_v51 }
 0x29a   : > { %v4640_v55 = vsel %vm7481_vm10, %v4638_v28, %v4639_v30  ;;  %v4501_v36 = vadd.f32 %v7346_v40, %v4461_v37  ;;  %v2891_v11 = vld [vmem:[#allocation2 + $0xb0] sm:$0xff] }
 0x29b   : > { %v7798_v42 = vpop.f32.mrf.mxu0  ;;  %5778 = vst.msk [vmem:[%s7378_s7 + $0x2c] sm:$0xf] %vm4561_vm7, %v4640_v55  ;;  %v3332_v13 = vld [vmem:[#allocation2 + $0x90] sm:$0xff]  ;;  %v7831_v44 = vpop.f32.mrf.mxu3 }
 0x29c   : > { %v4537_v16 = vmax.f32 %v4501_v36, 0.0  ;;  %v3910_v23 = vld [vmem:[#allocation2 + $0x88] sm:$0xff]  ;;  %v3368_v17 = vadd.f32 %v3332_v13, %v3269_v46  ;;  %2960 = vst.msk [vmem:[#allocation2 + $0x98] sm:$0xff] %vm314_vm0, %v2924_v25 }
 0x29d   : > { %v3946_v31 = vadd.f32 %v3910_v23, %v7694_v61 }
 0x29e   : > { %v4646_v10 = vpack.c.bf16 %v4537_v16, %v4537_v16  ;;  %3404 = vst.msk [vmem:[#allocation2 + $0x90] sm:$0xff] %vm314_vm0, %v3368_v17  ;;  %v4355_v60 = vld [vmem:[#allocation2 + $0x80] sm:$0xff]  ;;  %v3271_v3 = vpop.f32.mrf.mxu2 }
 0x29f   : > { %3982 = vst.msk [vmem:[#allocation2 + $0x88] sm:$0xff] %vm314_vm0, %v3946_v31  ;;  %v4391_v19 = vadd.f32 %v4355_v60, %v7739_v47 }
 0x2a0   : > { %v4652_v5 = vrot.slane %v4646_v10, 6  ;;  %v4462_v2 = vld [vmem:[#allocation2 + $0x78] sm:$0xff]  ;;  %v2829_v21 = vpop.f32.mrf.mxu1 }
 0x2a1   : > { %v4502_v4 = vadd.f32 %v7346_v40, %v4462_v2  ;;  %4427 = vst.msk [vmem:[#allocation2 + $0x80] sm:$0xff] %vm314_vm0, %v4391_v19  ;;  %v2925_v61 = vadd.f32 %v2889_v50, %v2829_v21  ;;  %v2892_v2 = vld [vmem:[#allocation2 + $0xb8] sm:$0xff] }
 0x2a2   : > { %v4653_v32 = vsel %vm7549_vm13, %v5779_v9, %v4652_v5  ;;  %v4654_v57 = vrot.slane %v4652_v5, 4 }
 0x2a3   : > { %v7813_v63 = vpop.f32.mrf.mxu0  ;;  %5780 = vst.msk [vmem:[%s7378_s7 + $0x30] sm:$0xf] %vm4561_vm7, %v4653_v32  ;;  %v4538_v47 = vmax.f32 %v4502_v4, 0.0  ;;  %v3333_v43 = vld [vmem:[#allocation2 + $0x98] sm:$0xff]  ;;  %v7848_v16 = vpop.f32.mrf.mxu3 }
 0x2a4   : > { %v3369_v29 = vadd.f32 %v3333_v43, %v3271_v3  ;;  %2961 = vst.msk [vmem:[#allocation2 + $0xa0] sm:$0xff] %vm314_vm0, %v2925_v61 }
 0x2a5   : > { %v4647_v53 = vpack.c.bf16 %v4538_v47, %v4538_v47  ;;  %v3911_v54 = vld [vmem:[#allocation2 + $0x90] sm:$0xff] }
 0x2a6   : > { %v3947_v59 = vadd.f32 %v3911_v54, %v7736_v62  ;;  %3405 = vst.msk [vmem:[#allocation2 + $0x98] sm:$0xff] %vm314_vm0, %v3369_v29  ;;  %v4356_v40 = vld [vmem:[#allocation2 + $0x88] sm:$0xff]  ;;  %v3274_v48 = vpop.f32.mrf.mxu2  ;;  %v7827_v62 = vld [vmem:[%s8014_s2] ss:$0 sm:$0xff] }
 0x2a7   : > { %v4655_v33 = vrot.slane %v4647_v53, 6  ;;  %v4392_v18 = vadd.f32 %v4356_v40, %v7758_v45  ;;  %v5782_v38 = vrot.slane %v4647_v53, 11 }
 0x2a8   : > { %v4463_v0 = vld [vmem:[#allocation2 + $0x80] sm:$0xff]  ;;  %3983 = vst.msk [vmem:[#allocation2 + $0x90] sm:$0xff] %vm314_vm0, %v3947_v59  ;;  %v2831_v6 = vpop.f32.mrf.mxu1 }
 0x2a9   : > { %v4656_v12 = vsel %vm7549_vm13, %v4654_v57, %v4655_v33  ;;  %v4503_v58 = vadd.f32 %v7827_v62, %v4463_v0  ;;  %4428 = vst.msk [vmem:[#allocation2 + $0x88] sm:$0xff] %vm314_vm0, %v4392_v18  ;;  %v2926_v1 = vadd.f32 %v2890_v26, %v2831_v6  ;;  %v2893_v33 = vld [vmem:[#allocation2 + $0xc0] sm:$0xff] }
 0x2aa   : > { %5781 = vst.msk [vmem:[%s7378_s7 + $0x34] sm:$0xf] %vm4561_vm7, %v4656_v12 }
 0x2ab   : > { %v7835_v45 = vpop.f32.mrf.mxu0  ;;  %v4539_v52 = vmax.f32 %v4503_v58, 0.0  ;;  %v3334_v20 = vld [vmem:[#allocation2 + $0xa0] sm:$0xff]  ;;  %2962 = vst.msk [vmem:[#allocation2 + $0xa8] sm:$0xff] %vm314_vm0, %v2926_v1  ;;  %v3863_v29 = vpop.f32.mrf.mxu3 }
 0x2ac   : > { %v3370_v7 = vadd.f32 %v3334_v20, %v3274_v48 }
 0x2ad   : > { %v4662_v41 = vpack.c.bf16 %v4539_v52, %v4539_v52  ;;  %v3912_v8 = vld [vmem:[#allocation2 + $0x98] sm:$0xff] }
 0x2ae   : > { %v3948_v35 = vadd.f32 %v3912_v8, %v7761_v34  ;;  %3406 = vst.msk [vmem:[#allocation2 + $0xa0] sm:$0xff] %vm314_vm0, %v3370_v7  ;;  %v3276_v24 = vpop.f32.mrf.mxu2 }
 0x2af   : > { %v4668_v46 = vrot.slane %v4662_v41, 7  ;;  %v4357_v39 = vld [vmem:[#allocation2 + $0x90] sm:$0xff] }
 0x2b0   : > { %v4464_v28 = vld [vmem:[#allocation2 + $0x88] sm:$0xff]  ;;  %3984 = vst.msk [vmem:[#allocation2 + $0x98] sm:$0xff] %vm314_vm0, %v3948_v35  ;;  %v4393_v30 = vadd.f32 %v4357_v39, %v7777_v56  ;;  %v2834_v51 = vpop.f32.mrf.mxu1 }
 0x2b1   : > { %v4669_v37 = vsel %vm7620_vm1, %v5782_v38, %v4668_v46  ;;  %v4504_v25 = vadd.f32 %v7827_v62, %v4464_v28  ;;  %v2927_v55 = vadd.f32 %v2891_v11, %v2834_v51  ;;  %v4670_v60 = vrot.slane %v4668_v46, 4 }
 0x2b2   : > { %5783 = vst.msk [vmem:[%s7378_s7 + $0x38] sm:$0xf] %vm4561_vm7, %v4669_v37  ;;  %v3335_v34 = vld [vmem:[#allocation2 + $0xa8] sm:$0xff] }
 0x2b3   : > { %v4540_v36 = vmax.f32 %v4504_v25, 0.0  ;;  %4429 = vst.msk [vmem:[#allocation2 + $0x90] sm:$0xff] %vm314_vm0, %v4393_v30  ;;  %v3371_v13 = vadd.f32 %v3335_v34, %v3276_v24  ;;  %v7850_v23 = vpop.f32.mrf.mxu0  ;;  %v3865_v41 = vpop.f32.mrf.mxu3  ;;  %v2894_v24 = vld [vmem:[#allocation2 + $0xc8] sm:$0xff]  ;;  %v2895_v34 = vld [vmem:[#allocation2 + $0xd0] sm:$0xff] }
 0x2b4   : > { %2963 = vst.msk [vmem:[#allocation2 + $0xb0] sm:$0xff] %vm314_vm0, %v2927_v55 }
 0x2b5   : > { %v4663_v56 = vpack.c.bf16 %v4540_v36, %v4540_v36  ;;  %v3913_v17 = vld [vmem:[#allocation2 + $0xa0] sm:$0xff]  ;;  %3407 = vst.msk [vmem:[#allocation2 + $0xa8] sm:$0xff] %vm314_vm0, %v3371_v13 }
 0x2b6   : > { %v3949_v31 = vadd.f32 %v3913_v17, %v7790_v27  ;;  %v3279_v10 = vpop.f32.mrf.mxu2 }
 0x2b7   : > { %v4671_v3 = vrot.slane %v4663_v56, 7  ;;  %v4358_v19 = vld [vmem:[#allocation2 + $0x98] sm:$0xff] }
 0x2b8   : > { %3985 = vst.msk [vmem:[#allocation2 + $0xa0] sm:$0xff] %vm314_vm0, %v3949_v31  ;;  %v4394_v9 = vadd.f32 %v4358_v19, %v7798_v42  ;;  %v2836_v5 = vpop.f32.mrf.mxu1 }
 0x2b9   : > { %v4672_v21 = vsel %vm7620_vm1, %v4670_v60, %v4671_v3  ;;  %v2928_v50 = vadd.f32 %v2892_v2, %v2836_v5 }
 0x2ba   : > { %5784 = vst.msk [vmem:[%s7378_s7 + $0x3c] sm:$0xf] %vm4561_vm7, %v4672_v21  ;;  %v4465_v4 = vld [vmem:[#allocation2 + $0x90] sm:$0xff] }
 0x2bb   : > { %v4505_v61 = vadd.f32 %v7827_v62, %v4465_v4  ;;  %4430 = vst.msk [vmem:[#allocation2 + $0x98] sm:$0xff] %vm314_vm0, %v4394_v9  ;;  %v3336_v27 = vld [vmem:[#allocation2 + $0xb0] sm:$0xff]  ;;  %v7865_v53 = vpop.f32.mrf.mxu0  ;;  %v3868_v56 = vpop.f32.mrf.mxu3 }
 0x2bc   : > { %v3914_v32 = vld [vmem:[#allocation2 + $0xa8] sm:$0xff]  ;;  %v3372_v47 = vadd.f32 %v3336_v27, %v3279_v10  ;;  %2964 = vst.msk [vmem:[#allocation2 + $0xb8] sm:$0xff] %vm314_vm0, %v2928_v50  ;;  %v2896_v27 = vld [vmem:[#allocation2 + $0xd8] sm:$0xff] }
 0x2bd   : > { %v4541_v42 = vmax.f32 %v4505_v61, 0.0  ;;  %v3950_v43 = vadd.f32 %v3914_v32, %v7807_v14 }
 0x2be   : > { %3408 = vst.msk [vmem:[#allocation2 + $0xb0] sm:$0xff] %vm314_vm0, %v3372_v47  ;;  %v3281_v54 = vpop.f32.mrf.mxu2 }
 0x2bf   : > { %v4678_v59 = vpack.c.bf16 %v4541_v42, %v4541_v42  ;;  %3986 = vst.msk [vmem:[#allocation2 + $0xa8] sm:$0xff] %vm314_vm0, %v3950_v43  ;;  %v4359_v40 = vld [vmem:[#allocation2 + $0xa0] sm:$0xff] }
 0x2c0   : > { %v4395_v48 = vadd.f32 %v4359_v40, %v7813_v63  ;;  %v2839_v57 = vpop.f32.mrf.mxu1 }
 0x2c1   : > { %5785 = vst.msk [vmem:[%s7378_s7 + $0x40] sm:$0xf] %vm4561_vm7, %v4678_v59  ;;  %v2929_v18 = vadd.f32 %v2893_v33, %v2839_v57 }
 0x2c2   : > { %v4466_v0 = vld [vmem:[#allocation2 + $0x98] sm:$0xff]  ;;  %4431 = vst.msk [vmem:[#allocation2 + $0xa0] sm:$0xff] %vm314_vm0, %v4395_v48 }
 0x2c3   : > { %v4506_v14 = vadd.f32 %v7827_v62, %v4466_v0  ;;  %v3337_v6 = vld [vmem:[#allocation2 + $0xb8] sm:$0xff]  ;;  %2965 = vst.msk [vmem:[#allocation2 + $0xc0] sm:$0xff] %vm314_vm0, %v2929_v18  ;;  %v7878_v8 = vpop.f32.mrf.mxu0  ;;  %v3870_v59 = vpop.f32.mrf.mxu3 }
 0x2c4   : > { %v3373_v26 = vadd.f32 %v3337_v6, %v3281_v54 }
 0x2c5   : > { %v4542_v12 = vmax.f32 %v4506_v14, 0.0  ;;  %v3915_v58 = vld [vmem:[#allocation2 + $0xb0] sm:$0xff] }
 0x2c6   : > { %v3951_v1 = vadd.f32 %v3915_v58, %v7831_v44  ;;  %3409 = vst.msk [vmem:[#allocation2 + $0xb8] sm:$0xff] %vm314_vm0, %v3373_v26  ;;  %v4360_v63 = vld [vmem:[#allocation2 + $0xa8] sm:$0xff]  ;;  %v3284_v52 = vpop.f32.mrf.mxu2  ;;  %v2897_v58 = vld [vmem:[#allocation2 + $0xe0] sm:$0xff] }
 0x2c7   : > { %v4679_v20 = vpack.c.bf16 %v4542_v12, %v4542_v12  ;;  %v4396_v7 = vadd.f32 %v4360_v63, %v7835_v45 }
 0x2c8   : > { %3987 = vst.msk [vmem:[#allocation2 + $0xb0] sm:$0xff] %vm314_vm0, %v3951_v1  ;;  %v2841_v35 = vpop.f32.mrf.mxu1 }
 0x2c9   : > { %5786 = vst.msk [vmem:[%s7378_s7 + $0x44] sm:$0xf] %vm4561_vm7, %v4679_v20  ;;  %v4467_v38 = vld [vmem:[#allocation2 + $0xa0] sm:$0xff]  ;;  %v2930_v46 = vadd.f32 %v2894_v24, %v2841_v35 }
 0x2ca   : > { %4432 = vst.msk [vmem:[#allocation2 + $0xa8] sm:$0xff] %vm314_vm0, %v4396_v7  ;;  %v3338_v44 = vld [vmem:[#allocation2 + $0xc0] sm:$0xff]  ;;  %v4507_v28 = vadd.f32 %v7827_v62, %v4467_v38 }
 0x2cb   : > { %v3374_v39 = vadd.f32 %v3338_v44, %v3284_v52  ;;  %2966 = vst.msk [vmem:[#allocation2 + $0xc8] sm:$0xff] %vm314_vm0, %v2930_v46  ;;  %v7890_v17 = vpop.f32.mrf.mxu0  ;;  %v3873_v38 = vpop.f32.mrf.mxu3 }
 0x2cc   : > { %v4543_v37 = vmax.f32 %v4507_v28, 0.0 }
 0x2cd   : > { %v3916_v45 = vld [vmem:[#allocation2 + $0xb8] sm:$0xff]  ;;  %3410 = vst.msk [vmem:[#allocation2 + $0xc0] sm:$0xff] %vm314_vm0, %v3374_v39 }
 0x2ce   : > { %v3952_v30 = vadd.f32 %v3916_v45, %v7848_v16  ;;  %v3286_v51 = vpop.f32.mrf.mxu2  ;;  %v4683_v60 = vpack.c.bf16 %v4543_v37, %v4543_v37 }
 0x2cf   : > { %v4361_v11 = vld [vmem:[#allocation2 + $0xb0] sm:$0xff] }
 0x2d0   : > { %3988 = vst.msk [vmem:[#allocation2 + $0xb8] sm:$0xff] %vm314_vm0, %v3952_v30  ;;  %v4397_v25 = vadd.f32 %v4361_v11, %v7850_v23  ;;  %v2844_v55 = vpop.f32.mrf.mxu1  ;;  %v5787_v21 = vrot.slane %v4683_v60, 9 }
 0x2d1   : > { %v4468_v36 = vld [vmem:[#allocation2 + $0xa8] sm:$0xff]  ;;  %v2931_v13 = vadd.f32 %v2895_v34, %v2844_v55 }
 0x2d2   : > { %v4508_v31 = vadd.f32 %v7827_v62, %v4468_v36  ;;  %4433 = vst.msk [vmem:[#allocation2 + $0xb0] sm:$0xff] %vm314_vm0, %v4397_v25  ;;  %v3339_v10 = vld [vmem:[#allocation2 + $0xc8] sm:$0xff] }
 0x2d3   : > { %v3375_v16 = vadd.f32 %v3339_v10, %v3286_v51  ;;  %2967 = vst.msk [vmem:[#allocation2 + $0xd0] sm:$0xff] %vm314_vm0, %v2931_v13  ;;  %v4314_v40 = vpop.f32.mrf.mxu0  ;;  %v2898_v25 = vld [vmem:[#allocation2 + $0xe8] sm:$0xff] }
 0x2d4   : > { %v4544_v3 = vmax.f32 %v4508_v31, 0.0  ;;  %v3917_v19 = vld [vmem:[#allocation2 + $0xc0] sm:$0xff] }
 0x2d5   : > { %v3953_v9 = vadd.f32 %v3917_v19, %v3863_v29  ;;  %3411 = vst.msk [vmem:[#allocation2 + $0xc8] sm:$0xff] %vm314_vm0, %v3375_v16 }
 0x2d6   : > { %v4684_v23 = vpack.c.bf16 %v4544_v3, %v4544_v3  ;;  %v3289_v5 = vpop.f32.mrf.mxu2 }
 0x2d7   : > { %3989 = vst.msk [vmem:[#allocation2 + $0xc0] sm:$0xff] %vm314_vm0, %v3953_v9  ;;  %v4362_v2 = vld [vmem:[#allocation2 + $0xb8] sm:$0xff] }
 0x2d8   : > { %v4691_v50 = vrot.slane %v4684_v23, 5  ;;  %v4398_v4 = vadd.f32 %v4362_v2, %v7865_v53  ;;  %v2846_v61 = vpop.f32.mrf.mxu1 }
 0x2d9   : > { %v4469_v32 = vld [vmem:[#allocation2 + $0xb0] sm:$0xff]  ;;  %v2932_v47 = vadd.f32 %v2896_v27, %v2846_v61 }
 0x2da   : > { %v4692_v42 = vsel %vm7481_vm10, %v5787_v21, %v4691_v50  ;;  %v4509_v43 = vadd.f32 %v7827_v62, %v4469_v32  ;;  %4434 = vst.msk [vmem:[#allocation2 + $0xb8] sm:$0xff] %vm314_vm0, %v4398_v4  ;;  %v3340_v29 = vld [vmem:[#allocation2 + $0xd0] sm:$0xff]  ;;  %v4693_v6 = vrot.slane %v4691_v50, 4 }
 0x2db   : > { %5788 = vst.msk [vmem:[%s7378_s7 + $0x48] sm:$0xf] %vm4561_vm7, %v4692_v42  ;;  %v3376_v54 = vadd.f32 %v3340_v29, %v3289_v5  ;;  %v4316_v46 = vpop.f32.mrf.mxu0  ;;  %v3875_v5 = vpop.f32.mrf.mxu3  ;;  %v2899_v4 = vld [vmem:[#allocation2 + $0xf0] sm:$0xff] }
 0x2dc   : > { %v4545_v48 = vmax.f32 %v4509_v43, 0.0  ;;  %v3918_v57 = vld [vmem:[#allocation2 + $0xc8] sm:$0xff]  ;;  %2968 = vst.msk [vmem:[#allocation2 + $0xd8] sm:$0xff] %vm314_vm0, %v2932_v47 }
 0x2dd   : > { %v3954_v53 = vadd.f32 %v3918_v57, %v3865_v41  ;;  %3412 = vst.msk [vmem:[#allocation2 + $0xd0] sm:$0xff] %vm314_vm0, %v3376_v54 }
 0x2de   : > { %v4685_v33 = vpack.c.bf16 %v4545_v48, %v4545_v48  ;;  %v4363_v18 = vld [vmem:[#allocation2 + $0xc0] sm:$0xff]  ;;  %v3291_v0 = vpop.f32.mrf.mxu2 }
 0x2df   : > { %3990 = vst.msk [vmem:[#allocation2 + $0xc8] sm:$0xff] %vm314_vm0, %v3954_v53  ;;  %v4399_v14 = vadd.f32 %v4363_v18, %v7878_v8 }
 0x2e0   : > { %v4694_v26 = vrot.slane %v4685_v33, 5  ;;  %v2849_v12 = vpop.f32.mrf.mxu1  ;;  %v5790_v30 = vrot.slane %v4685_v33, 10 }
 0x2e1   : > { %v4470_v1 = vld [vmem:[#allocation2 + $0xb8] sm:$0xff]  ;;  %4435 = vst.msk [vmem:[#allocation2 + $0xc0] sm:$0xff] %vm314_vm0, %v4399_v14  ;;  %v2933_v63 = vadd.f32 %v2897_v58, %v2849_v12 }
 0x2e2   : > { %v4695_v52 = vsel %vm7481_vm10, %v4693_v6, %v4694_v26  ;;  %v4510_v20 = vadd.f32 %v7827_v62, %v4470_v1  ;;  %v2900_v14 = vld [vmem:[#allocation2 + $0xf8] sm:$0xff] }
 0x2e3   : > { %5789 = vst.msk [vmem:[%s7378_s7 + $0x4c] sm:$0xf] %vm4561_vm7, %v4695_v52  ;;  %v3341_v7 = vld [vmem:[#allocation2 + $0xd8] sm:$0xff]  ;;  %v4319_v2 = vpop.f32.mrf.mxu0  ;;  %v3878_v58 = vpop.f32.mrf.mxu3 }
 0x2e4   : > { %v4546_v41 = vmax.f32 %v4510_v20, 0.0  ;;  %v3919_v35 = vld [vmem:[#allocation2 + $0xd0] sm:$0xff]  ;;  %v3377_v24 = vadd.f32 %v3341_v7, %v3291_v0  ;;  %2969 = vst.msk [vmem:[#allocation2 + $0xe0] sm:$0xff] %vm314_vm0, %v2933_v63 }
 0x2e5   : > { %v3955_v8 = vadd.f32 %v3919_v35, %v3868_v56 }
 0x2e6   : > { %v4701_v44 = vpack.c.bf16 %v4546_v41, %v4546_v41  ;;  %3413 = vst.msk [vmem:[#allocation2 + $0xd8] sm:$0xff] %vm314_vm0, %v3377_v24  ;;  %v4364_v39 = vld [vmem:[#allocation2 + $0xc8] sm:$0xff]  ;;  %v3294_v28 = vpop.f32.mrf.mxu2 }
 0x2e7   : > { %3991 = vst.msk [vmem:[#allocation2 + $0xd0] sm:$0xff] %vm314_vm0, %v3955_v8  ;;  %v4400_v45 = vadd.f32 %v4364_v39, %v7890_v17 }
 0x2e8   : > { %v4707_v51 = vrot.slane %v4701_v44, 6  ;;  %v4471_v11 = vld [vmem:[#allocation2 + $0xc0] sm:$0xff]  ;;  %v2851_v37 = vpop.f32.mrf.mxu1 }
 0x2e9   : > { %v4511_v55 = vadd.f32 %v7827_v62, %v4471_v11  ;;  %4436 = vst.msk [vmem:[#allocation2 + $0xc8] sm:$0xff] %vm314_vm0, %v4400_v45  ;;  %v2934_v34 = vadd.f32 %v2898_v25, %v2851_v37 }
 0x2ea   : > { %v4708_v36 = vsel %vm7549_vm13, %v5790_v30, %v4707_v51  ;;  %v4709_v19 = vrot.slane %v4707_v51, 4 }
 0x2eb   : > { %5791 = vst.msk [vmem:[%s7378_s7 + $0x50] sm:$0xf] %vm4561_vm7, %v4708_v36  ;;  %v4547_v13 = vmax.f32 %v4511_v55, 0.0  ;;  %v3342_v56 = vld [vmem:[#allocation2 + $0xe0] sm:$0xff]  ;;  %v4321_v1 = vpop.f32.mrf.mxu0  ;;  %v3880_v25 = vpop.f32.mrf.mxu3 }
 0x2ec   : > { %v3378_v31 = vadd.f32 %v3342_v56, %v3294_v28  ;;  %2970 = vst.msk [vmem:[#allocation2 + $0xe8] sm:$0xff] %vm314_vm0, %v2934_v34  ;;  %v2901_v28 = vld [vmem:[#allocation2 + $0x100] sm:$0xff] }
 0x2ed   : > { %v4702_v17 = vpack.c.bf16 %v4547_v13, %v4547_v13  ;;  %v3920_v10 = vld [vmem:[#allocation2 + $0xd8] sm:$0xff] }
 0x2ee   : > { %v3956_v16 = vadd.f32 %v3920_v10, %v3870_v59  ;;  %3414 = vst.msk [vmem:[#allocation2 + $0xe0] sm:$0xff] %vm314_vm0, %v3378_v31  ;;  %v4365_v60 = vld [vmem:[#allocation2 + $0xd0] sm:$0xff]  ;;  %v3296_v3 = vpop.f32.mrf.mxu2 }
 0x2ef   : > { %v4710_v9 = vrot.slane %v4702_v17, 6  ;;  %v4401_v23 = vadd.f32 %v4365_v60, %v4314_v40  ;;  %v5793_v48 = vrot.slane %v4702_v17, 11 }
 0x2f0   : > { %v4472_v21 = vld [vmem:[#allocation2 + $0xc8] sm:$0xff]  ;;  %3992 = vst.msk [vmem:[#allocation2 + $0xd8] sm:$0xff] %vm314_vm0, %v3956_v16  ;;  %v2854_v50 = vpop.f32.mrf.mxu1 }
 0x2f1   : > { %v4711_v61 = vsel %vm7549_vm13, %v4709_v19, %v4710_v9  ;;  %v4512_v27 = vadd.f32 %v7827_v62, %v4472_v21  ;;  %4437 = vst.msk [vmem:[#allocation2 + $0xd0] sm:$0xff] %vm314_vm0, %v4401_v23  ;;  %v2935_v32 = vadd.f32 %v2899_v4, %v2854_v50 }
 0x2f2   : > { %5792 = vst.msk [vmem:[%s7378_s7 + $0x54] sm:$0xf] %vm4561_vm7, %v4711_v61 }
 0x2f3   : > { %v4548_v47 = vmax.f32 %v4512_v27, 0.0  ;;  %v3343_v42 = vld [vmem:[#allocation2 + $0xe8] sm:$0xff]  ;;  %2971 = vst.msk [vmem:[#allocation2 + $0xf0] sm:$0xff] %vm314_vm0, %v2935_v32  ;;  %v4324_v55 = vpop.f32.mrf.mxu0  ;;  %v3883_v4 = vpop.f32.mrf.mxu3 }
 0x2f4   : > { %v3379_v43 = vadd.f32 %v3343_v42, %v3296_v3  ;;  %v2902_v3 = vld [vmem:[#allocation2 + $0x108] sm:$0xff] }
 0x2f5   : > { %v4717_v29 = vpack.c.bf16 %v4548_v47, %v4548_v47  ;;  %v3921_v54 = vld [vmem:[#allocation2 + $0xe0] sm:$0xff] }
 0x2f6   : > { %v3957_v59 = vadd.f32 %v3921_v54, %v3873_v38  ;;  %3415 = vst.msk [vmem:[#allocation2 + $0xe8] sm:$0xff] %vm314_vm0, %v3379_v43  ;;  %v3299_v40 = vpop.f32.mrf.mxu2  ;;  %v2903_v54 = vld [vmem:[#allocation2 + $0x110] sm:$0xff] }
 0x2f7   : > { %v4723_v57 = vrot.slane %v4717_v29, 7  ;;  %v4366_v53 = vld [vmem:[#allocation2 + $0xd8] sm:$0xff] }
 0x2f8   : > { %v4473_v33 = vld [vmem:[#allocation2 + $0xd0] sm:$0xff]  ;;  %3993 = vst.msk [vmem:[#allocation2 + $0xe0] sm:$0xff] %vm314_vm0, %v3957_v59  ;;  %v4402_v18 = vadd.f32 %v4366_v53, %v4316_v46  ;;  %v2856_v0 = vpop.f32.mrf.mxu1 }
 0x2f9   : > { %v4724_v6 = vsel %vm7620_vm1, %v5793_v48, %v4723_v57  ;;  %v4513_v26 = vadd.f32 %v7827_v62, %v4473_v33  ;;  %v2936_v12 = vadd.f32 %v2900_v14, %v2856_v0  ;;  %v4725_v8 = vrot.slane %v4723_v57, 4 }
 0x2fa   : > { %5794 = vst.msk [vmem:[%s7378_s7 + $0x58] sm:$0xf] %vm4561_vm7, %v4724_v6  ;;  %v3344_v63 = vld [vmem:[#allocation2 + $0xf0] sm:$0xff] }
 0x2fb   : > { %v4549_v52 = vmax.f32 %v4513_v26, 0.0  ;;  %4438 = vst.msk [vmem:[#allocation2 + $0xd8] sm:$0xff] %vm314_vm0, %v4402_v18  ;;  %v3380_v20 = vadd.f32 %v3344_v63, %v3299_v40  ;;  %v4326_v61 = vpop.f32.mrf.mxu0  ;;  %v3885_v14 = vpop.f32.mrf.mxu3  ;;  %v2904_v63 = vld [vmem:[#allocation2 + $0x118] sm:$0xff] }
 0x2fc   : > { %2972 = vst.msk [vmem:[#allocation2 + $0xf8] sm:$0xff] %vm314_vm0, %v2936_v12 }
 0x2fd   : > { %v4718_v7 = vpack.c.bf16 %v4549_v52, %v4549_v52  ;;  %v3922_v41 = vld [vmem:[#allocation2 + $0xe8] sm:$0xff]  ;;  %3416 = vst.msk [vmem:[#allocation2 + $0xf0] sm:$0xff] %vm314_vm0, %v3380_v20 }
 0x2fe   : > { %v3958_v35 = vadd.f32 %v3922_v41, %v3875_v5  ;;  %v3301_v24 = vpop.f32.mrf.mxu2 }
 0x2ff   : > { %v4726_v38 = vrot.slane %v4718_v7, 7  ;;  %v4367_v46 = vld [vmem:[#allocation2 + $0xe0] sm:$0xff] }
 0x300   : > { %3994 = vst.msk [vmem:[#allocation2 + $0xe8] sm:$0xff] %vm314_vm0, %v3958_v35  ;;  %v4403_v44 = vadd.f32 %v4367_v46, %v4319_v2  ;;  %v2859_v39 = vpop.f32.mrf.mxu1 }
 0x301   : > { %v4727_v45 = vsel %vm7620_vm1, %v4725_v8, %v4726_v38  ;;  %v2937_v30 = vadd.f32 %v2901_v28, %v2859_v39 }
 0x302   : > { %5795 = vst.msk [vmem:[%s7378_s7 + $0x5c] sm:$0xf] %vm4561_vm7, %v4727_v45  ;;  %v4474_v51 = vld [vmem:[#allocation2 + $0xd8] sm:$0xff] }
 0x303   : > { %v4514_v11 = vadd.f32 %v7827_v62, %v4474_v51  ;;  %4439 = vst.msk [vmem:[#allocation2 + $0xe0] sm:$0xff] %vm314_vm0, %v4403_v44  ;;  %v3345_v37 = vld [vmem:[#allocation2 + $0xf8] sm:$0xff]  ;;  %v4329_v6 = vpop.f32.mrf.mxu0 }
 0x304   : > { %v3923_v34 = vld [vmem:[#allocation2 + $0xf0] sm:$0xff]  ;;  %v3381_v36 = vadd.f32 %v3345_v37, %v3301_v24  ;;  %2973 = vst.msk [vmem:[#allocation2 + $0x100] sm:$0xff] %vm314_vm0, %v2937_v30 }
 0x305   : > { %v4550_v13 = vmax.f32 %v4514_v11, 0.0  ;;  %v3959_v56 = vadd.f32 %v3923_v34, %v3878_v58  ;;  %v3888_v11 = vpop.f32.mrf.mxu3 }
 0x306   : > { %3417 = vst.msk [vmem:[#allocation2 + $0xf8] sm:$0xff] %vm314_vm0, %v3381_v36  ;;  %v3304_v31 = vpop.f32.mrf.mxu2 }
 0x307   : > { %v4733_v17 = vpack.c.bf16 %v4550_v13, %v4550_v13  ;;  %3995 = vst.msk [vmem:[#allocation2 + $0xf0] sm:$0xff] %vm314_vm0, %v3959_v56  ;;  %v4368_v10 = vld [vmem:[#allocation2 + $0xe8] sm:$0xff] }
 0x308   : > { %v4404_v16 = vadd.f32 %v4368_v10, %v4321_v1  ;;  %v2861_v60 = vpop.f32.mrf.mxu1 }
 0x309   : > { %5796 = vst.msk [vmem:[%s7378_s7 + $0x60] sm:$0xf] %vm4561_vm7, %v4733_v17  ;;  %v2938_v19 = vadd.f32 %v2902_v3, %v2861_v60 }
 0x30a   : > { %v4475_v9 = vld [vmem:[#allocation2 + $0xe0] sm:$0xff]  ;;  %4440 = vst.msk [vmem:[#allocation2 + $0xe8] sm:$0xff] %vm314_vm0, %v4404_v16 }
 0x30b   : > { %v4515_v23 = vadd.f32 %v7827_v62, %v4475_v9  ;;  %v3346_v5 = vld [vmem:[#allocation2 + $0x100] sm:$0xff]  ;;  %2974 = vst.msk [vmem:[#allocation2 + $0x108] sm:$0xff] %vm314_vm0, %v2938_v19  ;;  %v4331_v36 = vpop.f32.mrf.mxu0 }
 0x30c   : > { %v3382_v2 = vadd.f32 %v3346_v5, %v3304_v31 }
 0x30d   : > { %v4551_v21 = vmax.f32 %v4515_v23, 0.0  ;;  %v3924_v50 = vld [vmem:[#allocation2 + $0xf8] sm:$0xff] }
 0x30e   : > { %v3960_v27 = vadd.f32 %v3924_v50, %v3880_v25  ;;  %3418 = vst.msk [vmem:[#allocation2 + $0x100] sm:$0xff] %vm314_vm0, %v3382_v2  ;;  %v4369_v32 = vld [vmem:[#allocation2 + $0xf0] sm:$0xff]  ;;  %v3306_v47 = vpop.f32.mrf.mxu2 }
 0x30f   : > { %v4734_v42 = vpack.c.bf16 %v4551_v21, %v4551_v21  ;;  %v4405_v43 = vadd.f32 %v4369_v32, %v4324_v55  ;;  %v3890_v21 = vpop.f32.mrf.mxu3 }
 0x310   : > { %3996 = vst.msk [vmem:[#allocation2 + $0xf8] sm:$0xff] %vm314_vm0, %v3960_v27  ;;  %v2864_v29 = vpop.f32.mrf.mxu1 }
 0x311   : > { %5797 = vst.msk [vmem:[%s7378_s7 + $0x64] sm:$0xf] %vm4561_vm7, %v4734_v42  ;;  %v4476_v59 = vld [vmem:[#allocation2 + $0xe8] sm:$0xff]  ;;  %v2939_v40 = vadd.f32 %v2903_v54, %v2864_v29 }
 0x312   : > { %4441 = vst.msk [vmem:[#allocation2 + $0xf0] sm:$0xff] %vm314_vm0, %v4405_v43  ;;  %v3347_v48 = vld [vmem:[#allocation2 + $0x108] sm:$0xff]  ;;  %v4516_v53 = vadd.f32 %v7827_v62, %v4476_v59 }
 0x313   : > { %v3383_v57 = vadd.f32 %v3347_v48, %v3306_v47  ;;  %2975 = vst.msk [vmem:[#allocation2 + $0x110] sm:$0xff] %vm314_vm0, %v2939_v40 }
 0x314   : > { %v4552_v26 = vmax.f32 %v4516_v53, 0.0 }
 0x315   : > { %v3925_v33 = vld [vmem:[#allocation2 + $0x100] sm:$0xff]  ;;  %3419 = vst.msk [vmem:[#allocation2 + $0x108] sm:$0xff] %vm314_vm0, %v3383_v57 }
 0x316   : > { %v3961_v18 = vadd.f32 %v3925_v33, %v3883_v4  ;;  %v3309_v58 = vpop.f32.mrf.mxu2  ;;  %v4738_v24 = vpack.c.bf16 %v4552_v26, %v4552_v26  ;;  %v4334_v4 = vpop.f32.mrf.mxu0 }
 0x317   : > { %v4370_v0 = vld [vmem:[#allocation2 + $0xf8] sm:$0xff] }
 0x318   : > { %3997 = vst.msk [vmem:[#allocation2 + $0x100] sm:$0xff] %vm314_vm0, %v3961_v18  ;;  %v4406_v12 = vadd.f32 %v4370_v0, %v4326_v61  ;;  %v2866_v1 = vpop.f32.mrf.mxu1  ;;  %v5798_v28 = vrot.slane %v4738_v24, 9 }
 0x319   : > { %v4477_v52 = vld [vmem:[#allocation2 + $0xf0] sm:$0xff]  ;;  %v2940_v20 = vadd.f32 %v2904_v63, %v2866_v1 }
 0x31a   : > { %v4517_v7 = vadd.f32 %v7827_v62, %v4477_v52  ;;  %4442 = vst.msk [vmem:[#allocation2 + $0xf8] sm:$0xff] %vm314_vm0, %v4406_v12  ;;  %v3348_v41 = vld [vmem:[#allocation2 + $0x110] sm:$0xff] }
 0x31b   : > { %v3384_v35 = vadd.f32 %v3348_v41, %v3309_v58  ;;  %2976 = vst.msk [vmem:[#allocation2 + $0x118] sm:$0xff] %vm314_vm0, %v2940_v20 }
 0x31c   : > { %v4553_v8 = vmax.f32 %v4517_v7, 0.0  ;;  %v3926_v38 = vld [vmem:[#allocation2 + $0x108] sm:$0xff] }
 0x31d   : > { %v3962_v46 = vadd.f32 %v3926_v38, %v3885_v14  ;;  %3420 = vst.msk [vmem:[#allocation2 + $0x110] sm:$0xff] %vm314_vm0, %v3384_v35 }
 0x31e   : > { %v4739_v44 = vpack.c.bf16 %v4553_v8, %v4553_v8  ;;  %v3311_v55 = vpop.f32.mrf.mxu2  ;;  %v4336_v48 = vpop.f32.mrf.mxu0 }
 0x31f   : > { %3998 = vst.msk [vmem:[#allocation2 + $0x108] sm:$0xff] %vm314_vm0, %v3962_v46  ;;  %v4371_v39 = vld [vmem:[#allocation2 + $0x100] sm:$0xff] }
 0x320   : > { %v4746_v45 = vrot.slane %v4739_v44, 5  ;;  %v4407_v30 = vadd.f32 %v4371_v39, %v4329_v6 }
 0x321   : > { %v4478_v51 = vld [vmem:[#allocation2 + $0xf8] sm:$0xff] }
 0x322   : > { %v4747_v37 = vsel %vm7481_vm10, %v5798_v28, %v4746_v45  ;;  %v4518_v25 = vadd.f32 %v7827_v62, %v4478_v51  ;;  %4443 = vst.msk [vmem:[#allocation2 + $0x100] sm:$0xff] %vm314_vm0, %v4407_v30  ;;  %v3349_v34 = vld [vmem:[#allocation2 + $0x118] sm:$0xff]  ;;  %v4748_v3 = vrot.slane %v4746_v45, 4 }
 0x323   : > { %5799 = vst.msk [vmem:[%s7378_s7 + $0x68] sm:$0xf] %vm4561_vm7, %v4747_v37  ;;  %v3385_v13 = vadd.f32 %v3349_v34, %v3311_v55 }
 0x324   : > { %v4554_v56 = vmax.f32 %v4518_v25, 0.0  ;;  %v3927_v31 = vld [vmem:[#allocation2 + $0x110] sm:$0xff] }
 0x325   : > { %v3963_v17 = vadd.f32 %v3927_v31, %v3888_v11  ;;  %3421 = vst.msk [vmem:[#allocation2 + $0x118] sm:$0xff] %vm314_vm0, %v3385_v13 }
 0x326   : > { %v4740_v10 = vpack.c.bf16 %v4554_v56, %v4554_v56  ;;  %v4372_v16 = vld [vmem:[#allocation2 + $0x108] sm:$0xff] }
 0x327   : > { %3999 = vst.msk [vmem:[#allocation2 + $0x110] sm:$0xff] %vm314_vm0, %v3963_v17  ;;  %v4408_v60 = vadd.f32 %v4372_v16, %v4331_v36 }
 0x328   : > { %v4749_v19 = vrot.slane %v4740_v10, 5  ;;  %v5801_v42 = vrot.slane %v4740_v10, 10 }
 0x329   : > { %v4479_v9 = vld [vmem:[#allocation2 + $0x100] sm:$0xff]  ;;  %4444 = vst.msk [vmem:[#allocation2 + $0x108] sm:$0xff] %vm314_vm0, %v4408_v60 }
 0x32a   : > { %v4750_v23 = vsel %vm7481_vm10, %v4748_v3, %v4749_v19  ;;  %v4519_v5 = vadd.f32 %v7827_v62, %v4479_v9 }
 0x32b   : > { %5800 = vst.msk [vmem:[%s7378_s7 + $0x6c] sm:$0xf] %vm4561_vm7, %v4750_v23 }
 0x32c   : > { %v4555_v2 = vmax.f32 %v4519_v5, 0.0  ;;  %v3928_v50 = vld [vmem:[#allocation2 + $0x118] sm:$0xff] }
 0x32d   : > { %v3964_v61 = vadd.f32 %v3928_v50, %v3890_v21 }
 0x32e   : > { %v4756_v27 = vpack.c.bf16 %v4555_v2, %v4555_v2  ;;  %v4373_v32 = vld [vmem:[#allocation2 + $0x110] sm:$0xff] }
 0x32f   : > { %4000 = vst.msk [vmem:[#allocation2 + $0x118] sm:$0xff] %vm314_vm0, %v3964_v61  ;;  %v4409_v47 = vadd.f32 %v4373_v32, %v4334_v4 }
 0x330   : > { %v4762_v43 = vrot.slane %v4756_v27, 6  ;;  %v4480_v29 = vld [vmem:[#allocation2 + $0x108] sm:$0xff] }
 0x331   : > { %v4520_v22 = vadd.f32 %v7827_v62, %v4480_v29  ;;  %4445 = vst.msk [vmem:[#allocation2 + $0x110] sm:$0xff] %vm314_vm0, %v4409_v47 }
 0x332   : > { %v4763_v54 = vsel %vm7549_vm13, %v5801_v42, %v4762_v43  ;;  %v4764_v53 = vrot.slane %v4762_v43, 4 }
 0x333   : > { %5802 = vst.msk [vmem:[%s7378_s7 + $0x70] sm:$0xf] %vm4561_vm7, %v4763_v54  ;;  %v4556_v59 = vmax.f32 %v4520_v22, 0.0 }
 0x335   : > { %v4757_v40 = vpack.c.bf16 %v4556_v59, %v4556_v59 }
 0x336   : > { %v4374_v57 = vld [vmem:[#allocation2 + $0x118] sm:$0xff] }
 0x337   : > { %v4765_v33 = vrot.slane %v4757_v40, 6  ;;  %v4410_v18 = vadd.f32 %v4374_v57, %v4336_v48  ;;  %v5804_v58 = vrot.slane %v4757_v40, 11 }
 0x338   : > { %v4481_v0 = vld [vmem:[#allocation2 + $0x110] sm:$0xff] }
 0x339   : > { %v4766_v14 = vsel %vm7549_vm13, %v4764_v53, %v4765_v33  ;;  %v4521_v6 = vadd.f32 %v7827_v62, %v4481_v0  ;;  %4446 = vst.msk [vmem:[#allocation2 + $0x118] sm:$0xff] %vm314_vm0, %v4410_v18 }
 0x33a   : > { %5803 = vst.msk [vmem:[%s7378_s7 + $0x74] sm:$0xf] %vm4561_vm7, %v4766_v14 }
 0x33b   : > { %v4557_v26 = vmax.f32 %v4521_v6, 0.0 }
 0x33d   : > { %v4772_v12 = vpack.c.bf16 %v4557_v26, %v4557_v26 }
 0x33f   : > { %v4778_v1 = vrot.slane %v4772_v12, 7 }
 0x340   : > { %v4482_v63 = vld [vmem:[#allocation2 + $0x118] sm:$0xff] }
 0x341   : > { %v4779_v52 = vsel %vm7620_vm1, %v5804_v58, %v4778_v1  ;;  %v4522_v20 = vadd.f32 %v7827_v62, %v4482_v63  ;;  %v4780_v41 = vrot.slane %v4778_v1, 4 }
 0x342   : > { %5805 = vst.msk [vmem:[%s7378_s7 + $0x78] sm:$0xf] %vm4561_vm7, %v4779_v52 }
 0x343   : > { %v4558_v49 = vmax.f32 %v4522_v20, 0.0 }
 0x345   : > { %v4773_v7 = vpack.c.bf16 %v4558_v49, %v4558_v49 }
 0x347   : > { %v4781_v35 = vrot.slane %v4773_v7, 7 }
 0x349   : > { %v4782_v24 = vsel %vm7620_vm1, %v4780_v41, %v4781_v35 }
 0x34a   : > { %5806 = vst.msk [vmem:[%s7378_s7 + $0x7c] sm:$0xf] %vm4561_vm7, %v4782_v24 }
 0x34b PF: > { %s13_s12 = sadd.s32 1, %s6013_s12  }
 0x34c   : > { %p10_p4 = scmp.ge.s32.totalorder %s13_s12, 4  }
 0x34e   :  { %12 = sbr.rel (!%p10_p4) target bundleno = 1 (0x1), region = 85 }

</bundles_post_ra>
